<compile_context>
chip_gen: v6e
topology: v6e:2x2x1
jax: 0.10.0
libtpu: 0.0.40
codegen_flags: <defaults>
</compile_context>

<pallas_src>
import jax
import jax.numpy as jnp
from jax.experimental import pallas as pl
from jax.experimental.pallas import tpu as pltpu

IN_DIM = 8
HID_DIM = 2000
OUT_DIM = 8
HID_PAD = 2048           # hidden dim zero-padded to a multiple of 128 lanes


def _mlp_kernel(x_ref, w1_ref, b1_ref, w2_ref, b2_ref, w3_ref, b3_ref, o_ref):
    """Single fused forward:  relu(relu(x@W1+b1) @ W2 + b2) @ W3 + b3."""
    # fc1 + ReLU (f32)
    h1 = jnp.dot(x_ref[...], w1_ref[...], preferred_element_type=jnp.float32)
    h1 = jnp.maximum(h1 + b1_ref[...], 0.0)

    # fc2 + ReLU: bf16 x bf16 on the MXU, f32 accumulation.
    h2 = jnp.dot(h1.astype(jnp.bfloat16), w2_ref[...],
                 preferred_element_type=jnp.float32)
    h2 = jnp.maximum(h2 + b2_ref[...], 0.0)

    # fc3 (+ bias folded into the kernel -- no wrapper epilogue)
    out = jnp.dot(h2, w3_ref[...], preferred_element_type=jnp.float32) + b3_ref[...]
    o_ref[...] = out.astype(o_ref.dtype)


def prepare_params(w1, b1, w2, b2, w3, b3):
    """One-time preparation: zero-pad hidden 2000 -> 2048 and cast W2 to bf16.

    Called once (outside the jitted forward) so no padding traffic is paid per
    call.  Zero padding is mathematically inert through ReLU and the matmuls:
    padded h1/h2 columns are relu(0 + 0) = 0 and padded W3 rows are 0.
    """
    w1p = jnp.zeros((IN_DIM, HID_PAD), jnp.float32).at[:, :HID_DIM].set(w1)
    b1p = jnp.zeros((1, HID_PAD), jnp.float32).at[:, :HID_DIM].set(b1)
    w2p = jnp.zeros((HID_PAD, HID_PAD), jnp.bfloat16).at[:HID_DIM, :HID_DIM].set(
        w2.astype(jnp.bfloat16))
    b2p = jnp.zeros((1, HID_PAD), jnp.float32).at[:, :HID_DIM].set(b2)
    w3p = jnp.zeros((HID_PAD, OUT_DIM), jnp.float32).at[:HID_DIM, :].set(w3)
    b3p = jnp.asarray(b3, jnp.float32).reshape(1, OUT_DIM)
    return w1p, b1p, w2p, b2p, w3p, b3p


@jax.jit
def ball_ball_update_net_pallas(x, w1p, b1p, w2p, b2p, w3p, b3p):
    """x: (B, 8) float32.  Params must come from prepare_params()."""
    B = x.shape[0]
    return pl.pallas_call(
        _mlp_kernel,
        out_shape=jax.ShapeDtypeStruct((B, OUT_DIM), jnp.float32),
        compiler_params=pltpu.CompilerParams(
            vmem_limit_bytes=32 * 1024 * 1024,
        ),
    )(x, w1p, b1p, w2p, b2p, w3p, b3p)


def init_params(key):
    """Deterministic init mimicking PyTorch nn.Linear default U(-1/sqrt(fan_in), ..)."""
    ks = jax.random.split(key, 6)

    def lin(kw, kb, fan_in, fan_out):
        bound = 1.0 / jnp.sqrt(fan_in)
        w = jax.random.uniform(kw, (fan_in, fan_out), jnp.float32, -bound, bound)
        b = jax.random.uniform(kb, (fan_out,), jnp.float32, -bound, bound)
        return w, b

    w1, b1 = lin(ks[0], ks[1], IN_DIM, HID_DIM)
    w2, b2 = lin(ks[2], ks[3], HID_DIM, HID_DIM)
    w3, b3 = lin(ks[4], ks[5], HID_DIM, OUT_DIM)
    return w1, b1, w2, b2, w3, b3


def reference_forward(x, w1, b1, w2, b2, w3, b3):
    """Reference that mirrors the kernel's bf16 fc2 path (h1 & W2 rounded to bf16,
    accumulation in f32), so the comparison isolates kernel correctness."""
    h1 = jnp.maximum(x @ w1 + b1, 0.0)
    h1q = h1.astype(jnp.bfloat16).astype(jnp.float32)
    w2q = w2.astype(jnp.bfloat16).astype(jnp.float32)
    h2 = jnp.maximum(h1q @ w2q + b2, 0.0)
    return h2 @ w3 + b3


if __name__ == "__main__":
    key = jax.random.PRNGKey(0)
    kx, kp = jax.random.split(key)

    B = 8
    x = jax.random.normal(kx, (B, IN_DIM), jnp.float32)
    raw_params = init_params(kp)

    # Padding / bf16 cast done ONCE, outside the per-call jitted forward.
    params = prepare_params(*raw_params)

    out = ball_ball_update_net_pallas(x, *params)
    out = jax.block_until_ready(out)

    ref = reference_forward(x, *raw_params)
    assert out.shape == (B, OUT_DIM)
    assert jnp.allclose(out, ref, atol=2e-2, rtol=2e-2), "mismatch vs reference"

    print("KERNEL_OK")
</pallas_src>

<mosaic_0001>
module attributes {stable_mosaic.version = 11 : i64} {
  func.func @_mlp_kernel(%arg0: memref<8x8xf32, #tpu.memory_space<vmem>>, %arg1: memref<8x2048xf32, #tpu.memory_space<vmem>>, %arg2: memref<1x2048xf32, #tpu.memory_space<vmem>>, %arg3: memref<2048x2048xbf16, #tpu.memory_space<vmem>>, %arg4: memref<1x2048xf32, #tpu.memory_space<vmem>>, %arg5: memref<2048x8xf32, #tpu.memory_space<vmem>>, %arg6: memref<1x8xf32, #tpu.memory_space<vmem>>, %arg7: memref<8x8xf32, #tpu.memory_space<vmem>>) attributes {dimension_semantics = [], scalar_prefetch = 0 : i64, scratch_operands = 0 : i64, tpu.core_type = #tpu.core_type<tc>} {
    %c0 = arith.constant 0 : index
    %c0_0 = arith.constant 0 : index
    %0 = vector.load %arg0[%c0, %c0_0] : memref<8x8xf32, #tpu.memory_space<vmem>>, vector<8x8xf32>
    %c0_1 = arith.constant 0 : index
    %c0_2 = arith.constant 0 : index
    %1 = vector.load %arg1[%c0_1, %c0_2] : memref<8x2048xf32, #tpu.memory_space<vmem>>, vector<8x2048xf32>
    %cst = arith.constant dense<0.000000e+00> : vector<8x2048xf32>
    %2 = tpu.matmul %0, %1, %cst {dimension_numbers = #tpu.dot_dimension_numbers<[1], [0], [0], [1], [0, 0, 1, 1], [], []>} : vector<8x8xf32>, vector<8x2048xf32>, vector<8x2048xf32> -> vector<8x2048xf32>
    %c0_3 = arith.constant 0 : index
    %c0_4 = arith.constant 0 : index
    %3 = vector.load %arg2[%c0_3, %c0_4] : memref<1x2048xf32, #tpu.memory_space<vmem>>, vector<1x2048xf32>
    %4 = vector.broadcast %3 : vector<1x2048xf32> to vector<8x2048xf32>
    %5 = arith.addf %2, %4 : vector<8x2048xf32>
    %cst_5 = arith.constant 0.000000e+00 : f32
    %6 = vector.broadcast %cst_5 : f32 to vector<8x2048xf32>
    %7 = arith.maximumf %5, %6 : vector<8x2048xf32>
    %8 = arith.truncf %7 : vector<8x2048xf32> to vector<8x2048xbf16>
    %c0_6 = arith.constant 0 : index
    %c0_7 = arith.constant 0 : index
    %9 = vector.load %arg3[%c0_6, %c0_7] : memref<2048x2048xbf16, #tpu.memory_space<vmem>>, vector<2048x2048xbf16>
    %cst_8 = arith.constant dense<0.000000e+00> : vector<8x2048xf32>
    %10 = tpu.matmul %8, %9, %cst_8 {dimension_numbers = #tpu.dot_dimension_numbers<[1], [0], [0], [1], [0, 0, 1, 1], [], []>} : vector<8x2048xbf16>, vector<2048x2048xbf16>, vector<8x2048xf32> -> vector<8x2048xf32>
    %c0_9 = arith.constant 0 : index
    %c0_10 = arith.constant 0 : index
    %11 = vector.load %arg4[%c0_9, %c0_10] : memref<1x2048xf32, #tpu.memory_space<vmem>>, vector<1x2048xf32>
    %12 = vector.broadcast %11 : vector<1x2048xf32> to vector<8x2048xf32>
    %13 = arith.addf %10, %12 : vector<8x2048xf32>
    %cst_11 = arith.constant 0.000000e+00 : f32
    %14 = vector.broadcast %cst_11 : f32 to vector<8x2048xf32>
    %15 = arith.maximumf %13, %14 : vector<8x2048xf32>
    %c0_12 = arith.constant 0 : index
    %c0_13 = arith.constant 0 : index
    %16 = vector.load %arg5[%c0_12, %c0_13] : memref<2048x8xf32, #tpu.memory_space<vmem>>, vector<2048x8xf32>
    %cst_14 = arith.constant dense<0.000000e+00> : vector<8x8xf32>
    %17 = tpu.matmul %15, %16, %cst_14 {dimension_numbers = #tpu.dot_dimension_numbers<[1], [0], [0], [1], [0, 0, 1, 1], [], []>} : vector<8x2048xf32>, vector<2048x8xf32>, vector<8x8xf32> -> vector<8x8xf32>
    %c0_15 = arith.constant 0 : index
    %c0_16 = arith.constant 0 : index
    %18 = vector.load %arg6[%c0_15, %c0_16] : memref<1x8xf32, #tpu.memory_space<vmem>>, vector<1x8xf32>
    %19 = vector.broadcast %18 : vector<1x8xf32> to vector<8x8xf32>
    %20 = arith.addf %17, %19 : vector<8x8xf32>
    %c0_17 = arith.constant 0 : index
    %c0_18 = arith.constant 0 : index
    %21 = vector.load %arg7[%c0_17, %c0_18] : memref<8x8xf32, #tpu.memory_space<vmem>>, vector<8x8xf32>
    tpu.vector_store %arg7[%c0_17, %c0_18], %20 {strides = array<i32>} : memref<8x8xf32, #tpu.memory_space<vmem>>, vector<8x8xf32>,
    return
  }
}

</mosaic_0001>

<bundles_post_ra>
// kernel: ball_ball_update_net_pallas.1
= control target key start
LH: loop header
LB: loop body
LE: loop exit
PB: predicated region body
PF: predicated region fallthrough
CT: control target
= control target key end

     0   :  { %12 = vsyncpa [#allocation3], 0  ;;  %s20471_s0 = inlined_call_operand.hbm [shape: f32[8,8], index: 0, kind: input, shape index: {}]   ;;  %s20472_s1 = inlined_call_operand.hbm [shape: f32[8,2048], index: 1, kind: input, shape index: {}]   ;;  %s20473_s2 = inlined_call_operand.hbm [shape: f32[1,2048], index: 2, kind: input, shape index: {}]   ;;  %s20474_s3 = inlined_call_operand.hbm [shape: bf16[2048,2048], index: 3, kind: input, shape index: {}]   ;;  %s20475_s4 = inlined_call_operand.hbm [shape: f32[1,2048], index: 4, kind: input, shape index: {}]   ;;  %s20476_s5 = inlined_call_operand.vmem [shape: f32[2048,8], index: 5, kind: input, shape index: {}]   ;;  %s20477_s6 = inlined_call_operand.hbm [shape: f32[1,8], index: 6, kind: input, shape index: {}]   ;;  %s20478_s7 = inlined_call_operand.hbm [shape: f32[8,8], index: 7, kind: output, shape index: {}]  }
   0x1   :  { %13 = vsyncpa [#allocation6], 0 }
   0x2   :  { %14 = vsyncpa [#allocation9], 0 }
   0x3   :  { %15 = vsyncpa [#allocation12], 0 }
   0x4   :  { %16 = vsyncpa [#allocation4], 0  ;;  %s19161_s24 = smov [#allocation5]   ;;  %s19162_s26 = smov [#allocation8]  }
   0x5   :  { %s33_s25 = sshll.u32 %s19161_s24, 4  ;;  %s52_s27 = sshll.u32 %s19162_s26, 4  ;;  %s34_s25 = int_to_ptr.vmem [resolvable:$true] %s33_s25  ;;  %s53_s27 = int_to_ptr.vmem [resolvable:$true] %s52_s27 }
   0x6   :  { %s19019_s28 = scalar_lea.vmem %s34_s25, 2048  ;;  %p19024_p1 = scmp.lt.s32.totalorder %s34_s25, %s34_s25 }
   0x7   :  { %p19020_p0 = scmp.ne.s32.totalorder %s34_s25, %s19019_s28  ;;  %p19025_p2 = scmp.lt.s32.totalorder %s19019_s28, %s19019_s28 }
   0x9   :  { %p19026_p3 = por %p19025_p2, %p19024_p1 }
   0xb   :  { %p19027_p4 = pnand %p19026_p3, %p19020_p0 }
   0xd   :  { %19030 = shalt.err (!%p19027_p4)
}
   0xe   :  { %36 = dma.hbm_to_vmem [thread:$0]  %s20472_s1, 2048, %s34_s25, [#allocation6]  }
   0xf   :  { %s19039_s8 = scalar_lea.vmem %s53_s27, 262144  ;;  %p19044_p6 = scmp.lt.s32.totalorder %s53_s27, %s53_s27 }
  0x10   :  { %p19040_p5 = scmp.ne.s32.totalorder %s53_s27, %s19039_s8  ;;  %p19045_p7 = scmp.lt.s32.totalorder %s19039_s8, %s19039_s8 }
  0x12   :  { %p19046_p8 = por %p19045_p7, %p19044_p6 }
  0x14   :  { %p19047_p9 = pnand %p19046_p8, %p19040_p5 }
  0x16   :  { %19050 = shalt.err (!%p19047_p9)
}
  0x17   :  { %s19163_s9 = smov 1024   ;;  %s19164_s10 = smov 64  }
  0x18   :  { %58 = dma.hbm_to_vmem [thread:$0]  %s20474_s3, 262144, %s53_s27, [#allocation9], %s19163_s9, %s19163_s9, %s19164_s10  }
  0x19   :  { %s19165_s13 = smov [#allocation2]   ;;  %s19166_s15 = smov [#allocation7]  }
  0x1a   :  { %s23_s14 = sshll.u32 %s19165_s13, 4  ;;  %s43_s16 = sshll.u32 %s19166_s15, 4  ;;  %s24_s14 = int_to_ptr.vmem [resolvable:$true] %s23_s14  ;;  %s44_s16 = int_to_ptr.vmem [resolvable:$true] %s43_s16 }
  0x1b   :  { %s19059_s1 = scalar_lea.vmem %s24_s14, 128  ;;  %p19064_p11 = scmp.lt.s32.totalorder %s24_s14, %s24_s14 }
  0x1c   :  { %p19060_p10 = scmp.ne.s32.totalorder %s24_s14, %s19059_s1  ;;  %p19065_p12 = scmp.lt.s32.totalorder %s19059_s1, %s19059_s1 }
  0x1e   :  { %p19066_p13 = por %p19065_p12, %p19064_p11 }
  0x20   :  { %p19067_p0 = pnand %p19066_p13, %p19060_p10 }
  0x22   :  { %19070 = shalt.err (!%p19067_p0)
}
  0x23   :  { %26 = dma.hbm_to_vmem [thread:$0]  %s20471_s0, 128, %s24_s14, [#allocation3]  }
  0x24   :  { %s19079_s19 = scalar_lea.vmem %s44_s16, 256  ;;  %p19084_p2 = scmp.lt.s32.totalorder %s44_s16, %s44_s16 }
  0x25   :  { %p19080_p1 = scmp.ne.s32.totalorder %s44_s16, %s19079_s19  ;;  %p19085_p3 = scmp.lt.s32.totalorder %s19079_s19, %s19079_s19 }
  0x27   :  { %p19086_p4 = por %p19085_p3, %p19084_p2 }
  0x29   :  { %p19087_p5 = pnand %p19086_p4, %p19080_p1 }
  0x2b   :  { %19090 = shalt.err (!%p19087_p5)
}
  0x2c   :  { %46 = dma.hbm_to_vmem [thread:$0]  %s20473_s2, 256, %s44_s16, [#allocation6]  }
  0x2d   :  { %s19167_s21 = smov [#allocation10]   ;;  %s19168_s23 = smov [#allocation11]  }
  0x2e   :  { %s65_s22 = sshll.u32 %s19167_s21, 4  ;;  %s77_s24 = sshll.u32 %s19168_s23, 4  ;;  %s66_s22 = int_to_ptr.vmem [resolvable:$true] %s65_s22  ;;  %s78_s24 = int_to_ptr.vmem [resolvable:$true] %s77_s24 }
  0x2f   :  { %s19099_s25 = scalar_lea.vmem %s66_s22, 256  ;;  %p19104_p7 = scmp.lt.s32.totalorder %s66_s22, %s66_s22 }
  0x30   :  { %p19100_p6 = scmp.ne.s32.totalorder %s66_s22, %s19099_s25  ;;  %p19105_p8 = scmp.lt.s32.totalorder %s19099_s25, %s19099_s25 }
  0x32   :  { %p19106_p9 = por %p19105_p8, %p19104_p7 }
  0x34   :  { %p19107_p10 = pnand %p19106_p9, %p19100_p6 }
  0x36   :  { %19110 = shalt.err (!%p19107_p10)
}
  0x37   :  { %68 = dma.hbm_to_vmem [thread:$0]  %s20475_s4, 256, %s66_s22, [#allocation9]  }
  0x38   :  { %s19119_s27 = scalar_lea.vmem %s78_s24, 16  ;;  %s19123_s2 = scalar_lea.vmem %s78_s24, 32 }
  0x39   :  { %p19120_p11 = scmp.ne.s32.totalorder %s78_s24, %s19119_s27  ;;  %p19124_p12 = scmp.lt.s32.totalorder %s78_s24, %s78_s24 }
  0x3a   :  { %p19125_p13 = scmp.lt.s32.totalorder %s19123_s2, %s19119_s27 }
  0x3c   :  { %p19126_p0 = por %p19125_p13, %p19124_p12 }
  0x3e   :  { %p19127_p1 = pnand %p19126_p0, %p19120_p11 }
  0x40   :  { %19130 = shalt.err (!%p19127_p1)
}
  0x41   :  { %80 = dma.hbm_to_vmem [thread:$0]  %s20477_s6, 16, %s78_s24, [#allocation12]  }
  0x42   :  { %19151 = dma.done.wait [#allocation3], 128  }
  0x43   :  { %19152 = vsyncadd [#allocation3], 4294967168 }
  0x44   :  { %19153 = dma.done.wait [#allocation6], 2304  }
  0x45   :  { %19154 = vsyncadd [#allocation6], 4294964992 }
  0x46   :  { %19155 = dma.done.wait [#allocation9], 262400  }
  0x47   :  { %19156 = vsyncadd [#allocation9], 4294704896 }
  0x48   :  { %19157 = dma.done.wait [#allocation12], 16  }
  0x49   :  { %19158 = vsyncadd [#allocation12], 4294967280  ;;  %v19169_v0 = vmov 0.0   ;;  %v101_v1 = vld [vmem:[#allocation5 + $0x8] sm:$0xff]  ;;  %v103_v2 = vld [vmem:[#allocation5 + $0x18] sm:$0xff]  ;;  %vm200_vm0 = vcmask 64512  }
  0x4a   :  { %268 = vmatprep.mubr.f32.mxu0 %v19169_v0  ;;  %339 = vmatprep.mubr.f32.mxu1 %v19169_v0  ;;  %v100_v3 = vld [vmem:[#allocation5] sm:$0xff]  ;;  %v102_v4 = vld [vmem:[#allocation5 + $0x10] sm:$0xff]  ;;  %v99_v5 = vld [vmem:[#allocation2] sm:$0xff] }
  0x4b   :  { %234 = vmatprep.subr.mxu0 %v101_v1  ;;  %305 = vmatprep.subr.mxu1 %v103_v2  ;;  %v105_v6 = vld [vmem:[#allocation5 + $0x28] sm:$0xff]  ;;  %v104_v7 = vld [vmem:[#allocation5 + $0x20] sm:$0xff]  ;;  %v107_v8 = vld [vmem:[#allocation5 + $0x38] sm:$0xff] }
  0x4c   :  { %235 = vmatpush1.msra.mxu0 %v100_v3  ;;  %306 = vmatpush1.msra.mxu1 %v102_v4  ;;  %v106_v9 = vld [vmem:[#allocation5 + $0x30] sm:$0xff]  ;;  %v109_v10 = vld [vmem:[#allocation5 + $0x48] sm:$0xff]  ;;  %v108_v11 = vld [vmem:[#allocation5 + $0x40] sm:$0xff] }
  0x4d   :  { %16658 = vmatmul.mubr.msk.f32.vlgmr.msra.gmra.mxu0 %vm200_vm0, %v99_v5  ;;  %16659 = vmatmul.mubr.msk.f32.vlgmr.msra.gmra.mxu1 %vm200_vm0, %v99_v5  ;;  %v111_v12 = vld [vmem:[#allocation5 + $0x58] sm:$0xff]  ;;  %v110_v13 = vld [vmem:[#allocation5 + $0x50] sm:$0xff]  ;;  %v113_v14 = vld [vmem:[#allocation5 + $0x68] sm:$0xff] }
  0x4e   :  { %376 = vmatprep.subr.mxu0 %v105_v6  ;;  %410 = vmatprep.mubr.f32.mxu0 %v19169_v0  ;;  %v916_v15 = vld [vmem:[#allocation8 + $0x380] sm:$0xff]  ;;  %v112_v17 = vld [vmem:[#allocation5 + $0x60] sm:$0xff]  ;;  %v115_v20 = vld [vmem:[#allocation5 + $0x78] sm:$0xff] }
  0x4f   :  { %377 = vmatpush1.msra.mxu0 %v104_v7  ;;  %447 = vmatprep.subr.mxu1 %v107_v8  ;;  %v924_v16 = vld [vmem:[#allocation8 + $0x3c0] sm:$0xff] }
  0x50   :  { %448 = vmatpush1.msra.mxu1 %v106_v9  ;;  %481 = vmatprep.mubr.f32.mxu1 %v19169_v0  ;;  %v1172_v18 = vld [vmem:[#allocation8 + $0xb80] sm:$0xff]  ;;  %v16779_v23 = vcombine.high %v916_v15, %v924_v16  ;;  %v16778_v28 = vcombine.low %v916_v15, %v924_v16 }
  0x51   :  { %16660 = vmatmul.mubr.msk.f32.vlgmr.msra.gmra.mxu0 %vm200_vm0, %v99_v5  ;;  %16661 = vmatmul.mubr.msk.f32.vlgmr.msra.gmra.mxu1 %vm200_vm0, %v99_v5  ;;  %v1180_v19 = vld [vmem:[#allocation8 + $0xbc0] sm:$0xff] }
  0x52   :  { %518 = vmatprep.subr.mxu0 %v109_v10  ;;  %552 = vmatprep.mubr.f32.mxu0 %v19169_v0  ;;  %v114_v21 = vld [vmem:[#allocation5 + $0x70] sm:$0xff]  ;;  %v17035_v27 = vcombine.high %v1172_v18, %v1180_v19  ;;  %v17034_v29 = vcombine.low %v1172_v18, %v1180_v19 }
  0x53   :  { %519 = vmatpush1.msra.mxu0 %v108_v11  ;;  %589 = vmatprep.subr.mxu1 %v111_v12  ;;  %v900_v22 = vld [vmem:[#allocation8 + $0x300] sm:$0xff] }
  0x54   :  { %590 = vmatpush1.msra.mxu1 %v110_v13  ;;  %623 = vmatprep.mubr.f32.mxu1 %v19169_v0  ;;  %v908_v24 = vld [vmem:[#allocation8 + $0x340] sm:$0xff] }
  0x55   :  { %16662 = vmatmul.mubr.msk.f32.vlgmr.msra.gmra.mxu0 %vm200_vm0, %v99_v5  ;;  %16663 = vmatmul.mubr.msk.f32.vlgmr.msra.gmra.mxu1 %vm200_vm0, %v99_v5  ;;  %v1156_v25 = vld [vmem:[#allocation8 + $0xb00] sm:$0xff]  ;;  %v16763_v30 = vcombine.high %v900_v22, %v908_v24  ;;  %v16762_v36 = vcombine.low %v900_v22, %v908_v24 }
  0x56   :  { %v1164_v26 = vld [vmem:[#allocation8 + $0xb40] sm:$0xff]  ;;  %660 = vmatprep.subr.mxu0 %v113_v14  ;;  %694 = vmatprep.mubr.f32.mxu0 %v19169_v0 }
  0x57   :  { %661 = vmatpush1.msra.mxu0 %v112_v17  ;;  %731 = vmatprep.subr.mxu1 %v115_v20  ;;  %v17019_v31 = vcombine.high %v1156_v25, %v1164_v26  ;;  %v884_v32 = vld [vmem:[#allocation8 + $0x280] sm:$0xff]  ;;  %v17018_v37 = vcombine.low %v1156_v25, %v1164_v26 }
  0x58   :  { %732 = vmatpush1.msra.mxu1 %v114_v21  ;;  %765 = vmatprep.mubr.f32.mxu1 %v19169_v0  ;;  %v892_v33 = vld [vmem:[#allocation8 + $0x2c0] sm:$0xff] }
  0x59   :  { %16664 = vmatmul.mubr.msk.f32.vlgmr.msra.gmra.mxu0 %vm200_vm0, %v99_v5  ;;  %13176 = vmatprep.subr.bf16.mxu0 %v16779_v23  ;;  %v1140_v34 = vld [vmem:[#allocation8 + $0xa80] sm:$0xff]  ;;  %v16747_v38 = vcombine.high %v884_v32, %v892_v33  ;;  %v16746_v44 = vcombine.low %v884_v32, %v892_v33 }
  0x5a   :  { %v1148_v35 = vld [vmem:[#allocation8 + $0xac0] sm:$0xff]  ;;  %13217 = vmatprep.subr.bf16.mxu1 %v17035_v27  ;;  %16665 = vmatmul.mubr.msk.f32.vlgmr.msra.gmra.mxu1 %vm200_vm0, %v99_v5 }
  0x5b   :  { %13177 = vmatpush1.bf16.msra.mxu0 %v16778_v28  ;;  %13218 = vmatpush1.bf16.msra.mxu1 %v17034_v29  ;;  %v17003_v39 = vcombine.high %v1140_v34, %v1148_v35  ;;  %v868_v40 = vld [vmem:[#allocation8 + $0x200] sm:$0xff]  ;;  %v17002_v45 = vcombine.low %v1140_v34, %v1148_v35 }
  0x5c   :  { %13178 = vmatprep.subr.bf16.mxu0 %v16763_v30  ;;  %13219 = vmatprep.subr.bf16.mxu1 %v17019_v31  ;;  %v876_v41 = vld [vmem:[#allocation8 + $0x240] sm:$0xff] }
  0x5d   :  { %v1124_v42 = vld [vmem:[#allocation8 + $0xa00] sm:$0xff]  ;;  %v16731_v46 = vcombine.high %v868_v40, %v876_v41  ;;  %v16730_v52 = vcombine.low %v868_v40, %v876_v41 }
  0x5e   :  { %v1132_v43 = vld [vmem:[#allocation8 + $0xa40] sm:$0xff] }
  0x5f   :  { %13179 = vmatpush1.bf16.msra.mxu0 %v16762_v36  ;;  %13220 = vmatpush1.bf16.msra.mxu1 %v17018_v37  ;;  %v16987_v47 = vcombine.high %v1124_v42, %v1132_v43  ;;  %v852_v48 = vld [vmem:[#allocation8 + $0x180] sm:$0xff]  ;;  %v16986_v53 = vcombine.low %v1124_v42, %v1132_v43 }
  0x60   :  { %13180 = vmatprep.subr.bf16.mxu0 %v16747_v38  ;;  %13221 = vmatprep.subr.bf16.mxu1 %v17003_v39  ;;  %v860_v49 = vld [vmem:[#allocation8 + $0x1c0] sm:$0xff] }
  0x61   :  { %v1108_v50 = vld [vmem:[#allocation8 + $0x980] sm:$0xff]  ;;  %v16715_v54 = vcombine.high %v852_v48, %v860_v49  ;;  %v16714_v60 = vcombine.low %v852_v48, %v860_v49 }
  0x62   :  { %v1116_v51 = vld [vmem:[#allocation8 + $0x9c0] sm:$0xff] }
  0x63   :  { %13181 = vmatpush1.bf16.msra.mxu0 %v16746_v44  ;;  %13222 = vmatpush1.bf16.msra.mxu1 %v17002_v45  ;;  %v16971_v55 = vcombine.high %v1108_v50, %v1116_v51  ;;  %v836_v56 = vld [vmem:[#allocation8 + $0x100] sm:$0xff]  ;;  %v16970_v61 = vcombine.low %v1108_v50, %v1116_v51 }
  0x64   :  { %13182 = vmatprep.subr.bf16.mxu0 %v16731_v46  ;;  %13223 = vmatprep.subr.bf16.mxu1 %v16987_v47  ;;  %v844_v57 = vld [vmem:[#allocation8 + $0x140] sm:$0xff] }
  0x65   :  { %v1092_v58 = vld [vmem:[#allocation8 + $0x900] sm:$0xff]  ;;  %v16699_v62 = vcombine.high %v836_v56, %v844_v57  ;;  %v16698_v4 = vcombine.low %v836_v56, %v844_v57 }
  0x66   :  { %v1100_v59 = vld [vmem:[#allocation8 + $0x940] sm:$0xff] }
  0x67   :  { %13183 = vmatpush1.bf16.msra.mxu0 %v16730_v52  ;;  %13224 = vmatpush1.bf16.msra.mxu1 %v16986_v53  ;;  %v16955_v63 = vcombine.high %v1092_v58, %v1100_v59  ;;  %v820_v0 = vld [vmem:[#allocation8 + $0x80] sm:$0xff]  ;;  %v16954_v5 = vcombine.low %v1092_v58, %v1100_v59 }
  0x68   :  { %13184 = vmatprep.subr.bf16.mxu0 %v16715_v54  ;;  %13225 = vmatprep.subr.bf16.mxu1 %v16971_v55  ;;  %v828_v1 = vld [vmem:[#allocation8 + $0xc0] sm:$0xff] }
  0x69   :  { %v1076_v2 = vld [vmem:[#allocation8 + $0x880] sm:$0xff]  ;;  %v16683_v6 = vcombine.high %v820_v0, %v828_v1  ;;  %v16682_v12 = vcombine.low %v820_v0, %v828_v1 }
  0x6a   :  { %v1084_v3 = vld [vmem:[#allocation8 + $0x8c0] sm:$0xff] }
  0x6b   :  { %13185 = vmatpush1.bf16.msra.mxu0 %v16714_v60  ;;  %13226 = vmatpush1.bf16.msra.mxu1 %v16970_v61  ;;  %v16939_v7 = vcombine.high %v1076_v2, %v1084_v3  ;;  %v804_v8 = vld [vmem:[#allocation8] sm:$0xff]  ;;  %v16938_v13 = vcombine.low %v1076_v2, %v1084_v3 }
  0x6c   :  { %13186 = vmatprep.subr.bf16.mxu0 %v16699_v62  ;;  %13227 = vmatprep.subr.bf16.mxu1 %v16955_v63  ;;  %v812_v9 = vld [vmem:[#allocation8 + $0x40] sm:$0xff] }
  0x6d   :  { %v1060_v10 = vld [vmem:[#allocation8 + $0x800] sm:$0xff]  ;;  %v16667_v14 = vcombine.high %v804_v8, %v812_v9  ;;  %v16666_v20 = vcombine.low %v804_v8, %v812_v9 }
  0x6e   :  { %v1068_v11 = vld [vmem:[#allocation8 + $0x840] sm:$0xff] }
  0x6f   :  { %13187 = vmatpush1.bf16.msra.mxu0 %v16698_v4  ;;  %13228 = vmatpush1.bf16.msra.mxu1 %v16954_v5  ;;  %v16923_v15 = vcombine.high %v1060_v10, %v1068_v11  ;;  %v1044_v16 = vld [vmem:[#allocation8 + $0x780] sm:$0xff]  ;;  %v16922_v21 = vcombine.low %v1060_v10, %v1068_v11 }
  0x70   :  { %13188 = vmatprep.subr.bf16.mxu0 %v16683_v6  ;;  %13229 = vmatprep.subr.bf16.mxu1 %v16939_v7  ;;  %v1052_v17 = vld [vmem:[#allocation8 + $0x7c0] sm:$0xff] }
  0x71   :  { %v1300_v18 = vld [vmem:[#allocation8 + $0xf80] sm:$0xff]  ;;  %v16907_v22 = vcombine.high %v1044_v16, %v1052_v17  ;;  %v16906_v28 = vcombine.low %v1044_v16, %v1052_v17 }
  0x72   :  { %v1308_v19 = vld [vmem:[#allocation8 + $0xfc0] sm:$0xff] }
  0x73   :  { %13189 = vmatpush1.bf16.msra.mxu0 %v16682_v12  ;;  %13230 = vmatpush1.bf16.msra.mxu1 %v16938_v13  ;;  %v17163_v23 = vcombine.high %v1300_v18, %v1308_v19  ;;  %v1028_v24 = vld [vmem:[#allocation8 + $0x700] sm:$0xff]  ;;  %v17162_v29 = vcombine.low %v1300_v18, %v1308_v19 }
  0x74   :  { %13190 = vmatprep.subr.bf16.mxu0 %v16667_v14  ;;  %13231 = vmatprep.subr.bf16.mxu1 %v16923_v15  ;;  %v1036_v25 = vld [vmem:[#allocation8 + $0x740] sm:$0xff] }
  0x75   :  { %v1284_v26 = vld [vmem:[#allocation8 + $0xf00] sm:$0xff]  ;;  %v16891_v30 = vcombine.high %v1028_v24, %v1036_v25  ;;  %v16890_v36 = vcombine.low %v1028_v24, %v1036_v25 }
  0x76   :  { %v1292_v27 = vld [vmem:[#allocation8 + $0xf40] sm:$0xff] }
  0x77   :  { %13191 = vmatpush1.bf16.msra.mxu0 %v16666_v20  ;;  %13232 = vmatpush1.bf16.msra.mxu1 %v16922_v21  ;;  %v17147_v31 = vcombine.high %v1284_v26, %v1292_v27  ;;  %v1012_v32 = vld [vmem:[#allocation8 + $0x680] sm:$0xff]  ;;  %v17146_v37 = vcombine.low %v1284_v26, %v1292_v27  ;;  %v120_v26 = vlaneseq }
  0x78   :  { %13192 = vmatprep.subr.bf16.mxu0 %v16907_v22  ;;  %13233 = vmatprep.subr.bf16.mxu1 %v17163_v23  ;;  %v1020_v33 = vld [vmem:[#allocation8 + $0x6c0] sm:$0xff] }
  0x79   :  { %v1268_v34 = vld [vmem:[#allocation8 + $0xe80] sm:$0xff]  ;;  %v16875_v38 = vcombine.high %v1012_v32, %v1020_v33  ;;  %v16874_v44 = vcombine.low %v1012_v32, %v1020_v33  ;;  %v19253_v27 = vshrl.u32 %v120_v26, 7 }
  0x7a   :  { %v1276_v35 = vld [vmem:[#allocation8 + $0xec0] sm:$0xff] }
  0x7b   :  { %13193 = vmatpush2.bf16.msra.mxu0 %v16906_v28  ;;  %13234 = vmatpush2.bf16.msra.mxu1 %v17162_v29  ;;  %v17131_v39 = vcombine.high %v1268_v34, %v1276_v35  ;;  %v996_v40 = vld [vmem:[#allocation8 + $0x600] sm:$0xff]  ;;  %v17130_v45 = vcombine.low %v1268_v34, %v1276_v35  ;;  %v19256_v28 = vsub.s32 0, %v19253_v27  ;;  %v19259_v29 = vsub.s32 2, %v19253_v27 }
  0x7c   :  { %13194 = vmatprep.subr.bf16.mxu0 %v16891_v30  ;;  %13235 = vmatprep.subr.bf16.mxu1 %v17147_v31  ;;  %v1004_v41 = vld [vmem:[#allocation8 + $0x640] sm:$0xff]  ;;  %v19261_v30 = vld [vmem:[#allocation7] sm:$0xff]  ;;  %v19264_v31 = vsub.s32 1, %v19253_v27  ;;  %v19267_v32 = vsub.s32 3, %v19253_v27  ;;  %v19274_v35 = vsub.s32 5, %v19253_v27 }
  0x7d   :  { %v1252_v42 = vld [vmem:[#allocation8 + $0xe00] sm:$0xff]  ;;  %v16859_v46 = vcombine.high %v996_v40, %v1004_v41  ;;  %v16858_v52 = vcombine.low %v996_v40, %v1004_v41  ;;  %v123_v33 = vrot.slane %v19261_v30, %v19256_v28  ;;  %v131_v34 = vrot.slane %v19261_v30, %v19259_v29 }
  0x7e   :  { %v1260_v43 = vld [vmem:[#allocation8 + $0xe40] sm:$0xff] }
  0x7f   :  { %13195 = vmatpush2.bf16.msra.mxu0 %v16890_v36  ;;  %13236 = vmatpush2.bf16.msra.mxu1 %v17146_v37  ;;  %v17115_v47 = vcombine.high %v1252_v42, %v1260_v43  ;;  %v980_v48 = vld [vmem:[#allocation8 + $0x580] sm:$0xff]  ;;  %v17114_v53 = vcombine.low %v1252_v42, %v1260_v43  ;;  %v127_v36 = vrot.slane %v19261_v30, %v19264_v31 }
  0x80   :  { %13196 = vmatprep.subr.bf16.mxu0 %v16875_v38  ;;  %13237 = vmatprep.subr.bf16.mxu1 %v17131_v39  ;;  %v988_v49 = vld [vmem:[#allocation8 + $0x5c0] sm:$0xff]  ;;  %v135_v37 = vrot.slane %v19261_v30, %v19267_v32  ;;  %v19281_v38 = vsub.s32 7, %v19253_v27 }
  0x81   :  { %v1236_v50 = vld [vmem:[#allocation8 + $0xd80] sm:$0xff]  ;;  %v16843_v54 = vcombine.high %v980_v48, %v988_v49  ;;  %v16842_v60 = vcombine.low %v980_v48, %v988_v49 }
  0x82   :  { %v1244_v51 = vld [vmem:[#allocation8 + $0xdc0] sm:$0xff]  ;;  %v151_v49 = vrot.slane %v19261_v30, %v19281_v38 }
  0x83   :  { %13197 = vmatpush2.bf16.msra.mxu0 %v16874_v44  ;;  %13238 = vmatpush2.bf16.msra.mxu1 %v17130_v45  ;;  %v17099_v55 = vcombine.high %v1236_v50, %v1244_v51  ;;  %v964_v56 = vld [vmem:[#allocation8 + $0x500] sm:$0xff]  ;;  %v17098_v61 = vcombine.low %v1236_v50, %v1244_v51  ;;  %v143_v45 = vrot.slane %v19261_v30, %v19274_v35 }
  0x84   :  { %13198 = vmatprep.subr.bf16.mxu0 %v16859_v46  ;;  %13239 = vmatprep.subr.bf16.mxu1 %v17115_v47  ;;  %v972_v57 = vld [vmem:[#allocation8 + $0x540] sm:$0xff] }
  0x85   :  { %v1220_v58 = vld [vmem:[#allocation8 + $0xd00] sm:$0xff]  ;;  %v16827_v62 = vcombine.high %v964_v56, %v972_v57  ;;  %v16826_v0 = vcombine.low %v964_v56, %v972_v57 }
  0x86   :  { %v1228_v59 = vld [vmem:[#allocation8 + $0xd40] sm:$0xff] }
  0x87   :  { %13199 = vmatpush2.bf16.msra.mxu0 %v16858_v52  ;;  %13240 = vmatpush2.bf16.msra.mxu1 %v17114_v53  ;;  %v17083_v63 = vcombine.high %v1220_v58, %v1228_v59  ;;  %v17082_v1 = vcombine.low %v1220_v58, %v1228_v59  ;;  %v948_v2 = vld [vmem:[#allocation8 + $0x480] sm:$0xff] }
  0x88   :  { %13200 = vmatprep.subr.bf16.mxu0 %v16843_v54  ;;  %13241 = vmatprep.subr.bf16.mxu1 %v17099_v55  ;;  %v956_v3 = vld [vmem:[#allocation8 + $0x4c0] sm:$0xff] }
  0x89   :  { %v1204_v4 = vld [vmem:[#allocation8 + $0xc80] sm:$0xff]  ;;  %v16811_v5 = vcombine.high %v948_v2, %v956_v3  ;;  %v16810_v8 = vcombine.low %v948_v2, %v956_v3 }
  0x8a   :  { %v1212_v6 = vld [vmem:[#allocation8 + $0xcc0] sm:$0xff] }
  0x8b   :  { %13201 = vmatpush2.bf16.msra.mxu0 %v16842_v60  ;;  %13242 = vmatpush2.bf16.msra.mxu1 %v17098_v61  ;;  %v17067_v7 = vcombine.high %v1204_v4, %v1212_v6  ;;  %v17066_v9 = vcombine.low %v1204_v4, %v1212_v6  ;;  %v932_v10 = vld [vmem:[#allocation8 + $0x400] sm:$0xff] }
  0x8c   :  { %13202 = vmatprep.subr.bf16.mxu0 %v16827_v62  ;;  %13243 = vmatprep.subr.bf16.mxu1 %v17083_v63  ;;  %v940_v11 = vld [vmem:[#allocation8 + $0x440] sm:$0xff] }
  0x8d   :  { %v1188_v12 = vld [vmem:[#allocation8 + $0xc00] sm:$0xff]  ;;  %v16795_v13 = vcombine.high %v932_v10, %v940_v11  ;;  %v16794_v16 = vcombine.low %v932_v10, %v940_v11 }
  0x8e   :  { %v1196_v14 = vld [vmem:[#allocation8 + $0xc40] sm:$0xff] }
  0x8f   :  { %13203 = vmatpush2.bf16.msra.mxu0 %v16826_v0  ;;  %13244 = vmatpush2.bf16.msra.mxu1 %v17082_v1  ;;  %v17051_v15 = vcombine.high %v1188_v12, %v1196_v14  ;;  %v17050_v17 = vcombine.low %v1188_v12, %v1196_v14  ;;  %v19237_v18 = vld [vmem:[#allocation8 + $0x1380] sm:$0xff] }
  0x90   :  { %13204 = vmatprep.subr.bf16.mxu0 %v16811_v5  ;;  %13245 = vmatprep.subr.bf16.mxu1 %v17067_v7  ;;  %v19239_v19 = vld [vmem:[#allocation8 + $0x13c0] sm:$0xff] }
  0x91   :  { %v19241_v20 = vld [vmem:[#allocation8 + $0x1b80] sm:$0xff]  ;;  %v17291_v21 = vcombine.high %v19237_v18, %v19239_v19  ;;  %v17290_v23 = vcombine.low %v19237_v18, %v19239_v19 }
  0x92   :  { %v19245_v22 = vld [vmem:[#allocation8 + $0x1bc0] sm:$0xff] }
  0x93   :  { %13205 = vmatpush2.bf16.msra.mxu0 %v16810_v8  ;;  %13246 = vmatpush2.bf16.msra.mxu1 %v17066_v9  ;;  %v17546_v24 = vcombine.low %v19241_v20, %v19245_v22  ;;  %v17547_v25 = vcombine.high %v19241_v20, %v19245_v22  ;;  %v1412_v51 = vld [vmem:[#allocation8 + $0x1300] sm:$0xff] }
  0x94   :  { %13206 = vmatprep.subr.bf16.mxu0 %v16795_v13  ;;  %13247 = vmatprep.subr.bf16.mxu1 %v17051_v15  ;;  %v1420_v56 = vld [vmem:[#allocation8 + $0x1340] sm:$0xff] }
  0x95   :  { %v1668_v57 = vld [vmem:[#allocation8 + $0x1b00] sm:$0xff]  ;;  %v17275_v3 = vcombine.high %v1412_v51, %v1420_v56  ;;  %v17274_v11 = vcombine.low %v1412_v51, %v1420_v56 }
  0x96   :  { %v1676_v58 = vld [vmem:[#allocation8 + $0x1b40] sm:$0xff] }
  0x97   :  { %13207 = vmatpush2.bf16.msra.mxu0 %v16794_v16  ;;  %13248 = vmatpush2.bf16.msra.mxu1 %v17050_v17  ;;  %v17531_v4 = vcombine.high %v1668_v57, %v1676_v58  ;;  %v1396_v5 = vld [vmem:[#allocation8 + $0x1280] sm:$0xff]  ;;  %v17530_v12 = vcombine.low %v1668_v57, %v1676_v58 }
  0x98   :  { %13258 = vmatprep.subr.bf16.mxu0 %v17291_v21  ;;  %13299 = vmatprep.subr.bf16.mxu1 %v17547_v25  ;;  %v1404_v6 = vld [vmem:[#allocation8 + $0x12c0] sm:$0xff] }
  0x99   :  { %v1652_v7 = vld [vmem:[#allocation8 + $0x1a80] sm:$0xff]  ;;  %v17259_v15 = vcombine.high %v1396_v5, %v1404_v6  ;;  %v17258_v21 = vcombine.low %v1396_v5, %v1404_v6 }
  0x9a   :  { %v1660_v8 = vld [vmem:[#allocation8 + $0x1ac0] sm:$0xff] }
  0x9b   :  { %v17515_v16 = vcombine.high %v1652_v7, %v1660_v8  ;;  %v1380_v17 = vld [vmem:[#allocation8 + $0x1200] sm:$0xff]  ;;  %v17514_v22 = vcombine.low %v1652_v7, %v1660_v8 }
  0x9c   :  { %v1388_v18 = vld [vmem:[#allocation8 + $0x1240] sm:$0xff] }
  0x9d   :  { %v1636_v19 = vld [vmem:[#allocation8 + $0x1a00] sm:$0xff] }
  0x9e   :  { %v1644_v20 = vld [vmem:[#allocation8 + $0x1a40] sm:$0xff] }
  0x9f   :  { %v1364_v25 = vld [vmem:[#allocation8 + $0x1180] sm:$0xff] }
  0xa0   :  { %v1372_v26 = vld [vmem:[#allocation8 + $0x11c0] sm:$0xff] }
  0xa1   :  { %v1588_v51 = vld [vmem:[#allocation8 + $0x1880] sm:$0xff] }
  0xa2   :  { %v1556_v7 = vld [vmem:[#allocation8 + $0x1780] sm:$0xff] }
  0xa3   :  { %v1564_v8 = vld [vmem:[#allocation8 + $0x17c0] sm:$0xff] }
 0x10d   :  { %v270_v39 = vpop.f32.mrf.mxu0  ;;  %v341_v40 = vpop.f32.mrf.mxu1 }
 0x10e   :  { %v271_v41 = vadd.f32 %v270_v39, %v123_v33  ;;  %v342_v42 = vadd.f32 %v341_v40, %v131_v34  ;;  %v1620_v33 = vld [vmem:[#allocation8 + $0x1980] sm:$0xff]  ;;  %v17227_v39 = vcombine.high %v1364_v25, %v1372_v26 }
 0x10f   :  { %v272_v43 = vpop.f32.mrf.mxu0  ;;  %v343_v44 = vpop.f32.mrf.mxu1  ;;  %v1628_v34 = vld [vmem:[#allocation8 + $0x19c0] sm:$0xff] }
 0x110   :  { %v774_v46 = vmax.f32 %v342_v42, 0.0  ;;  %v273_v47 = vadd.f32 %v272_v43, %v127_v36  ;;  %v344_v48 = vadd.f32 %v343_v44, %v135_v37  ;;  %v772_v50 = vmax.f32 %v271_v41, 0.0  ;;  %v1348_v41 = vld [vmem:[#allocation8 + $0x1100] sm:$0xff] }
 0x111   :  { %v19287_v52 = vpop.f32.mrf.mxu0  ;;  %v19289_v53 = vpop.f32.mrf.mxu1  ;;  %v17242_v36 = vcombine.low %v1380_v17, %v1388_v18  ;;  %v17498_v37 = vcombine.low %v1636_v19, %v1644_v20  ;;  %v17483_v40 = vcombine.high %v1620_v33, %v1628_v34  ;;  %v1356_v42 = vld [vmem:[#allocation8 + $0x1140] sm:$0xff] }
 0x112   :  { %v773_v54 = vmax.f32 %v273_v47, 0.0  ;;  %v775_v55 = vmax.f32 %v344_v48, 0.0  ;;  %v19291_v59 = vpack.c.bf16 %v774_v46, %v774_v46  ;;  %v19297_v2 = vpack.c.bf16 %v772_v50, %v772_v50  ;;  %v1604_v43 = vld [vmem:[#allocation8 + $0x1900] sm:$0xff] }
 0x113   :  { %v414_v60 = vpop.f32.mrf.mxu0  ;;  %v485_v61 = vpop.f32.mrf.mxu1  ;;  %v1612_v44 = vld [vmem:[#allocation8 + $0x1940] sm:$0xff]  ;;  %v17482_v46 = vcombine.low %v1620_v33, %v1628_v34  ;;  %v17211_v47 = vcombine.high %v1348_v41, %v1356_v42 }
 0x114   :  { %v19293_v62 = vpack.c.bf16 %v773_v54, %v773_v54  ;;  %v19295_v63 = vpack.c.bf16 %v775_v55, %v775_v55  ;;  %v415_v0 = vadd.f32 %v414_v60, %v143_v45  ;;  %v486_v1 = vadd.f32 %v485_v61, %v151_v49  ;;  %v1332_v49 = vld [vmem:[#allocation8 + $0x1080] sm:$0xff] }
 0x115   :  { %v17226_v45 = vcombine.low %v1364_v25, %v1372_v26  ;;  %v17467_v48 = vcombine.high %v1604_v43, %v1612_v44  ;;  %v1340_v50 = vld [vmem:[#allocation8 + $0x10c0] sm:$0xff]  ;;  %v17210_v55 = vcombine.low %v1348_v41, %v1356_v42  ;;  %v17466_v56 = vcombine.low %v1604_v43, %v1612_v44 }
 0x116   :  { %13208 = vmatprep.mubr.bf16.mxu0 %v19293_v62  ;;  %13249 = vmatprep.mubr.bf16.mxu1 %v19295_v63  ;;  %v777_v9 = vmax.f32 %v415_v0, 0.0  ;;  %v779_v10 = vmax.f32 %v486_v1, 0.0  ;;  %v1596_v54 = vld [vmem:[#allocation8 + $0x18c0] sm:$0xff]  ;;  %v17195_v57 = vcombine.high %v1332_v49, %v1340_v50 }
 0x117   :  { %13209 = vmatmul.mubr.bf16.vlgmr.msra.gmra.mxu0 %v19297_v2  ;;  %13250 = vmatmul.mubr.bf16.vlgmr.msra.gmra.mxu1 %v19291_v59  ;;  %v17451_v58 = vcombine.high %v1588_v51, %v1596_v54  ;;  %v1316_v60 = vld [vmem:[#allocation8 + $0x1000] sm:$0xff] }
 0x118   :  { %13259 = vmatpush1.bf16.msra.mxu0 %v17290_v23  ;;  %13300 = vmatpush1.bf16.msra.mxu1 %v17546_v24  ;;  %v19303_v13 = vpack.c.bf16 %v777_v9, %v777_v9  ;;  %v19305_v14 = vpack.c.bf16 %v779_v10, %v779_v10  ;;  %v17243_v23 = vcombine.high %v1380_v17, %v1388_v18  ;;  %v1324_v61 = vld [vmem:[#allocation8 + $0x1040] sm:$0xff] }
 0x119   :  { %13260 = vmatprep.subr.bf16.mxu0 %v17275_v3  ;;  %13301 = vmatprep.subr.bf16.mxu1 %v17531_v4  ;;  %v17499_v24 = vcombine.high %v1636_v19, %v1644_v20  ;;  %v1572_v0 = vld [vmem:[#allocation8 + $0x1800] sm:$0xff]  ;;  %v17194_v3 = vcombine.low %v1332_v49, %v1340_v50  ;;  %v17450_v4 = vcombine.low %v1588_v51, %v1596_v54 }
 0x11a   :  { %13290 = vmatprep.mubr.bf16.mxu0 %v19303_v13  ;;  %13331 = vmatprep.mubr.bf16.mxu1 %v19305_v14  ;;  %v1580_v1 = vld [vmem:[#allocation8 + $0x1840] sm:$0xff]  ;;  %v17179_v5 = vcombine.high %v1316_v60, %v1324_v61 }
 0x11b   :  { %v17435_v6 = vcombine.high %v1572_v0, %v1580_v1  ;;  %v1812_v9 = vld [vmem:[#allocation8 + $0x1f80] sm:$0xff] }
 0x11c   :  { %13261 = vmatpush1.bf16.msra.mxu0 %v17274_v11  ;;  %13302 = vmatpush1.bf16.msra.mxu1 %v17530_v12  ;;  %v1820_v10 = vld [vmem:[#allocation8 + $0x1fc0] sm:$0xff]  ;;  %v17178_v11 = vcombine.low %v1316_v60, %v1324_v61  ;;  %v17434_v12 = vcombine.low %v1572_v0, %v1580_v1 }
 0x11d   :  { %13262 = vmatprep.subr.bf16.mxu0 %v17259_v15  ;;  %13303 = vmatprep.subr.bf16.mxu1 %v17515_v16  ;;  %v17419_v15 = vcombine.high %v1556_v7, %v1564_v8  ;;  %v17675_v16 = vcombine.high %v1812_v9, %v1820_v10  ;;  %v1540_v17 = vld [vmem:[#allocation8 + $0x1700] sm:$0xff] }
 0x11e   :  { %v1548_v18 = vld [vmem:[#allocation8 + $0x1740] sm:$0xff] }
 0x11f   :  { %v1796_v19 = vld [vmem:[#allocation8 + $0x1f00] sm:$0xff] }
 0x120   :  { %13263 = vmatpush1.bf16.msra.mxu0 %v17258_v21  ;;  %13304 = vmatpush1.bf16.msra.mxu1 %v17514_v22  ;;  %v1804_v20 = vld [vmem:[#allocation8 + $0x1f40] sm:$0xff]  ;;  %v17418_v21 = vcombine.low %v1556_v7, %v1564_v8  ;;  %v17674_v22 = vcombine.low %v1812_v9, %v1820_v10  ;;  %v19313_v8 = vsub.s32 4, %v19253_v27 }
 0x121   :  { %13264 = vmatprep.subr.bf16.mxu0 %v17243_v23  ;;  %13305 = vmatprep.subr.bf16.mxu1 %v17499_v24  ;;  %v17403_v23 = vcombine.high %v1540_v17, %v1548_v18  ;;  %v17659_v24 = vcombine.high %v1796_v19, %v1804_v20  ;;  %v1524_v25 = vld [vmem:[#allocation8 + $0x1680] sm:$0xff] }
 0x122   :  { %v1532_v26 = vld [vmem:[#allocation8 + $0x16c0] sm:$0xff] }
 0x123   :  { %v1780_v33 = vld [vmem:[#allocation8 + $0x1e80] sm:$0xff] }
 0x124   :  { %13265 = vmatpush1.bf16.msra.mxu0 %v17242_v36  ;;  %13306 = vmatpush1.bf16.msra.mxu1 %v17498_v37  ;;  %v1788_v34 = vld [vmem:[#allocation8 + $0x1ec0] sm:$0xff]  ;;  %v17402_v36 = vcombine.low %v1540_v17, %v1548_v18  ;;  %v17658_v37 = vcombine.low %v1796_v19, %v1804_v20  ;;  %v19319_v17 = vpop.f32.mrf.mxu0  ;;  %v19321_v18 = vpop.f32.mrf.mxu1 }
 0x125   :  { %13266 = vmatprep.subr.bf16.mxu0 %v17227_v39  ;;  %13307 = vmatprep.subr.bf16.mxu1 %v17483_v40  ;;  %v17387_v39 = vcombine.high %v1524_v25, %v1532_v26  ;;  %v17643_v40 = vcombine.high %v1780_v33, %v1788_v34  ;;  %v1508_v41 = vld [vmem:[#allocation8 + $0x1600] sm:$0xff] }
 0x126   :  { %v1516_v42 = vld [vmem:[#allocation8 + $0x1640] sm:$0xff] }
 0x127   :  { %v1764_v43 = vld [vmem:[#allocation8 + $0x1e00] sm:$0xff] }
 0x128   :  { %13267 = vmatpush1.bf16.msra.mxu0 %v17226_v45  ;;  %13308 = vmatpush1.bf16.msra.mxu1 %v17482_v46  ;;  %v1772_v44 = vld [vmem:[#allocation8 + $0x1e40] sm:$0xff]  ;;  %v17386_v45 = vcombine.low %v1524_v25, %v1532_v26  ;;  %v17642_v46 = vcombine.low %v1780_v33, %v1788_v34 }
 0x129   :  { %13268 = vmatprep.subr.bf16.mxu0 %v17211_v47  ;;  %13309 = vmatprep.subr.bf16.mxu1 %v17467_v48  ;;  %v17371_v47 = vcombine.high %v1508_v41, %v1516_v42  ;;  %v17627_v48 = vcombine.high %v1764_v43, %v1772_v44  ;;  %v1492_v49 = vld [vmem:[#allocation8 + $0x1580] sm:$0xff] }
 0x12a   :  { %v1500_v50 = vld [vmem:[#allocation8 + $0x15c0] sm:$0xff] }
 0x12b   :  { %v1748_v51 = vld [vmem:[#allocation8 + $0x1d80] sm:$0xff] }
 0x12c   :  { %13269 = vmatpush1.bf16.msra.mxu0 %v17210_v55  ;;  %13310 = vmatpush1.bf16.msra.mxu1 %v17466_v56  ;;  %v1756_v54 = vld [vmem:[#allocation8 + $0x1dc0] sm:$0xff]  ;;  %v17370_v55 = vcombine.low %v1508_v41, %v1516_v42  ;;  %v17626_v56 = vcombine.low %v1764_v43, %v1772_v44 }
 0x12d   :  { %13270 = vmatprep.subr.bf16.mxu0 %v17195_v57  ;;  %13311 = vmatprep.subr.bf16.mxu1 %v17451_v58  ;;  %v17355_v57 = vcombine.high %v1492_v49, %v1500_v50  ;;  %v17611_v58 = vcombine.high %v1748_v51, %v1756_v54  ;;  %v1476_v60 = vld [vmem:[#allocation8 + $0x1500] sm:$0xff] }
 0x12e   :  { %v1484_v61 = vld [vmem:[#allocation8 + $0x1540] sm:$0xff] }
 0x12f   :  { %v1732_v0 = vld [vmem:[#allocation8 + $0x1d00] sm:$0xff]  ;;  %v17338_v19 = vcombine.low %v1476_v60, %v1484_v61 }
 0x130   :  { %13271 = vmatpush1.bf16.msra.mxu0 %v17194_v3  ;;  %13312 = vmatpush1.bf16.msra.mxu1 %v17450_v4  ;;  %v1740_v1 = vld [vmem:[#allocation8 + $0x1d40] sm:$0xff]  ;;  %v19310_v3 = vsub.s32 6, %v19253_v27  ;;  %v17354_v4 = vcombine.low %v1492_v49, %v1500_v50  ;;  %v139_v27 = vrot.slane %v19261_v30, %v19313_v8 }
 0x131   :  { %13272 = vmatprep.subr.bf16.mxu0 %v17179_v5  ;;  %13313 = vmatprep.subr.bf16.mxu1 %v17435_v6  ;;  %v17610_v5 = vcombine.low %v1748_v51, %v1756_v54  ;;  %v17339_v6 = vcombine.high %v1476_v60, %v1484_v61  ;;  %v17595_v7 = vcombine.high %v1732_v0, %v1740_v1  ;;  %v1460_v9 = vld [vmem:[#allocation8 + $0x1480] sm:$0xff] }
 0x132   :  { %v1468_v10 = vld [vmem:[#allocation8 + $0x14c0] sm:$0xff]  ;;  %v17594_v20 = vcombine.low %v1732_v0, %v1740_v1  ;;  %v413_v41 = vadd.f32 %v19287_v52, %v139_v27 }
 0x133   :  { %v1700_v25 = vld [vmem:[#allocation8 + $0x1c00] sm:$0xff] }
 0x134   :  { %13273 = vmatpush1.bf16.msra.mxu0 %v17178_v11  ;;  %13314 = vmatpush1.bf16.msra.mxu1 %v17434_v12  ;;  %v1716_v11 = vld [vmem:[#allocation8 + $0x1c80] sm:$0xff]  ;;  %v776_v54 = vmax.f32 %v413_v41, 0.0 }
 0x135   :  { %13274 = vmatprep.subr.bf16.mxu0 %v17419_v15  ;;  %13315 = vmatprep.subr.bf16.mxu1 %v17675_v16  ;;  %v1724_v12 = vld [vmem:[#allocation8 + $0x1cc0] sm:$0xff]  ;;  %v147_v15 = vrot.slane %v19261_v30, %v19310_v3  ;;  %v19317_v16 = vld [vmem:[#allocation7 + $0x8] sm:$0xff] }
 0x136   :  { %v1708_v26 = vld [vmem:[#allocation8 + $0x1c40] sm:$0xff]  ;;  %v159_v33 = vrot.slane %v19317_v16, %v19264_v31  ;;  %v167_v34 = vrot.slane %v19317_v16, %v19267_v32  ;;  %v17578_v30 = vcombine.low %v1716_v11, %v1724_v12 }
 0x137   :  { %v17563_v43 = vcombine.high %v1700_v25, %v1708_v26  ;;  %v1940_v44 = vld [vmem:[#allocation8 + $0x2380] sm:$0xff]  ;;  %v17562_v51 = vcombine.low %v1700_v25, %v1708_v26 }
 0x138   :  { %13275 = vmatpush2.bf16.msra.mxu0 %v17418_v21  ;;  %13316 = vmatpush2.bf16.msra.mxu1 %v17674_v22  ;;  %v17323_v21 = vcombine.high %v1460_v9, %v1468_v10  ;;  %v17579_v22 = vcombine.high %v1716_v11, %v1724_v12  ;;  %v2188_v60 = vld [vmem:[#allocation8 + $0x2b40] sm:$0xff] }
 0x139   :  { %13276 = vmatprep.subr.bf16.mxu0 %v17403_v23  ;;  %13317 = vmatprep.subr.bf16.mxu1 %v17659_v24  ;;  %v1444_v23 = vld [vmem:[#allocation8 + $0x1400] sm:$0xff] }
 0x13a   :  { %v1452_v24 = vld [vmem:[#allocation8 + $0x1440] sm:$0xff] }
 0x13b   :  { %v17307_v42 = vcombine.high %v1444_v23, %v1452_v24  ;;  %v1916_v11 = vld [vmem:[#allocation8 + $0x22c0] sm:$0xff] }
 0x13c   :  { %13277 = vmatpush2.bf16.msra.mxu0 %v17402_v36  ;;  %13318 = vmatpush2.bf16.msra.mxu1 %v17658_v37  ;;  %v484_v36 = vadd.f32 %v19289_v53, %v147_v15  ;;  %v556_v37 = vpop.f32.mrf.mxu0  ;;  %v17306_v53 = vcombine.low %v1444_v23, %v1452_v24  ;;  %v2164_v12 = vld [vmem:[#allocation8 + $0x2a80] sm:$0xff] }
 0x13d   :  { %13278 = vmatprep.subr.bf16.mxu0 %v17387_v39  ;;  %13319 = vmatprep.subr.bf16.mxu1 %v17643_v40  ;;  %v627_v39 = vpop.f32.mrf.mxu1  ;;  %v17322_v40 = vcombine.low %v1460_v9, %v1468_v10  ;;  %v1908_v10 = vld [vmem:[#allocation8 + $0x2280] sm:$0xff] }
 0x13e   :  { %v628_v49 = vadd.f32 %v627_v39, %v167_v34  ;;  %v778_v50 = vmax.f32 %v484_v36, 0.0  ;;  %v2172_v15 = vld [vmem:[#allocation8 + $0x2ac0] sm:$0xff]  ;;  %v17770_v34 = vcombine.low %v1908_v10, %v1916_v11 }
 0x13f   :  { %v18027_v23 = vcombine.high %v2164_v12, %v2172_v15  ;;  %v1892_v24 = vld [vmem:[#allocation8 + $0x2200] sm:$0xff]  ;;  %v18026_v36 = vcombine.low %v2164_v12, %v2172_v15 }
 0x140   :  { %13279 = vmatpush2.bf16.msra.mxu0 %v17386_v45  ;;  %13320 = vmatpush2.bf16.msra.mxu1 %v17642_v46  ;;  %v1948_v45 = vld [vmem:[#allocation8 + $0x23c0] sm:$0xff]  ;;  %v783_v0 = vmax.f32 %v628_v49, 0.0  ;;  %v19331_v1 = vpack.c.bf16 %v778_v50, %v778_v50 }
 0x141   :  { %13280 = vmatprep.subr.bf16.mxu0 %v17371_v47  ;;  %13321 = vmatprep.subr.bf16.mxu1 %v17627_v48  ;;  %v2196_v46 = vld [vmem:[#allocation8 + $0x2b80] sm:$0xff]  ;;  %v557_v48 = vadd.f32 %v556_v37, %v159_v33 }
 0x142   :  { %v2204_v47 = vld [vmem:[#allocation8 + $0x2bc0] sm:$0xff] }
 0x143   :  { %v18059_v52 = vcombine.high %v2196_v46, %v2204_v47  ;;  %v781_v61 = vmax.f32 %v557_v48, 0.0  ;;  %v1900_v25 = vld [vmem:[#allocation8 + $0x2240] sm:$0xff] }
 0x144   :  { %13281 = vmatpush2.bf16.msra.mxu0 %v17370_v55  ;;  %13322 = vmatpush2.bf16.msra.mxu1 %v17626_v56  ;;  %v17803_v55 = vcombine.high %v1940_v44, %v1948_v45  ;;  %v1924_v56 = vld [vmem:[#allocation8 + $0x2300] sm:$0xff]  ;;  %v17755_v37 = vcombine.high %v1892_v24, %v1900_v25 }
 0x145   :  { %13282 = vmatprep.subr.bf16.mxu0 %v17355_v57  ;;  %13323 = vmatprep.subr.bf16.mxu1 %v17611_v58  ;;  %v1932_v57 = vld [vmem:[#allocation8 + $0x2340] sm:$0xff] }
 0x146   :  { %v2180_v58 = vld [vmem:[#allocation8 + $0x2b00] sm:$0xff]  ;;  %v17786_v27 = vcombine.low %v1924_v56, %v1932_v57 }
 0x147   :  { %v18043_v9 = vcombine.high %v2180_v58, %v2188_v60  ;;  %v2148_v26 = vld [vmem:[#allocation8 + $0x2a00] sm:$0xff] }
 0x148   :  { %13283 = vmatpush2.bf16.msra.mxu0 %v17354_v4  ;;  %13324 = vmatpush2.bf16.msra.mxu1 %v17610_v5  ;;  %v17802_v4 = vcombine.low %v1940_v44, %v1948_v45  ;;  %v18058_v5 = vcombine.low %v2196_v46, %v2204_v47  ;;  %v2156_v33 = vld [vmem:[#allocation8 + $0x2a40] sm:$0xff] }
 0x149   :  { %13284 = vmatprep.subr.bf16.mxu0 %v17339_v6  ;;  %13325 = vmatprep.subr.bf16.mxu1 %v17595_v7  ;;  %v19333_v6 = vpack.c.bf16 %v776_v54, %v776_v54  ;;  %v17787_v7 = vcombine.high %v1924_v56, %v1932_v57  ;;  %v18011_v39 = vcombine.high %v2148_v26, %v2156_v33  ;;  %v2132_v41 = vld [vmem:[#allocation8 + $0x2980] sm:$0xff] }
 0x14a   :  { %v18010_v44 = vcombine.low %v2148_v26, %v2156_v33  ;;  %v1860_v47 = vld [vmem:[#allocation8 + $0x2100] sm:$0xff] }
 0x14b   :  { %v1868_v48 = vld [vmem:[#allocation8 + $0x2140] sm:$0xff] }
 0x14c   :  { %13285 = vmatpush2.bf16.msra.mxu0 %v17338_v19  ;;  %13326 = vmatpush2.bf16.msra.mxu1 %v17594_v20  ;;  %v19335_v19 = vpack.c.bf16 %v781_v61, %v781_v61  ;;  %v19337_v20 = vpack.c.bf16 %v783_v0, %v783_v0  ;;  %v2116_v49 = vld [vmem:[#allocation8 + $0x2900] sm:$0xff]  ;;  %v17723_v54 = vcombine.high %v1860_v47, %v1868_v48 }
 0x14d   :  { %13286 = vmatprep.subr.bf16.mxu0 %v17323_v21  ;;  %13327 = vmatprep.subr.bf16.mxu1 %v17579_v22  ;;  %v18042_v21 = vcombine.low %v2180_v58, %v2188_v60  ;;  %v17771_v22 = vcombine.high %v1908_v10, %v1916_v11  ;;  %v2124_v50 = vld [vmem:[#allocation8 + $0x2940] sm:$0xff]  ;;  %v17722_v60 = vcombine.low %v1860_v47, %v1868_v48 }
 0x14e   :  { %v1852_v56 = vld [vmem:[#allocation8 + $0x20c0] sm:$0xff]  ;;  %v17978_v61 = vcombine.low %v2116_v49, %v2124_v50 }
 0x14f   :  { %v2100_v57 = vld [vmem:[#allocation8 + $0x2880] sm:$0xff] }
 0x150   :  { %13287 = vmatpush2.bf16.msra.mxu0 %v17322_v40  ;;  %13328 = vmatpush2.bf16.msra.mxu1 %v17578_v30  ;;  %v1876_v40 = vld [vmem:[#allocation8 + $0x2180] sm:$0xff] }
 0x151   :  { %13288 = vmatprep.subr.bf16.mxu0 %v17307_v42  ;;  %13329 = vmatprep.subr.bf16.mxu1 %v17563_v43  ;;  %v1884_v30 = vld [vmem:[#allocation8 + $0x21c0] sm:$0xff]  ;;  %v17754_v43 = vcombine.low %v1892_v24, %v1900_v25 }
 0x152   :  { %v2140_v42 = vld [vmem:[#allocation8 + $0x29c0] sm:$0xff]  ;;  %v17739_v45 = vcombine.high %v1876_v40, %v1884_v30 }
 0x153   :  { %v17995_v46 = vcombine.high %v2132_v41, %v2140_v42  ;;  %v2108_v58 = vld [vmem:[#allocation8 + $0x28c0] sm:$0xff] }
 0x154   :  { %13289 = vmatpush2.bf16.msra.mxu0 %v17306_v53  ;;  %13330 = vmatpush2.bf16.msra.mxu1 %v17562_v51  ;;  %v17738_v53 = vcombine.low %v1876_v40, %v1884_v30  ;;  %v17994_v51 = vcombine.low %v2132_v41, %v2140_v42  ;;  %v2092_v10 = vld [vmem:[#allocation8 + $0x2840] sm:$0xff]  ;;  %v17962_v12 = vcombine.low %v2100_v57, %v2108_v58 }
 0x155   :  { %13340 = vmatprep.subr.bf16.mxu0 %v17803_v55  ;;  %13381 = vmatprep.subr.bf16.mxu1 %v18059_v52  ;;  %v17979_v55 = vcombine.high %v2116_v49, %v2124_v50  ;;  %v1844_v52 = vld [vmem:[#allocation8 + $0x2080] sm:$0xff] }
 0x156   :  { %v17707_v0 = vcombine.high %v1844_v52, %v1852_v56  ;;  %v17706_v11 = vcombine.low %v1844_v52, %v1852_v56  ;;  %v2332_v24 = vld [vmem:[#allocation8 + $0x2fc0] sm:$0xff] }
 0x157   :  { %13291 = vmatmul.mubr.bf16.vlgmr.msra.gmra.mxu0 %v19333_v6  ;;  %13332 = vmatmul.mubr.bf16.vlgmr.msra.gmra.mxu1 %v19331_v1  ;;  %v2316_v40 = vld [vmem:[#allocation8 + $0x2f40] sm:$0xff] }
 0x158   :  { %13341 = vmatpush1.bf16.msra.mxu0 %v17802_v4  ;;  %13382 = vmatpush1.bf16.msra.mxu1 %v18058_v5  ;;  %v17963_v4 = vcombine.high %v2100_v57, %v2108_v58  ;;  %v1828_v5 = vld [vmem:[#allocation8 + $0x2000] sm:$0xff] }
 0x159   :  { %13342 = vmatprep.subr.bf16.mxu0 %v17787_v7  ;;  %13383 = vmatprep.subr.bf16.mxu1 %v18043_v9  ;;  %v1836_v7 = vld [vmem:[#allocation8 + $0x2040] sm:$0xff] }
 0x15a   :  { %13372 = vmatprep.mubr.bf16.mxu0 %v19335_v19  ;;  %13413 = vmatprep.mubr.bf16.mxu1 %v19337_v20  ;;  %v2084_v9 = vld [vmem:[#allocation8 + $0x2800] sm:$0xff]  ;;  %v17691_v15 = vcombine.high %v1828_v5, %v1836_v7  ;;  %v17690_v25 = vcombine.low %v1828_v5, %v1836_v7 }
 0x15b   :  { %v17946_v26 = vcombine.low %v2084_v9, %v2092_v10  ;;  %v2300_v47 = vld [vmem:[#allocation8 + $0x2ec0] sm:$0xff] }
 0x15c   :  { %13343 = vmatpush1.bf16.msra.mxu0 %v17786_v27  ;;  %13384 = vmatpush1.bf16.msra.mxu1 %v18042_v21  ;;  %v17947_v27 = vcombine.high %v2084_v9, %v2092_v10  ;;  %v2068_v21 = vld [vmem:[#allocation8 + $0x2780] sm:$0xff] }
 0x15d   :  { %13344 = vmatprep.subr.bf16.mxu0 %v17771_v22  ;;  %13385 = vmatprep.subr.bf16.mxu1 %v18027_v23  ;;  %v2076_v22 = vld [vmem:[#allocation8 + $0x27c0] sm:$0xff] }
 0x15e   :  { %v2324_v23 = vld [vmem:[#allocation8 + $0x2f80] sm:$0xff]  ;;  %v17931_v33 = vcombine.high %v2068_v21, %v2076_v22  ;;  %v17930_v30 = vcombine.low %v2068_v21, %v2076_v22 }
 0x15f   :  { %v18186_v41 = vcombine.low %v2324_v23, %v2332_v24  ;;  %v2284_v52 = vld [vmem:[#allocation8 + $0x2e40] sm:$0xff] }
 0x160   :  { %13345 = vmatpush1.bf16.msra.mxu0 %v17770_v34  ;;  %13386 = vmatpush1.bf16.msra.mxu1 %v18026_v36  ;;  %v18187_v34 = vcombine.high %v2324_v23, %v2332_v24  ;;  %v2052_v36 = vld [vmem:[#allocation8 + $0x2700] sm:$0xff] }
 0x161   :  { %13346 = vmatprep.subr.bf16.mxu0 %v17755_v37  ;;  %13387 = vmatprep.subr.bf16.mxu1 %v18011_v39  ;;  %v2060_v37 = vld [vmem:[#allocation8 + $0x2740] sm:$0xff] }
 0x162   :  { %v2308_v39 = vld [vmem:[#allocation8 + $0x2f00] sm:$0xff]  ;;  %v17915_v42 = vcombine.high %v2052_v36, %v2060_v37  ;;  %v17914_v48 = vcombine.low %v2052_v36, %v2060_v37  ;;  %v163_v37 = vrot.slane %v19317_v16, %v19259_v29 }
 0x163   :  { %v18170_v49 = vcombine.low %v2308_v39, %v2316_v40  ;;  %v2268_v5 = vld [vmem:[#allocation8 + $0x2dc0] sm:$0xff] }
 0x164   :  { %13347 = vmatpush1.bf16.msra.mxu0 %v17754_v43  ;;  %13388 = vmatpush1.bf16.msra.mxu1 %v18010_v44  ;;  %v18171_v43 = vcombine.high %v2308_v39, %v2316_v40  ;;  %v2036_v44 = vld [vmem:[#allocation8 + $0x2680] sm:$0xff]  ;;  %v19345_v39 = vpop.f32.mrf.mxu0  ;;  %v19347_v40 = vpop.f32.mrf.mxu1 }
 0x165   :  { %13348 = vmatprep.subr.bf16.mxu0 %v17739_v45  ;;  %13389 = vmatprep.subr.bf16.mxu1 %v17995_v46  ;;  %v2044_v45 = vld [vmem:[#allocation8 + $0x26c0] sm:$0xff] }
 0x166   :  { %v2292_v46 = vld [vmem:[#allocation8 + $0x2e80] sm:$0xff]  ;;  %v17899_v50 = vcombine.high %v2036_v44, %v2044_v45  ;;  %v17898_v56 = vcombine.low %v2036_v44, %v2044_v45 }
 0x167   :  { %v18154_v57 = vcombine.low %v2292_v46, %v2300_v47  ;;  %v2252_v21 = vld [vmem:[#allocation8 + $0x2d40] sm:$0xff] }
 0x168   :  { %13349 = vmatpush1.bf16.msra.mxu0 %v17738_v53  ;;  %13390 = vmatpush1.bf16.msra.mxu1 %v17994_v51  ;;  %v18155_v53 = vcombine.high %v2292_v46, %v2300_v47  ;;  %v2020_v51 = vld [vmem:[#allocation8 + $0x2600] sm:$0xff] }
 0x169   :  { %13350 = vmatprep.subr.bf16.mxu0 %v17723_v54  ;;  %13391 = vmatprep.subr.bf16.mxu1 %v17979_v55  ;;  %v2028_v54 = vld [vmem:[#allocation8 + $0x2640] sm:$0xff] }
 0x16a   :  { %v2276_v55 = vld [vmem:[#allocation8 + $0x2e00] sm:$0xff]  ;;  %v17883_v58 = vcombine.high %v2020_v51, %v2028_v54  ;;  %v17882_v7 = vcombine.low %v2020_v51, %v2028_v54  ;;  %v698_v51 = vpop.f32.mrf.mxu0  ;;  %v769_v54 = vpop.f32.mrf.mxu1 }
 0x16b   :  { %v18138_v9 = vcombine.low %v2276_v55, %v2284_v52  ;;  %v2236_v36 = vld [vmem:[#allocation8 + $0x2cc0] sm:$0xff] }
 0x16c   :  { %13351 = vmatpush1.bf16.msra.mxu0 %v17722_v60  ;;  %13392 = vmatpush1.bf16.msra.mxu1 %v17978_v61  ;;  %v18139_v60 = vcombine.high %v2276_v55, %v2284_v52  ;;  %v2004_v61 = vld [vmem:[#allocation8 + $0x2580] sm:$0xff] }
 0x16d   :  { %13352 = vmatprep.subr.bf16.mxu0 %v17707_v0  ;;  %13393 = vmatprep.subr.bf16.mxu1 %v17963_v4  ;;  %v2012_v0 = vld [vmem:[#allocation8 + $0x25c0] sm:$0xff] }
 0x16e   :  { %v2260_v4 = vld [vmem:[#allocation8 + $0x2d80] sm:$0xff]  ;;  %v17867_v10 = vcombine.high %v2004_v61, %v2012_v0  ;;  %v17866_v22 = vcombine.low %v2004_v61, %v2012_v0 }
 0x16f   :  { %v18122_v23 = vcombine.low %v2260_v4, %v2268_v5  ;;  %v1956_v45 = vld [vmem:[#allocation8 + $0x2400] sm:$0xff] }
 0x170   :  { %13353 = vmatpush1.bf16.msra.mxu0 %v17706_v11  ;;  %13394 = vmatpush1.bf16.msra.mxu1 %v17962_v12  ;;  %v18123_v11 = vcombine.high %v2260_v4, %v2268_v5  ;;  %v1988_v12 = vld [vmem:[#allocation8 + $0x2500] sm:$0xff] }
 0x171   :  { %13354 = vmatprep.subr.bf16.mxu0 %v17691_v15  ;;  %13395 = vmatprep.subr.bf16.mxu1 %v17947_v27  ;;  %v1996_v15 = vld [vmem:[#allocation8 + $0x2540] sm:$0xff] }
 0x172   :  { %v2244_v27 = vld [vmem:[#allocation8 + $0x2d00] sm:$0xff]  ;;  %v17851_v24 = vcombine.high %v1988_v12, %v1996_v15 }
 0x173   :  { %v1964_v46 = vld [vmem:[#allocation8 + $0x2440] sm:$0xff] }
 0x174   :  { %13355 = vmatpush1.bf16.msra.mxu0 %v17690_v25  ;;  %13396 = vmatpush1.bf16.msra.mxu1 %v17946_v26  ;;  %v18107_v25 = vcombine.high %v2244_v27, %v2252_v21  ;;  %v1972_v26 = vld [vmem:[#allocation8 + $0x2480] sm:$0xff] }
 0x175   :  { %13356 = vmatprep.subr.bf16.mxu0 %v17931_v33  ;;  %13397 = vmatprep.subr.bf16.mxu1 %v18187_v34  ;;  %v1980_v33 = vld [vmem:[#allocation8 + $0x24c0] sm:$0xff] }
 0x176   :  { %v2228_v34 = vld [vmem:[#allocation8 + $0x2c80] sm:$0xff]  ;;  %v17834_v55 = vcombine.low %v1972_v26, %v1980_v33 }
 0x177   :  { %v18091_v44 = vcombine.high %v2228_v34, %v2236_v36  ;;  %v2212_v47 = vld [vmem:[#allocation8 + $0x2c00] sm:$0xff]  ;;  %v18090_v52 = vcombine.low %v2228_v34, %v2236_v36 }
 0x178   :  { %13357 = vmatpush2.bf16.msra.mxu0 %v17930_v30  ;;  %13398 = vmatpush2.bf16.msra.mxu1 %v18186_v41  ;;  %v17850_v30 = vcombine.low %v1988_v12, %v1996_v15  ;;  %v18106_v41 = vcombine.low %v2244_v27, %v2252_v21  ;;  %v2460_v61 = vld [vmem:[#allocation8 + $0x33c0] sm:$0xff] }
 0x179   :  { %13358 = vmatprep.subr.bf16.mxu0 %v17915_v42  ;;  %13399 = vmatprep.subr.bf16.mxu1 %v18171_v43  ;;  %v155_v42 = vrot.slane %v19317_v16, %v19256_v28  ;;  %v17835_v43 = vcombine.high %v1972_v26, %v1980_v33  ;;  %v2708_v0 = vld [vmem:[#allocation8 + $0x3b80] sm:$0xff] }
 0x17a   :  { %v2716_v4 = vld [vmem:[#allocation8 + $0x3bc0] sm:$0xff] }
 0x17b   :  { %v2436_v15 = vld [vmem:[#allocation8 + $0x3300] sm:$0xff]  ;;  %v18570_v33 = vcombine.low %v2708_v0, %v2716_v4 }
 0x17c   :  { %13359 = vmatpush2.bf16.msra.mxu0 %v17914_v48  ;;  %13400 = vmatpush2.bf16.msra.mxu1 %v18170_v49  ;;  %v2220_v48 = vld [vmem:[#allocation8 + $0x2c40] sm:$0xff]  ;;  %v175_v49 = vrot.slane %v19317_v16, %v19274_v35 }
 0x17d   :  { %13360 = vmatprep.subr.bf16.mxu0 %v17899_v50  ;;  %13401 = vmatprep.subr.bf16.mxu1 %v18155_v53  ;;  %v183_v50 = vrot.slane %v19317_v16, %v19281_v38  ;;  %v626_v53 = vadd.f32 %v19321_v18, %v163_v37  ;;  %v17818_v18 = vcombine.low %v1956_v45, %v1964_v46 }
 0x17e   :  { %v699_v5 = vadd.f32 %v698_v51, %v175_v49  ;;  %v2660_v51 = vld [vmem:[#allocation8 + $0x3a00] sm:$0xff] }
 0x180   :  { %13361 = vmatpush2.bf16.msra.mxu0 %v17898_v56  ;;  %13402 = vmatpush2.bf16.msra.mxu1 %v18154_v57  ;;  %v555_v56 = vadd.f32 %v19319_v17, %v155_v42  ;;  %v17819_v57 = vcombine.high %v1956_v45, %v1964_v46  ;;  %v18571_v17 = vcombine.high %v2708_v0, %v2716_v4  ;;  %v785_v27 = vmax.f32 %v699_v5, 0.0  ;;  %v2684_v45 = vld [vmem:[#allocation8 + $0x3ac0] sm:$0xff] }
 0x181   :  { %13362 = vmatprep.subr.bf16.mxu0 %v17883_v58  ;;  %13403 = vmatprep.subr.bf16.mxu1 %v18139_v60  ;;  %v18075_v58 = vcombine.high %v2212_v47, %v2220_v48  ;;  %v2452_v60 = vld [vmem:[#allocation8 + $0x3380] sm:$0xff] }
 0x182   :  { %v18315_v12 = vcombine.high %v2452_v60, %v2460_v61  ;;  %v18314_v26 = vcombine.low %v2452_v60, %v2460_v61  ;;  %v2396_v60 = vld [vmem:[#allocation8 + $0x31c0] sm:$0xff] }
 0x183   :  { %v2644_v61 = vld [vmem:[#allocation8 + $0x3980] sm:$0xff] }
 0x184   :  { %13363 = vmatpush2.bf16.msra.mxu0 %v17882_v7  ;;  %13404 = vmatpush2.bf16.msra.mxu1 %v18138_v9  ;;  %v770_v7 = vadd.f32 %v769_v54, %v183_v50  ;;  %v782_v9 = vmax.f32 %v626_v53, 0.0  ;;  %v2404_v50 = vld [vmem:[#allocation8 + $0x3200] sm:$0xff] }
 0x185   :  { %13364 = vmatprep.subr.bf16.mxu0 %v17867_v10  ;;  %13405 = vmatprep.subr.bf16.mxu1 %v18123_v11  ;;  %v18074_v10 = vcombine.low %v2212_v47, %v2220_v48  ;;  %v780_v11 = vmax.f32 %v555_v56, 0.0  ;;  %v2412_v53 = vld [vmem:[#allocation8 + $0x3240] sm:$0xff] }
 0x186   :  { %v787_v21 = vmax.f32 %v770_v7, 0.0  ;;  %v2668_v54 = vld [vmem:[#allocation8 + $0x3a40] sm:$0xff]  ;;  %v18267_v56 = vcombine.high %v2404_v50, %v2412_v53  ;;  %v18266_v4 = vcombine.low %v2404_v50, %v2412_v53 }
 0x187   :  { %v19359_v34 = vpack.c.bf16 %v780_v11, %v780_v11  ;;  %v2652_v0 = vld [vmem:[#allocation8 + $0x39c0] sm:$0xff]  ;;  %v18522_v5 = vcombine.low %v2660_v51, %v2668_v54 }
 0x188   :  { %13365 = vmatpush2.bf16.msra.mxu0 %v17866_v22  ;;  %13406 = vmatpush2.bf16.msra.mxu1 %v18122_v23  ;;  %v2444_v22 = vld [vmem:[#allocation8 + $0x3340] sm:$0xff]  ;;  %v19363_v42 = vpack.c.bf16 %v787_v21, %v787_v21 }
 0x189   :  { %13366 = vmatprep.subr.bf16.mxu0 %v17851_v24  ;;  %13407 = vmatprep.subr.bf16.mxu1 %v18107_v25  ;;  %v2692_v23 = vld [vmem:[#allocation8 + $0x3b00] sm:$0xff]  ;;  %v19357_v25 = vpack.c.bf16 %v782_v9, %v782_v9  ;;  %v18299_v36 = vcombine.high %v2436_v15, %v2444_v22  ;;  %v18298_v46 = vcombine.low %v2436_v15, %v2444_v22 }
 0x18a   :  { %v2700_v24 = vld [vmem:[#allocation8 + $0x3b40] sm:$0xff]  ;;  %v18507_v9 = vcombine.high %v2644_v61, %v2652_v0  ;;  %v18506_v15 = vcombine.low %v2644_v61, %v2652_v0 }
 0x18b   :  { %v18555_v37 = vcombine.high %v2692_v23, %v2700_v24  ;;  %v18554_v47 = vcombine.low %v2692_v23, %v2700_v24  ;;  %v2628_v11 = vld [vmem:[#allocation8 + $0x3900] sm:$0xff] }
 0x18c   :  { %13367 = vmatpush2.bf16.msra.mxu0 %v17850_v30  ;;  %13408 = vmatpush2.bf16.msra.mxu1 %v18106_v41  ;;  %v2420_v30 = vld [vmem:[#allocation8 + $0x3280] sm:$0xff]  ;;  %v19361_v41 = vpack.c.bf16 %v785_v27, %v785_v27 }
 0x18d   :  { %13368 = vmatprep.subr.bf16.mxu0 %v17835_v43  ;;  %13409 = vmatprep.subr.bf16.mxu1 %v18091_v44  ;;  %v2428_v43 = vld [vmem:[#allocation8 + $0x32c0] sm:$0xff] }
 0x18e   :  { %v2676_v44 = vld [vmem:[#allocation8 + $0x3a80] sm:$0xff]  ;;  %v18283_v48 = vcombine.high %v2420_v30, %v2428_v43 }
 0x18f   :  { %v18539_v49 = vcombine.high %v2676_v44, %v2684_v45  ;;  %v2356_v22 = vld [vmem:[#allocation8 + $0x3080] sm:$0xff] }
 0x190   :  { %13369 = vmatpush2.bf16.msra.mxu0 %v17834_v55  ;;  %13410 = vmatpush2.bf16.msra.mxu1 %v18090_v52  ;;  %v18282_v55 = vcombine.low %v2420_v30, %v2428_v43  ;;  %v18538_v52 = vcombine.low %v2676_v44, %v2684_v45  ;;  %v2364_v23 = vld [vmem:[#allocation8 + $0x30c0] sm:$0xff] }
 0x191   :  { %13370 = vmatprep.subr.bf16.mxu0 %v17819_v57  ;;  %13411 = vmatprep.subr.bf16.mxu1 %v18075_v58  ;;  %v18523_v57 = vcombine.high %v2660_v51, %v2668_v54  ;;  %v2388_v58 = vld [vmem:[#allocation8 + $0x3180] sm:$0xff] }
 0x192   :  { %v18251_v7 = vcombine.high %v2388_v58, %v2396_v60  ;;  %v2612_v24 = vld [vmem:[#allocation8 + $0x3880] sm:$0xff] }
 0x193   :  { %v2340_v43 = vld [vmem:[#allocation8 + $0x3000] sm:$0xff] }
 0x194   :  { %13371 = vmatpush2.bf16.msra.mxu0 %v17818_v18  ;;  %13412 = vmatpush2.bf16.msra.mxu1 %v18074_v10  ;;  %v2372_v18 = vld [vmem:[#allocation8 + $0x3100] sm:$0xff] }
 0x195   :  { %13422 = vmatprep.subr.bf16.mxu0 %v18315_v12  ;;  %13463 = vmatprep.subr.bf16.mxu1 %v18571_v17  ;;  %v2380_v10 = vld [vmem:[#allocation8 + $0x3140] sm:$0xff]  ;;  %v18250_v17 = vcombine.low %v2388_v58, %v2396_v60 }
 0x196   :  { %v2636_v12 = vld [vmem:[#allocation8 + $0x3940] sm:$0xff]  ;;  %v18235_v27 = vcombine.high %v2372_v18, %v2380_v10 }
 0x197   :  { %13373 = vmatmul.mubr.bf16.vlgmr.msra.gmra.mxu0 %v19359_v34  ;;  %13414 = vmatmul.mubr.bf16.vlgmr.msra.gmra.mxu1 %v19357_v25  ;;  %v18491_v21 = vcombine.high %v2628_v11, %v2636_v12  ;;  %v2348_v44 = vld [vmem:[#allocation8 + $0x3040] sm:$0xff] }
 0x198   :  { %13423 = vmatpush1.bf16.msra.mxu0 %v18314_v26  ;;  %13464 = vmatpush1.bf16.msra.mxu1 %v18570_v33  ;;  %v2620_v26 = vld [vmem:[#allocation8 + $0x38c0] sm:$0xff]  ;;  %v18234_v33 = vcombine.low %v2372_v18, %v2380_v10 }
 0x199   :  { %13424 = vmatprep.subr.bf16.mxu0 %v18299_v36  ;;  %13465 = vmatprep.subr.bf16.mxu1 %v18555_v37  ;;  %v18490_v36 = vcombine.low %v2628_v11, %v2636_v12  ;;  %v18219_v37 = vcombine.high %v2356_v22, %v2364_v23  ;;  %v18475_v30 = vcombine.high %v2612_v24, %v2620_v26  ;;  %v2596_v45 = vld [vmem:[#allocation8 + $0x3800] sm:$0xff] }
 0x19a   :  { %13454 = vmatprep.mubr.bf16.mxu0 %v19361_v41  ;;  %13495 = vmatprep.mubr.bf16.mxu1 %v19363_v42  ;;  %v2580_v53 = vld [vmem:[#allocation8 + $0x3780] sm:$0xff] }
 0x19b   :  { %v2588_v51 = vld [vmem:[#allocation8 + $0x37c0] sm:$0xff] }
 0x19c   :  { %13425 = vmatpush1.bf16.msra.mxu0 %v18298_v46  ;;  %13466 = vmatpush1.bf16.msra.mxu1 %v18554_v47  ;;  %v2604_v46 = vld [vmem:[#allocation8 + $0x3840] sm:$0xff]  ;;  %v18218_v47 = vcombine.low %v2356_v22, %v2364_v23 }
 0x19d   :  { %13426 = vmatprep.subr.bf16.mxu0 %v18283_v48  ;;  %13467 = vmatprep.subr.bf16.mxu1 %v18539_v49  ;;  %v18474_v48 = vcombine.low %v2612_v24, %v2620_v26  ;;  %v18203_v49 = vcombine.high %v2340_v43, %v2348_v44  ;;  %v18459_v50 = vcombine.high %v2596_v45, %v2604_v46  ;;  %v2836_v54 = vld [vmem:[#allocation8 + $0x3f80] sm:$0xff] }
 0x19e   :  { %v2564_v60 = vld [vmem:[#allocation8 + $0x3700] sm:$0xff] }
 0x19f   :  { %v2572_v61 = vld [vmem:[#allocation8 + $0x3740] sm:$0xff] }
 0x1a0   :  { %13427 = vmatpush1.bf16.msra.mxu0 %v18282_v55  ;;  %13468 = vmatpush1.bf16.msra.mxu1 %v18538_v52  ;;  %v2844_v55 = vld [vmem:[#allocation8 + $0x3fc0] sm:$0xff]  ;;  %v18202_v52 = vcombine.low %v2340_v43, %v2348_v44 }
 0x1a1   :  { %13428 = vmatprep.subr.bf16.mxu0 %v18267_v56  ;;  %13469 = vmatprep.subr.bf16.mxu1 %v18523_v57  ;;  %v18458_v56 = vcombine.low %v2596_v45, %v2604_v46  ;;  %v18443_v57 = vcombine.high %v2580_v53, %v2588_v51  ;;  %v18699_v58 = vcombine.high %v2836_v54, %v2844_v55  ;;  %v2820_v0 = vld [vmem:[#allocation8 + $0x3f00] sm:$0xff] }
 0x1a2   :  { %v2548_v10 = vld [vmem:[#allocation8 + $0x3680] sm:$0xff] }
 0x1a3   :  { %v2556_v11 = vld [vmem:[#allocation8 + $0x36c0] sm:$0xff] }
 0x1a4   :  { %13429 = vmatpush1.bf16.msra.mxu0 %v18266_v4  ;;  %13470 = vmatpush1.bf16.msra.mxu1 %v18522_v5  ;;  %v2828_v4 = vld [vmem:[#allocation8 + $0x3f40] sm:$0xff]  ;;  %v18442_v5 = vcombine.low %v2580_v53, %v2588_v51 }
 0x1a5   :  { %13430 = vmatprep.subr.bf16.mxu0 %v18251_v7  ;;  %13471 = vmatprep.subr.bf16.mxu1 %v18507_v9  ;;  %v18698_v7 = vcombine.low %v2836_v54, %v2844_v55  ;;  %v18427_v9 = vcombine.high %v2564_v60, %v2572_v61  ;;  %v18683_v18 = vcombine.high %v2820_v0, %v2828_v4  ;;  %v2804_v12 = vld [vmem:[#allocation8 + $0x3e80] sm:$0xff] }
 0x1a6   :  { %v2532_v23 = vld [vmem:[#allocation8 + $0x3600] sm:$0xff] }
 0x1a7   :  { %v2540_v24 = vld [vmem:[#allocation8 + $0x3640] sm:$0xff] }
 0x1a8   :  { %13431 = vmatpush1.bf16.msra.mxu0 %v18250_v17  ;;  %13472 = vmatpush1.bf16.msra.mxu1 %v18506_v15  ;;  %v2812_v17 = vld [vmem:[#allocation8 + $0x3ec0] sm:$0xff]  ;;  %v18426_v15 = vcombine.low %v2564_v60, %v2572_v61 }
 0x1a9   :  { %13432 = vmatprep.subr.bf16.mxu0 %v18235_v27  ;;  %13473 = vmatprep.subr.bf16.mxu1 %v18491_v21  ;;  %v18682_v27 = vcombine.low %v2820_v0, %v2828_v4  ;;  %v18411_v21 = vcombine.high %v2548_v10, %v2556_v11  ;;  %v18667_v22 = vcombine.high %v2804_v12, %v2812_v17  ;;  %v2788_v26 = vld [vmem:[#allocation8 + $0x3e00] sm:$0xff] }
 0x1aa   :  { %v2516_v44 = vld [vmem:[#allocation8 + $0x3580] sm:$0xff] }
 0x1ab   :  { %v2524_v45 = vld [vmem:[#allocation8 + $0x35c0] sm:$0xff] }
 0x1ac   :  { %13433 = vmatpush1.bf16.msra.mxu0 %v18234_v33  ;;  %13474 = vmatpush1.bf16.msra.mxu1 %v18490_v36  ;;  %v2796_v33 = vld [vmem:[#allocation8 + $0x3e40] sm:$0xff]  ;;  %v18410_v36 = vcombine.low %v2548_v10, %v2556_v11  ;;  %v179_v10 = vrot.slane %v19317_v16, %v19310_v3 }
 0x1ad   :  { %13434 = vmatprep.subr.bf16.mxu0 %v18219_v37  ;;  %13475 = vmatprep.subr.bf16.mxu1 %v18475_v30  ;;  %v18666_v37 = vcombine.low %v2804_v12, %v2812_v17  ;;  %v18395_v30 = vcombine.high %v2532_v23, %v2540_v24  ;;  %v18651_v43 = vcombine.high %v2788_v26, %v2796_v33  ;;  %v2772_v46 = vld [vmem:[#allocation8 + $0x3d80] sm:$0xff] }
 0x1ae   :  { %v2500_v51 = vld [vmem:[#allocation8 + $0x3500] sm:$0xff] }
 0x1af   :  { %v2508_v54 = vld [vmem:[#allocation8 + $0x3540] sm:$0xff] }
 0x1b0   :  { %13435 = vmatpush1.bf16.msra.mxu0 %v18218_v47  ;;  %13476 = vmatpush1.bf16.msra.mxu1 %v18474_v48  ;;  %v2780_v47 = vld [vmem:[#allocation8 + $0x3dc0] sm:$0xff]  ;;  %v18394_v48 = vcombine.low %v2532_v23, %v2540_v24 }
 0x1b1   :  { %13436 = vmatprep.subr.bf16.mxu0 %v18203_v49  ;;  %13477 = vmatprep.subr.bf16.mxu1 %v18459_v50  ;;  %v18650_v49 = vcombine.low %v2788_v26, %v2796_v33  ;;  %v18379_v50 = vcombine.high %v2516_v44, %v2524_v45  ;;  %v18635_v53 = vcombine.high %v2772_v46, %v2780_v47  ;;  %v2756_v55 = vld [vmem:[#allocation8 + $0x3d00] sm:$0xff] }
 0x1b2   :  { %v2484_v61 = vld [vmem:[#allocation8 + $0x3480] sm:$0xff]  ;;  %v768_v26 = vadd.f32 %v19347_v40, %v179_v10  ;;  %v901_v40 = vld [vmem:[#allocation8 + $0x308] sm:$0xff] }
 0x1b3   :  { %v2492_v0 = vld [vmem:[#allocation8 + $0x34c0] sm:$0xff] }
 0x1b4   :  { %13437 = vmatpush1.bf16.msra.mxu0 %v18202_v52  ;;  %13478 = vmatpush1.bf16.msra.mxu1 %v18458_v56  ;;  %v2764_v52 = vld [vmem:[#allocation8 + $0x3d40] sm:$0xff]  ;;  %v18378_v56 = vcombine.low %v2516_v44, %v2524_v45  ;;  %v18347_v11 = vcombine.high %v2484_v61, %v2492_v0  ;;  %v18346_v23 = vcombine.low %v2484_v61, %v2492_v0  ;;  %v885_v0 = vld [vmem:[#allocation8 + $0x288] sm:$0xff] }
 0x1b5   :  { %13438 = vmatprep.subr.bf16.mxu0 %v18443_v57  ;;  %13479 = vmatprep.subr.bf16.mxu1 %v18699_v58  ;;  %v18634_v57 = vcombine.low %v2772_v46, %v2780_v47  ;;  %v18363_v58 = vcombine.high %v2500_v51, %v2508_v54  ;;  %v18619_v60 = vcombine.high %v2756_v55, %v2764_v52  ;;  %v2740_v4 = vld [vmem:[#allocation8 + $0x3c80] sm:$0xff] }
 0x1b6   :  { %v2468_v17 = vld [vmem:[#allocation8 + $0x3400] sm:$0xff] }
 0x1b8   :  { %13439 = vmatpush2.bf16.msra.mxu0 %v18442_v5  ;;  %13480 = vmatpush2.bf16.msra.mxu1 %v18698_v7  ;;  %v2748_v5 = vld [vmem:[#allocation8 + $0x3cc0] sm:$0xff]  ;;  %v171_v7 = vrot.slane %v19317_v16, %v19313_v8 }
 0x1b9   :  { %13440 = vmatprep.subr.bf16.mxu0 %v18427_v9  ;;  %13481 = vmatprep.subr.bf16.mxu1 %v18683_v18  ;;  %v18362_v9 = vcombine.low %v2500_v51, %v2508_v54  ;;  %v18618_v18 = vcombine.low %v2756_v55, %v2764_v52  ;;  %v18603_v12 = vcombine.high %v2740_v4, %v2748_v5  ;;  %v1165_v51 = vld [vmem:[#allocation8 + $0xb48] sm:$0xff] }
 0x1ba   :  { %v18602_v24 = vcombine.low %v2740_v4, %v2748_v5  ;;  %v893_v4 = vld [vmem:[#allocation8 + $0x2c8] sm:$0xff] }
 0x1bc   :  { %13441 = vmatpush2.bf16.msra.mxu0 %v18426_v15  ;;  %13482 = vmatpush2.bf16.msra.mxu1 %v18682_v27  ;;  %v2476_v15 = vld [vmem:[#allocation8 + $0x3440] sm:$0xff] }
 0x1bd   :  { %13442 = vmatprep.subr.bf16.mxu0 %v18411_v21  ;;  %13483 = vmatprep.subr.bf16.mxu1 %v18667_v22  ;;  %v2724_v27 = vld [vmem:[#allocation8 + $0x3c00] sm:$0xff]  ;;  %v697_v22 = vadd.f32 %v19345_v39, %v171_v7  ;;  %v18331_v33 = vcombine.high %v2468_v17, %v2476_v15  ;;  %v18330_v44 = vcombine.low %v2468_v17, %v2476_v15  ;;  %v786_v39 = vmax.f32 %v768_v26, 0.0  ;;  %v877_v26 = vld [vmem:[#allocation8 + $0x248] sm:$0xff] }
 0x1be   :  { %v2732_v21 = vld [vmem:[#allocation8 + $0x3c40] sm:$0xff] }
 0x1bf   :  { %v18587_v16 = vcombine.high %v2724_v27, %v2732_v21  ;;  %v18586_v45 = vcombine.low %v2724_v27, %v2732_v21  ;;  %v784_v46 = vmax.f32 %v697_v22, 0.0  ;;  %v16749_v27 = vcombine.high %v885_v0, %v893_v4 }
 0x1c0   :  { %13443 = vmatpush2.bf16.msra.mxu0 %v18410_v36  ;;  %13484 = vmatpush2.bf16.msra.mxu1 %v18666_v37  ;;  %v917_v36 = vld [vmem:[#allocation8 + $0x388] sm:$0xff] }
 0x1c1   :  { %13444 = vmatprep.subr.bf16.mxu0 %v18395_v30  ;;  %13485 = vmatprep.subr.bf16.mxu1 %v18651_v43  ;;  %v925_v37 = vld [vmem:[#allocation8 + $0x3c8] sm:$0xff]  ;;  %v19376_v52 = vpack.c.bf16 %v784_v46, %v784_v46 }
 0x1c2   :  { %v1173_v30 = vld [vmem:[#allocation8 + $0xb88] sm:$0xff]  ;;  %v16781_v47 = vcombine.high %v917_v36, %v925_v37  ;;  %v16780_v54 = vcombine.low %v917_v36, %v925_v37 }
 0x1c3   :  { %v1181_v43 = vld [vmem:[#allocation8 + $0xbc8] sm:$0xff] }
 0x1c4   :  { %13445 = vmatpush2.bf16.msra.mxu0 %v18394_v48  ;;  %13486 = vmatpush2.bf16.msra.mxu1 %v18650_v49  ;;  %v17037_v48 = vcombine.high %v1173_v30, %v1181_v43  ;;  %v2852_v49 = vld [vmem:[#allocation10] sm:$0xff]  ;;  %v1125_v36 = vld [vmem:[#allocation8 + $0xa08] sm:$0xff] }
 0x1c5   :  { %13446 = vmatprep.subr.bf16.mxu0 %v18379_v50  ;;  %13487 = vmatprep.subr.bf16.mxu1 %v18635_v53  ;;  %v909_v50 = vld [vmem:[#allocation8 + $0x348] sm:$0xff]  ;;  %v2859_v55 = vrot.slane %v2852_v49, %v19256_v28 }
 0x1c6   :  { %v1157_v53 = vld [vmem:[#allocation8 + $0xb08] sm:$0xff] }
 0x1c7   :  { %v17021_v61 = vcombine.high %v1157_v53, %v1165_v51  ;;  %v17020_v15 = vcombine.low %v1157_v53, %v1165_v51  ;;  %v1133_v37 = vld [vmem:[#allocation8 + $0xa48] sm:$0xff] }
 0x1c8   :  { %13447 = vmatpush2.bf16.msra.mxu0 %v18378_v56  ;;  %13488 = vmatpush2.bf16.msra.mxu1 %v18634_v57  ;;  %v19378_v56 = vpack.c.bf16 %v786_v39, %v786_v39  ;;  %v17036_v57 = vcombine.low %v1173_v30, %v1181_v43  ;;  %v16748_v43 = vcombine.low %v885_v0, %v893_v4 }
 0x1c9   :  { %13448 = vmatprep.subr.bf16.mxu0 %v18363_v58  ;;  %13489 = vmatprep.subr.bf16.mxu1 %v18619_v60  ;;  %v2863_v58 = vrot.slane %v2852_v49, %v19264_v31  ;;  %v16765_v60 = vcombine.high %v901_v40, %v909_v50  ;;  %v861_v49 = vld [vmem:[#allocation8 + $0x1c8] sm:$0xff]  ;;  %v16988_v51 = vcombine.low %v1125_v36, %v1133_v37 }
 0x1cc   :  { %13449 = vmatpush2.bf16.msra.mxu0 %v18362_v9  ;;  %13490 = vmatpush2.bf16.msra.mxu1 %v18618_v18  ;;  %v1141_v9 = vld [vmem:[#allocation8 + $0xa88] sm:$0xff] }
 0x1cd   :  { %13450 = vmatprep.subr.bf16.mxu0 %v18347_v11  ;;  %13491 = vmatprep.subr.bf16.mxu1 %v18603_v12  ;;  %v1149_v18 = vld [vmem:[#allocation8 + $0xac8] sm:$0xff]  ;;  %v16764_v11 = vcombine.low %v901_v40, %v909_v50 }
 0x1ce   :  { %v17004_v46 = vcombine.low %v1141_v9, %v1149_v18  ;;  %v1109_v40 = vld [vmem:[#allocation8 + $0x988] sm:$0xff] }
 0x1cf   :  { %v1117_v50 = vld [vmem:[#allocation8 + $0x9c8] sm:$0xff] }
 0x1d0   :  { %13451 = vmatpush2.bf16.msra.mxu0 %v18346_v23  ;;  %13492 = vmatpush2.bf16.msra.mxu1 %v18602_v24  ;;  %v17005_v23 = vcombine.high %v1141_v9, %v1149_v18  ;;  %v869_v24 = vld [vmem:[#allocation8 + $0x208] sm:$0xff]  ;;  %v16972_v4 = vcombine.low %v1109_v40, %v1117_v50 }
 0x1d1   :  { %13452 = vmatprep.subr.bf16.mxu0 %v18331_v33  ;;  %13493 = vmatprep.subr.bf16.mxu1 %v18587_v16  ;;  %v16733_v39 = vcombine.high %v869_v24, %v877_v26  ;;  %v16732_v53 = vcombine.low %v869_v24, %v877_v26  ;;  %v821_v9 = vld [vmem:[#allocation8 + $0x88] sm:$0xff] }
 0x1d2   :  { %v829_v18 = vld [vmem:[#allocation8 + $0xc8] sm:$0xff] }
 0x1d3   :  { %v1061_v24 = vld [vmem:[#allocation8 + $0x808] sm:$0xff] }
 0x1d4   :  { %13453 = vmatpush2.bf16.msra.mxu0 %v18330_v44  ;;  %13494 = vmatpush2.bf16.msra.mxu1 %v18586_v45  ;;  %v1069_v26 = vld [vmem:[#allocation8 + $0x848] sm:$0xff] }
 0x1d5   :  { %13504 = vmatprep.subr.bf16.mxu0 %v16781_v47  ;;  %13545 = vmatprep.subr.bf16.mxu1 %v17037_v48  ;;  %v16989_v47 = vcombine.high %v1125_v36, %v1133_v37  ;;  %v853_v48 = vld [vmem:[#allocation8 + $0x188] sm:$0xff]  ;;  %v16925_v37 = vcombine.high %v1061_v24, %v1069_v26 }
 0x1d6   :  { %v16716_v0 = vcombine.low %v853_v48, %v861_v49 }
 0x1d7   :  { %13455 = vmatmul.mubr.bf16.vlgmr.msra.gmra.mxu0 %v19376_v52  ;;  %13496 = vmatmul.mubr.bf16.vlgmr.msra.gmra.mxu1 %v19378_v56  ;;  %v13210_v5 = vpop.f32.mrf.mxu0  ;;  %v13251_v7 = vpop.f32.mrf.mxu1 }
 0x1d8   :  { %v13211_v10 = vadd.f32 %v13210_v5, %v2859_v55  ;;  %13505 = vmatpush1.bf16.msra.mxu0 %v16780_v54  ;;  %13536 = vmatprep.mubr.bf16.mxu0 %v19293_v62  ;;  %v16717_v54 = vcombine.high %v853_v48, %v861_v49  ;;  %v16973_v55 = vcombine.high %v1109_v40, %v1117_v50  ;;  %v1029_v40 = vld [vmem:[#allocation8 + $0x708] sm:$0xff] }
 0x1d9   :  { %13546 = vmatpush1.bf16.msra.mxu1 %v17036_v57  ;;  %13577 = vmatprep.mubr.bf16.mxu1 %v19295_v63  ;;  %v13212_v12 = vpop.f32.mrf.mxu0  ;;  %v13253_v17 = vpop.f32.mrf.mxu1  ;;  %v837_v57 = vld [vmem:[#allocation8 + $0x108] sm:$0xff] }
 0x1da   :  { %v19385_v21 = vadd.f32 %v13251_v7, %v13211_v10  ;;  %v13213_v22 = vadd.f32 %v13212_v12, %v2863_v58  ;;  %13506 = vmatprep.subr.bf16.mxu0 %v16765_v60  ;;  %13547 = vmatprep.subr.bf16.mxu1 %v17021_v61  ;;  %v845_v58 = vld [vmem:[#allocation8 + $0x148] sm:$0xff] }
 0x1db   :  { %v13214_v33 = vpop.f32.mrf.mxu0  ;;  %v13255_v16 = vpop.f32.mrf.mxu1  ;;  %v1093_v60 = vld [vmem:[#allocation8 + $0x908] sm:$0xff]  ;;  %v16701_v5 = vcombine.high %v837_v57, %v845_v58  ;;  %v16700_v12 = vcombine.low %v837_v57, %v845_v58 }
 0x1dc   :  { %v19387_v30 = vadd.f32 %v13253_v17, %v13213_v22  ;;  %13507 = vmatpush1.bf16.msra.mxu0 %v16764_v11  ;;  %v1101_v61 = vld [vmem:[#allocation8 + $0x948] sm:$0xff]  ;;  %v16684_v33 = vcombine.low %v821_v9, %v829_v18 }
 0x1dd   :  { %13548 = vmatpush1.bf16.msra.mxu1 %v17020_v15  ;;  %v13215_v44 = vpop.f32.mrf.mxu0  ;;  %v13256_v45 = vpop.f32.mrf.mxu1  ;;  %13508 = vmatprep.subr.bf16.mxu0 %v16749_v27  ;;  %v16957_v7 = vcombine.high %v1093_v60, %v1101_v61  ;;  %v1077_v10 = vld [vmem:[#allocation8 + $0x888] sm:$0xff]  ;;  %v16956_v17 = vcombine.low %v1093_v60, %v1101_v61  ;;  %v16685_v15 = vcombine.high %v821_v9, %v829_v18 }
 0x1de   :  { %13549 = vmatprep.subr.bf16.mxu1 %v17005_v23  ;;  %v1085_v11 = vld [vmem:[#allocation8 + $0x8c8] sm:$0xff] }
 0x1df   :  { %v16941_v27 = vcombine.high %v1077_v10, %v1085_v11  ;;  %v805_v22 = vld [vmem:[#allocation8 + $0x8] sm:$0xff]  ;;  %v16940_v16 = vcombine.low %v1077_v10, %v1085_v11 }
 0x1e0   :  { %13509 = vmatpush1.bf16.msra.mxu0 %v16748_v43  ;;  %v813_v23 = vld [vmem:[#allocation8 + $0x48] sm:$0xff] }
 0x1e1   :  { %13550 = vmatpush1.bf16.msra.mxu1 %v17004_v46  ;;  %13510 = vmatprep.subr.bf16.mxu0 %v16733_v39  ;;  %v16669_v36 = vcombine.high %v805_v22, %v813_v23  ;;  %v1045_v43 = vld [vmem:[#allocation8 + $0x788] sm:$0xff]  ;;  %v16668_v39 = vcombine.low %v805_v22, %v813_v23 }
 0x1e2   :  { %13551 = vmatprep.subr.bf16.mxu1 %v16989_v47  ;;  %v1053_v44 = vld [vmem:[#allocation8 + $0x7c8] sm:$0xff]  ;;  %v16924_v47 = vcombine.low %v1061_v24, %v1069_v26 }
 0x1e3   :  { %v1301_v45 = vld [vmem:[#allocation8 + $0xf88] sm:$0xff]  ;;  %v16909_v48 = vcombine.high %v1045_v43, %v1053_v44 }
 0x1e4   :  { %13511 = vmatpush1.bf16.msra.mxu0 %v16732_v53  ;;  %v1309_v46 = vld [vmem:[#allocation8 + $0xfc8] sm:$0xff] }
 0x1e5   :  { %13552 = vmatpush1.bf16.msra.mxu1 %v16988_v51  ;;  %13512 = vmatprep.subr.bf16.mxu0 %v16717_v54  ;;  %v17165_v49 = vcombine.high %v1301_v45, %v1309_v46  ;;  %v1037_v50 = vld [vmem:[#allocation8 + $0x748] sm:$0xff]  ;;  %v16908_v54 = vcombine.low %v1045_v43, %v1053_v44 }
 0x1e6   :  { %13553 = vmatprep.subr.bf16.mxu1 %v16973_v55  ;;  %v1285_v53 = vld [vmem:[#allocation8 + $0xf08] sm:$0xff]  ;;  %v17164_v55 = vcombine.low %v1301_v45, %v1309_v46  ;;  %v16893_v57 = vcombine.high %v1029_v40, %v1037_v50 }
 0x1e7   :  { %v1293_v51 = vld [vmem:[#allocation8 + $0xf48] sm:$0xff] }
 0x1e8   :  { %13513 = vmatpush1.bf16.msra.mxu0 %v16716_v0  ;;  %v17149_v58 = vcombine.high %v1285_v53, %v1293_v51  ;;  %v1013_v60 = vld [vmem:[#allocation8 + $0x688] sm:$0xff] }
 0x1e9   :  { %13554 = vmatpush1.bf16.msra.mxu1 %v16972_v4  ;;  %13514 = vmatprep.subr.bf16.mxu0 %v16701_v5  ;;  %v1021_v61 = vld [vmem:[#allocation8 + $0x6c8] sm:$0xff]  ;;  %v16892_v5 = vcombine.low %v1029_v40, %v1037_v50 }
 0x1ea   :  { %13555 = vmatprep.subr.bf16.mxu1 %v16957_v7  ;;  %v1269_v0 = vld [vmem:[#allocation8 + $0xe88] sm:$0xff]  ;;  %v17148_v7 = vcombine.low %v1285_v53, %v1293_v51  ;;  %v16877_v9 = vcombine.high %v1013_v60, %v1021_v61 }
 0x1eb   :  { %v1277_v4 = vld [vmem:[#allocation8 + $0xec8] sm:$0xff] }
 0x1ec   :  { %13515 = vmatpush1.bf16.msra.mxu0 %v16700_v12  ;;  %v17133_v18 = vcombine.high %v1269_v0, %v1277_v4  ;;  %v997_v10 = vld [vmem:[#allocation8 + $0x608] sm:$0xff] }
 0x1ed   :  { %13556 = vmatpush1.bf16.msra.mxu1 %v16956_v17  ;;  %13516 = vmatprep.subr.bf16.mxu0 %v16685_v15  ;;  %v1005_v11 = vld [vmem:[#allocation8 + $0x648] sm:$0xff]  ;;  %v16876_v15 = vcombine.low %v1013_v60, %v1021_v61 }
 0x1ee   :  { %13557 = vmatprep.subr.bf16.mxu1 %v16941_v27  ;;  %v1253_v12 = vld [vmem:[#allocation8 + $0xe08] sm:$0xff]  ;;  %v17132_v27 = vcombine.low %v1269_v0, %v1277_v4  ;;  %v16861_v22 = vcombine.high %v997_v10, %v1005_v11 }
 0x1ef   :  { %v1261_v17 = vld [vmem:[#allocation8 + $0xe48] sm:$0xff] }
 0x1f0   :  { %13517 = vmatpush1.bf16.msra.mxu0 %v16684_v33  ;;  %v17117_v23 = vcombine.high %v1253_v12, %v1261_v17  ;;  %v981_v24 = vld [vmem:[#allocation8 + $0x588] sm:$0xff] }
 0x1f1   :  { %13558 = vmatpush1.bf16.msra.mxu1 %v16940_v16  ;;  %13518 = vmatprep.subr.bf16.mxu0 %v16669_v36  ;;  %v989_v26 = vld [vmem:[#allocation8 + $0x5c8] sm:$0xff]  ;;  %v16860_v36 = vcombine.low %v997_v10, %v1005_v11 }
 0x1f2   :  { %13559 = vmatprep.subr.bf16.mxu1 %v16925_v37  ;;  %v1237_v33 = vld [vmem:[#allocation8 + $0xd88] sm:$0xff]  ;;  %v17116_v37 = vcombine.low %v1253_v12, %v1261_v17  ;;  %v16845_v43 = vcombine.high %v981_v24, %v989_v26 }
 0x1f3   :  { %v1245_v16 = vld [vmem:[#allocation8 + $0xdc8] sm:$0xff] }
 0x1f4   :  { %13519 = vmatpush1.bf16.msra.mxu0 %v16668_v39  ;;  %v17101_v44 = vcombine.high %v1237_v33, %v1245_v16  ;;  %v965_v45 = vld [vmem:[#allocation8 + $0x508] sm:$0xff] }
 0x1f5   :  { %13560 = vmatpush1.bf16.msra.mxu1 %v16924_v47  ;;  %13520 = vmatprep.subr.bf16.mxu0 %v16909_v48  ;;  %v973_v46 = vld [vmem:[#allocation8 + $0x548] sm:$0xff]  ;;  %v16844_v48 = vcombine.low %v981_v24, %v989_v26 }
 0x1f6   :  { %13561 = vmatprep.subr.bf16.mxu1 %v17165_v49  ;;  %v1221_v39 = vld [vmem:[#allocation8 + $0xd08] sm:$0xff]  ;;  %v17100_v49 = vcombine.low %v1237_v33, %v1245_v16  ;;  %v16829_v40 = vcombine.high %v965_v45, %v973_v46 }
 0x1f7   :  { %v1229_v47 = vld [vmem:[#allocation8 + $0xd48] sm:$0xff] }
 0x1f8   :  { %13521 = vmatpush2.bf16.msra.mxu0 %v16908_v54  ;;  %v17085_v50 = vcombine.high %v1221_v39, %v1229_v47  ;;  %v949_v53 = vld [vmem:[#allocation8 + $0x488] sm:$0xff] }
 0x1f9   :  { %13562 = vmatpush2.bf16.msra.mxu1 %v17164_v55  ;;  %13522 = vmatprep.subr.bf16.mxu0 %v16893_v57  ;;  %v957_v51 = vld [vmem:[#allocation8 + $0x4c8] sm:$0xff]  ;;  %v16828_v57 = vcombine.low %v965_v45, %v973_v46 }
 0x1fa   :  { %13563 = vmatprep.subr.bf16.mxu1 %v17149_v58  ;;  %v1205_v54 = vld [vmem:[#allocation8 + $0xc88] sm:$0xff]  ;;  %v17084_v58 = vcombine.low %v1221_v39, %v1229_v47  ;;  %v16813_v60 = vcombine.high %v949_v53, %v957_v51 }
 0x1fb   :  { %v1213_v55 = vld [vmem:[#allocation8 + $0xcc8] sm:$0xff] }
 0x1fc   :  { %13523 = vmatpush2.bf16.msra.mxu0 %v16892_v5  ;;  %v17069_v61 = vcombine.high %v1205_v54, %v1213_v55  ;;  %v933_v0 = vld [vmem:[#allocation8 + $0x408] sm:$0xff] }
 0x1fd   :  { %13564 = vmatpush2.bf16.msra.mxu1 %v17148_v7  ;;  %13524 = vmatprep.subr.bf16.mxu0 %v16877_v9  ;;  %v941_v4 = vld [vmem:[#allocation8 + $0x448] sm:$0xff]  ;;  %v16812_v9 = vcombine.low %v949_v53, %v957_v51 }
 0x1fe   :  { %13565 = vmatprep.subr.bf16.mxu1 %v17133_v18  ;;  %v1189_v5 = vld [vmem:[#allocation8 + $0xc08] sm:$0xff]  ;;  %v17068_v18 = vcombine.low %v1205_v54, %v1213_v55  ;;  %v16797_v10 = vcombine.high %v933_v0, %v941_v4 }
 0x1ff   :  { %v1197_v7 = vld [vmem:[#allocation8 + $0xc48] sm:$0xff] }
 0x200   :  { %13525 = vmatpush2.bf16.msra.mxu0 %v16876_v15  ;;  %v17053_v11 = vcombine.high %v1189_v5, %v1197_v7  ;;  %v1429_v12 = vld [vmem:[#allocation8 + $0x1388] sm:$0xff] }
 0x201   :  { %13566 = vmatpush2.bf16.msra.mxu1 %v17132_v27  ;;  %13526 = vmatprep.subr.bf16.mxu0 %v16861_v22  ;;  %v1437_v17 = vld [vmem:[#allocation8 + $0x13c8] sm:$0xff]  ;;  %v16796_v22 = vcombine.low %v933_v0, %v941_v4 }
 0x202   :  { %13567 = vmatprep.subr.bf16.mxu1 %v17117_v23  ;;  %v1685_v15 = vld [vmem:[#allocation8 + $0x1b88] sm:$0xff]  ;;  %v17052_v23 = vcombine.low %v1189_v5, %v1197_v7  ;;  %v17293_v24 = vcombine.high %v1429_v12, %v1437_v17 }
 0x203   :  { %v1693_v27 = vld [vmem:[#allocation8 + $0x1bc8] sm:$0xff] }
 0x204   :  { %13527 = vmatpush2.bf16.msra.mxu0 %v16860_v36  ;;  %v17549_v26 = vcombine.high %v1685_v15, %v1693_v27  ;;  %v1413_v33 = vld [vmem:[#allocation8 + $0x1308] sm:$0xff]  ;;  %v17292_v36 = vcombine.low %v1429_v12, %v1437_v17 }
 0x205   :  { %13568 = vmatpush2.bf16.msra.mxu1 %v17116_v37  ;;  %13528 = vmatprep.subr.bf16.mxu0 %v16845_v43  ;;  %v1421_v16 = vld [vmem:[#allocation8 + $0x1348] sm:$0xff] }
 0x206   :  { %13569 = vmatprep.subr.bf16.mxu1 %v17101_v44  ;;  %v1669_v37 = vld [vmem:[#allocation8 + $0x1b08] sm:$0xff]  ;;  %v17548_v44 = vcombine.low %v1685_v15, %v1693_v27  ;;  %v17277_v45 = vcombine.high %v1413_v33, %v1421_v16  ;;  %v17276_v51 = vcombine.low %v1413_v33, %v1421_v16 }
 0x207   :  { %v1677_v43 = vld [vmem:[#allocation8 + $0x1b48] sm:$0xff] }
 0x208   :  { %13529 = vmatpush2.bf16.msra.mxu0 %v16844_v48  ;;  %v1397_v46 = vld [vmem:[#allocation8 + $0x1288] sm:$0xff] }
 0x209   :  { %13570 = vmatpush2.bf16.msra.mxu1 %v17100_v49  ;;  %13530 = vmatprep.subr.bf16.mxu0 %v16829_v40  ;;  %v1405_v39 = vld [vmem:[#allocation8 + $0x12c8] sm:$0xff]  ;;  %v17533_v49 = vcombine.high %v1669_v37, %v1677_v43 }
 0x20a   :  { %13571 = vmatprep.subr.bf16.mxu1 %v17085_v50  ;;  %v1653_v40 = vld [vmem:[#allocation8 + $0x1a88] sm:$0xff] }
 0x20b   :  { %v1661_v50 = vld [vmem:[#allocation8 + $0x1ac8] sm:$0xff] }
 0x20c   :  { %13531 = vmatpush2.bf16.msra.mxu0 %v16828_v57  ;;  %v17532_v57 = vcombine.low %v1669_v37, %v1677_v43  ;;  %v17517_v0 = vcombine.high %v1653_v40, %v1661_v50  ;;  %v1389_v4 = vld [vmem:[#allocation8 + $0x1248] sm:$0xff]  ;;  %v17516_v15 = vcombine.low %v1653_v40, %v1661_v50 }
 0x20d   :  { %13572 = vmatpush2.bf16.msra.mxu1 %v17084_v58  ;;  %13532 = vmatprep.subr.bf16.mxu0 %v16813_v60  ;;  %v17261_v58 = vcombine.high %v1397_v46, %v1405_v39  ;;  %v1349_v43 = vld [vmem:[#allocation8 + $0x1108] sm:$0xff] }
 0x20e   :  { %13573 = vmatprep.subr.bf16.mxu1 %v17069_v61  ;;  %v1333_v40 = vld [vmem:[#allocation8 + $0x1088] sm:$0xff] }
 0x20f   :  { %v1341_v50 = vld [vmem:[#allocation8 + $0x10c8] sm:$0xff] }
 0x210   :  { %13533 = vmatpush2.bf16.msra.mxu0 %v16812_v9  ;;  %v1637_v9 = vld [vmem:[#allocation8 + $0x1a08] sm:$0xff] }
 0x211   :  { %13574 = vmatpush2.bf16.msra.mxu1 %v17068_v18  ;;  %13534 = vmatprep.subr.bf16.mxu0 %v16797_v10  ;;  %v1645_v18 = vld [vmem:[#allocation8 + $0x1a48] sm:$0xff] }
 0x212   :  { %13575 = vmatprep.subr.bf16.mxu1 %v17053_v11  ;;  %v17260_v11 = vcombine.low %v1397_v46, %v1405_v39  ;;  %v17500_v16 = vcombine.low %v1637_v9, %v1645_v18  ;;  %v1613_v46 = vld [vmem:[#allocation8 + $0x1948] sm:$0xff] }
 0x214   :  { %13535 = vmatpush2.bf16.msra.mxu0 %v16796_v22  ;;  %v1365_v22 = vld [vmem:[#allocation8 + $0x1188] sm:$0xff] }
 0x215   :  { %13576 = vmatpush2.bf16.msra.mxu1 %v17052_v23  ;;  %13586 = vmatprep.subr.bf16.mxu0 %v17293_v24  ;;  %v1373_v23 = vld [vmem:[#allocation8 + $0x11c8] sm:$0xff] }
 0x216   :  { %13627 = vmatprep.subr.bf16.mxu1 %v17549_v26  ;;  %v1621_v24 = vld [vmem:[#allocation8 + $0x1988] sm:$0xff]  ;;  %v17228_v39 = vcombine.low %v1365_v22, %v1373_v23 }
 0x217   :  { %v13292_v47 = vpop.f32.mrf.mxu0  ;;  %v13333_v48 = vpop.f32.mrf.mxu1  ;;  %13537 = vmatmul.mubr.bf16.vlgmr.msra.gmra.mxu0 %v19297_v2  ;;  %v1629_v26 = vld [vmem:[#allocation8 + $0x19c8] sm:$0xff] }
 0x218   :  { %v13293_v53 = vadd.f32 %v13292_v47, %v19385_v21  ;;  %13578 = vmatmul.mubr.bf16.vlgmr.msra.gmra.mxu1 %v19291_v59  ;;  %13587 = vmatpush1.bf16.msra.mxu0 %v17292_v36  ;;  %v1381_v21 = vld [vmem:[#allocation8 + $0x1208] sm:$0xff]  ;;  %v17229_v36 = vcombine.high %v1365_v22, %v1373_v23  ;;  %v17485_v37 = vcombine.high %v1621_v24, %v1629_v26 }
 0x219   :  { %13618 = vmatprep.mubr.bf16.mxu0 %v19303_v13  ;;  %13628 = vmatpush1.bf16.msra.mxu1 %v17548_v44  ;;  %v13294_v54 = vpop.f32.mrf.mxu0  ;;  %v13335_v55 = vpop.f32.mrf.mxu1  ;;  %v17245_v27 = vcombine.high %v1381_v21, %v1389_v4  ;;  %v17244_v33 = vcombine.low %v1381_v21, %v1389_v4  ;;  %v1357_v44 = vld [vmem:[#allocation8 + $0x1148] sm:$0xff]  ;;  %v17484_v47 = vcombine.low %v1621_v24, %v1629_v26 }
 0x21a   :  { %v19393_v60 = vadd.f32 %v13333_v48, %v13293_v53  ;;  %13659 = vmatprep.mubr.bf16.mxu1 %v19305_v14  ;;  %v13295_v61 = vadd.f32 %v13294_v54, %v19387_v30  ;;  %13588 = vmatprep.subr.bf16.mxu0 %v17277_v45  ;;  %v17501_v30 = vcombine.high %v1637_v9, %v1645_v18  ;;  %v1605_v45 = vld [vmem:[#allocation8 + $0x1908] sm:$0xff] }
 0x21b   :  { %v13296_v5 = vpop.f32.mrf.mxu0  ;;  %v13337_v7 = vpop.f32.mrf.mxu1  ;;  %13629 = vmatprep.subr.bf16.mxu1 %v17533_v49  ;;  %v17213_v48 = vcombine.high %v1349_v43, %v1357_v44  ;;  %v17469_v49 = vcombine.high %v1605_v45, %v1613_v46  ;;  %v1589_v53 = vld [vmem:[#allocation8 + $0x1888] sm:$0xff]  ;;  %v17212_v54 = vcombine.low %v1349_v43, %v1357_v44 }
 0x21c   :  { %v19397_v10 = vadd.f32 %v13335_v55, %v13295_v61  ;;  %13589 = vmatpush1.bf16.msra.mxu0 %v17276_v51  ;;  %v1597_v51 = vld [vmem:[#allocation8 + $0x18c8] sm:$0xff]  ;;  %v17468_v55 = vcombine.low %v1605_v45, %v1613_v46  ;;  %v17196_v5 = vcombine.low %v1333_v40, %v1341_v50 }
 0x21d   :  { %13630 = vmatpush1.bf16.msra.mxu1 %v17532_v57  ;;  %v13297_v12 = vpop.f32.mrf.mxu0  ;;  %v13338_v17 = vpop.f32.mrf.mxu1  ;;  %13590 = vmatprep.subr.bf16.mxu0 %v17261_v58  ;;  %v17197_v57 = vcombine.high %v1333_v40, %v1341_v50  ;;  %v17453_v58 = vcombine.high %v1589_v53, %v1597_v51  ;;  %v1317_v61 = vld [vmem:[#allocation8 + $0x1008] sm:$0xff]  ;;  %v17452_v7 = vcombine.low %v1589_v53, %v1597_v51 }
 0x21e   :  { %13631 = vmatprep.subr.bf16.mxu1 %v17517_v0  ;;  %v1325_v0 = vld [vmem:[#allocation8 + $0x1048] sm:$0xff] }
 0x21f   :  { %v1573_v21 = vld [vmem:[#allocation8 + $0x1808] sm:$0xff]  ;;  %v17181_v9 = vcombine.high %v1317_v61, %v1325_v0 }
 0x220   :  { %13591 = vmatpush1.bf16.msra.mxu0 %v17260_v11  ;;  %v1581_v4 = vld [vmem:[#allocation8 + $0x1848] sm:$0xff] }
 0x221   :  { %13632 = vmatpush1.bf16.msra.mxu1 %v17516_v15  ;;  %13592 = vmatprep.subr.bf16.mxu0 %v17245_v27  ;;  %v17437_v18 = vcombine.high %v1573_v21, %v1581_v4  ;;  %v1557_v11 = vld [vmem:[#allocation8 + $0x1788] sm:$0xff]  ;;  %v17180_v27 = vcombine.low %v1317_v61, %v1325_v0 }
 0x222   :  { %13633 = vmatprep.subr.bf16.mxu1 %v17501_v30  ;;  %v1565_v12 = vld [vmem:[#allocation8 + $0x17c8] sm:$0xff]  ;;  %v17436_v30 = vcombine.low %v1573_v21, %v1581_v4 }
 0x223   :  { %v1813_v17 = vld [vmem:[#allocation8 + $0x1f88] sm:$0xff]  ;;  %v17421_v22 = vcombine.high %v1557_v11, %v1565_v12 }
 0x224   :  { %13593 = vmatpush1.bf16.msra.mxu0 %v17244_v33  ;;  %v1821_v15 = vld [vmem:[#allocation8 + $0x1fc8] sm:$0xff] }
 0x225   :  { %13634 = vmatpush1.bf16.msra.mxu1 %v17500_v16  ;;  %13594 = vmatprep.subr.bf16.mxu0 %v17229_v36  ;;  %v17677_v23 = vcombine.high %v1813_v17, %v1821_v15  ;;  %v1541_v24 = vld [vmem:[#allocation8 + $0x1708] sm:$0xff]  ;;  %v17420_v36 = vcombine.low %v1557_v11, %v1565_v12 }
 0x226   :  { %13635 = vmatprep.subr.bf16.mxu1 %v17485_v37  ;;  %v1549_v26 = vld [vmem:[#allocation8 + $0x1748] sm:$0xff]  ;;  %v17676_v37 = vcombine.low %v1813_v17, %v1821_v15 }
 0x227   :  { %v1797_v33 = vld [vmem:[#allocation8 + $0x1f08] sm:$0xff]  ;;  %v17405_v43 = vcombine.high %v1541_v24, %v1549_v26 }
 0x228   :  { %13595 = vmatpush1.bf16.msra.mxu0 %v17228_v39  ;;  %v1805_v16 = vld [vmem:[#allocation8 + $0x1f48] sm:$0xff] }
 0x229   :  { %13636 = vmatpush1.bf16.msra.mxu1 %v17484_v47  ;;  %13596 = vmatprep.subr.bf16.mxu0 %v17213_v48  ;;  %v17661_v44 = vcombine.high %v1797_v33, %v1805_v16  ;;  %v1525_v45 = vld [vmem:[#allocation8 + $0x1688] sm:$0xff]  ;;  %v17404_v48 = vcombine.low %v1541_v24, %v1549_v26 }
 0x22a   :  { %13637 = vmatprep.subr.bf16.mxu1 %v17469_v49  ;;  %v1533_v46 = vld [vmem:[#allocation8 + $0x16c8] sm:$0xff]  ;;  %v17660_v49 = vcombine.low %v1797_v33, %v1805_v16 }
 0x22b   :  { %v1781_v39 = vld [vmem:[#allocation8 + $0x1e88] sm:$0xff]  ;;  %v17389_v40 = vcombine.high %v1525_v45, %v1533_v46 }
 0x22c   :  { %13597 = vmatpush1.bf16.msra.mxu0 %v17212_v54  ;;  %v1789_v47 = vld [vmem:[#allocation8 + $0x1ec8] sm:$0xff] }
 0x22d   :  { %13638 = vmatpush1.bf16.msra.mxu1 %v17468_v55  ;;  %13598 = vmatprep.subr.bf16.mxu0 %v17197_v57  ;;  %v17645_v50 = vcombine.high %v1781_v39, %v1789_v47  ;;  %v1509_v53 = vld [vmem:[#allocation8 + $0x1608] sm:$0xff]  ;;  %v17388_v57 = vcombine.low %v1525_v45, %v1533_v46 }
 0x22e   :  { %13639 = vmatprep.subr.bf16.mxu1 %v17453_v58  ;;  %v1517_v51 = vld [vmem:[#allocation8 + $0x1648] sm:$0xff]  ;;  %v17644_v58 = vcombine.low %v1781_v39, %v1789_v47 }
 0x22f   :  { %v1765_v54 = vld [vmem:[#allocation8 + $0x1e08] sm:$0xff]  ;;  %v17373_v61 = vcombine.high %v1509_v53, %v1517_v51 }
 0x230   :  { %13599 = vmatpush1.bf16.msra.mxu0 %v17196_v5  ;;  %v1773_v55 = vld [vmem:[#allocation8 + $0x1e48] sm:$0xff] }
 0x231   :  { %13640 = vmatpush1.bf16.msra.mxu1 %v17452_v7  ;;  %13600 = vmatprep.subr.bf16.mxu0 %v17181_v9  ;;  %v17629_v0 = vcombine.high %v1765_v54, %v1773_v55  ;;  %v1493_v21 = vld [vmem:[#allocation8 + $0x1588] sm:$0xff]  ;;  %v17372_v9 = vcombine.low %v1509_v53, %v1517_v51 }
 0x232   :  { %13641 = vmatprep.subr.bf16.mxu1 %v17437_v18  ;;  %v1501_v4 = vld [vmem:[#allocation8 + $0x15c8] sm:$0xff]  ;;  %v17628_v18 = vcombine.low %v1765_v54, %v1773_v55 }
 0x233   :  { %v1749_v5 = vld [vmem:[#allocation8 + $0x1d88] sm:$0xff]  ;;  %v17357_v11 = vcombine.high %v1493_v21, %v1501_v4 }
 0x234   :  { %13601 = vmatpush1.bf16.msra.mxu0 %v17180_v27  ;;  %v1757_v7 = vld [vmem:[#allocation8 + $0x1dc8] sm:$0xff] }
 0x235   :  { %13642 = vmatpush1.bf16.msra.mxu1 %v17436_v30  ;;  %13602 = vmatprep.subr.bf16.mxu0 %v17421_v22  ;;  %v17613_v12 = vcombine.high %v1749_v5, %v1757_v7  ;;  %v1477_v17 = vld [vmem:[#allocation8 + $0x1508] sm:$0xff]  ;;  %v17356_v22 = vcombine.low %v1493_v21, %v1501_v4 }
 0x236   :  { %13643 = vmatprep.subr.bf16.mxu1 %v17677_v23  ;;  %v1485_v15 = vld [vmem:[#allocation8 + $0x1548] sm:$0xff]  ;;  %v17612_v23 = vcombine.low %v1749_v5, %v1757_v7 }
 0x237   :  { %v1733_v27 = vld [vmem:[#allocation8 + $0x1d08] sm:$0xff]  ;;  %v17341_v24 = vcombine.high %v1477_v17, %v1485_v15 }
 0x238   :  { %13603 = vmatpush2.bf16.msra.mxu0 %v17420_v36  ;;  %v1741_v30 = vld [vmem:[#allocation8 + $0x1d48] sm:$0xff] }
 0x239   :  { %13644 = vmatpush2.bf16.msra.mxu1 %v17676_v37  ;;  %13604 = vmatprep.subr.bf16.mxu0 %v17405_v43  ;;  %v17597_v26 = vcombine.high %v1733_v27, %v1741_v30  ;;  %v1461_v33 = vld [vmem:[#allocation8 + $0x1488] sm:$0xff]  ;;  %v17340_v43 = vcombine.low %v1477_v17, %v1485_v15 }
 0x23a   :  { %13645 = vmatprep.subr.bf16.mxu1 %v17661_v44  ;;  %v1469_v16 = vld [vmem:[#allocation8 + $0x14c8] sm:$0xff]  ;;  %v17596_v44 = vcombine.low %v1733_v27, %v1741_v30 }
 0x23b   :  { %v1717_v36 = vld [vmem:[#allocation8 + $0x1c88] sm:$0xff]  ;;  %v17325_v45 = vcombine.high %v1461_v33, %v1469_v16 }
 0x23c   :  { %13605 = vmatpush2.bf16.msra.mxu0 %v17404_v48  ;;  %v1725_v37 = vld [vmem:[#allocation8 + $0x1cc8] sm:$0xff] }
 0x23d   :  { %13646 = vmatpush2.bf16.msra.mxu1 %v17660_v49  ;;  %13606 = vmatprep.subr.bf16.mxu0 %v17389_v40  ;;  %v17581_v46 = vcombine.high %v1717_v36, %v1725_v37  ;;  %v1445_v39 = vld [vmem:[#allocation8 + $0x1408] sm:$0xff]  ;;  %v17324_v40 = vcombine.low %v1461_v33, %v1469_v16 }
 0x23e   :  { %13647 = vmatprep.subr.bf16.mxu1 %v17645_v50  ;;  %v1453_v47 = vld [vmem:[#allocation8 + $0x1448] sm:$0xff]  ;;  %v17580_v50 = vcombine.low %v1717_v36, %v1725_v37 }
 0x23f   :  { %v1701_v48 = vld [vmem:[#allocation8 + $0x1c08] sm:$0xff]  ;;  %v17309_v53 = vcombine.high %v1445_v39, %v1453_v47 }
 0x240   :  { %13607 = vmatpush2.bf16.msra.mxu0 %v17388_v57  ;;  %v1709_v49 = vld [vmem:[#allocation8 + $0x1c48] sm:$0xff] }
 0x241   :  { %13648 = vmatpush2.bf16.msra.mxu1 %v17644_v58  ;;  %13608 = vmatprep.subr.bf16.mxu0 %v17373_v61  ;;  %v17565_v51 = vcombine.high %v1701_v48, %v1709_v49  ;;  %v1941_v54 = vld [vmem:[#allocation8 + $0x2388] sm:$0xff]  ;;  %v17308_v61 = vcombine.low %v1445_v39, %v1453_v47 }
 0x242   :  { %13649 = vmatprep.subr.bf16.mxu1 %v17629_v0  ;;  %v1949_v55 = vld [vmem:[#allocation8 + $0x23c8] sm:$0xff]  ;;  %v17564_v0 = vcombine.low %v1701_v48, %v1709_v49 }
 0x243   :  { %v2197_v57 = vld [vmem:[#allocation8 + $0x2b88] sm:$0xff]  ;;  %v17805_v21 = vcombine.high %v1941_v54, %v1949_v55 }
 0x244   :  { %13609 = vmatpush2.bf16.msra.mxu0 %v17372_v9  ;;  %v2205_v58 = vld [vmem:[#allocation8 + $0x2bc8] sm:$0xff]  ;;  %v17804_v9 = vcombine.low %v1941_v54, %v1949_v55 }
 0x245   :  { %13650 = vmatpush2.bf16.msra.mxu1 %v17628_v18  ;;  %13610 = vmatprep.subr.bf16.mxu0 %v17357_v11  ;;  %v18061_v4 = vcombine.high %v2197_v57, %v2205_v58  ;;  %v1925_v5 = vld [vmem:[#allocation8 + $0x2308] sm:$0xff] }
 0x246   :  { %13651 = vmatprep.subr.bf16.mxu1 %v17613_v12  ;;  %v1933_v7 = vld [vmem:[#allocation8 + $0x2348] sm:$0xff]  ;;  %v18060_v12 = vcombine.low %v2197_v57, %v2205_v58 }
 0x247   :  { %v2181_v18 = vld [vmem:[#allocation8 + $0x2b08] sm:$0xff]  ;;  %v17789_v17 = vcombine.high %v1925_v5, %v1933_v7  ;;  %v17788_v16 = vcombine.low %v1925_v5, %v1933_v7 }
 0x248   :  { %13611 = vmatpush2.bf16.msra.mxu0 %v17356_v22  ;;  %v2189_v11 = vld [vmem:[#allocation8 + $0x2b48] sm:$0xff] }
 0x249   :  { %13652 = vmatpush2.bf16.msra.mxu1 %v17612_v23  ;;  %13612 = vmatprep.subr.bf16.mxu0 %v17341_v24  ;;  %v1909_v15 = vld [vmem:[#allocation8 + $0x2288] sm:$0xff]  ;;  %v18045_v23 = vcombine.high %v2181_v18, %v2189_v11 }
 0x24a   :  { %13653 = vmatprep.subr.bf16.mxu1 %v17597_v26  ;;  %v1917_v27 = vld [vmem:[#allocation8 + $0x22c8] sm:$0xff] }
 0x24b   :  { %v2165_v24 = vld [vmem:[#allocation8 + $0x2a88] sm:$0xff] }
 0x24c   :  { %13613 = vmatpush2.bf16.msra.mxu0 %v17340_v43  ;;  %v2173_v26 = vld [vmem:[#allocation8 + $0x2ac8] sm:$0xff]  ;;  %v18044_v43 = vcombine.low %v2181_v18, %v2189_v11 }
 0x24d   :  { %13654 = vmatpush2.bf16.msra.mxu1 %v17596_v44  ;;  %13614 = vmatprep.subr.bf16.mxu0 %v17325_v45  ;;  %v17773_v44 = vcombine.high %v1909_v15, %v1917_v27  ;;  %v18029_v39 = vcombine.high %v2165_v24, %v2173_v26  ;;  %v1901_v47 = vld [vmem:[#allocation8 + $0x2248] sm:$0xff]  ;;  %v18028_v57 = vcombine.low %v2165_v24, %v2173_v26 }
 0x24e   :  { %13655 = vmatprep.subr.bf16.mxu1 %v17581_v46  ;;  %v1861_v11 = vld [vmem:[#allocation8 + $0x2108] sm:$0xff] }
 0x24f   :  { %v1845_v24 = vld [vmem:[#allocation8 + $0x2088] sm:$0xff] }
 0x250   :  { %13615 = vmatpush2.bf16.msra.mxu0 %v17324_v40  ;;  %v2149_v40 = vld [vmem:[#allocation8 + $0x2a08] sm:$0xff] }
 0x251   :  { %13656 = vmatpush2.bf16.msra.mxu1 %v17580_v50  ;;  %13616 = vmatprep.subr.bf16.mxu0 %v17309_v53  ;;  %v2157_v50 = vld [vmem:[#allocation8 + $0x2a48] sm:$0xff] }
 0x252   :  { %13657 = vmatprep.subr.bf16.mxu1 %v17565_v51  ;;  %v17772_v51 = vcombine.low %v1909_v15, %v1917_v27  ;;  %v18012_v7 = vcombine.low %v2149_v40, %v2157_v50  ;;  %v2125_v15 = vld [vmem:[#allocation8 + $0x2948] sm:$0xff] }
 0x253   :  { %v1853_v26 = vld [vmem:[#allocation8 + $0x20c8] sm:$0xff] }
 0x254   :  { %13617 = vmatpush2.bf16.msra.mxu0 %v17308_v61  ;;  %v1877_v61 = vld [vmem:[#allocation8 + $0x2188] sm:$0xff] }
 0x255   :  { %13658 = vmatpush2.bf16.msra.mxu1 %v17564_v0  ;;  %13668 = vmatprep.subr.bf16.mxu0 %v17805_v21  ;;  %v1885_v0 = vld [vmem:[#allocation8 + $0x21c8] sm:$0xff] }
 0x256   :  { %13709 = vmatprep.subr.bf16.mxu1 %v18061_v4  ;;  %v2133_v21 = vld [vmem:[#allocation8 + $0x2988] sm:$0xff]  ;;  %v17740_v27 = vcombine.low %v1877_v61, %v1885_v0 }
 0x257   :  { %v13374_v30 = vpop.f32.mrf.mxu0  ;;  %v13415_v22 = vpop.f32.mrf.mxu1  ;;  %13619 = vmatmul.mubr.bf16.vlgmr.msra.gmra.mxu0 %v19333_v6  ;;  %v2141_v4 = vld [vmem:[#allocation8 + $0x29c8] sm:$0xff] }
 0x258   :  { %v13375_v33 = vadd.f32 %v13374_v30, %v19393_v60  ;;  %13660 = vmatmul.mubr.bf16.vlgmr.msra.gmra.mxu1 %v19331_v1  ;;  %13669 = vmatpush1.bf16.msra.mxu0 %v17804_v9  ;;  %v1893_v60 = vld [vmem:[#allocation8 + $0x2208] sm:$0xff]  ;;  %v17741_v9 = vcombine.high %v1877_v61, %v1885_v0  ;;  %v17997_v18 = vcombine.high %v2133_v21, %v2141_v4 }
 0x259   :  { %13700 = vmatprep.mubr.bf16.mxu0 %v19335_v19  ;;  %13710 = vmatpush1.bf16.msra.mxu1 %v18060_v12  ;;  %v13376_v36 = vpop.f32.mrf.mxu0  ;;  %v13417_v37 = vpop.f32.mrf.mxu1  ;;  %v17757_v58 = vcombine.high %v1893_v60, %v1901_v47  ;;  %v17756_v5 = vcombine.low %v1893_v60, %v1901_v47  ;;  %v1869_v12 = vld [vmem:[#allocation8 + $0x2148] sm:$0xff]  ;;  %v17996_v30 = vcombine.low %v2133_v21, %v2141_v4 }
 0x25a   :  { %v19403_v45 = vadd.f32 %v13415_v22, %v13375_v33  ;;  %13741 = vmatprep.mubr.bf16.mxu1 %v19337_v20  ;;  %v13377_v46 = vadd.f32 %v13376_v36, %v19397_v10  ;;  %13670 = vmatprep.subr.bf16.mxu0 %v17789_v17  ;;  %v18013_v10 = vcombine.high %v2149_v40, %v2157_v50  ;;  %v2117_v17 = vld [vmem:[#allocation8 + $0x2908] sm:$0xff] }
 0x25b   :  { %v13378_v48 = vpop.f32.mrf.mxu0  ;;  %v13419_v49 = vpop.f32.mrf.mxu1  ;;  %13711 = vmatprep.subr.bf16.mxu1 %v18045_v23  ;;  %v17725_v22 = vcombine.high %v1861_v11, %v1869_v12  ;;  %v17981_v23 = vcombine.high %v2117_v17, %v2125_v15  ;;  %v2101_v33 = vld [vmem:[#allocation8 + $0x2888] sm:$0xff]  ;;  %v17724_v36 = vcombine.low %v1861_v11, %v1869_v12 }
 0x25c   :  { %v19407_v53 = vadd.f32 %v13417_v37, %v13377_v46  ;;  %13671 = vmatpush1.bf16.msra.mxu0 %v17788_v16  ;;  %v2109_v16 = vld [vmem:[#allocation8 + $0x28c8] sm:$0xff]  ;;  %v17980_v37 = vcombine.low %v2117_v17, %v2125_v15  ;;  %v17708_v48 = vcombine.low %v1845_v24, %v1853_v26 }
 0x25d   :  { %13712 = vmatpush1.bf16.msra.mxu1 %v18044_v43  ;;  %v13379_v54 = vpop.f32.mrf.mxu0  ;;  %v13420_v55 = vpop.f32.mrf.mxu1  ;;  %13672 = vmatprep.subr.bf16.mxu0 %v17773_v44  ;;  %v17709_v43 = vcombine.high %v1845_v24, %v1853_v26  ;;  %v17965_v44 = vcombine.high %v2101_v33, %v2109_v16  ;;  %v1829_v46 = vld [vmem:[#allocation8 + $0x2008] sm:$0xff]  ;;  %v17964_v49 = vcombine.low %v2101_v33, %v2109_v16 }
 0x25e   :  { %13713 = vmatprep.subr.bf16.mxu1 %v18029_v39  ;;  %v1837_v39 = vld [vmem:[#allocation8 + $0x2048] sm:$0xff] }
 0x25f   :  { %v2085_v60 = vld [vmem:[#allocation8 + $0x2808] sm:$0xff]  ;;  %v17693_v40 = vcombine.high %v1829_v46, %v1837_v39 }
 0x260   :  { %13673 = vmatpush1.bf16.msra.mxu0 %v17772_v51  ;;  %v2093_v47 = vld [vmem:[#allocation8 + $0x2848] sm:$0xff] }
 0x261   :  { %13714 = vmatpush1.bf16.msra.mxu1 %v18028_v57  ;;  %13674 = vmatprep.subr.bf16.mxu0 %v17757_v58  ;;  %v17949_v50 = vcombine.high %v2085_v60, %v2093_v47  ;;  %v2069_v51 = vld [vmem:[#allocation8 + $0x2788] sm:$0xff]  ;;  %v17692_v58 = vcombine.low %v1829_v46, %v1837_v39 }
 0x262   :  { %13715 = vmatprep.subr.bf16.mxu1 %v18013_v10  ;;  %v2077_v54 = vld [vmem:[#allocation8 + $0x27c8] sm:$0xff]  ;;  %v17948_v10 = vcombine.low %v2085_v60, %v2093_v47 }
 0x263   :  { %v2325_v55 = vld [vmem:[#allocation8 + $0x2f88] sm:$0xff]  ;;  %v17933_v61 = vcombine.high %v2069_v51, %v2077_v54 }
 0x264   :  { %13675 = vmatpush1.bf16.msra.mxu0 %v17756_v5  ;;  %v2333_v57 = vld [vmem:[#allocation8 + $0x2fc8] sm:$0xff] }
 0x265   :  { %13716 = vmatpush1.bf16.msra.mxu1 %v18012_v7  ;;  %13676 = vmatprep.subr.bf16.mxu0 %v17741_v9  ;;  %v18189_v0 = vcombine.high %v2325_v55, %v2333_v57  ;;  %v2053_v21 = vld [vmem:[#allocation8 + $0x2708] sm:$0xff]  ;;  %v17932_v9 = vcombine.low %v2069_v51, %v2077_v54 }
 0x266   :  { %13717 = vmatprep.subr.bf16.mxu1 %v17997_v18  ;;  %v2061_v4 = vld [vmem:[#allocation8 + $0x2748] sm:$0xff]  ;;  %v18188_v18 = vcombine.low %v2325_v55, %v2333_v57 }
 0x267   :  { %v2309_v5 = vld [vmem:[#allocation8 + $0x2f08] sm:$0xff]  ;;  %v17917_v11 = vcombine.high %v2053_v21, %v2061_v4 }
 0x268   :  { %13677 = vmatpush1.bf16.msra.mxu0 %v17740_v27  ;;  %v2317_v7 = vld [vmem:[#allocation8 + $0x2f48] sm:$0xff] }
 0x269   :  { %13718 = vmatpush1.bf16.msra.mxu1 %v17996_v30  ;;  %13678 = vmatprep.subr.bf16.mxu0 %v17725_v22  ;;  %v18173_v12 = vcombine.high %v2309_v5, %v2317_v7  ;;  %v2037_v17 = vld [vmem:[#allocation8 + $0x2688] sm:$0xff]  ;;  %v17916_v22 = vcombine.low %v2053_v21, %v2061_v4 }
 0x26a   :  { %13719 = vmatprep.subr.bf16.mxu1 %v17981_v23  ;;  %v2045_v15 = vld [vmem:[#allocation8 + $0x26c8] sm:$0xff]  ;;  %v18172_v23 = vcombine.low %v2309_v5, %v2317_v7 }
 0x26b   :  { %v2293_v27 = vld [vmem:[#allocation8 + $0x2e88] sm:$0xff]  ;;  %v17901_v24 = vcombine.high %v2037_v17, %v2045_v15 }
 0x26c   :  { %13679 = vmatpush1.bf16.msra.mxu0 %v17724_v36  ;;  %v2301_v30 = vld [vmem:[#allocation8 + $0x2ec8] sm:$0xff] }
 0x26d   :  { %13720 = vmatpush1.bf16.msra.mxu1 %v17980_v37  ;;  %13680 = vmatprep.subr.bf16.mxu0 %v17709_v43  ;;  %v18157_v26 = vcombine.high %v2293_v27, %v2301_v30  ;;  %v2021_v33 = vld [vmem:[#allocation8 + $0x2608] sm:$0xff]  ;;  %v17900_v43 = vcombine.low %v2037_v17, %v2045_v15 }
 0x26e   :  { %13721 = vmatprep.subr.bf16.mxu1 %v17965_v44  ;;  %v2029_v16 = vld [vmem:[#allocation8 + $0x2648] sm:$0xff]  ;;  %v18156_v44 = vcombine.low %v2293_v27, %v2301_v30 }
 0x26f   :  { %v2277_v36 = vld [vmem:[#allocation8 + $0x2e08] sm:$0xff]  ;;  %v17885_v46 = vcombine.high %v2021_v33, %v2029_v16 }
 0x270   :  { %13681 = vmatpush1.bf16.msra.mxu0 %v17708_v48  ;;  %v2285_v37 = vld [vmem:[#allocation8 + $0x2e48] sm:$0xff] }
 0x271   :  { %13722 = vmatpush1.bf16.msra.mxu1 %v17964_v49  ;;  %13682 = vmatprep.subr.bf16.mxu0 %v17693_v40  ;;  %v18141_v39 = vcombine.high %v2277_v36, %v2285_v37  ;;  %v2005_v60 = vld [vmem:[#allocation8 + $0x2588] sm:$0xff]  ;;  %v17884_v40 = vcombine.low %v2021_v33, %v2029_v16 }
 0x272   :  { %13723 = vmatprep.subr.bf16.mxu1 %v17949_v50  ;;  %v2013_v47 = vld [vmem:[#allocation8 + $0x25c8] sm:$0xff]  ;;  %v18140_v50 = vcombine.low %v2277_v36, %v2285_v37 }
 0x273   :  { %v2261_v48 = vld [vmem:[#allocation8 + $0x2d88] sm:$0xff]  ;;  %v17869_v51 = vcombine.high %v2005_v60, %v2013_v47 }
 0x274   :  { %13683 = vmatpush1.bf16.msra.mxu0 %v17692_v58  ;;  %v2269_v49 = vld [vmem:[#allocation8 + $0x2dc8] sm:$0xff] }
 0x275   :  { %13724 = vmatpush1.bf16.msra.mxu1 %v17948_v10  ;;  %13684 = vmatprep.subr.bf16.mxu0 %v17933_v61  ;;  %v18125_v54 = vcombine.high %v2261_v48, %v2269_v49  ;;  %v1989_v55 = vld [vmem:[#allocation8 + $0x2508] sm:$0xff]  ;;  %v17868_v61 = vcombine.low %v2005_v60, %v2013_v47 }
 0x276   :  { %13725 = vmatprep.subr.bf16.mxu1 %v18189_v0  ;;  %v1997_v57 = vld [vmem:[#allocation8 + $0x2548] sm:$0xff]  ;;  %v18124_v0 = vcombine.low %v2261_v48, %v2269_v49 }
 0x277   :  { %v2245_v58 = vld [vmem:[#allocation8 + $0x2d08] sm:$0xff]  ;;  %v17853_v21 = vcombine.high %v1989_v55, %v1997_v57 }
 0x278   :  { %13685 = vmatpush2.bf16.msra.mxu0 %v17932_v9  ;;  %v2253_v10 = vld [vmem:[#allocation8 + $0x2d48] sm:$0xff] }
 0x279   :  { %13726 = vmatpush2.bf16.msra.mxu1 %v18188_v18  ;;  %13686 = vmatprep.subr.bf16.mxu0 %v17917_v11  ;;  %v18109_v4 = vcombine.high %v2245_v58, %v2253_v10  ;;  %v1973_v5 = vld [vmem:[#allocation8 + $0x2488] sm:$0xff]  ;;  %v17852_v11 = vcombine.low %v1989_v55, %v1997_v57 }
 0x27a   :  { %13727 = vmatprep.subr.bf16.mxu1 %v18173_v12  ;;  %v1981_v7 = vld [vmem:[#allocation8 + $0x24c8] sm:$0xff]  ;;  %v18108_v12 = vcombine.low %v2245_v58, %v2253_v10 }
 0x27b   :  { %v2229_v9 = vld [vmem:[#allocation8 + $0x2c88] sm:$0xff]  ;;  %v17837_v17 = vcombine.high %v1973_v5, %v1981_v7 }
 0x27c   :  { %13687 = vmatpush2.bf16.msra.mxu0 %v17916_v22  ;;  %v2237_v18 = vld [vmem:[#allocation8 + $0x2cc8] sm:$0xff] }
 0x27d   :  { %13728 = vmatpush2.bf16.msra.mxu1 %v18172_v23  ;;  %13688 = vmatprep.subr.bf16.mxu0 %v17901_v24  ;;  %v18093_v15 = vcombine.high %v2229_v9, %v2237_v18  ;;  %v1957_v27 = vld [vmem:[#allocation8 + $0x2408] sm:$0xff]  ;;  %v17836_v24 = vcombine.low %v1973_v5, %v1981_v7 }
 0x27e   :  { %13729 = vmatprep.subr.bf16.mxu1 %v18157_v26  ;;  %v1965_v30 = vld [vmem:[#allocation8 + $0x2448] sm:$0xff]  ;;  %v18092_v26 = vcombine.low %v2229_v9, %v2237_v18 }
 0x27f   :  { %v2213_v22 = vld [vmem:[#allocation8 + $0x2c08] sm:$0xff]  ;;  %v17821_v33 = vcombine.high %v1957_v27, %v1965_v30 }
 0x280   :  { %13689 = vmatpush2.bf16.msra.mxu0 %v17900_v43  ;;  %v2221_v23 = vld [vmem:[#allocation8 + $0x2c48] sm:$0xff] }
 0x281   :  { %13730 = vmatpush2.bf16.msra.mxu1 %v18156_v44  ;;  %13690 = vmatprep.subr.bf16.mxu0 %v17885_v46  ;;  %v18077_v16 = vcombine.high %v2213_v22, %v2221_v23  ;;  %v2453_v36 = vld [vmem:[#allocation8 + $0x3388] sm:$0xff]  ;;  %v17820_v46 = vcombine.low %v1957_v27, %v1965_v30 }
 0x282   :  { %13731 = vmatprep.subr.bf16.mxu1 %v18141_v39  ;;  %v2461_v37 = vld [vmem:[#allocation8 + $0x33c8] sm:$0xff]  ;;  %v18076_v39 = vcombine.low %v2213_v22, %v2221_v23 }
 0x283   :  { %v2709_v43 = vld [vmem:[#allocation8 + $0x3b88] sm:$0xff]  ;;  %v18317_v60 = vcombine.high %v2453_v36, %v2461_v37 }
 0x284   :  { %13691 = vmatpush2.bf16.msra.mxu0 %v17884_v40  ;;  %v2717_v44 = vld [vmem:[#allocation8 + $0x3bc8] sm:$0xff]  ;;  %v18316_v40 = vcombine.low %v2453_v36, %v2461_v37 }
 0x285   :  { %13732 = vmatpush2.bf16.msra.mxu1 %v18140_v50  ;;  %13692 = vmatprep.subr.bf16.mxu0 %v17869_v51  ;;  %v18573_v47 = vcombine.high %v2709_v43, %v2717_v44  ;;  %v2437_v48 = vld [vmem:[#allocation8 + $0x3308] sm:$0xff] }
 0x286   :  { %13733 = vmatprep.subr.bf16.mxu1 %v18125_v54  ;;  %v2445_v49 = vld [vmem:[#allocation8 + $0x3348] sm:$0xff]  ;;  %v18572_v54 = vcombine.low %v2709_v43, %v2717_v44 }
 0x287   :  { %v2693_v50 = vld [vmem:[#allocation8 + $0x3b08] sm:$0xff]  ;;  %v18301_v55 = vcombine.high %v2437_v48, %v2445_v49  ;;  %v18300_v7 = vcombine.low %v2437_v48, %v2445_v49 }
 0x288   :  { %13693 = vmatpush2.bf16.msra.mxu0 %v17868_v61  ;;  %v2701_v51 = vld [vmem:[#allocation8 + $0x3b48] sm:$0xff] }
 0x289   :  { %13734 = vmatpush2.bf16.msra.mxu1 %v18124_v0  ;;  %13694 = vmatprep.subr.bf16.mxu0 %v17853_v21  ;;  %v2421_v57 = vld [vmem:[#allocation8 + $0x3288] sm:$0xff]  ;;  %v18557_v0 = vcombine.high %v2693_v50, %v2701_v51 }
 0x28a   :  { %13735 = vmatprep.subr.bf16.mxu1 %v18109_v4  ;;  %v2429_v58 = vld [vmem:[#allocation8 + $0x32c8] sm:$0xff] }
 0x28b   :  { %v2677_v21 = vld [vmem:[#allocation8 + $0x3a88] sm:$0xff] }
 0x28c   :  { %13695 = vmatpush2.bf16.msra.mxu0 %v17852_v11  ;;  %v2685_v4 = vld [vmem:[#allocation8 + $0x3ac8] sm:$0xff]  ;;  %v18556_v11 = vcombine.low %v2693_v50, %v2701_v51 }
 0x28d   :  { %13736 = vmatpush2.bf16.msra.mxu1 %v18108_v12  ;;  %13696 = vmatprep.subr.bf16.mxu0 %v17837_v17  ;;  %v18285_v12 = vcombine.high %v2421_v57, %v2429_v58  ;;  %v18541_v27 = vcombine.high %v2677_v21, %v2685_v4  ;;  %v2413_v30 = vld [vmem:[#allocation8 + $0x3248] sm:$0xff]  ;;  %v18540_v43 = vcombine.low %v2677_v21, %v2685_v4 }
 0x28e   :  { %13737 = vmatprep.subr.bf16.mxu1 %v18093_v15  ;;  %v2373_v51 = vld [vmem:[#allocation8 + $0x3108] sm:$0xff] }
 0x28f   :  { %v2357_v21 = vld [vmem:[#allocation8 + $0x3088] sm:$0xff] }
 0x290   :  { %13697 = vmatpush2.bf16.msra.mxu0 %v17836_v24  ;;  %v2661_v24 = vld [vmem:[#allocation8 + $0x3a08] sm:$0xff] }
 0x291   :  { %13738 = vmatpush2.bf16.msra.mxu1 %v18092_v26  ;;  %13698 = vmatprep.subr.bf16.mxu0 %v17821_v33  ;;  %v2669_v26 = vld [vmem:[#allocation8 + $0x3a48] sm:$0xff] }
 0x292   :  { %13739 = vmatprep.subr.bf16.mxu1 %v18077_v16  ;;  %v18284_v16 = vcombine.low %v2421_v57, %v2429_v58  ;;  %v18524_v49 = vcombine.low %v2661_v24, %v2669_v26  ;;  %v2637_v57 = vld [vmem:[#allocation8 + $0x3948] sm:$0xff] }
 0x293   :  { %v2365_v4 = vld [vmem:[#allocation8 + $0x30c8] sm:$0xff] }
 0x294   :  { %13699 = vmatpush2.bf16.msra.mxu0 %v17820_v46  ;;  %v2389_v46 = vld [vmem:[#allocation8 + $0x3188] sm:$0xff] }
 0x295   :  { %13740 = vmatpush2.bf16.msra.mxu1 %v18076_v39  ;;  %13750 = vmatprep.subr.bf16.mxu0 %v18317_v60  ;;  %v2397_v39 = vld [vmem:[#allocation8 + $0x31c8] sm:$0xff] }
 0x296   :  { %13791 = vmatprep.subr.bf16.mxu1 %v18573_v47  ;;  %v2645_v60 = vld [vmem:[#allocation8 + $0x3988] sm:$0xff]  ;;  %v18252_v58 = vcombine.low %v2389_v46, %v2397_v39 }
 0x297   :  { %v13456_v10 = vpop.f32.mrf.mxu0  ;;  %v13497_v61 = vpop.f32.mrf.mxu1  ;;  %13701 = vmatmul.mubr.bf16.vlgmr.msra.gmra.mxu0 %v19359_v34  ;;  %v2653_v47 = vld [vmem:[#allocation8 + $0x39c8] sm:$0xff] }
 0x298   :  { %v13457_v5 = vadd.f32 %v13456_v10, %v19403_v45  ;;  %13742 = vmatmul.mubr.bf16.vlgmr.msra.gmra.mxu1 %v19357_v25  ;;  %13751 = vmatpush1.bf16.msra.mxu0 %v18316_v40  ;;  %v2405_v45 = vld [vmem:[#allocation8 + $0x3208] sm:$0xff]  ;;  %v18253_v40 = vcombine.high %v2389_v46, %v2397_v39  ;;  %v18509_v50 = vcombine.high %v2645_v60, %v2653_v47 }
 0x299   :  { %13782 = vmatprep.mubr.bf16.mxu0 %v19361_v41  ;;  %13792 = vmatpush1.bf16.msra.mxu1 %v18572_v54  ;;  %v13458_v9 = vpop.f32.mrf.mxu0  ;;  %v13499_v18 = vpop.f32.mrf.mxu1  ;;  %v18269_v44 = vcombine.high %v2405_v45, %v2413_v30  ;;  %v18268_v48 = vcombine.low %v2405_v45, %v2413_v30  ;;  %v2381_v54 = vld [vmem:[#allocation8 + $0x3148] sm:$0xff]  ;;  %v18508_v10 = vcombine.low %v2645_v60, %v2653_v47 }
 0x29a   :  { %v19413_v17 = vadd.f32 %v13497_v61, %v13457_v5  ;;  %13823 = vmatprep.mubr.bf16.mxu1 %v19363_v42  ;;  %v13459_v15 = vadd.f32 %v13458_v9, %v19407_v53  ;;  %13752 = vmatprep.subr.bf16.mxu0 %v18301_v55  ;;  %v18525_v53 = vcombine.high %v2661_v24, %v2669_v26  ;;  %v2629_v55 = vld [vmem:[#allocation8 + $0x3908] sm:$0xff] }
 0x29b   :  { %v13460_v22 = vpop.f32.mrf.mxu0  ;;  %v13501_v23 = vpop.f32.mrf.mxu1  ;;  %13793 = vmatprep.subr.bf16.mxu1 %v18557_v0  ;;  %v18237_v61 = vcombine.high %v2373_v51, %v2381_v54  ;;  %v18493_v0 = vcombine.high %v2629_v55, %v2637_v57  ;;  %v2613_v5 = vld [vmem:[#allocation8 + $0x3888] sm:$0xff]  ;;  %v18236_v9 = vcombine.low %v2373_v51, %v2381_v54 }
 0x29c   :  { %v19417_v33 = vadd.f32 %v13499_v18, %v13459_v15  ;;  %13753 = vmatpush1.bf16.msra.mxu0 %v18300_v7  ;;  %v2621_v7 = vld [vmem:[#allocation8 + $0x38c8] sm:$0xff]  ;;  %v18492_v18 = vcombine.low %v2629_v55, %v2637_v57  ;;  %v18220_v22 = vcombine.low %v2357_v21, %v2365_v4 }
 0x29d   :  { %13794 = vmatpush1.bf16.msra.mxu1 %v18556_v11  ;;  %v13461_v36 = vpop.f32.mrf.mxu0  ;;  %v13502_v37 = vpop.f32.mrf.mxu1  ;;  %13754 = vmatprep.subr.bf16.mxu0 %v18285_v12  ;;  %v18221_v11 = vcombine.high %v2357_v21, %v2365_v4  ;;  %v18477_v12 = vcombine.high %v2613_v5, %v2621_v7  ;;  %v2341_v15 = vld [vmem:[#allocation8 + $0x3008] sm:$0xff]  ;;  %v18476_v23 = vcombine.low %v2613_v5, %v2621_v7 }
 0x29e   :  { %13795 = vmatprep.subr.bf16.mxu1 %v18541_v27  ;;  %v2349_v27 = vld [vmem:[#allocation8 + $0x3048] sm:$0xff] }
 0x29f   :  { %v2597_v45 = vld [vmem:[#allocation8 + $0x3808] sm:$0xff]  ;;  %v18205_v24 = vcombine.high %v2341_v15, %v2349_v27 }
 0x2a0   :  { %13755 = vmatpush1.bf16.msra.mxu0 %v18284_v16  ;;  %v2605_v30 = vld [vmem:[#allocation8 + $0x3848] sm:$0xff] }
 0x2a1   :  { %13796 = vmatpush1.bf16.msra.mxu1 %v18540_v43  ;;  %13756 = vmatprep.subr.bf16.mxu0 %v18269_v44  ;;  %v18461_v26 = vcombine.high %v2597_v45, %v2605_v30  ;;  %v2581_v16 = vld [vmem:[#allocation8 + $0x3788] sm:$0xff]  ;;  %v18204_v44 = vcombine.low %v2341_v15, %v2349_v27 }
 0x2a2   :  { %13797 = vmatprep.subr.bf16.mxu1 %v18525_v53  ;;  %v2589_v36 = vld [vmem:[#allocation8 + $0x37c8] sm:$0xff]  ;;  %v18460_v53 = vcombine.low %v2597_v45, %v2605_v30 }
 0x2a3   :  { %v2837_v37 = vld [vmem:[#allocation8 + $0x3f88] sm:$0xff]  ;;  %v18445_v46 = vcombine.high %v2581_v16, %v2589_v36 }
 0x2a4   :  { %13757 = vmatpush1.bf16.msra.mxu0 %v18268_v48  ;;  %v2845_v43 = vld [vmem:[#allocation8 + $0x3fc8] sm:$0xff] }
 0x2a5   :  { %13798 = vmatpush1.bf16.msra.mxu1 %v18524_v49  ;;  %13758 = vmatprep.subr.bf16.mxu0 %v18253_v40  ;;  %v18701_v39 = vcombine.high %v2837_v37, %v2845_v43  ;;  %v2565_v60 = vld [vmem:[#allocation8 + $0x3708] sm:$0xff]  ;;  %v18444_v40 = vcombine.low %v2581_v16, %v2589_v36 }
 0x2a6   :  { %13799 = vmatprep.subr.bf16.mxu1 %v18509_v50  ;;  %v2573_v47 = vld [vmem:[#allocation8 + $0x3748] sm:$0xff]  ;;  %v18700_v50 = vcombine.low %v2837_v37, %v2845_v43 }
 0x2a7   :  { %v2821_v48 = vld [vmem:[#allocation8 + $0x3f08] sm:$0xff]  ;;  %v18429_v51 = vcombine.high %v2565_v60, %v2573_v47 }
 0x2a8   :  { %13759 = vmatpush1.bf16.msra.mxu0 %v18252_v58  ;;  %v2829_v49 = vld [vmem:[#allocation8 + $0x3f48] sm:$0xff] }
 0x2a9   :  { %13800 = vmatpush1.bf16.msra.mxu1 %v18508_v10  ;;  %13760 = vmatprep.subr.bf16.mxu0 %v18237_v61  ;;  %v18685_v54 = vcombine.high %v2821_v48, %v2829_v49  ;;  %v2549_v55 = vld [vmem:[#allocation8 + $0x3688] sm:$0xff]  ;;  %v18428_v61 = vcombine.low %v2565_v60, %v2573_v47 }
 0x2aa   :  { %13801 = vmatprep.subr.bf16.mxu1 %v18493_v0  ;;  %v2557_v57 = vld [vmem:[#allocation8 + $0x36c8] sm:$0xff]  ;;  %v18684_v0 = vcombine.low %v2821_v48, %v2829_v49 }
 0x2ab   :  { %v2805_v58 = vld [vmem:[#allocation8 + $0x3e88] sm:$0xff]  ;;  %v18413_v21 = vcombine.high %v2549_v55, %v2557_v57 }
 0x2ac   :  { %13761 = vmatpush1.bf16.msra.mxu0 %v18236_v9  ;;  %v2813_v10 = vld [vmem:[#allocation8 + $0x3ec8] sm:$0xff] }
 0x2ad   :  { %13802 = vmatpush1.bf16.msra.mxu1 %v18492_v18  ;;  %13762 = vmatprep.subr.bf16.mxu0 %v18221_v11  ;;  %v18669_v4 = vcombine.high %v2805_v58, %v2813_v10  ;;  %v2533_v5 = vld [vmem:[#allocation8 + $0x3608] sm:$0xff]  ;;  %v18412_v11 = vcombine.low %v2549_v55, %v2557_v57 }
 0x2ae   :  { %13803 = vmatprep.subr.bf16.mxu1 %v18477_v12  ;;  %v2541_v7 = vld [vmem:[#allocation8 + $0x3648] sm:$0xff]  ;;  %v18668_v12 = vcombine.low %v2805_v58, %v2813_v10 }
 0x2af   :  { %v2789_v9 = vld [vmem:[#allocation8 + $0x3e08] sm:$0xff]  ;;  %v18397_v15 = vcombine.high %v2533_v5, %v2541_v7 }
 0x2b0   :  { %13763 = vmatpush1.bf16.msra.mxu0 %v18220_v22  ;;  %v2797_v18 = vld [vmem:[#allocation8 + $0x3e48] sm:$0xff] }
 0x2b1   :  { %13804 = vmatpush1.bf16.msra.mxu1 %v18476_v23  ;;  %13764 = vmatprep.subr.bf16.mxu0 %v18205_v24  ;;  %v18653_v27 = vcombine.high %v2789_v9, %v2797_v18  ;;  %v2517_v45 = vld [vmem:[#allocation8 + $0x3588] sm:$0xff]  ;;  %v18396_v24 = vcombine.low %v2533_v5, %v2541_v7 }
 0x2b2   :  { %13805 = vmatprep.subr.bf16.mxu1 %v18461_v26  ;;  %v2525_v30 = vld [vmem:[#allocation8 + $0x35c8] sm:$0xff]  ;;  %v18652_v26 = vcombine.low %v2789_v9, %v2797_v18  ;;  %v918_v9 = vld [vmem:[#allocation8 + $0x390] sm:$0xff] }
 0x2b3   :  { %v2773_v22 = vld [vmem:[#allocation8 + $0x3d88] sm:$0xff]  ;;  %v18381_v16 = vcombine.high %v2517_v45, %v2525_v30  ;;  %v926_v18 = vld [vmem:[#allocation8 + $0x3d0] sm:$0xff] }
 0x2b4   :  { %13765 = vmatpush1.bf16.msra.mxu0 %v18204_v44  ;;  %v2781_v23 = vld [vmem:[#allocation8 + $0x3dc8] sm:$0xff] }
 0x2b5   :  { %13806 = vmatpush1.bf16.msra.mxu1 %v18460_v53  ;;  %13766 = vmatprep.subr.bf16.mxu0 %v18445_v46  ;;  %v18637_v36 = vcombine.high %v2773_v22, %v2781_v23  ;;  %v2501_v37 = vld [vmem:[#allocation8 + $0x3508] sm:$0xff]  ;;  %v18380_v46 = vcombine.low %v2517_v45, %v2525_v30  ;;  %v16783_v45 = vcombine.high %v918_v9, %v926_v18 }
 0x2b6   :  { %13807 = vmatprep.subr.bf16.mxu1 %v18701_v39  ;;  %v2509_v43 = vld [vmem:[#allocation8 + $0x3548] sm:$0xff]  ;;  %v18636_v39 = vcombine.low %v2773_v22, %v2781_v23  ;;  %v902_v22 = vld [vmem:[#allocation8 + $0x310] sm:$0xff] }
 0x2b7   :  { %v2757_v44 = vld [vmem:[#allocation8 + $0x3d08] sm:$0xff]  ;;  %v18365_v60 = vcombine.high %v2501_v37, %v2509_v43  ;;  %v910_v23 = vld [vmem:[#allocation8 + $0x350] sm:$0xff] }
 0x2b8   :  { %13767 = vmatpush2.bf16.msra.mxu0 %v18444_v40  ;;  %v2765_v53 = vld [vmem:[#allocation8 + $0x3d48] sm:$0xff] }
 0x2b9   :  { %13808 = vmatpush2.bf16.msra.mxu1 %v18700_v50  ;;  %13768 = vmatprep.subr.bf16.mxu0 %v18429_v51  ;;  %v18621_v47 = vcombine.high %v2757_v44, %v2765_v53  ;;  %v2485_v48 = vld [vmem:[#allocation8 + $0x3488] sm:$0xff]  ;;  %v18364_v51 = vcombine.low %v2501_v37, %v2509_v43  ;;  %v1166_v37 = vld [vmem:[#allocation8 + $0xb50] sm:$0xff] }
 0x2ba   :  { %13809 = vmatprep.subr.bf16.mxu1 %v18685_v54  ;;  %v2493_v49 = vld [vmem:[#allocation8 + $0x34c8] sm:$0xff]  ;;  %v18620_v54 = vcombine.low %v2757_v44, %v2765_v53  ;;  %v16767_v44 = vcombine.high %v902_v22, %v910_v23  ;;  %v886_v53 = vld [vmem:[#allocation8 + $0x290] sm:$0xff] }
 0x2bb   :  { %v2741_v40 = vld [vmem:[#allocation8 + $0x3c88] sm:$0xff]  ;;  %v18349_v55 = vcombine.high %v2485_v48, %v2493_v49 }
 0x2bc   :  { %13769 = vmatpush2.bf16.msra.mxu0 %v18428_v61  ;;  %v2749_v50 = vld [vmem:[#allocation8 + $0x3cc8] sm:$0xff] }
 0x2bd   :  { %13810 = vmatpush2.bf16.msra.mxu1 %v18684_v0  ;;  %13770 = vmatprep.subr.bf16.mxu0 %v18413_v21  ;;  %v18605_v57 = vcombine.high %v2741_v40, %v2749_v50  ;;  %v2469_v58 = vld [vmem:[#allocation8 + $0x3408] sm:$0xff]  ;;  %v18348_v21 = vcombine.low %v2485_v48, %v2493_v49  ;;  %v1150_v48 = vld [vmem:[#allocation8 + $0xad0] sm:$0xff] }
 0x2be   :  { %13811 = vmatprep.subr.bf16.mxu1 %v18669_v4  ;;  %v2477_v10 = vld [vmem:[#allocation8 + $0x3448] sm:$0xff]  ;;  %v18604_v4 = vcombine.low %v2741_v40, %v2749_v50  ;;  %v16766_v50 = vcombine.low %v902_v22, %v910_v23  ;;  %v1110_v22 = vld [vmem:[#allocation8 + $0x990] sm:$0xff] }
 0x2bf   :  { %v2725_v61 = vld [vmem:[#allocation8 + $0x3c08] sm:$0xff]  ;;  %v18333_v5 = vcombine.high %v2469_v58, %v2477_v10  ;;  %v1118_v23 = vld [vmem:[#allocation8 + $0x9d0] sm:$0xff] }
 0x2c0   :  { %13771 = vmatpush2.bf16.msra.mxu0 %v18412_v11  ;;  %v2733_v0 = vld [vmem:[#allocation8 + $0x3c48] sm:$0xff]  ;;  %v1174_v11 = vld [vmem:[#allocation8 + $0xb90] sm:$0xff] }
 0x2c1   :  { %13812 = vmatpush2.bf16.msra.mxu1 %v18668_v12  ;;  %13772 = vmatprep.subr.bf16.mxu0 %v18397_v15  ;;  %v18589_v7 = vcombine.high %v2725_v61, %v2733_v0  ;;  %v1182_v12 = vld [vmem:[#allocation8 + $0xbd0] sm:$0xff]  ;;  %v18332_v15 = vcombine.low %v2469_v58, %v2477_v10 }
 0x2c2   :  { %13813 = vmatprep.subr.bf16.mxu1 %v18653_v27  ;;  %v18588_v27 = vcombine.low %v2725_v61, %v2733_v0  ;;  %v17039_v30 = vcombine.high %v1174_v11, %v1182_v12  ;;  %v17038_v43 = vcombine.low %v1174_v11, %v1182_v12  ;;  %v870_v61 = vld [vmem:[#allocation8 + $0x210] sm:$0xff] }
 0x2c3   :  { %v878_v0 = vld [vmem:[#allocation8 + $0x250] sm:$0xff] }
 0x2c4   :  { %13773 = vmatpush2.bf16.msra.mxu0 %v18396_v24  ;;  %v19419_v24 = vld [vmem:[#allocation10] sm:$0xff]  ;;  %v16735_v12 = vcombine.high %v870_v61, %v878_v0 }
 0x2c5   :  { %13814 = vmatpush2.bf16.msra.mxu1 %v18652_v26  ;;  %13774 = vmatprep.subr.bf16.mxu0 %v18381_v16  ;;  %v2867_v26 = vrot.slane %v19419_v24, %v19259_v29  ;;  %v16782_v16 = vcombine.low %v918_v9, %v926_v18 }
 0x2c6   :  { %13815 = vmatprep.subr.bf16.mxu1 %v18637_v36  ;;  %v1158_v36 = vld [vmem:[#allocation8 + $0xb10] sm:$0xff] }
 0x2c8   :  { %13775 = vmatpush2.bf16.msra.mxu0 %v18380_v46  ;;  %v894_v46 = vld [vmem:[#allocation8 + $0x2d0] sm:$0xff] }
 0x2c9   :  { %13816 = vmatpush2.bf16.msra.mxu1 %v18636_v39  ;;  %13776 = vmatprep.subr.bf16.mxu0 %v18365_v60  ;;  %v17023_v60 = vcombine.high %v1158_v36, %v1166_v37  ;;  %v16750_v9 = vcombine.low %v886_v53, %v894_v46 }
 0x2ca   :  { %13817 = vmatprep.subr.bf16.mxu1 %v18621_v47  ;;  %v1142_v47 = vld [vmem:[#allocation8 + $0xa90] sm:$0xff] }
 0x2cb   :  { %v17007_v10 = vcombine.high %v1142_v47, %v1150_v48  ;;  %v17006_v11 = vcombine.low %v1142_v47, %v1150_v48 }
 0x2cc   :  { %13777 = vmatpush2.bf16.msra.mxu0 %v18364_v51 }
 0x2cd   :  { %13818 = vmatpush2.bf16.msra.mxu1 %v18620_v54  ;;  %13778 = vmatprep.subr.bf16.mxu0 %v18349_v55  ;;  %v17022_v54 = vcombine.low %v1158_v36, %v1166_v37  ;;  %v16751_v55 = vcombine.high %v886_v53, %v894_v46  ;;  %v16975_v37 = vcombine.high %v1110_v22, %v1118_v23  ;;  %v1094_v53 = vld [vmem:[#allocation8 + $0x910] sm:$0xff] }
 0x2ce   :  { %13819 = vmatprep.subr.bf16.mxu1 %v18605_v57  ;;  %v1102_v46 = vld [vmem:[#allocation8 + $0x950] sm:$0xff] }
 0x2cf   :  { %v16959_v48 = vcombine.high %v1094_v53, %v1102_v46 }
 0x2d0   :  { %13779 = vmatpush2.bf16.msra.mxu0 %v18348_v21 }
 0x2d1   :  { %13820 = vmatpush2.bf16.msra.mxu1 %v18604_v4  ;;  %13780 = vmatprep.subr.bf16.mxu0 %v18333_v5  ;;  %v1126_v4 = vld [vmem:[#allocation8 + $0xa10] sm:$0xff] }
 0x2d2   :  { %13821 = vmatprep.subr.bf16.mxu1 %v18589_v7  ;;  %v1134_v5 = vld [vmem:[#allocation8 + $0xa50] sm:$0xff] }
 0x2d4   :  { %13781 = vmatpush2.bf16.msra.mxu0 %v18332_v15 }
 0x2d5   :  { %13822 = vmatpush2.bf16.msra.mxu1 %v18588_v27  ;;  %13832 = vmatprep.subr.bf16.mxu0 %v16783_v45  ;;  %v16991_v27 = vcombine.high %v1126_v4, %v1134_v5  ;;  %v854_v45 = vld [vmem:[#allocation8 + $0x190] sm:$0xff] }
 0x2d6   :  { %13873 = vmatprep.subr.bf16.mxu1 %v17039_v30  ;;  %v862_v30 = vld [vmem:[#allocation8 + $0x1d0] sm:$0xff] }
 0x2d7   :  { %v13538_v39 = vpop.f32.mrf.mxu0  ;;  %13783 = vmatmul.mubr.bf16.vlgmr.msra.gmra.mxu0 %v19376_v52  ;;  %v16719_v36 = vcombine.high %v854_v45, %v862_v30 }
 0x2d8   :  { %v13539_v49 = vadd.f32 %v13538_v39, %v2867_v26  ;;  %v13579_v40 = vpop.f32.mrf.mxu1  ;;  %13824 = vmatmul.mubr.bf16.vlgmr.msra.gmra.mxu1 %v19378_v56  ;;  %13833 = vmatpush1.bf16.msra.mxu0 %v16782_v16  ;;  %v16734_v26 = vcombine.low %v870_v61, %v878_v0  ;;  %v16990_v16 = vcombine.low %v1126_v4, %v1134_v5  ;;  %v814_v4 = vld [vmem:[#allocation8 + $0x50] sm:$0xff] }
 0x2d9   :  { %13864 = vmatprep.mubr.bf16.mxu0 %v19293_v62  ;;  %13874 = vmatpush1.bf16.msra.mxu1 %v17038_v43  ;;  %v19426_v51 = vpop.f32.mrf.mxu0  ;;  %v838_v43 = vld [vmem:[#allocation8 + $0x110] sm:$0xff]  ;;  %v16718_v39 = vcombine.low %v854_v45, %v862_v30 }
 0x2da   :  { %v19428_v57 = vadd.f32 %v13579_v40, %v13539_v49  ;;  %13905 = vmatprep.mubr.bf16.mxu1 %v19295_v63  ;;  %v19431_v58 = vpop.f32.mrf.mxu1  ;;  %13834 = vmatprep.subr.bf16.mxu0 %v16767_v44  ;;  %v846_v44 = vld [vmem:[#allocation8 + $0x150] sm:$0xff] }
 0x2db   :  { %v13542_v21 = vpop.f32.mrf.mxu0  ;;  %13875 = vmatprep.subr.bf16.mxu1 %v17023_v60  ;;  %v16974_v60 = vcombine.low %v1110_v22, %v1118_v23  ;;  %v16703_v47 = vcombine.high %v838_v43, %v846_v44  ;;  %v822_v49 = vld [vmem:[#allocation8 + $0x90] sm:$0xff] }
 0x2dc   :  { %v13583_v7 = vpop.f32.mrf.mxu1  ;;  %13835 = vmatpush1.bf16.msra.mxu0 %v16766_v50  ;;  %v830_v40 = vld [vmem:[#allocation8 + $0xd0] sm:$0xff] }
 0x2dd   :  { %13876 = vmatpush1.bf16.msra.mxu1 %v17022_v54  ;;  %v13543_v18 = vpop.f32.mrf.mxu0  ;;  %13836 = vmatprep.subr.bf16.mxu0 %v16751_v55  ;;  %v1078_v50 = vld [vmem:[#allocation8 + $0x890] sm:$0xff]  ;;  %v16702_v55 = vcombine.low %v838_v43, %v846_v44  ;;  %v16687_v61 = vcombine.high %v822_v49, %v830_v40 }
 0x2de   :  { %v13584_v15 = vpop.f32.mrf.mxu1  ;;  %13877 = vmatprep.subr.bf16.mxu1 %v17007_v10  ;;  %v1086_v54 = vld [vmem:[#allocation8 + $0x8d0] sm:$0xff]  ;;  %v16958_v10 = vcombine.low %v1094_v53, %v1102_v46 }
 0x2df   :  { %v16943_v0 = vcombine.high %v1078_v50, %v1086_v54  ;;  %v806_v21 = vld [vmem:[#allocation8 + $0x10] sm:$0xff]  ;;  %v16942_v18 = vcombine.low %v1078_v50, %v1086_v54 }
 0x2e0   :  { %13837 = vmatpush1.bf16.msra.mxu0 %v16750_v9  ;;  %v1062_v5 = vld [vmem:[#allocation8 + $0x810] sm:$0xff]  ;;  %v16686_v9 = vcombine.low %v822_v49, %v830_v40  ;;  %v16670_v22 = vcombine.low %v806_v21, %v814_v4 }
 0x2e1   :  { %13878 = vmatpush1.bf16.msra.mxu1 %v17006_v11  ;;  %13838 = vmatprep.subr.bf16.mxu0 %v16735_v12  ;;  %v1070_v7 = vld [vmem:[#allocation8 + $0x850] sm:$0xff]  ;;  %v16671_v11 = vcombine.high %v806_v21, %v814_v4 }
 0x2e2   :  { %13879 = vmatprep.subr.bf16.mxu1 %v16991_v27  ;;  %v16927_v12 = vcombine.high %v1062_v5, %v1070_v7  ;;  %v1046_v15 = vld [vmem:[#allocation8 + $0x790] sm:$0xff]  ;;  %v16926_v23 = vcombine.low %v1062_v5, %v1070_v7 }
 0x2e3   :  { %v1054_v27 = vld [vmem:[#allocation8 + $0x7d0] sm:$0xff] }
 0x2e4   :  { %13839 = vmatpush1.bf16.msra.mxu0 %v16734_v26  ;;  %v1302_v45 = vld [vmem:[#allocation8 + $0xf90] sm:$0xff]  ;;  %v16911_v26 = vcombine.high %v1046_v15, %v1054_v27  ;;  %v16910_v53 = vcombine.low %v1046_v15, %v1054_v27 }
 0x2e5   :  { %13880 = vmatpush1.bf16.msra.mxu1 %v16990_v16  ;;  %13840 = vmatprep.subr.bf16.mxu0 %v16719_v36  ;;  %v1310_v30 = vld [vmem:[#allocation8 + $0xfd0] sm:$0xff] }
 0x2e6   :  { %13881 = vmatprep.subr.bf16.mxu1 %v16975_v37  ;;  %v17167_v16 = vcombine.high %v1302_v45, %v1310_v30  ;;  %v1030_v36 = vld [vmem:[#allocation8 + $0x710] sm:$0xff]  ;;  %v17166_v46 = vcombine.low %v1302_v45, %v1310_v30 }
 0x2e7   :  { %v1038_v37 = vld [vmem:[#allocation8 + $0x750] sm:$0xff] }
 0x2e8   :  { %13841 = vmatpush1.bf16.msra.mxu0 %v16718_v39  ;;  %v1286_v43 = vld [vmem:[#allocation8 + $0xf10] sm:$0xff]  ;;  %v16895_v39 = vcombine.high %v1030_v36, %v1038_v37  ;;  %v16894_v50 = vcombine.low %v1030_v36, %v1038_v37 }
 0x2e9   :  { %13882 = vmatpush1.bf16.msra.mxu1 %v16974_v60  ;;  %13842 = vmatprep.subr.bf16.mxu0 %v16703_v47  ;;  %v1294_v44 = vld [vmem:[#allocation8 + $0xf50] sm:$0xff] }
 0x2ea   :  { %13883 = vmatprep.subr.bf16.mxu1 %v16959_v48  ;;  %v17151_v60 = vcombine.high %v1286_v43, %v1294_v44  ;;  %v1014_v47 = vld [vmem:[#allocation8 + $0x690] sm:$0xff]  ;;  %v17150_v54 = vcombine.low %v1286_v43, %v1294_v44 }
 0x2eb   :  { %v1022_v48 = vld [vmem:[#allocation8 + $0x6d0] sm:$0xff] }
 0x2ec   :  { %13843 = vmatpush1.bf16.msra.mxu0 %v16702_v55  ;;  %v1270_v49 = vld [vmem:[#allocation8 + $0xe90] sm:$0xff]  ;;  %v16879_v55 = vcombine.high %v1014_v47, %v1022_v48  ;;  %v16878_v5 = vcombine.low %v1014_v47, %v1022_v48 }
 0x2ed   :  { %13884 = vmatpush1.bf16.msra.mxu1 %v16958_v10  ;;  %13844 = vmatprep.subr.bf16.mxu0 %v16687_v61  ;;  %v1278_v40 = vld [vmem:[#allocation8 + $0xed0] sm:$0xff] }
 0x2ee   :  { %13885 = vmatprep.subr.bf16.mxu1 %v16943_v0  ;;  %v17135_v10 = vcombine.high %v1270_v49, %v1278_v40  ;;  %v998_v61 = vld [vmem:[#allocation8 + $0x610] sm:$0xff]  ;;  %v17134_v7 = vcombine.low %v1270_v49, %v1278_v40 }
 0x2ef   :  { %v1006_v0 = vld [vmem:[#allocation8 + $0x650] sm:$0xff] }
 0x2f0   :  { %13845 = vmatpush1.bf16.msra.mxu0 %v16686_v9  ;;  %v1254_v21 = vld [vmem:[#allocation8 + $0xe10] sm:$0xff]  ;;  %v16863_v9 = vcombine.high %v998_v61, %v1006_v0  ;;  %v16862_v45 = vcombine.low %v998_v61, %v1006_v0 }
 0x2f1   :  { %13886 = vmatpush1.bf16.msra.mxu1 %v16942_v18  ;;  %13846 = vmatprep.subr.bf16.mxu0 %v16671_v11  ;;  %v1262_v4 = vld [vmem:[#allocation8 + $0xe50] sm:$0xff] }
 0x2f2   :  { %13887 = vmatprep.subr.bf16.mxu1 %v16927_v12  ;;  %v17119_v18 = vcombine.high %v1254_v21, %v1262_v4  ;;  %v982_v11 = vld [vmem:[#allocation8 + $0x590] sm:$0xff]  ;;  %v17118_v30 = vcombine.low %v1254_v21, %v1262_v4 }
 0x2f3   :  { %v990_v12 = vld [vmem:[#allocation8 + $0x5d0] sm:$0xff] }
 0x2f4   :  { %13847 = vmatpush1.bf16.msra.mxu0 %v16670_v22  ;;  %v1238_v15 = vld [vmem:[#allocation8 + $0xd90] sm:$0xff]  ;;  %v16847_v22 = vcombine.high %v982_v11, %v990_v12  ;;  %v16846_v43 = vcombine.low %v982_v11, %v990_v12 }
 0x2f5   :  { %13888 = vmatpush1.bf16.msra.mxu1 %v16926_v23  ;;  %13848 = vmatprep.subr.bf16.mxu0 %v16911_v26  ;;  %v1246_v27 = vld [vmem:[#allocation8 + $0xdd0] sm:$0xff] }
 0x2f6   :  { %13889 = vmatprep.subr.bf16.mxu1 %v17167_v16  ;;  %v17103_v23 = vcombine.high %v1238_v15, %v1246_v27  ;;  %v966_v26 = vld [vmem:[#allocation8 + $0x510] sm:$0xff]  ;;  %v17102_v44 = vcombine.low %v1238_v15, %v1246_v27 }
 0x2f7   :  { %v974_v16 = vld [vmem:[#allocation8 + $0x550] sm:$0xff] }
 0x2f8   :  { %13849 = vmatpush2.bf16.msra.mxu0 %v16910_v53  ;;  %v1222_v36 = vld [vmem:[#allocation8 + $0xd10] sm:$0xff]  ;;  %v16831_v53 = vcombine.high %v966_v26, %v974_v16  ;;  %v16830_v49 = vcombine.low %v966_v26, %v974_v16 }
 0x2f9   :  { %13890 = vmatpush2.bf16.msra.mxu1 %v17166_v46  ;;  %13850 = vmatprep.subr.bf16.mxu0 %v16895_v39  ;;  %v1230_v37 = vld [vmem:[#allocation8 + $0xd50] sm:$0xff] }
 0x2fa   :  { %13891 = vmatprep.subr.bf16.mxu1 %v17151_v60  ;;  %v17087_v46 = vcombine.high %v1222_v36, %v1230_v37  ;;  %v950_v39 = vld [vmem:[#allocation8 + $0x490] sm:$0xff]  ;;  %v17086_v40 = vcombine.low %v1222_v36, %v1230_v37 }
 0x2fb   :  { %v958_v60 = vld [vmem:[#allocation8 + $0x4d0] sm:$0xff] }
 0x2fc   :  { %13851 = vmatpush2.bf16.msra.mxu0 %v16894_v50  ;;  %v1206_v47 = vld [vmem:[#allocation8 + $0xc90] sm:$0xff]  ;;  %v16815_v50 = vcombine.high %v950_v39, %v958_v60  ;;  %v16814_v21 = vcombine.low %v950_v39, %v958_v60 }
 0x2fd   :  { %13892 = vmatpush2.bf16.msra.mxu1 %v17150_v54  ;;  %13852 = vmatprep.subr.bf16.mxu0 %v16879_v55  ;;  %v1214_v48 = vld [vmem:[#allocation8 + $0xcd0] sm:$0xff] }
 0x2fe   :  { %13893 = vmatprep.subr.bf16.mxu1 %v17135_v10  ;;  %v17071_v54 = vcombine.high %v1206_v47, %v1214_v48  ;;  %v934_v55 = vld [vmem:[#allocation8 + $0x410] sm:$0xff]  ;;  %v17070_v4 = vcombine.low %v1206_v47, %v1214_v48 }
 0x2ff   :  { %v942_v10 = vld [vmem:[#allocation8 + $0x450] sm:$0xff] }
 0x300   :  { %13853 = vmatpush2.bf16.msra.mxu0 %v16878_v5  ;;  %v1190_v61 = vld [vmem:[#allocation8 + $0xc10] sm:$0xff]  ;;  %v16799_v5 = vcombine.high %v934_v55, %v942_v10  ;;  %v16798_v15 = vcombine.low %v934_v55, %v942_v10 }
 0x301   :  { %13894 = vmatpush2.bf16.msra.mxu1 %v17134_v7  ;;  %13854 = vmatprep.subr.bf16.mxu0 %v16863_v9  ;;  %v1198_v0 = vld [vmem:[#allocation8 + $0xc50] sm:$0xff] }
 0x302   :  { %13895 = vmatprep.subr.bf16.mxu1 %v17119_v18  ;;  %v17055_v7 = vcombine.high %v1190_v61, %v1198_v0  ;;  %v1430_v9 = vld [vmem:[#allocation8 + $0x1390] sm:$0xff]  ;;  %v17054_v27 = vcombine.low %v1190_v61, %v1198_v0 }
 0x303   :  { %v1438_v18 = vld [vmem:[#allocation8 + $0x13d0] sm:$0xff] }
 0x304   :  { %13855 = vmatpush2.bf16.msra.mxu0 %v16862_v45  ;;  %v1686_v11 = vld [vmem:[#allocation8 + $0x1b90] sm:$0xff]  ;;  %v17295_v45 = vcombine.high %v1430_v9, %v1438_v18  ;;  %v17294_v26 = vcombine.low %v1430_v9, %v1438_v18 }
 0x305   :  { %13896 = vmatpush2.bf16.msra.mxu1 %v17118_v30  ;;  %13856 = vmatprep.subr.bf16.mxu0 %v16847_v22  ;;  %v1694_v12 = vld [vmem:[#allocation8 + $0x1bd0] sm:$0xff] }
 0x306   :  { %13897 = vmatprep.subr.bf16.mxu1 %v17103_v23  ;;  %v17551_v30 = vcombine.high %v1686_v11, %v1694_v12  ;;  %v1414_v22 = vld [vmem:[#allocation8 + $0x1310] sm:$0xff]  ;;  %v17550_v37 = vcombine.low %v1686_v11, %v1694_v12 }
 0x307   :  { %v1422_v23 = vld [vmem:[#allocation8 + $0x1350] sm:$0xff] }
 0x308   :  { %13857 = vmatpush2.bf16.msra.mxu0 %v16846_v43  ;;  %v1670_v16 = vld [vmem:[#allocation8 + $0x1b10] sm:$0xff]  ;;  %v17279_v43 = vcombine.high %v1414_v22, %v1422_v23 }
 0x309   :  { %13898 = vmatpush2.bf16.msra.mxu1 %v17102_v44  ;;  %13858 = vmatprep.subr.bf16.mxu0 %v16831_v53  ;;  %v1678_v36 = vld [vmem:[#allocation8 + $0x1b50] sm:$0xff] }
 0x30a   :  { %13899 = vmatprep.subr.bf16.mxu1 %v17087_v46  ;;  %v1398_v44 = vld [vmem:[#allocation8 + $0x1290] sm:$0xff]  ;;  %v17535_v39 = vcombine.high %v1670_v16, %v1678_v36 }
 0x30b   :  { %v1406_v53 = vld [vmem:[#allocation8 + $0x12d0] sm:$0xff] }
 0x30c   :  { %13859 = vmatpush2.bf16.msra.mxu0 %v16830_v49  ;;  %v1654_v60 = vld [vmem:[#allocation8 + $0x1a90] sm:$0xff]  ;;  %v17263_v55 = vcombine.high %v1398_v44, %v1406_v53  ;;  %v17262_v18 = vcombine.low %v1398_v44, %v1406_v53 }
 0x30d   :  { %13900 = vmatpush2.bf16.msra.mxu1 %v17086_v40  ;;  %13860 = vmatprep.subr.bf16.mxu0 %v16815_v50  ;;  %v1662_v47 = vld [vmem:[#allocation8 + $0x1ad0] sm:$0xff]  ;;  %v17278_v40 = vcombine.low %v1414_v22, %v1422_v23 }
 0x30e   :  { %13901 = vmatprep.subr.bf16.mxu1 %v17071_v54  ;;  %v17534_v54 = vcombine.low %v1670_v16, %v1678_v36  ;;  %v1382_v0 = vld [vmem:[#allocation8 + $0x1210] sm:$0xff]  ;;  %v17518_v12 = vcombine.low %v1654_v60, %v1662_v47 }
 0x30f   :  { %v1374_v22 = vld [vmem:[#allocation8 + $0x11d0] sm:$0xff] }
 0x310   :  { %13861 = vmatpush2.bf16.msra.mxu0 %v16814_v21  ;;  %v1390_v21 = vld [vmem:[#allocation8 + $0x1250] sm:$0xff] }
 0x311   :  { %13902 = vmatpush2.bf16.msra.mxu1 %v17070_v4  ;;  %13862 = vmatprep.subr.bf16.mxu0 %v16799_v5  ;;  %v1638_v5 = vld [vmem:[#allocation8 + $0x1a10] sm:$0xff]  ;;  %v17246_v16 = vcombine.low %v1382_v0, %v1390_v21 }
 0x312   :  { %13903 = vmatprep.subr.bf16.mxu1 %v17055_v7  ;;  %v1646_v7 = vld [vmem:[#allocation8 + $0x1a50] sm:$0xff] }
 0x313   :  { %v1622_v23 = vld [vmem:[#allocation8 + $0x1990] sm:$0xff]  ;;  %v17502_v36 = vcombine.low %v1638_v5, %v1646_v7 }
 0x314   :  { %13863 = vmatpush2.bf16.msra.mxu0 %v16798_v15  ;;  %v17247_v15 = vcombine.high %v1382_v0, %v1390_v21  ;;  %v1350_v44 = vld [vmem:[#allocation8 + $0x1110] sm:$0xff] }
 0x315   :  { %13904 = vmatpush2.bf16.msra.mxu1 %v17054_v27  ;;  %13914 = vmatprep.subr.bf16.mxu0 %v17295_v45  ;;  %v17503_v45 = vcombine.high %v1638_v5, %v1646_v7  ;;  %v1358_v53 = vld [vmem:[#allocation8 + $0x1150] sm:$0xff] }
 0x316   :  { %13955 = vmatprep.subr.bf16.mxu1 %v17551_v30  ;;  %v1366_v30 = vld [vmem:[#allocation8 + $0x1190] sm:$0xff]  ;;  %v17214_v0 = vcombine.low %v1350_v44, %v1358_v53 }
 0x317   :  { %v13620_v46 = vpop.f32.mrf.mxu0  ;;  %13865 = vmatmul.mubr.bf16.vlgmr.msra.gmra.mxu0 %v19297_v2  ;;  %v1318_v7 = vld [vmem:[#allocation8 + $0x1010] sm:$0xff] }
 0x318   :  { %v13621_v48 = vadd.f32 %v13620_v46, %v19428_v57  ;;  %v13661_v49 = vpop.f32.mrf.mxu1  ;;  %13906 = vmatmul.mubr.bf16.vlgmr.msra.gmra.mxu1 %v19291_v59  ;;  %13915 = vmatpush1.bf16.msra.mxu0 %v17294_v26  ;;  %v17519_v57 = vcombine.high %v1654_v60, %v1662_v47  ;;  %v1630_v26 = vld [vmem:[#allocation8 + $0x19d0] sm:$0xff]  ;;  %v17230_v60 = vcombine.low %v1366_v30, %v1374_v22 }
 0x319   :  { %13946 = vmatprep.mubr.bf16.mxu0 %v19303_v13  ;;  %13956 = vmatpush1.bf16.msra.mxu1 %v17550_v37  ;;  %v19437_v50 = vpop.f32.mrf.mxu0  ;;  %v17231_v37 = vcombine.high %v1366_v30, %v1374_v22  ;;  %v1606_v46 = vld [vmem:[#allocation8 + $0x1910] sm:$0xff]  ;;  %v17486_v47 = vcombine.low %v1622_v23, %v1630_v26 }
 0x31a   :  { %v19439_v10 = vadd.f32 %v13661_v49, %v13621_v48  ;;  %13987 = vmatprep.mubr.bf16.mxu1 %v19305_v14  ;;  %v19442_v61 = vpop.f32.mrf.mxu1  ;;  %13916 = vmatprep.subr.bf16.mxu0 %v17279_v43  ;;  %v17487_v43 = vcombine.high %v1622_v23, %v1630_v26  ;;  %v17215_v48 = vcombine.high %v1350_v44, %v1358_v53  ;;  %v1558_v30 = vld [vmem:[#allocation8 + $0x1790] sm:$0xff] }
 0x31b   :  { %v13624_v4 = vpop.f32.mrf.mxu0  ;;  %13957 = vmatprep.subr.bf16.mxu1 %v17535_v39  ;;  %v1614_v39 = vld [vmem:[#allocation8 + $0x1950] sm:$0xff] }
 0x31c   :  { %v13665_v9 = vpop.f32.mrf.mxu1  ;;  %13917 = vmatpush1.bf16.msra.mxu0 %v17278_v40  ;;  %v17471_v49 = vcombine.high %v1606_v46, %v1614_v39  ;;  %v1334_v40 = vld [vmem:[#allocation8 + $0x1090] sm:$0xff]  ;;  %v17470_v21 = vcombine.low %v1606_v46, %v1614_v39 }
 0x31d   :  { %13958 = vmatpush1.bf16.msra.mxu1 %v17534_v54  ;;  %v13625_v11 = vpop.f32.mrf.mxu0  ;;  %13918 = vmatprep.subr.bf16.mxu0 %v17263_v55  ;;  %v1342_v54 = vld [vmem:[#allocation8 + $0x10d0] sm:$0xff] }
 0x31e   :  { %v13666_v27 = vpop.f32.mrf.mxu1  ;;  %13959 = vmatprep.subr.bf16.mxu1 %v17519_v57  ;;  %v1590_v55 = vld [vmem:[#allocation8 + $0x1890] sm:$0xff]  ;;  %v17199_v4 = vcombine.high %v1334_v40, %v1342_v54 }
 0x31f   :  { %v1598_v57 = vld [vmem:[#allocation8 + $0x18d0] sm:$0xff] }
 0x320   :  { %13919 = vmatpush1.bf16.msra.mxu0 %v17262_v18  ;;  %v17455_v5 = vcombine.high %v1590_v55, %v1598_v57  ;;  %v1326_v9 = vld [vmem:[#allocation8 + $0x1050] sm:$0xff] }
 0x321   :  { %13960 = vmatpush1.bf16.msra.mxu1 %v17518_v12  ;;  %13920 = vmatprep.subr.bf16.mxu0 %v17247_v15  ;;  %v1574_v18 = vld [vmem:[#allocation8 + $0x1810] sm:$0xff]  ;;  %v17198_v12 = vcombine.low %v1334_v40, %v1342_v54  ;;  %v17454_v15 = vcombine.low %v1590_v55, %v1598_v57  ;;  %v17183_v27 = vcombine.high %v1318_v7, %v1326_v9 }
 0x322   :  { %13961 = vmatprep.subr.bf16.mxu1 %v17503_v45  ;;  %v1582_v11 = vld [vmem:[#allocation8 + $0x1850] sm:$0xff] }
 0x323   :  { %v17439_v45 = vcombine.high %v1574_v18, %v1582_v11  ;;  %v1566_v22 = vld [vmem:[#allocation8 + $0x17d0] sm:$0xff] }
 0x324   :  { %13921 = vmatpush1.bf16.msra.mxu0 %v17246_v16  ;;  %v1814_v23 = vld [vmem:[#allocation8 + $0x1f90] sm:$0xff]  ;;  %v17182_v16 = vcombine.low %v1318_v7, %v1326_v9 }
 0x325   :  { %13962 = vmatpush1.bf16.msra.mxu1 %v17502_v36  ;;  %13922 = vmatprep.subr.bf16.mxu0 %v17231_v37  ;;  %v1822_v26 = vld [vmem:[#allocation8 + $0x1fd0] sm:$0xff]  ;;  %v17438_v36 = vcombine.low %v1574_v18, %v1582_v11  ;;  %v17423_v37 = vcombine.high %v1558_v30, %v1566_v22 }
 0x326   :  { %13963 = vmatprep.subr.bf16.mxu1 %v17487_v43  ;;  %v17679_v43 = vcombine.high %v1814_v23, %v1822_v26  ;;  %v1542_v44 = vld [vmem:[#allocation8 + $0x1710] sm:$0xff] }
 0x327   :  { %v1550_v53 = vld [vmem:[#allocation8 + $0x1750] sm:$0xff] }
 0x328   :  { %13923 = vmatpush1.bf16.msra.mxu0 %v17230_v60  ;;  %v1798_v46 = vld [vmem:[#allocation8 + $0x1f10] sm:$0xff]  ;;  %v17422_v60 = vcombine.low %v1558_v30, %v1566_v22 }
 0x329   :  { %13964 = vmatpush1.bf16.msra.mxu1 %v17486_v47  ;;  %13924 = vmatprep.subr.bf16.mxu0 %v17215_v48  ;;  %v1806_v39 = vld [vmem:[#allocation8 + $0x1f50] sm:$0xff]  ;;  %v17678_v47 = vcombine.low %v1814_v23, %v1822_v26  ;;  %v17407_v48 = vcombine.high %v1542_v44, %v1550_v53 }
 0x32a   :  { %13965 = vmatprep.subr.bf16.mxu1 %v17471_v49  ;;  %v17663_v49 = vcombine.high %v1798_v46, %v1806_v39  ;;  %v1526_v40 = vld [vmem:[#allocation8 + $0x1690] sm:$0xff] }
 0x32b   :  { %v1534_v54 = vld [vmem:[#allocation8 + $0x16d0] sm:$0xff] }
 0x32c   :  { %13925 = vmatpush1.bf16.msra.mxu0 %v17214_v0  ;;  %v1782_v55 = vld [vmem:[#allocation8 + $0x1e90] sm:$0xff]  ;;  %v17406_v0 = vcombine.low %v1542_v44, %v1550_v53 }
 0x32d   :  { %13966 = vmatpush1.bf16.msra.mxu1 %v17470_v21  ;;  %13926 = vmatprep.subr.bf16.mxu0 %v17199_v4  ;;  %v1790_v57 = vld [vmem:[#allocation8 + $0x1ed0] sm:$0xff]  ;;  %v17662_v21 = vcombine.low %v1798_v46, %v1806_v39  ;;  %v17391_v4 = vcombine.high %v1526_v40, %v1534_v54 }
 0x32e   :  { %13967 = vmatprep.subr.bf16.mxu1 %v17455_v5  ;;  %v17647_v5 = vcombine.high %v1782_v55, %v1790_v57  ;;  %v1510_v7 = vld [vmem:[#allocation8 + $0x1610] sm:$0xff] }
 0x32f   :  { %v1518_v9 = vld [vmem:[#allocation8 + $0x1650] sm:$0xff] }
 0x330   :  { %13927 = vmatpush1.bf16.msra.mxu0 %v17198_v12  ;;  %v1766_v18 = vld [vmem:[#allocation8 + $0x1e10] sm:$0xff]  ;;  %v17390_v12 = vcombine.low %v1526_v40, %v1534_v54 }
 0x331   :  { %13968 = vmatpush1.bf16.msra.mxu1 %v17454_v15  ;;  %13928 = vmatprep.subr.bf16.mxu0 %v17183_v27  ;;  %v1774_v11 = vld [vmem:[#allocation8 + $0x1e50] sm:$0xff]  ;;  %v17646_v15 = vcombine.low %v1782_v55, %v1790_v57  ;;  %v17375_v27 = vcombine.high %v1510_v7, %v1518_v9 }
 0x332   :  { %13969 = vmatprep.subr.bf16.mxu1 %v17439_v45  ;;  %v17631_v45 = vcombine.high %v1766_v18, %v1774_v11  ;;  %v1494_v30 = vld [vmem:[#allocation8 + $0x1590] sm:$0xff] }
 0x333   :  { %v1502_v22 = vld [vmem:[#allocation8 + $0x15d0] sm:$0xff] }
 0x334   :  { %13929 = vmatpush1.bf16.msra.mxu0 %v17182_v16  ;;  %v1750_v23 = vld [vmem:[#allocation8 + $0x1d90] sm:$0xff]  ;;  %v17374_v16 = vcombine.low %v1510_v7, %v1518_v9 }
 0x335   :  { %13970 = vmatpush1.bf16.msra.mxu1 %v17438_v36  ;;  %13930 = vmatprep.subr.bf16.mxu0 %v17423_v37  ;;  %v1758_v26 = vld [vmem:[#allocation8 + $0x1dd0] sm:$0xff]  ;;  %v17630_v36 = vcombine.low %v1766_v18, %v1774_v11  ;;  %v17359_v37 = vcombine.high %v1494_v30, %v1502_v22 }
 0x336   :  { %13971 = vmatprep.subr.bf16.mxu1 %v17679_v43  ;;  %v17615_v43 = vcombine.high %v1750_v23, %v1758_v26  ;;  %v1478_v44 = vld [vmem:[#allocation8 + $0x1510] sm:$0xff] }
 0x337   :  { %v1486_v53 = vld [vmem:[#allocation8 + $0x1550] sm:$0xff] }
 0x338   :  { %13931 = vmatpush2.bf16.msra.mxu0 %v17422_v60  ;;  %v1734_v46 = vld [vmem:[#allocation8 + $0x1d10] sm:$0xff]  ;;  %v17358_v60 = vcombine.low %v1494_v30, %v1502_v22 }
 0x339   :  { %13972 = vmatpush2.bf16.msra.mxu1 %v17678_v47  ;;  %13932 = vmatprep.subr.bf16.mxu0 %v17407_v48  ;;  %v1742_v39 = vld [vmem:[#allocation8 + $0x1d50] sm:$0xff]  ;;  %v17614_v47 = vcombine.low %v1750_v23, %v1758_v26  ;;  %v17343_v48 = vcombine.high %v1478_v44, %v1486_v53 }
 0x33a   :  { %13973 = vmatprep.subr.bf16.mxu1 %v17663_v49  ;;  %v17599_v49 = vcombine.high %v1734_v46, %v1742_v39  ;;  %v1462_v40 = vld [vmem:[#allocation8 + $0x1490] sm:$0xff] }
 0x33b   :  { %v1470_v54 = vld [vmem:[#allocation8 + $0x14d0] sm:$0xff] }
 0x33c   :  { %13933 = vmatpush2.bf16.msra.mxu0 %v17406_v0  ;;  %v1718_v55 = vld [vmem:[#allocation8 + $0x1c90] sm:$0xff]  ;;  %v17342_v0 = vcombine.low %v1478_v44, %v1486_v53 }
 0x33d   :  { %13974 = vmatpush2.bf16.msra.mxu1 %v17662_v21  ;;  %13934 = vmatprep.subr.bf16.mxu0 %v17391_v4  ;;  %v1726_v57 = vld [vmem:[#allocation8 + $0x1cd0] sm:$0xff]  ;;  %v17598_v21 = vcombine.low %v1734_v46, %v1742_v39  ;;  %v17327_v4 = vcombine.high %v1462_v40, %v1470_v54 }
 0x33e   :  { %13975 = vmatprep.subr.bf16.mxu1 %v17647_v5  ;;  %v2871_v5 = vrot.slane %v19419_v24, %v19267_v32  ;;  %v17583_v7 = vcombine.high %v1718_v55, %v1726_v57  ;;  %v1446_v9 = vld [vmem:[#allocation8 + $0x1410] sm:$0xff] }
 0x33f   :  { %v1454_v18 = vld [vmem:[#allocation8 + $0x1450] sm:$0xff] }
 0x340   :  { %13935 = vmatpush2.bf16.msra.mxu0 %v17390_v12  ;;  %v1702_v11 = vld [vmem:[#allocation8 + $0x1c10] sm:$0xff]  ;;  %v13541_v30 = vadd.f32 %v19426_v51, %v2871_v5 }
 0x341   :  { %13976 = vmatpush2.bf16.msra.mxu1 %v17646_v15  ;;  %13936 = vmatprep.subr.bf16.mxu0 %v17375_v27  ;;  %v1710_v12 = vld [vmem:[#allocation8 + $0x1c50] sm:$0xff]  ;;  %v17326_v15 = vcombine.low %v1462_v40, %v1470_v54  ;;  %v17582_v27 = vcombine.low %v1718_v55, %v1726_v57 }
 0x342   :  { %13977 = vmatprep.subr.bf16.mxu1 %v17631_v45  ;;  %v17311_v45 = vcombine.high %v1446_v9, %v1454_v18  ;;  %v17567_v22 = vcombine.high %v1702_v11, %v1710_v12  ;;  %v1942_v23 = vld [vmem:[#allocation8 + $0x2390] sm:$0xff]  ;;  %v13582_v44 = vadd.f32 %v19431_v58, %v13541_v30 }
 0x343   :  { %v1950_v26 = vld [vmem:[#allocation8 + $0x23d0] sm:$0xff] }
 0x344   :  { %13937 = vmatpush2.bf16.msra.mxu0 %v17374_v16  ;;  %v2198_v16 = vld [vmem:[#allocation8 + $0x2b90] sm:$0xff]  ;;  %v13623_v51 = vadd.f32 %v19437_v50, %v13582_v44 }
 0x345   :  { %13978 = vmatpush2.bf16.msra.mxu1 %v17630_v36  ;;  %13938 = vmatprep.subr.bf16.mxu0 %v17359_v37  ;;  %v2206_v24 = vld [vmem:[#allocation8 + $0x2bd0] sm:$0xff]  ;;  %v17310_v36 = vcombine.low %v1446_v9, %v1454_v18  ;;  %v17566_v37 = vcombine.low %v1702_v11, %v1710_v12 }
 0x346   :  { %13979 = vmatprep.subr.bf16.mxu1 %v17615_v43  ;;  %v17807_v43 = vcombine.high %v1942_v23, %v1950_v26  ;;  %v18063_v53 = vcombine.high %v2198_v16, %v2206_v24  ;;  %v1926_v46 = vld [vmem:[#allocation8 + $0x2310] sm:$0xff] }
 0x347   :  { %v1934_v39 = vld [vmem:[#allocation8 + $0x2350] sm:$0xff] }
 0x348   :  { %13939 = vmatpush2.bf16.msra.mxu0 %v17358_v60  ;;  %v17806_v60 = vcombine.low %v1942_v23, %v1950_v26  ;;  %v17791_v40 = vcombine.high %v1926_v46, %v1934_v39  ;;  %v1910_v54 = vld [vmem:[#allocation8 + $0x2290] sm:$0xff] }
 0x349   :  { %13980 = vmatpush2.bf16.msra.mxu1 %v17614_v47  ;;  %13940 = vmatprep.subr.bf16.mxu0 %v17343_v48  ;;  %v2182_v47 = vld [vmem:[#allocation8 + $0x2b10] sm:$0xff] }
 0x34a   :  { %13981 = vmatprep.subr.bf16.mxu1 %v17599_v49  ;;  %v2190_v48 = vld [vmem:[#allocation8 + $0x2b50] sm:$0xff]  ;;  %v18062_v49 = vcombine.low %v2198_v16, %v2206_v24 }
 0x34b   :  { %v1918_v55 = vld [vmem:[#allocation8 + $0x22d0] sm:$0xff]  ;;  %v18047_v58 = vcombine.high %v2182_v47, %v2190_v48  ;;  %v18046_v18 = vcombine.low %v2182_v47, %v2190_v48 }
 0x34c   :  { %13941 = vmatpush2.bf16.msra.mxu0 %v17342_v0  ;;  %v2166_v0 = vld [vmem:[#allocation8 + $0x2a90] sm:$0xff]  ;;  %v17775_v11 = vcombine.high %v1910_v54, %v1918_v55  ;;  %v17774_v24 = vcombine.low %v1910_v54, %v1918_v55 }
 0x34d   :  { %13982 = vmatpush2.bf16.msra.mxu1 %v17598_v21  ;;  %13942 = vmatprep.subr.bf16.mxu0 %v17327_v4  ;;  %v2174_v21 = vld [vmem:[#allocation8 + $0x2ad0] sm:$0xff]  ;;  %v13664_v4 = vadd.f32 %v19442_v61, %v13623_v51 }
 0x34e   :  { %13983 = vmatprep.subr.bf16.mxu1 %v17583_v7  ;;  %v17790_v7 = vcombine.low %v1926_v46, %v1934_v39  ;;  %v18031_v61 = vcombine.high %v2166_v0, %v2174_v21  ;;  %v2158_v23 = vld [vmem:[#allocation8 + $0x2a50] sm:$0xff] }
 0x34f   :  { %v1878_v46 = vld [vmem:[#allocation8 + $0x2190] sm:$0xff] }
 0x350   :  { %13943 = vmatpush2.bf16.msra.mxu0 %v17326_v15  ;;  %v1886_v39 = vld [vmem:[#allocation8 + $0x21d0] sm:$0xff] }
 0x351   :  { %13984 = vmatpush2.bf16.msra.mxu1 %v17582_v27  ;;  %13944 = vmatprep.subr.bf16.mxu0 %v17311_v45  ;;  %v1902_v45 = vld [vmem:[#allocation8 + $0x2250] sm:$0xff] }
 0x352   :  { %13985 = vmatprep.subr.bf16.mxu1 %v17567_v22  ;;  %v2150_v22 = vld [vmem:[#allocation8 + $0x2a10] sm:$0xff] }
 0x353   :  { %v2134_v51 = vld [vmem:[#allocation8 + $0x2990] sm:$0xff]  ;;  %v18014_v48 = vcombine.low %v2150_v22, %v2158_v23 }
 0x354   :  { %13945 = vmatpush2.bf16.msra.mxu0 %v17310_v36  ;;  %v1862_v54 = vld [vmem:[#allocation8 + $0x2110] sm:$0xff] }
 0x355   :  { %13986 = vmatpush2.bf16.msra.mxu1 %v17566_v37  ;;  %13996 = vmatprep.subr.bf16.mxu0 %v17807_v43  ;;  %v18030_v37 = vcombine.low %v2166_v0, %v2174_v21  ;;  %v1870_v55 = vld [vmem:[#allocation8 + $0x2150] sm:$0xff]  ;;  %v17742_v0 = vcombine.low %v1878_v46, %v1886_v39 }
 0x356   :  { %14037 = vmatprep.subr.bf16.mxu1 %v18063_v53  ;;  %v18015_v53 = vcombine.high %v2150_v22, %v2158_v23  ;;  %v2094_v22 = vld [vmem:[#allocation8 + $0x2850] sm:$0xff] }
 0x357   :  { %v13702_v57 = vpop.f32.mrf.mxu0  ;;  %13947 = vmatmul.mubr.bf16.vlgmr.msra.gmra.mxu0 %v19333_v6 }
 0x358   :  { %v13703_v50 = vadd.f32 %v13702_v57, %v19439_v10  ;;  %v13743_v5 = vpop.f32.mrf.mxu1  ;;  %13988 = vmatmul.mubr.bf16.vlgmr.msra.gmra.mxu1 %v19331_v1  ;;  %13997 = vmatpush1.bf16.msra.mxu0 %v17806_v60  ;;  %v1894_v10 = vld [vmem:[#allocation8 + $0x2210] sm:$0xff] }
 0x359   :  { %14028 = vmatprep.mubr.bf16.mxu0 %v19335_v19  ;;  %14038 = vmatpush1.bf16.msra.mxu1 %v18062_v49  ;;  %v13704_v9 = vpop.f32.mrf.mxu0  ;;  %v17759_v43 = vcombine.high %v1894_v10, %v1902_v45  ;;  %v2142_v60 = vld [vmem:[#allocation8 + $0x29d0] sm:$0xff]  ;;  %v17758_v47 = vcombine.low %v1894_v10, %v1902_v45  ;;  %v17743_v49 = vcombine.high %v1878_v46, %v1886_v39 }
 0x35a   :  { %v19454_v12 = vadd.f32 %v13743_v5, %v13703_v50  ;;  %14069 = vmatprep.mubr.bf16.mxu1 %v19337_v20  ;;  %v13705_v15 = vadd.f32 %v13704_v9, %v13664_v4  ;;  %v13745_v27 = vpop.f32.mrf.mxu1  ;;  %13998 = vmatprep.subr.bf16.mxu0 %v17791_v40  ;;  %v17999_v40 = vcombine.high %v2134_v51, %v2142_v60  ;;  %v2118_v57 = vld [vmem:[#allocation8 + $0x2910] sm:$0xff] }
 0x35b   :  { %v13706_v30 = vpop.f32.mrf.mxu0  ;;  %14039 = vmatprep.subr.bf16.mxu1 %v18047_v58  ;;  %v2126_v58 = vld [vmem:[#allocation8 + $0x2950] sm:$0xff]  ;;  %v17998_v21 = vcombine.low %v2134_v51, %v2142_v60  ;;  %v17727_v4 = vcombine.high %v1862_v54, %v1870_v55 }
 0x35c   :  { %v19457_v26 = vadd.f32 %v13745_v27, %v13705_v15  ;;  %v13747_v16 = vpop.f32.mrf.mxu1  ;;  %13999 = vmatpush1.bf16.msra.mxu0 %v17790_v7  ;;  %v17983_v50 = vcombine.high %v2118_v57, %v2126_v58  ;;  %v1846_v5 = vld [vmem:[#allocation8 + $0x2090] sm:$0xff]  ;;  %v17982_v15 = vcombine.low %v2118_v57, %v2126_v58 }
 0x35d   :  { %14040 = vmatpush1.bf16.msra.mxu1 %v18046_v18  ;;  %v13707_v36 = vpop.f32.mrf.mxu0  ;;  %14000 = vmatprep.subr.bf16.mxu0 %v17775_v11  ;;  %v1854_v7 = vld [vmem:[#allocation8 + $0x20d0] sm:$0xff]  ;;  %v17726_v11 = vcombine.low %v1862_v54, %v1870_v55 }
 0x35e   :  { %v13748_v44 = vpop.f32.mrf.mxu1  ;;  %14041 = vmatprep.subr.bf16.mxu1 %v18031_v61  ;;  %v2102_v9 = vld [vmem:[#allocation8 + $0x2890] sm:$0xff]  ;;  %v17711_v27 = vcombine.high %v1846_v5, %v1854_v7  ;;  %v17710_v23 = vcombine.low %v1846_v5, %v1854_v7 }
 0x35f   :  { %v2110_v18 = vld [vmem:[#allocation8 + $0x28d0] sm:$0xff] }
 0x360   :  { %14001 = vmatpush1.bf16.msra.mxu0 %v17774_v24  ;;  %v17967_v61 = vcombine.high %v2102_v9, %v2110_v18  ;;  %v1830_v10 = vld [vmem:[#allocation8 + $0x2010] sm:$0xff]  ;;  %v17966_v16 = vcombine.low %v2102_v9, %v2110_v18 }
 0x361   :  { %14042 = vmatpush1.bf16.msra.mxu1 %v18030_v37  ;;  %14002 = vmatprep.subr.bf16.mxu0 %v17759_v43  ;;  %v1838_v45 = vld [vmem:[#allocation8 + $0x2050] sm:$0xff] }
 0x362   :  { %14043 = vmatprep.subr.bf16.mxu1 %v18015_v53  ;;  %v2086_v30 = vld [vmem:[#allocation8 + $0x2810] sm:$0xff]  ;;  %v17695_v24 = vcombine.high %v1830_v10, %v1838_v45  ;;  %v17694_v46 = vcombine.low %v1830_v10, %v1838_v45 }
 0x363   :  { %v17951_v36 = vcombine.high %v2086_v30, %v2094_v22  ;;  %v2070_v37 = vld [vmem:[#allocation8 + $0x2790] sm:$0xff]  ;;  %v17950_v39 = vcombine.low %v2086_v30, %v2094_v22 }
 0x364   :  { %14003 = vmatpush1.bf16.msra.mxu0 %v17758_v47  ;;  %v2078_v43 = vld [vmem:[#allocation8 + $0x27d0] sm:$0xff] }
 0x365   :  { %14044 = vmatpush1.bf16.msra.mxu1 %v18014_v48  ;;  %14004 = vmatprep.subr.bf16.mxu0 %v17743_v49  ;;  %v2326_v44 = vld [vmem:[#allocation8 + $0x2f90] sm:$0xff]  ;;  %v17935_v51 = vcombine.high %v2070_v37, %v2078_v43  ;;  %v17934_v54 = vcombine.low %v2070_v37, %v2078_v43 }
 0x366   :  { %14045 = vmatprep.subr.bf16.mxu1 %v17999_v40  ;;  %v2334_v53 = vld [vmem:[#allocation8 + $0x2fd0] sm:$0xff] }
 0x367   :  { %v18191_v60 = vcombine.high %v2326_v44, %v2334_v53  ;;  %v2054_v47 = vld [vmem:[#allocation8 + $0x2710] sm:$0xff]  ;;  %v18190_v55 = vcombine.low %v2326_v44, %v2334_v53 }
 0x368   :  { %14005 = vmatpush1.bf16.msra.mxu0 %v17742_v0  ;;  %v2062_v48 = vld [vmem:[#allocation8 + $0x2750] sm:$0xff] }
 0x369   :  { %14046 = vmatpush1.bf16.msra.mxu1 %v17998_v21  ;;  %14006 = vmatprep.subr.bf16.mxu0 %v17727_v4  ;;  %v2310_v49 = vld [vmem:[#allocation8 + $0x2f10] sm:$0xff]  ;;  %v17919_v57 = vcombine.high %v2054_v47, %v2062_v48  ;;  %v17918_v5 = vcombine.low %v2054_v47, %v2062_v48 }
 0x36a   :  { %14047 = vmatprep.subr.bf16.mxu1 %v17983_v50  ;;  %v2318_v40 = vld [vmem:[#allocation8 + $0x2f50] sm:$0xff] }
 0x36b   :  { %v18175_v58 = vcombine.high %v2310_v49, %v2318_v40  ;;  %v2038_v0 = vld [vmem:[#allocation8 + $0x2690] sm:$0xff]  ;;  %v18174_v7 = vcombine.low %v2310_v49, %v2318_v40 }
 0x36c   :  { %14007 = vmatpush1.bf16.msra.mxu0 %v17726_v11  ;;  %v2046_v21 = vld [vmem:[#allocation8 + $0x26d0] sm:$0xff] }
 0x36d   :  { %14048 = vmatpush1.bf16.msra.mxu1 %v17982_v15  ;;  %14008 = vmatprep.subr.bf16.mxu0 %v17711_v27  ;;  %v2294_v4 = vld [vmem:[#allocation8 + $0x2e90] sm:$0xff]  ;;  %v17903_v9 = vcombine.high %v2038_v0, %v2046_v21  ;;  %v17902_v10 = vcombine.low %v2038_v0, %v2046_v21 }
 0x36e   :  { %14049 = vmatprep.subr.bf16.mxu1 %v17967_v61  ;;  %v2302_v50 = vld [vmem:[#allocation8 + $0x2ed0] sm:$0xff] }
 0x36f   :  { %v18159_v18 = vcombine.high %v2294_v4, %v2302_v50  ;;  %v2022_v11 = vld [vmem:[#allocation8 + $0x2610] sm:$0xff]  ;;  %v18158_v45 = vcombine.low %v2294_v4, %v2302_v50 }
 0x370   :  { %14009 = vmatpush1.bf16.msra.mxu0 %v17710_v23  ;;  %v2030_v15 = vld [vmem:[#allocation8 + $0x2650] sm:$0xff] }
 0x371   :  { %14050 = vmatpush1.bf16.msra.mxu1 %v17966_v16  ;;  %14010 = vmatprep.subr.bf16.mxu0 %v17695_v24  ;;  %v2278_v27 = vld [vmem:[#allocation8 + $0x2e10] sm:$0xff]  ;;  %v17887_v30 = vcombine.high %v2022_v11, %v2030_v15  ;;  %v17886_v37 = vcombine.low %v2022_v11, %v2030_v15 }
 0x372   :  { %14051 = vmatprep.subr.bf16.mxu1 %v17951_v36  ;;  %v2286_v61 = vld [vmem:[#allocation8 + $0x2e50] sm:$0xff] }
 0x373   :  { %v18143_v22 = vcombine.high %v2278_v27, %v2286_v61  ;;  %v2006_v23 = vld [vmem:[#allocation8 + $0x2590] sm:$0xff]  ;;  %v18142_v43 = vcombine.low %v2278_v27, %v2286_v61 }
 0x374   :  { %14011 = vmatpush1.bf16.msra.mxu0 %v17694_v46  ;;  %v2014_v16 = vld [vmem:[#allocation8 + $0x25d0] sm:$0xff] }
 0x375   :  { %14052 = vmatpush1.bf16.msra.mxu1 %v17950_v39  ;;  %14012 = vmatprep.subr.bf16.mxu0 %v17935_v51  ;;  %v2262_v24 = vld [vmem:[#allocation8 + $0x2d90] sm:$0xff]  ;;  %v17871_v44 = vcombine.high %v2006_v23, %v2014_v16  ;;  %v17870_v47 = vcombine.low %v2006_v23, %v2014_v16 }
 0x376   :  { %14053 = vmatprep.subr.bf16.mxu1 %v18191_v60  ;;  %v2270_v36 = vld [vmem:[#allocation8 + $0x2dd0] sm:$0xff] }
 0x377   :  { %v18127_v53 = vcombine.high %v2262_v24, %v2270_v36  ;;  %v1990_v46 = vld [vmem:[#allocation8 + $0x2510] sm:$0xff]  ;;  %v18126_v48 = vcombine.low %v2262_v24, %v2270_v36 }
 0x378   :  { %14013 = vmatpush2.bf16.msra.mxu0 %v17934_v54  ;;  %v1998_v39 = vld [vmem:[#allocation8 + $0x2550] sm:$0xff] }
 0x379   :  { %14054 = vmatpush2.bf16.msra.mxu1 %v18190_v55  ;;  %14014 = vmatprep.subr.bf16.mxu0 %v17919_v57  ;;  %v2246_v51 = vld [vmem:[#allocation8 + $0x2d10] sm:$0xff]  ;;  %v17855_v49 = vcombine.high %v1990_v46, %v1998_v39  ;;  %v17854_v0 = vcombine.low %v1990_v46, %v1998_v39 }
 0x37a   :  { %14055 = vmatprep.subr.bf16.mxu1 %v18175_v58  ;;  %v2254_v60 = vld [vmem:[#allocation8 + $0x2d50] sm:$0xff] }
 0x37b   :  { %v18111_v40 = vcombine.high %v2246_v51, %v2254_v60  ;;  %v1974_v54 = vld [vmem:[#allocation8 + $0x2490] sm:$0xff]  ;;  %v18110_v21 = vcombine.low %v2246_v51, %v2254_v60 }
 0x37c   :  { %14015 = vmatpush2.bf16.msra.mxu0 %v17918_v5  ;;  %v1982_v55 = vld [vmem:[#allocation8 + $0x24d0] sm:$0xff] }
 0x37d   :  { %14056 = vmatpush2.bf16.msra.mxu1 %v18174_v7  ;;  %14016 = vmatprep.subr.bf16.mxu0 %v17903_v9  ;;  %v2230_v57 = vld [vmem:[#allocation8 + $0x2c90] sm:$0xff]  ;;  %v17839_v4 = vcombine.high %v1974_v54, %v1982_v55  ;;  %v17838_v11 = vcombine.low %v1974_v54, %v1982_v55 }
 0x37e   :  { %14057 = vmatprep.subr.bf16.mxu1 %v18159_v18  ;;  %v2238_v58 = vld [vmem:[#allocation8 + $0x2cd0] sm:$0xff] }
 0x37f   :  { %v18095_v50 = vcombine.high %v2230_v57, %v2238_v58  ;;  %v1958_v5 = vld [vmem:[#allocation8 + $0x2410] sm:$0xff]  ;;  %v18094_v15 = vcombine.low %v2230_v57, %v2238_v58 }
 0x380   :  { %14017 = vmatpush2.bf16.msra.mxu0 %v17902_v10  ;;  %v1966_v7 = vld [vmem:[#allocation8 + $0x2450] sm:$0xff] }
 0x381   :  { %14058 = vmatpush2.bf16.msra.mxu1 %v18158_v45  ;;  %14018 = vmatprep.subr.bf16.mxu0 %v17887_v30  ;;  %v2214_v9 = vld [vmem:[#allocation8 + $0x2c10] sm:$0xff]  ;;  %v17823_v27 = vcombine.high %v1958_v5, %v1966_v7  ;;  %v17822_v23 = vcombine.low %v1958_v5, %v1966_v7 }
 0x382   :  { %14059 = vmatprep.subr.bf16.mxu1 %v18143_v22  ;;  %v2222_v18 = vld [vmem:[#allocation8 + $0x2c50] sm:$0xff] }
 0x383   :  { %v18079_v61 = vcombine.high %v2214_v9, %v2222_v18  ;;  %v2454_v10 = vld [vmem:[#allocation8 + $0x3390] sm:$0xff]  ;;  %v18078_v16 = vcombine.low %v2214_v9, %v2222_v18 }
 0x384   :  { %14019 = vmatpush2.bf16.msra.mxu0 %v17886_v37  ;;  %v2462_v45 = vld [vmem:[#allocation8 + $0x33d0] sm:$0xff] }
 0x385   :  { %14060 = vmatpush2.bf16.msra.mxu1 %v18142_v43  ;;  %14020 = vmatprep.subr.bf16.mxu0 %v17871_v44  ;;  %v2710_v30 = vld [vmem:[#allocation8 + $0x3b90] sm:$0xff]  ;;  %v18319_v24 = vcombine.high %v2454_v10, %v2462_v45  ;;  %v18318_v44 = vcombine.low %v2454_v10, %v2462_v45 }
 0x386   :  { %14061 = vmatprep.subr.bf16.mxu1 %v18127_v53  ;;  %v2718_v22 = vld [vmem:[#allocation8 + $0x3bd0] sm:$0xff] }
 0x387   :  { %v18575_v36 = vcombine.high %v2710_v30, %v2718_v22  ;;  %v2438_v37 = vld [vmem:[#allocation8 + $0x3310] sm:$0xff]  ;;  %v18574_v39 = vcombine.low %v2710_v30, %v2718_v22 }
 0x388   :  { %14021 = vmatpush2.bf16.msra.mxu0 %v17870_v47  ;;  %v2446_v43 = vld [vmem:[#allocation8 + $0x3350] sm:$0xff] }
 0x389   :  { %14062 = vmatpush2.bf16.msra.mxu1 %v18126_v48  ;;  %14022 = vmatprep.subr.bf16.mxu0 %v17855_v49  ;;  %v2694_v53 = vld [vmem:[#allocation8 + $0x3b10] sm:$0xff]  ;;  %v18303_v51 = vcombine.high %v2438_v37, %v2446_v43  ;;  %v18302_v58 = vcombine.low %v2438_v37, %v2446_v43 }
 0x38a   :  { %14063 = vmatprep.subr.bf16.mxu1 %v18111_v40  ;;  %v2702_v46 = vld [vmem:[#allocation8 + $0x3b50] sm:$0xff] }
 0x38b   :  { %v2422_v60 = vld [vmem:[#allocation8 + $0x3290] sm:$0xff]  ;;  %v18559_v49 = vcombine.high %v2694_v53, %v2702_v46 }
 0x38c   :  { %14023 = vmatpush2.bf16.msra.mxu0 %v17854_v0  ;;  %v2430_v47 = vld [vmem:[#allocation8 + $0x32d0] sm:$0xff] }
 0x38d   :  { %14064 = vmatpush2.bf16.msra.mxu1 %v18110_v21  ;;  %14024 = vmatprep.subr.bf16.mxu0 %v17839_v4  ;;  %v2678_v40 = vld [vmem:[#allocation8 + $0x3a90] sm:$0xff]  ;;  %v18558_v21 = vcombine.low %v2694_v53, %v2702_v46  ;;  %v18287_v4 = vcombine.high %v2422_v60, %v2430_v47  ;;  %v18286_v45 = vcombine.low %v2422_v60, %v2430_v47 }
 0x38e   :  { %14065 = vmatprep.subr.bf16.mxu1 %v18095_v50  ;;  %v2686_v54 = vld [vmem:[#allocation8 + $0x3ad0] sm:$0xff] }
 0x38f   :  { %v2406_v9 = vld [vmem:[#allocation8 + $0x3210] sm:$0xff]  ;;  %v18542_v22 = vcombine.low %v2678_v40, %v2686_v54 }
 0x390   :  { %14025 = vmatpush2.bf16.msra.mxu0 %v17838_v11  ;;  %v2414_v18 = vld [vmem:[#allocation8 + $0x3250] sm:$0xff] }
 0x391   :  { %14066 = vmatpush2.bf16.msra.mxu1 %v18094_v15  ;;  %14026 = vmatprep.subr.bf16.mxu0 %v17823_v27  ;;  %v2662_v15 = vld [vmem:[#allocation8 + $0x3a10] sm:$0xff] }
 0x392   :  { %14067 = vmatprep.subr.bf16.mxu1 %v18079_v61  ;;  %v2670_v27 = vld [vmem:[#allocation8 + $0x3a50] sm:$0xff] }
 0x393   :  { %v2646_v37 = vld [vmem:[#allocation8 + $0x3990] sm:$0xff]  ;;  %v18526_v53 = vcombine.low %v2662_v15, %v2670_v27 }
 0x394   :  { %14027 = vmatpush2.bf16.msra.mxu0 %v17822_v23  ;;  %v18271_v23 = vcombine.high %v2406_v9, %v2414_v18  ;;  %v2654_v43 = vld [vmem:[#allocation8 + $0x39d0] sm:$0xff] }
 0x395   :  { %14068 = vmatpush2.bf16.msra.mxu1 %v18078_v16  ;;  %14078 = vmatprep.subr.bf16.mxu0 %v18319_v24  ;;  %v18527_v16 = vcombine.high %v2662_v15, %v2670_v27  ;;  %v2390_v24 = vld [vmem:[#allocation8 + $0x3190] sm:$0xff] }
 0x396   :  { %14119 = vmatprep.subr.bf16.mxu1 %v18575_v36  ;;  %v2398_v36 = vld [vmem:[#allocation8 + $0x31d0] sm:$0xff] }
 0x397   :  { %v13784_v48 = vpop.f32.mrf.mxu0  ;;  %14029 = vmatmul.mubr.bf16.vlgmr.msra.gmra.mxu0 %v19359_v34  ;;  %v18255_v46 = vcombine.high %v2390_v24, %v2398_v36  ;;  %v2382_v60 = vld [vmem:[#allocation8 + $0x3150] sm:$0xff] }
 0x398   :  { %v13785_v55 = vadd.f32 %v13784_v48, %v19454_v12  ;;  %v13825_v57 = vpop.f32.mrf.mxu1  ;;  %14070 = vmatmul.mubr.bf16.vlgmr.msra.gmra.mxu1 %v19357_v25  ;;  %14079 = vmatpush1.bf16.msra.mxu0 %v18318_v44  ;;  %v18543_v12 = vcombine.high %v2678_v40, %v2686_v54  ;;  %v18270_v44 = vcombine.low %v2406_v9, %v2414_v18  ;;  %v2630_v47 = vld [vmem:[#allocation8 + $0x3910] sm:$0xff] }
 0x399   :  { %14110 = vmatprep.mubr.bf16.mxu0 %v19361_v41  ;;  %14120 = vmatpush1.bf16.msra.mxu1 %v18574_v39  ;;  %v13786_v0 = vpop.f32.mrf.mxu0  ;;  %v18511_v39 = vcombine.high %v2646_v37, %v2654_v43  ;;  %v2638_v48 = vld [vmem:[#allocation8 + $0x3950] sm:$0xff]  ;;  %v18510_v40 = vcombine.low %v2646_v37, %v2654_v43 }
 0x39a   :  { %v19463_v50 = vadd.f32 %v13825_v57, %v13785_v55  ;;  %14151 = vmatprep.mubr.bf16.mxu1 %v19363_v42  ;;  %v13787_v5 = vadd.f32 %v13786_v0, %v19457_v26  ;;  %v13827_v7 = vpop.f32.mrf.mxu1  ;;  %14080 = vmatprep.subr.bf16.mxu0 %v18303_v51  ;;  %v2374_v51 = vld [vmem:[#allocation8 + $0x3110] sm:$0xff]  ;;  %v18495_v55 = vcombine.high %v2630_v47, %v2638_v48 }
 0x39b   :  { %v13788_v11 = vpop.f32.mrf.mxu0  ;;  %14121 = vmatprep.subr.bf16.mxu1 %v18559_v49  ;;  %v18254_v49 = vcombine.low %v2390_v24, %v2398_v36  ;;  %v18239_v54 = vcombine.high %v2374_v51, %v2382_v60  ;;  %v2358_v57 = vld [vmem:[#allocation8 + $0x3090] sm:$0xff] }
 0x39c   :  { %v19467_v61 = vadd.f32 %v13827_v7, %v13787_v5  ;;  %v13829_v10 = vpop.f32.mrf.mxu1  ;;  %14081 = vmatpush1.bf16.msra.mxu0 %v18302_v58  ;;  %v2366_v58 = vld [vmem:[#allocation8 + $0x30d0] sm:$0xff]  ;;  %v18494_v5 = vcombine.low %v2630_v47, %v2638_v48 }
 0x39d   :  { %14122 = vmatpush1.bf16.msra.mxu1 %v18558_v21  ;;  %v13789_v30 = vpop.f32.mrf.mxu0  ;;  %14082 = vmatprep.subr.bf16.mxu0 %v18287_v4  ;;  %v2614_v0 = vld [vmem:[#allocation8 + $0x3890] sm:$0xff]  ;;  %v18238_v4 = vcombine.low %v2374_v51, %v2382_v60  ;;  %v18223_v7 = vcombine.high %v2358_v57, %v2366_v58  ;;  %v18222_v27 = vcombine.low %v2358_v57, %v2366_v58 }
 0x39e   :  { %v13830_v26 = vpop.f32.mrf.mxu1  ;;  %14123 = vmatprep.subr.bf16.mxu1 %v18543_v12  ;;  %v2622_v21 = vld [vmem:[#allocation8 + $0x38d0] sm:$0xff] }
 0x39f   :  { %v18479_v12 = vcombine.high %v2614_v0, %v2622_v21  ;;  %v2342_v9 = vld [vmem:[#allocation8 + $0x3010] sm:$0xff]  ;;  %v18478_v10 = vcombine.low %v2614_v0, %v2622_v21 }
 0x3a0   :  { %14083 = vmatpush1.bf16.msra.mxu0 %v18286_v45  ;;  %v2350_v18 = vld [vmem:[#allocation8 + $0x3050] sm:$0xff] }
 0x3a1   :  { %14124 = vmatpush1.bf16.msra.mxu1 %v18542_v22  ;;  %14084 = vmatprep.subr.bf16.mxu0 %v18271_v23  ;;  %v2598_v11 = vld [vmem:[#allocation8 + $0x3810] sm:$0xff]  ;;  %v18207_v45 = vcombine.high %v2342_v9, %v2350_v18  ;;  %v18206_v24 = vcombine.low %v2342_v9, %v2350_v18 }
 0x3a2   :  { %14125 = vmatprep.subr.bf16.mxu1 %v18527_v16  ;;  %v2606_v15 = vld [vmem:[#allocation8 + $0x3850] sm:$0xff] }
 0x3a3   :  { %v18463_v30 = vcombine.high %v2598_v11, %v2606_v15  ;;  %v2582_v22 = vld [vmem:[#allocation8 + $0x3790] sm:$0xff]  ;;  %v18462_v36 = vcombine.low %v2598_v11, %v2606_v15 }
 0x3a4   :  { %14085 = vmatpush1.bf16.msra.mxu0 %v18270_v44  ;;  %v2590_v23 = vld [vmem:[#allocation8 + $0x37d0] sm:$0xff] }
 0x3a5   :  { %14126 = vmatpush1.bf16.msra.mxu1 %v18526_v53  ;;  %14086 = vmatprep.subr.bf16.mxu0 %v18255_v46  ;;  %v2838_v26 = vld [vmem:[#allocation8 + $0x3f90] sm:$0xff]  ;;  %v18447_v37 = vcombine.high %v2582_v22, %v2590_v23  ;;  %v18446_v51 = vcombine.low %v2582_v22, %v2590_v23 }
 0x3a6   :  { %14127 = vmatprep.subr.bf16.mxu1 %v18511_v39  ;;  %v2846_v16 = vld [vmem:[#allocation8 + $0x3fd0] sm:$0xff] }
 0x3a7   :  { %v18703_v43 = vcombine.high %v2838_v26, %v2846_v16  ;;  %v2566_v44 = vld [vmem:[#allocation8 + $0x3710] sm:$0xff]  ;;  %v18702_v60 = vcombine.low %v2838_v26, %v2846_v16 }
 0x3a8   :  { %14087 = vmatpush1.bf16.msra.mxu0 %v18254_v49  ;;  %v2574_v53 = vld [vmem:[#allocation8 + $0x3750] sm:$0xff] }
 0x3a9   :  { %14128 = vmatpush1.bf16.msra.mxu1 %v18510_v40  ;;  %14088 = vmatprep.subr.bf16.mxu0 %v18239_v54  ;;  %v2822_v46 = vld [vmem:[#allocation8 + $0x3f10] sm:$0xff]  ;;  %v18431_v47 = vcombine.high %v2566_v44, %v2574_v53  ;;  %v18430_v57 = vcombine.low %v2566_v44, %v2574_v53 }
 0x3aa   :  { %14129 = vmatprep.subr.bf16.mxu1 %v18495_v55  ;;  %v2830_v39 = vld [vmem:[#allocation8 + $0x3f50] sm:$0xff] }
 0x3ab   :  { %v18687_v48 = vcombine.high %v2822_v46, %v2830_v39  ;;  %v2550_v49 = vld [vmem:[#allocation8 + $0x3690] sm:$0xff]  ;;  %v18686_v58 = vcombine.low %v2822_v46, %v2830_v39 }
 0x3ac   :  { %14089 = vmatpush1.bf16.msra.mxu0 %v18238_v4  ;;  %v2558_v40 = vld [vmem:[#allocation8 + $0x36d0] sm:$0xff] }
 0x3ad   :  { %14130 = vmatpush1.bf16.msra.mxu1 %v18494_v5  ;;  %14090 = vmatprep.subr.bf16.mxu0 %v18223_v7  ;;  %v2806_v54 = vld [vmem:[#allocation8 + $0x3e90] sm:$0xff]  ;;  %v18415_v0 = vcombine.high %v2550_v49, %v2558_v40  ;;  %v18414_v9 = vcombine.low %v2550_v49, %v2558_v40 }
 0x3ae   :  { %14131 = vmatprep.subr.bf16.mxu1 %v18479_v12  ;;  %v2814_v55 = vld [vmem:[#allocation8 + $0x3ed0] sm:$0xff] }
 0x3af   :  { %v18671_v21 = vcombine.high %v2806_v54, %v2814_v55  ;;  %v2534_v4 = vld [vmem:[#allocation8 + $0x3610] sm:$0xff]  ;;  %v18670_v18 = vcombine.low %v2806_v54, %v2814_v55 }
 0x3b0   :  { %14091 = vmatpush1.bf16.msra.mxu0 %v18222_v27  ;;  %v2542_v5 = vld [vmem:[#allocation8 + $0x3650] sm:$0xff] }
 0x3b1   :  { %14132 = vmatpush1.bf16.msra.mxu1 %v18478_v10  ;;  %14092 = vmatprep.subr.bf16.mxu0 %v18207_v45  ;;  %v2790_v7 = vld [vmem:[#allocation8 + $0x3e10] sm:$0xff]  ;;  %v18399_v11 = vcombine.high %v2534_v4, %v2542_v5  ;;  %v18398_v22 = vcombine.low %v2534_v4, %v2542_v5 }
 0x3b2   :  { %14133 = vmatprep.subr.bf16.mxu1 %v18463_v30  ;;  %v2798_v12 = vld [vmem:[#allocation8 + $0x3e50] sm:$0xff] }
 0x3b3   :  { %v18655_v15 = vcombine.high %v2790_v7, %v2798_v12  ;;  %v2518_v27 = vld [vmem:[#allocation8 + $0x3590] sm:$0xff]  ;;  %v18654_v23 = vcombine.low %v2790_v7, %v2798_v12 }
 0x3b4   :  { %14093 = vmatpush1.bf16.msra.mxu0 %v18206_v24  ;;  %v2526_v10 = vld [vmem:[#allocation8 + $0x35d0] sm:$0xff] }
 0x3b5   :  { %14134 = vmatpush1.bf16.msra.mxu1 %v18462_v36  ;;  %14094 = vmatprep.subr.bf16.mxu0 %v18447_v37  ;;  %v2774_v45 = vld [vmem:[#allocation8 + $0x3d90] sm:$0xff]  ;;  %v18383_v26 = vcombine.high %v2518_v27, %v2526_v10  ;;  %v18382_v44 = vcombine.low %v2518_v27, %v2526_v10 }
 0x3b6   :  { %14135 = vmatprep.subr.bf16.mxu1 %v18703_v43  ;;  %v2782_v30 = vld [vmem:[#allocation8 + $0x3dd0] sm:$0xff] }
 0x3b7   :  { %v18639_v16 = vcombine.high %v2774_v45, %v2782_v30  ;;  %v2502_v24 = vld [vmem:[#allocation8 + $0x3510] sm:$0xff]  ;;  %v18638_v53 = vcombine.low %v2774_v45, %v2782_v30 }
 0x3b8   :  { %14095 = vmatpush2.bf16.msra.mxu0 %v18446_v51  ;;  %v2510_v36 = vld [vmem:[#allocation8 + $0x3550] sm:$0xff] }
 0x3b9   :  { %14136 = vmatpush2.bf16.msra.mxu1 %v18702_v60  ;;  %14096 = vmatprep.subr.bf16.mxu0 %v18431_v47  ;;  %v2758_v37 = vld [vmem:[#allocation8 + $0x3d10] sm:$0xff]  ;;  %v18367_v46 = vcombine.high %v2502_v24, %v2510_v36  ;;  %v18366_v49 = vcombine.low %v2502_v24, %v2510_v36  ;;  %v1159_v36 = vld [vmem:[#allocation8 + $0xb18] sm:$0xff] }
 0x3ba   :  { %14137 = vmatprep.subr.bf16.mxu1 %v18687_v48  ;;  %v2766_v43 = vld [vmem:[#allocation8 + $0x3d50] sm:$0xff] }
 0x3bb   :  { %v18623_v39 = vcombine.high %v2758_v37, %v2766_v43  ;;  %v2486_v51 = vld [vmem:[#allocation8 + $0x3490] sm:$0xff]  ;;  %v18622_v40 = vcombine.low %v2758_v37, %v2766_v43  ;;  %v1167_v37 = vld [vmem:[#allocation8 + $0xb58] sm:$0xff] }
 0x3bc   :  { %14097 = vmatpush2.bf16.msra.mxu0 %v18430_v57  ;;  %v2494_v60 = vld [vmem:[#allocation8 + $0x34d0] sm:$0xff] }
 0x3bd   :  { %14138 = vmatpush2.bf16.msra.mxu1 %v18686_v58  ;;  %14098 = vmatprep.subr.bf16.mxu0 %v18415_v0  ;;  %v2742_v47 = vld [vmem:[#allocation8 + $0x3c90] sm:$0xff]  ;;  %v18351_v54 = vcombine.high %v2486_v51, %v2494_v60  ;;  %v18350_v4 = vcombine.low %v2486_v51, %v2494_v60  ;;  %v17025_v60 = vcombine.high %v1159_v36, %v1167_v37 }
 0x3be   :  { %14139 = vmatprep.subr.bf16.mxu1 %v18671_v21  ;;  %v2750_v48 = vld [vmem:[#allocation8 + $0x3cd0] sm:$0xff] }
 0x3bf   :  { %v18607_v55 = vcombine.high %v2742_v47, %v2750_v48  ;;  %v2470_v57 = vld [vmem:[#allocation8 + $0x3410] sm:$0xff]  ;;  %v18606_v5 = vcombine.low %v2742_v47, %v2750_v48  ;;  %v1143_v47 = vld [vmem:[#allocation8 + $0xa98] sm:$0xff] }
 0x3c0   :  { %14099 = vmatpush2.bf16.msra.mxu0 %v18414_v9  ;;  %v2478_v58 = vld [vmem:[#allocation8 + $0x3450] sm:$0xff]  ;;  %v919_v9 = vld [vmem:[#allocation8 + $0x398] sm:$0xff] }
 0x3c1   :  { %14140 = vmatpush2.bf16.msra.mxu1 %v18670_v18  ;;  %14100 = vmatprep.subr.bf16.mxu0 %v18399_v11  ;;  %v2726_v0 = vld [vmem:[#allocation8 + $0x3c10] sm:$0xff]  ;;  %v18335_v7 = vcombine.high %v2470_v57, %v2478_v58  ;;  %v927_v18 = vld [vmem:[#allocation8 + $0x3d8] sm:$0xff]  ;;  %v18334_v27 = vcombine.low %v2470_v57, %v2478_v58  ;;  %v17024_v57 = vcombine.low %v1159_v36, %v1167_v37 }
 0x3c2   :  { %14141 = vmatprep.subr.bf16.mxu1 %v18655_v15  ;;  %v2734_v21 = vld [vmem:[#allocation8 + $0x3c50] sm:$0xff]  ;;  %v1175_v11 = vld [vmem:[#allocation8 + $0xb98] sm:$0xff]  ;;  %v16785_v45 = vcombine.high %v919_v9, %v927_v18  ;;  %v16784_v24 = vcombine.low %v919_v9, %v927_v18 }
 0x3c3   :  { %v18591_v12 = vcombine.high %v2726_v0, %v2734_v21  ;;  %v1183_v15 = vld [vmem:[#allocation8 + $0xbd8] sm:$0xff]  ;;  %v18590_v10 = vcombine.low %v2726_v0, %v2734_v21 }
 0x3c4   :  { %14101 = vmatpush2.bf16.msra.mxu0 %v18398_v22  ;;  %v17041_v30 = vcombine.high %v1175_v11, %v1183_v15  ;;  %v903_v22 = vld [vmem:[#allocation8 + $0x318] sm:$0xff]  ;;  %v17040_v43 = vcombine.low %v1175_v11, %v1183_v15 }
 0x3c5   :  { %14142 = vmatpush2.bf16.msra.mxu1 %v18654_v23  ;;  %14102 = vmatprep.subr.bf16.mxu0 %v18383_v26  ;;  %v911_v23 = vld [vmem:[#allocation8 + $0x358] sm:$0xff]  ;;  %v19006_v26 = vld [vmem:[#allocation10] sm:$0xff] }
 0x3c6   :  { %14143 = vmatprep.subr.bf16.mxu1 %v18639_v16  ;;  %v2875_v16 = vrot.slane %v19006_v26, %v19313_v8  ;;  %v1151_v48 = vld [vmem:[#allocation8 + $0xad8] sm:$0xff] }
 0x3c7   :  { %v1127_v18 = vld [vmem:[#allocation8 + $0xa18] sm:$0xff] }
 0x3c8   :  { %14103 = vmatpush2.bf16.msra.mxu0 %v18382_v44  ;;  %v2879_v44 = vrot.slane %v19006_v26, %v19274_v35  ;;  %v1135_v11 = vld [vmem:[#allocation8 + $0xa58] sm:$0xff] }
 0x3c9   :  { %14144 = vmatpush2.bf16.msra.mxu1 %v18638_v53  ;;  %14104 = vmatprep.subr.bf16.mxu0 %v18367_v46  ;;  %v16769_v53 = vcombine.high %v903_v22, %v911_v23  ;;  %v887_v46 = vld [vmem:[#allocation8 + $0x298] sm:$0xff]  ;;  %v16993_v26 = vcombine.high %v1127_v18, %v1135_v11 }
 0x3ca   :  { %14145 = vmatprep.subr.bf16.mxu1 %v18623_v39  ;;  %v895_v39 = vld [vmem:[#allocation8 + $0x2d8] sm:$0xff] }
 0x3cb   :  { %v16753_v58 = vcombine.high %v887_v46, %v895_v39  ;;  %v1111_v36 = vld [vmem:[#allocation8 + $0x998] sm:$0xff] }
 0x3cc   :  { %14105 = vmatpush2.bf16.msra.mxu0 %v18366_v49  ;;  %v1119_v37 = vld [vmem:[#allocation8 + $0x9d8] sm:$0xff] }
 0x3cd   :  { %14146 = vmatpush2.bf16.msra.mxu1 %v18622_v40  ;;  %14106 = vmatprep.subr.bf16.mxu0 %v18351_v54  ;;  %v16768_v54 = vcombine.low %v903_v22, %v911_v23 }
 0x3ce   :  { %14147 = vmatprep.subr.bf16.mxu1 %v18607_v55 }
 0x3d0   :  { %14107 = vmatpush2.bf16.msra.mxu0 %v18350_v4 }
 0x3d1   :  { %14148 = vmatpush2.bf16.msra.mxu1 %v18606_v5  ;;  %14108 = vmatprep.subr.bf16.mxu0 %v18335_v7  ;;  %v17009_v5 = vcombine.high %v1143_v47, %v1151_v48  ;;  %v871_v7 = vld [vmem:[#allocation8 + $0x218] sm:$0xff] }
 0x3d2   :  { %14149 = vmatprep.subr.bf16.mxu1 %v18591_v12  ;;  %v879_v12 = vld [vmem:[#allocation8 + $0x258] sm:$0xff] }
 0x3d3   :  { %v16737_v22 = vcombine.high %v871_v7, %v879_v12 }
 0x3d4   :  { %14109 = vmatpush2.bf16.msra.mxu0 %v18334_v27 }
 0x3d5   :  { %14150 = vmatpush2.bf16.msra.mxu1 %v18590_v10  ;;  %14160 = vmatprep.subr.bf16.mxu0 %v16785_v45  ;;  %v16752_v10 = vcombine.low %v887_v46, %v895_v39  ;;  %v16977_v46 = vcombine.high %v1111_v36, %v1119_v37  ;;  %v839_v39 = vld [vmem:[#allocation8 + $0x118] sm:$0xff] }
 0x3d6   :  { %14201 = vmatprep.subr.bf16.mxu1 %v17041_v30  ;;  %v17008_v30 = vcombine.low %v1143_v47, %v1151_v48  ;;  %v1103_v47 = vld [vmem:[#allocation8 + $0x958] sm:$0xff] }
 0x3d7   :  { %v13866_v51 = vpop.f32.mrf.mxu0  ;;  %14111 = vmatmul.mubr.bf16.vlgmr.msra.gmra.mxu0 %v19376_v52 }
 0x3d8   :  { %v13867_v49 = vadd.f32 %v13866_v51, %v2875_v16  ;;  %v13907_v40 = vpop.f32.mrf.mxu1  ;;  %14152 = vmatmul.mubr.bf16.vlgmr.msra.gmra.mxu1 %v19378_v56  ;;  %14161 = vmatpush1.bf16.msra.mxu0 %v16784_v24  ;;  %v855_v16 = vld [vmem:[#allocation8 + $0x198] sm:$0xff] }
 0x3d9   :  { %14192 = vmatprep.mubr.bf16.mxu0 %v19293_v62  ;;  %14202 = vmatpush1.bf16.msra.mxu1 %v17040_v43  ;;  %v13868_v55 = vpop.f32.mrf.mxu0  ;;  %v863_v24 = vld [vmem:[#allocation8 + $0x1d8] sm:$0xff]  ;;  %v16736_v43 = vcombine.low %v871_v7, %v879_v12 }
 0x3da   :  { %v19474_v0 = vadd.f32 %v13907_v40, %v13867_v49  ;;  %14233 = vmatprep.mubr.bf16.mxu1 %v19295_v63  ;;  %v13869_v21 = vadd.f32 %v13868_v55, %v2879_v44  ;;  %v13909_v4 = vpop.f32.mrf.mxu1  ;;  %14162 = vmatprep.subr.bf16.mxu0 %v16769_v53  ;;  %v16992_v44 = vcombine.low %v1127_v18, %v1135_v11  ;;  %v847_v51 = vld [vmem:[#allocation8 + $0x158] sm:$0xff] }
 0x3db   :  { %v13870_v9 = vpop.f32.mrf.mxu0  ;;  %14203 = vmatprep.subr.bf16.mxu1 %v17025_v60  ;;  %v16721_v53 = vcombine.high %v855_v16, %v863_v24  ;;  %v1095_v60 = vld [vmem:[#allocation8 + $0x918] sm:$0xff]  ;;  %v16720_v48 = vcombine.low %v855_v16, %v863_v24  ;;  %v16976_v49 = vcombine.low %v1111_v36, %v1119_v37  ;;  %v16705_v40 = vcombine.high %v839_v39, %v847_v51 }
 0x3dc   :  { %v19477_v15 = vadd.f32 %v13909_v4, %v13869_v21  ;;  %v13911_v27 = vpop.f32.mrf.mxu1  ;;  %14163 = vmatpush1.bf16.msra.mxu0 %v16768_v54  ;;  %v16961_v54 = vcombine.high %v1095_v60, %v1103_v47  ;;  %v823_v55 = vld [vmem:[#allocation8 + $0x98] sm:$0xff]  ;;  %v16704_v4 = vcombine.low %v839_v39, %v847_v51 }
 0x3dd   :  { %14204 = vmatpush1.bf16.msra.mxu1 %v17024_v57  ;;  %v13871_v45 = vpop.f32.mrf.mxu0  ;;  %14164 = vmatprep.subr.bf16.mxu0 %v16753_v58  ;;  %v831_v57 = vld [vmem:[#allocation8 + $0xd8] sm:$0xff] }
 0x3de   :  { %v13912_v23 = vpop.f32.mrf.mxu1  ;;  %14205 = vmatprep.subr.bf16.mxu1 %v17009_v5  ;;  %v1079_v58 = vld [vmem:[#allocation8 + $0x898] sm:$0xff]  ;;  %v16960_v5 = vcombine.low %v1095_v60, %v1103_v47  ;;  %v16689_v7 = vcombine.high %v823_v55, %v831_v57 }
 0x3df   :  { %v1087_v21 = vld [vmem:[#allocation8 + $0x8d8] sm:$0xff] }
 0x3e0   :  { %14165 = vmatpush1.bf16.msra.mxu0 %v16752_v10  ;;  %v16945_v12 = vcombine.high %v1079_v58, %v1087_v21  ;;  %v807_v9 = vld [vmem:[#allocation8 + $0x18] sm:$0xff]  ;;  %v16688_v10 = vcombine.low %v823_v55, %v831_v57  ;;  %v16944_v45 = vcombine.low %v1079_v58, %v1087_v21 }
 0x3e1   :  { %14206 = vmatpush1.bf16.msra.mxu1 %v17008_v30  ;;  %14166 = vmatprep.subr.bf16.mxu0 %v16737_v22  ;;  %v815_v18 = vld [vmem:[#allocation8 + $0x58] sm:$0xff] }
 0x3e2   :  { %14207 = vmatprep.subr.bf16.mxu1 %v16993_v26  ;;  %v1063_v11 = vld [vmem:[#allocation8 + $0x818] sm:$0xff]  ;;  %v16673_v30 = vcombine.high %v807_v9, %v815_v18  ;;  %v16672_v36 = vcombine.low %v807_v9, %v815_v18 }
 0x3e3   :  { %v1071_v27 = vld [vmem:[#allocation8 + $0x858] sm:$0xff] }
 0x3e4   :  { %14167 = vmatpush1.bf16.msra.mxu0 %v16736_v43  ;;  %v16929_v22 = vcombine.high %v1063_v11, %v1071_v27  ;;  %v1047_v23 = vld [vmem:[#allocation8 + $0x798] sm:$0xff]  ;;  %v16928_v37 = vcombine.low %v1063_v11, %v1071_v27 }
 0x3e5   :  { %14208 = vmatpush1.bf16.msra.mxu1 %v16992_v44  ;;  %14168 = vmatprep.subr.bf16.mxu0 %v16721_v53  ;;  %v1055_v26 = vld [vmem:[#allocation8 + $0x7d8] sm:$0xff] }
 0x3e6   :  { %14209 = vmatprep.subr.bf16.mxu1 %v16977_v46  ;;  %v1303_v16 = vld [vmem:[#allocation8 + $0xf98] sm:$0xff]  ;;  %v16913_v43 = vcombine.high %v1047_v23, %v1055_v26  ;;  %v16912_v60 = vcombine.low %v1047_v23, %v1055_v26 }
 0x3e7   :  { %v1311_v24 = vld [vmem:[#allocation8 + $0xfd8] sm:$0xff] }
 0x3e8   :  { %14169 = vmatpush1.bf16.msra.mxu0 %v16720_v48  ;;  %v17169_v44 = vcombine.high %v1303_v16, %v1311_v24  ;;  %v1031_v53 = vld [vmem:[#allocation8 + $0x718] sm:$0xff]  ;;  %v17168_v47 = vcombine.low %v1303_v16, %v1311_v24 }
 0x3e9   :  { %14210 = vmatpush1.bf16.msra.mxu1 %v16976_v49  ;;  %14170 = vmatprep.subr.bf16.mxu0 %v16705_v40  ;;  %v1039_v46 = vld [vmem:[#allocation8 + $0x758] sm:$0xff] }
 0x3ea   :  { %14211 = vmatprep.subr.bf16.mxu1 %v16961_v54  ;;  %v1287_v39 = vld [vmem:[#allocation8 + $0xf18] sm:$0xff]  ;;  %v16897_v48 = vcombine.high %v1031_v53, %v1039_v46  ;;  %v16896_v58 = vcombine.low %v1031_v53, %v1039_v46 }
 0x3eb   :  { %v1295_v51 = vld [vmem:[#allocation8 + $0xf58] sm:$0xff] }
 0x3ec   :  { %14171 = vmatpush1.bf16.msra.mxu0 %v16704_v4  ;;  %v17153_v49 = vcombine.high %v1287_v39, %v1295_v51  ;;  %v1015_v40 = vld [vmem:[#allocation8 + $0x698] sm:$0xff]  ;;  %v17152_v21 = vcombine.low %v1287_v39, %v1295_v51 }
 0x3ed   :  { %14212 = vmatpush1.bf16.msra.mxu1 %v16960_v5  ;;  %14172 = vmatprep.subr.bf16.mxu0 %v16689_v7  ;;  %v1023_v54 = vld [vmem:[#allocation8 + $0x6d8] sm:$0xff] }
 0x3ee   :  { %14213 = vmatprep.subr.bf16.mxu1 %v16945_v12  ;;  %v1271_v55 = vld [vmem:[#allocation8 + $0xe98] sm:$0xff]  ;;  %v16881_v4 = vcombine.high %v1015_v40, %v1023_v54  ;;  %v16880_v11 = vcombine.low %v1015_v40, %v1023_v54 }
 0x3ef   :  { %v1279_v57 = vld [vmem:[#allocation8 + $0xed8] sm:$0xff] }
 0x3f0   :  { %14173 = vmatpush1.bf16.msra.mxu0 %v16688_v10  ;;  %v17137_v5 = vcombine.high %v1271_v55, %v1279_v57  ;;  %v999_v7 = vld [vmem:[#allocation8 + $0x618] sm:$0xff]  ;;  %v17136_v27 = vcombine.low %v1271_v55, %v1279_v57 }
 0x3f1   :  { %14214 = vmatpush1.bf16.msra.mxu1 %v16944_v45  ;;  %14174 = vmatprep.subr.bf16.mxu0 %v16673_v30  ;;  %v1007_v12 = vld [vmem:[#allocation8 + $0x658] sm:$0xff] }
 0x3f2   :  { %14215 = vmatprep.subr.bf16.mxu1 %v16929_v22  ;;  %v1255_v9 = vld [vmem:[#allocation8 + $0xe18] sm:$0xff]  ;;  %v16865_v10 = vcombine.high %v999_v7, %v1007_v12  ;;  %v16864_v16 = vcombine.low %v999_v7, %v1007_v12 }
 0x3f3   :  { %v1263_v18 = vld [vmem:[#allocation8 + $0xe58] sm:$0xff] }
 0x3f4   :  { %14175 = vmatpush1.bf16.msra.mxu0 %v16672_v36  ;;  %v17121_v45 = vcombine.high %v1255_v9, %v1263_v18  ;;  %v983_v30 = vld [vmem:[#allocation8 + $0x598] sm:$0xff]  ;;  %v17120_v24 = vcombine.low %v1255_v9, %v1263_v18 }
 0x3f5   :  { %14216 = vmatpush1.bf16.msra.mxu1 %v16928_v37  ;;  %14176 = vmatprep.subr.bf16.mxu0 %v16913_v43  ;;  %v991_v22 = vld [vmem:[#allocation8 + $0x5d8] sm:$0xff] }
 0x3f6   :  { %14217 = vmatprep.subr.bf16.mxu1 %v17169_v44  ;;  %v1239_v23 = vld [vmem:[#allocation8 + $0xd98] sm:$0xff]  ;;  %v16849_v36 = vcombine.high %v983_v30, %v991_v22  ;;  %v16848_v39 = vcombine.low %v983_v30, %v991_v22 }
 0x3f7   :  { %v1247_v26 = vld [vmem:[#allocation8 + $0xdd8] sm:$0xff] }
 0x3f8   :  { %14177 = vmatpush2.bf16.msra.mxu0 %v16912_v60  ;;  %v17105_v37 = vcombine.high %v1239_v23, %v1247_v26  ;;  %v967_v43 = vld [vmem:[#allocation8 + $0x518] sm:$0xff]  ;;  %v17104_v51 = vcombine.low %v1239_v23, %v1247_v26 }
 0x3f9   :  { %14218 = vmatpush2.bf16.msra.mxu1 %v17168_v47  ;;  %14178 = vmatprep.subr.bf16.mxu0 %v16897_v48  ;;  %v975_v44 = vld [vmem:[#allocation8 + $0x558] sm:$0xff] }
 0x3fa   :  { %14219 = vmatprep.subr.bf16.mxu1 %v17153_v49  ;;  %v1223_v53 = vld [vmem:[#allocation8 + $0xd18] sm:$0xff]  ;;  %v16833_v60 = vcombine.high %v967_v43, %v975_v44  ;;  %v16832_v55 = vcombine.low %v967_v43, %v975_v44 }
 0x3fb   :  { %v1231_v46 = vld [vmem:[#allocation8 + $0xd58] sm:$0xff] }
 0x3fc   :  { %14179 = vmatpush2.bf16.msra.mxu0 %v16896_v58  ;;  %v17089_v47 = vcombine.high %v1223_v53, %v1231_v46  ;;  %v951_v48 = vld [vmem:[#allocation8 + $0x498] sm:$0xff]  ;;  %v17088_v57 = vcombine.low %v1223_v53, %v1231_v46 }
 0x3fd   :  { %14220 = vmatpush2.bf16.msra.mxu1 %v17152_v21  ;;  %14180 = vmatprep.subr.bf16.mxu0 %v16881_v4  ;;  %v959_v49 = vld [vmem:[#allocation8 + $0x4d8] sm:$0xff] }
 0x3fe   :  { %14221 = vmatprep.subr.bf16.mxu1 %v17137_v5  ;;  %v1207_v40 = vld [vmem:[#allocation8 + $0xc98] sm:$0xff]  ;;  %v16817_v58 = vcombine.high %v951_v48, %v959_v49  ;;  %v16816_v9 = vcombine.low %v951_v48, %v959_v49 }
 0x3ff   :  { %v1215_v54 = vld [vmem:[#allocation8 + $0xcd8] sm:$0xff] }
 0x400   :  { %14181 = vmatpush2.bf16.msra.mxu0 %v16880_v11  ;;  %v17073_v21 = vcombine.high %v1207_v40, %v1215_v54  ;;  %v935_v4 = vld [vmem:[#allocation8 + $0x418] sm:$0xff]  ;;  %v17072_v18 = vcombine.low %v1207_v40, %v1215_v54 }
 0x401   :  { %14222 = vmatpush2.bf16.msra.mxu1 %v17136_v27  ;;  %14182 = vmatprep.subr.bf16.mxu0 %v16865_v10  ;;  %v943_v5 = vld [vmem:[#allocation8 + $0x458] sm:$0xff] }
 0x402   :  { %14223 = vmatprep.subr.bf16.mxu1 %v17121_v45  ;;  %v1191_v7 = vld [vmem:[#allocation8 + $0xc18] sm:$0xff]  ;;  %v16801_v11 = vcombine.high %v935_v4, %v943_v5  ;;  %v16800_v23 = vcombine.low %v935_v4, %v943_v5 }
 0x403   :  { %v1199_v12 = vld [vmem:[#allocation8 + $0xc58] sm:$0xff] }
 0x404   :  { %14183 = vmatpush2.bf16.msra.mxu0 %v16864_v16  ;;  %v17057_v27 = vcombine.high %v1191_v7, %v1199_v12  ;;  %v1431_v10 = vld [vmem:[#allocation8 + $0x1398] sm:$0xff]  ;;  %v17056_v26 = vcombine.low %v1191_v7, %v1199_v12 }
 0x405   :  { %14224 = vmatpush2.bf16.msra.mxu1 %v17120_v24  ;;  %14184 = vmatprep.subr.bf16.mxu0 %v16849_v36  ;;  %v1439_v45 = vld [vmem:[#allocation8 + $0x13d8] sm:$0xff] }
 0x406   :  { %14225 = vmatprep.subr.bf16.mxu1 %v17105_v37  ;;  %v1687_v30 = vld [vmem:[#allocation8 + $0x1b98] sm:$0xff]  ;;  %v17297_v16 = vcombine.high %v1431_v10, %v1439_v45  ;;  %v17296_v43 = vcombine.low %v1431_v10, %v1439_v45 }
 0x407   :  { %v1695_v22 = vld [vmem:[#allocation8 + $0x1bd8] sm:$0xff] }
 0x408   :  { %14185 = vmatpush2.bf16.msra.mxu0 %v16848_v39  ;;  %v17553_v24 = vcombine.high %v1687_v30, %v1695_v22  ;;  %v1415_v36 = vld [vmem:[#allocation8 + $0x1318] sm:$0xff]  ;;  %v17552_v46 = vcombine.low %v1687_v30, %v1695_v22 }
 0x409   :  { %14226 = vmatpush2.bf16.msra.mxu1 %v17104_v51  ;;  %14186 = vmatprep.subr.bf16.mxu0 %v16833_v60  ;;  %v1423_v37 = vld [vmem:[#allocation8 + $0x1358] sm:$0xff] }
 0x40a   :  { %14227 = vmatprep.subr.bf16.mxu1 %v17089_v47  ;;  %v1671_v44 = vld [vmem:[#allocation8 + $0x1b18] sm:$0xff]  ;;  %v17281_v39 = vcombine.high %v1415_v36, %v1423_v37 }
 0x40b   :  { %v1679_v53 = vld [vmem:[#allocation8 + $0x1b58] sm:$0xff] }
 0x40c   :  { %14187 = vmatpush2.bf16.msra.mxu0 %v16832_v55  ;;  %v1399_v51 = vld [vmem:[#allocation8 + $0x1298] sm:$0xff]  ;;  %v17537_v48 = vcombine.high %v1671_v44, %v1679_v53 }
 0x40d   :  { %14228 = vmatpush2.bf16.msra.mxu1 %v17088_v57  ;;  %14188 = vmatprep.subr.bf16.mxu0 %v16817_v58  ;;  %v1407_v60 = vld [vmem:[#allocation8 + $0x12d8] sm:$0xff]  ;;  %v17280_v57 = vcombine.low %v1415_v36, %v1423_v37 }
 0x40e   :  { %14229 = vmatprep.subr.bf16.mxu1 %v17073_v21  ;;  %v1655_v49 = vld [vmem:[#allocation8 + $0x1a98] sm:$0xff]  ;;  %v17536_v21 = vcombine.low %v1671_v44, %v1679_v53  ;;  %v17265_v4 = vcombine.high %v1399_v51, %v1407_v60  ;;  %v17264_v22 = vcombine.low %v1399_v51, %v1407_v60 }
 0x40f   :  { %v1663_v40 = vld [vmem:[#allocation8 + $0x1ad8] sm:$0xff] }
 0x410   :  { %14189 = vmatpush2.bf16.msra.mxu0 %v16816_v9  ;;  %v1383_v9 = vld [vmem:[#allocation8 + $0x1218] sm:$0xff] }
 0x411   :  { %14230 = vmatpush2.bf16.msra.mxu1 %v17072_v18  ;;  %14190 = vmatprep.subr.bf16.mxu0 %v16801_v11  ;;  %v1391_v18 = vld [vmem:[#allocation8 + $0x1258] sm:$0xff] }
 0x412   :  { %14231 = vmatprep.subr.bf16.mxu1 %v17057_v27  ;;  %v1639_v27 = vld [vmem:[#allocation8 + $0x1a18] sm:$0xff]  ;;  %v17248_v53 = vcombine.low %v1383_v9, %v1391_v18 }
 0x413   :  { %v1647_v10 = vld [vmem:[#allocation8 + $0x1a58] sm:$0xff] }
 0x414   :  { %14191 = vmatpush2.bf16.msra.mxu0 %v16800_v23  ;;  %v1367_v36 = vld [vmem:[#allocation8 + $0x1198] sm:$0xff] }
 0x415   :  { %14232 = vmatpush2.bf16.msra.mxu1 %v17056_v26  ;;  %14242 = vmatprep.subr.bf16.mxu0 %v17297_v16  ;;  %v17520_v26 = vcombine.low %v1655_v49, %v1663_v40  ;;  %v17249_v16 = vcombine.high %v1383_v9, %v1391_v18  ;;  %v1375_v37 = vld [vmem:[#allocation8 + $0x11d8] sm:$0xff] }
 0x416   :  { %14283 = vmatprep.subr.bf16.mxu1 %v17553_v24  ;;  %v17505_v24 = vcombine.high %v1639_v27, %v1647_v10  ;;  %v1631_v44 = vld [vmem:[#allocation8 + $0x19d8] sm:$0xff] }
 0x417   :  { %v13948_v47 = vpop.f32.mrf.mxu0  ;;  %14193 = vmatmul.mubr.bf16.vlgmr.msra.gmra.mxu0 %v19297_v2  ;;  %v1351_v60 = vld [vmem:[#allocation8 + $0x1118] sm:$0xff] }
 0x418   :  { %v13949_v54 = vadd.f32 %v13948_v47, %v19474_v0  ;;  %v13989_v55 = vpop.f32.mrf.mxu1  ;;  %14234 = vmatmul.mubr.bf16.vlgmr.msra.gmra.mxu1 %v19291_v59  ;;  %14243 = vmatpush1.bf16.msra.mxu0 %v17296_v43  ;;  %v17521_v0 = vcombine.high %v1655_v49, %v1663_v40  ;;  %v1623_v43 = vld [vmem:[#allocation8 + $0x1998] sm:$0xff]  ;;  %v17232_v40 = vcombine.low %v1367_v36, %v1375_v37 }
 0x419   :  { %14274 = vmatprep.mubr.bf16.mxu0 %v19303_v13  ;;  %14284 = vmatpush1.bf16.msra.mxu1 %v17552_v46  ;;  %v13950_v58 = vpop.f32.mrf.mxu0  ;;  %v17504_v46 = vcombine.low %v1639_v27, %v1647_v10  ;;  %v17489_v51 = vcombine.high %v1623_v43, %v1631_v44  ;;  %v1359_v47 = vld [vmem:[#allocation8 + $0x1158] sm:$0xff] }
 0x41a   :  { %v19483_v5 = vadd.f32 %v13989_v55, %v13949_v54  ;;  %14315 = vmatprep.mubr.bf16.mxu1 %v19305_v14  ;;  %v13951_v7 = vadd.f32 %v13950_v58, %v19477_v15  ;;  %v13991_v12 = vpop.f32.mrf.mxu1  ;;  %14244 = vmatprep.subr.bf16.mxu0 %v17281_v39  ;;  %v17233_v39 = vcombine.high %v1367_v36, %v1375_v37  ;;  %v1615_v49 = vld [vmem:[#allocation8 + $0x1958] sm:$0xff] }
 0x41b   :  { %v13952_v11 = vpop.f32.mrf.mxu0  ;;  %14285 = vmatprep.subr.bf16.mxu1 %v17537_v48  ;;  %v1607_v48 = vld [vmem:[#allocation8 + $0x1918] sm:$0xff]  ;;  %v17488_v54 = vcombine.low %v1623_v43, %v1631_v44  ;;  %v17217_v55 = vcombine.high %v1351_v60, %v1359_v47 }
 0x41c   :  { %v19487_v45 = vadd.f32 %v13991_v12, %v13951_v7  ;;  %v13993_v30 = vpop.f32.mrf.mxu1  ;;  %14245 = vmatpush1.bf16.msra.mxu0 %v17280_v57  ;;  %v17473_v57 = vcombine.high %v1607_v48, %v1615_v49  ;;  %v1335_v58 = vld [vmem:[#allocation8 + $0x1098] sm:$0xff]  ;;  %v17216_v12 = vcombine.low %v1351_v60, %v1359_v47 }
 0x41d   :  { %14286 = vmatpush1.bf16.msra.mxu1 %v17536_v21  ;;  %v13953_v23 = vpop.f32.mrf.mxu0  ;;  %14246 = vmatprep.subr.bf16.mxu0 %v17265_v4  ;;  %v1343_v21 = vld [vmem:[#allocation8 + $0x10d8] sm:$0xff] }
 0x41e   :  { %v13994_v15 = vpop.f32.mrf.mxu1  ;;  %14287 = vmatprep.subr.bf16.mxu1 %v17521_v0  ;;  %v1591_v4 = vld [vmem:[#allocation8 + $0x1898] sm:$0xff]  ;;  %v17472_v0 = vcombine.low %v1607_v48, %v1615_v49  ;;  %v17201_v9 = vcombine.high %v1335_v58, %v1343_v21 }
 0x41f   :  { %v1599_v7 = vld [vmem:[#allocation8 + $0x18d8] sm:$0xff] }
 0x420   :  { %14247 = vmatpush1.bf16.msra.mxu0 %v17264_v22  ;;  %v17457_v18 = vcombine.high %v1591_v4, %v1599_v7  ;;  %v1319_v11 = vld [vmem:[#allocation8 + $0x1018] sm:$0xff]  ;;  %v17200_v22 = vcombine.low %v1335_v58, %v1343_v21  ;;  %v17456_v23 = vcombine.low %v1591_v4, %v1599_v7 }
 0x421   :  { %14288 = vmatpush1.bf16.msra.mxu1 %v17520_v26  ;;  %14248 = vmatprep.subr.bf16.mxu0 %v17249_v16  ;;  %v1327_v27 = vld [vmem:[#allocation8 + $0x1058] sm:$0xff] }
 0x422   :  { %14289 = vmatprep.subr.bf16.mxu1 %v17505_v24  ;;  %v1575_v10 = vld [vmem:[#allocation8 + $0x1818] sm:$0xff]  ;;  %v17185_v26 = vcombine.high %v1319_v11, %v1327_v27  ;;  %v17184_v43 = vcombine.low %v1319_v11, %v1327_v27 }
 0x423   :  { %v1583_v30 = vld [vmem:[#allocation8 + $0x1858] sm:$0xff] }
 0x424   :  { %14249 = vmatpush1.bf16.msra.mxu0 %v17248_v53  ;;  %v17441_v16 = vcombine.high %v1575_v10, %v1583_v30  ;;  %v1559_v15 = vld [vmem:[#allocation8 + $0x1798] sm:$0xff]  ;;  %v17440_v44 = vcombine.low %v1575_v10, %v1583_v30 }
 0x425   :  { %14290 = vmatpush1.bf16.msra.mxu1 %v17504_v46  ;;  %14250 = vmatprep.subr.bf16.mxu0 %v17233_v39  ;;  %v1567_v24 = vld [vmem:[#allocation8 + $0x17d8] sm:$0xff] }
 0x426   :  { %14291 = vmatprep.subr.bf16.mxu1 %v17489_v51  ;;  %v1815_v36 = vld [vmem:[#allocation8 + $0x1f98] sm:$0xff]  ;;  %v17425_v53 = vcombine.high %v1559_v15, %v1567_v24  ;;  %v17424_v48 = vcombine.low %v1559_v15, %v1567_v24 }
 0x427   :  { %v1823_v37 = vld [vmem:[#allocation8 + $0x1fd8] sm:$0xff] }
 0x428   :  { %14251 = vmatpush1.bf16.msra.mxu0 %v17232_v40  ;;  %v17681_v46 = vcombine.high %v1815_v36, %v1823_v37  ;;  %v1543_v39 = vld [vmem:[#allocation8 + $0x1718] sm:$0xff]  ;;  %v17680_v49 = vcombine.low %v1815_v36, %v1823_v37 }
 0x429   :  { %14292 = vmatpush1.bf16.msra.mxu1 %v17488_v54  ;;  %14252 = vmatprep.subr.bf16.mxu0 %v17217_v55  ;;  %v1551_v51 = vld [vmem:[#allocation8 + $0x1758] sm:$0xff] }
 0x42a   :  { %14293 = vmatprep.subr.bf16.mxu1 %v17473_v57  ;;  %v1799_v60 = vld [vmem:[#allocation8 + $0x1f18] sm:$0xff]  ;;  %v17409_v40 = vcombine.high %v1543_v39, %v1551_v51  ;;  %v17408_v4 = vcombine.low %v1543_v39, %v1551_v51 }
 0x42b   :  { %v1807_v47 = vld [vmem:[#allocation8 + $0x1f58] sm:$0xff] }
 0x42c   :  { %14253 = vmatpush1.bf16.msra.mxu0 %v17216_v12  ;;  %v17665_v54 = vcombine.high %v1799_v60, %v1807_v47  ;;  %v1527_v55 = vld [vmem:[#allocation8 + $0x1698] sm:$0xff]  ;;  %v17664_v7 = vcombine.low %v1799_v60, %v1807_v47 }
 0x42d   :  { %14294 = vmatpush1.bf16.msra.mxu1 %v17472_v0  ;;  %14254 = vmatprep.subr.bf16.mxu0 %v17201_v9  ;;  %v1535_v57 = vld [vmem:[#allocation8 + $0x16d8] sm:$0xff] }
 0x42e   :  { %14295 = vmatprep.subr.bf16.mxu1 %v17457_v18  ;;  %v1783_v58 = vld [vmem:[#allocation8 + $0x1e98] sm:$0xff]  ;;  %v17393_v12 = vcombine.high %v1527_v55, %v1535_v57  ;;  %v17392_v10 = vcombine.low %v1527_v55, %v1535_v57 }
 0x42f   :  { %v1791_v21 = vld [vmem:[#allocation8 + $0x1ed8] sm:$0xff] }
 0x430   :  { %14255 = vmatpush1.bf16.msra.mxu0 %v17200_v22  ;;  %v17649_v0 = vcombine.high %v1783_v58, %v1791_v21  ;;  %v1511_v9 = vld [vmem:[#allocation8 + $0x1618] sm:$0xff]  ;;  %v17648_v30 = vcombine.low %v1783_v58, %v1791_v21 }
 0x431   :  { %14296 = vmatpush1.bf16.msra.mxu1 %v17456_v23  ;;  %14256 = vmatprep.subr.bf16.mxu0 %v17185_v26  ;;  %v1519_v18 = vld [vmem:[#allocation8 + $0x1658] sm:$0xff] }
 0x432   :  { %14297 = vmatprep.subr.bf16.mxu1 %v17441_v16  ;;  %v1767_v11 = vld [vmem:[#allocation8 + $0x1e18] sm:$0xff]  ;;  %v17377_v22 = vcombine.high %v1511_v9, %v1519_v18  ;;  %v17376_v36 = vcombine.low %v1511_v9, %v1519_v18 }
 0x433   :  { %v1775_v27 = vld [vmem:[#allocation8 + $0x1e58] sm:$0xff] }
 0x434   :  { %14257 = vmatpush1.bf16.msra.mxu0 %v17184_v43  ;;  %v17633_v23 = vcombine.high %v1767_v11, %v1775_v27  ;;  %v1495_v26 = vld [vmem:[#allocation8 + $0x1598] sm:$0xff]  ;;  %v17632_v37 = vcombine.low %v1767_v11, %v1775_v27 }
 0x435   :  { %14298 = vmatpush1.bf16.msra.mxu1 %v17440_v44  ;;  %14258 = vmatprep.subr.bf16.mxu0 %v17425_v53  ;;  %v1503_v16 = vld [vmem:[#allocation8 + $0x15d8] sm:$0xff] }
 0x436   :  { %14299 = vmatprep.subr.bf16.mxu1 %v17681_v46  ;;  %v1751_v15 = vld [vmem:[#allocation8 + $0x1d98] sm:$0xff]  ;;  %v17361_v43 = vcombine.high %v1495_v26, %v1503_v16  ;;  %v17360_v60 = vcombine.low %v1495_v26, %v1503_v16 }
 0x437   :  { %v1759_v24 = vld [vmem:[#allocation8 + $0x1dd8] sm:$0xff] }
 0x438   :  { %14259 = vmatpush2.bf16.msra.mxu0 %v17424_v48  ;;  %v17617_v44 = vcombine.high %v1751_v15, %v1759_v24  ;;  %v1479_v53 = vld [vmem:[#allocation8 + $0x1518] sm:$0xff]  ;;  %v17616_v47 = vcombine.low %v1751_v15, %v1759_v24 }
 0x439   :  { %14300 = vmatpush2.bf16.msra.mxu1 %v17680_v49  ;;  %14260 = vmatprep.subr.bf16.mxu0 %v17409_v40  ;;  %v1487_v46 = vld [vmem:[#allocation8 + $0x1558] sm:$0xff] }
 0x43a   :  { %14301 = vmatprep.subr.bf16.mxu1 %v17665_v54  ;;  %v1735_v39 = vld [vmem:[#allocation8 + $0x1d18] sm:$0xff]  ;;  %v17345_v48 = vcombine.high %v1479_v53, %v1487_v46  ;;  %v17344_v58 = vcombine.low %v1479_v53, %v1487_v46 }
 0x43b   :  { %v1743_v51 = vld [vmem:[#allocation8 + $0x1d58] sm:$0xff] }
 0x43c   :  { %14261 = vmatpush2.bf16.msra.mxu0 %v17408_v4  ;;  %v17601_v49 = vcombine.high %v1735_v39, %v1743_v51  ;;  %v1463_v40 = vld [vmem:[#allocation8 + $0x1498] sm:$0xff]  ;;  %v17600_v21 = vcombine.low %v1735_v39, %v1743_v51 }
 0x43d   :  { %14302 = vmatpush2.bf16.msra.mxu1 %v17664_v7  ;;  %14262 = vmatprep.subr.bf16.mxu0 %v17393_v12  ;;  %v1471_v54 = vld [vmem:[#allocation8 + $0x14d8] sm:$0xff] }
 0x43e   :  { %14303 = vmatprep.subr.bf16.mxu1 %v17649_v0  ;;  %v1719_v55 = vld [vmem:[#allocation8 + $0x1c98] sm:$0xff]  ;;  %v17329_v4 = vcombine.high %v1463_v40, %v1471_v54  ;;  %v17328_v11 = vcombine.low %v1463_v40, %v1471_v54 }
 0x43f   :  { %v1727_v57 = vld [vmem:[#allocation8 + $0x1cd8] sm:$0xff] }
 0x440   :  { %14263 = vmatpush2.bf16.msra.mxu0 %v17392_v10  ;;  %v17585_v7 = vcombine.high %v1719_v55, %v1727_v57  ;;  %v1447_v12 = vld [vmem:[#allocation8 + $0x1418] sm:$0xff]  ;;  %v17584_v27 = vcombine.low %v1719_v55, %v1727_v57 }
 0x441   :  { %14304 = vmatpush2.bf16.msra.mxu1 %v17648_v30  ;;  %14264 = vmatprep.subr.bf16.mxu0 %v17377_v22  ;;  %v1455_v0 = vld [vmem:[#allocation8 + $0x1458] sm:$0xff] }
 0x442   :  { %14305 = vmatprep.subr.bf16.mxu1 %v17633_v23  ;;  %v1703_v9 = vld [vmem:[#allocation8 + $0x1c18] sm:$0xff]  ;;  %v17313_v10 = vcombine.high %v1447_v12, %v1455_v0  ;;  %v17312_v15 = vcombine.low %v1447_v12, %v1455_v0 }
 0x443   :  { %v1711_v18 = vld [vmem:[#allocation8 + $0x1c58] sm:$0xff] }
 0x444   :  { %14265 = vmatpush2.bf16.msra.mxu0 %v17376_v36  ;;  %v17569_v30 = vcombine.high %v1703_v9, %v1711_v18  ;;  %v1943_v22 = vld [vmem:[#allocation8 + $0x2398] sm:$0xff]  ;;  %v17568_v24 = vcombine.low %v1703_v9, %v1711_v18 }
 0x445   :  { %14306 = vmatpush2.bf16.msra.mxu1 %v17632_v37  ;;  %14266 = vmatprep.subr.bf16.mxu0 %v17361_v43  ;;  %v1951_v23 = vld [vmem:[#allocation8 + $0x23d8] sm:$0xff] }
 0x446   :  { %14307 = vmatprep.subr.bf16.mxu1 %v17617_v44  ;;  %v2199_v26 = vld [vmem:[#allocation8 + $0x2b98] sm:$0xff]  ;;  %v17809_v36 = vcombine.high %v1943_v22, %v1951_v23  ;;  %v17808_v53 = vcombine.low %v1943_v22, %v1951_v23 }
 0x447   :  { %v2207_v16 = vld [vmem:[#allocation8 + $0x2bd8] sm:$0xff] }
 0x448   :  { %14267 = vmatpush2.bf16.msra.mxu0 %v17360_v60  ;;  %v18065_v37 = vcombine.high %v2199_v26, %v2207_v16  ;;  %v1927_v43 = vld [vmem:[#allocation8 + $0x2318] sm:$0xff]  ;;  %v18064_v51 = vcombine.low %v2199_v26, %v2207_v16 }
 0x449   :  { %14308 = vmatpush2.bf16.msra.mxu1 %v17616_v47  ;;  %14268 = vmatprep.subr.bf16.mxu0 %v17345_v48  ;;  %v1935_v44 = vld [vmem:[#allocation8 + $0x2358] sm:$0xff] }
 0x44a   :  { %14309 = vmatprep.subr.bf16.mxu1 %v17601_v49  ;;  %v2183_v46 = vld [vmem:[#allocation8 + $0x2b18] sm:$0xff]  ;;  %v17793_v60 = vcombine.high %v1927_v43, %v1935_v44 }
 0x44b   :  { %v2191_v39 = vld [vmem:[#allocation8 + $0x2b58] sm:$0xff] }
 0x44c   :  { %14269 = vmatpush2.bf16.msra.mxu0 %v17344_v58  ;;  %v1911_v47 = vld [vmem:[#allocation8 + $0x2298] sm:$0xff]  ;;  %v18049_v40 = vcombine.high %v2183_v46, %v2191_v39 }
 0x44d   :  { %14310 = vmatpush2.bf16.msra.mxu1 %v17600_v21  ;;  %14270 = vmatprep.subr.bf16.mxu0 %v17329_v4  ;;  %v1919_v48 = vld [vmem:[#allocation8 + $0x22d8] sm:$0xff]  ;;  %v17792_v21 = vcombine.low %v1927_v43, %v1935_v44 }
 0x44e   :  { %14311 = vmatprep.subr.bf16.mxu1 %v17585_v7  ;;  %v2167_v54 = vld [vmem:[#allocation8 + $0x2a98] sm:$0xff]  ;;  %v18048_v7 = vcombine.low %v2183_v46, %v2191_v39  ;;  %v17777_v12 = vcombine.high %v1911_v47, %v1919_v48  ;;  %v17776_v16 = vcombine.low %v1911_v47, %v1919_v48 }
 0x44f   :  { %v2175_v55 = vld [vmem:[#allocation8 + $0x2ad8] sm:$0xff] }
 0x450   :  { %14271 = vmatpush2.bf16.msra.mxu0 %v17328_v11  ;;  %v1895_v11 = vld [vmem:[#allocation8 + $0x2218] sm:$0xff] }
 0x451   :  { %14312 = vmatpush2.bf16.msra.mxu1 %v17584_v27  ;;  %14272 = vmatprep.subr.bf16.mxu0 %v17313_v10  ;;  %v1903_v27 = vld [vmem:[#allocation8 + $0x2258] sm:$0xff] }
 0x452   :  { %14313 = vmatprep.subr.bf16.mxu1 %v17569_v30  ;;  %v2151_v30 = vld [vmem:[#allocation8 + $0x2a18] sm:$0xff]  ;;  %v17760_v39 = vcombine.low %v1895_v11, %v1903_v27 }
 0x453   :  { %v2159_v22 = vld [vmem:[#allocation8 + $0x2a58] sm:$0xff] }
 0x454   :  { %14273 = vmatpush2.bf16.msra.mxu0 %v17312_v15  ;;  %v1879_v43 = vld [vmem:[#allocation8 + $0x2198] sm:$0xff] }
 0x455   :  { %14314 = vmatpush2.bf16.msra.mxu1 %v17568_v24  ;;  %14324 = vmatprep.subr.bf16.mxu0 %v17809_v36  ;;  %v18032_v24 = vcombine.low %v2167_v54, %v2175_v55  ;;  %v17761_v36 = vcombine.high %v1895_v11, %v1903_v27  ;;  %v1887_v44 = vld [vmem:[#allocation8 + $0x21d8] sm:$0xff] }
 0x456   :  { %14365 = vmatprep.subr.bf16.mxu1 %v18065_v37  ;;  %v18017_v37 = vcombine.high %v2151_v30, %v2159_v22  ;;  %v2143_v46 = vld [vmem:[#allocation8 + $0x29d8] sm:$0xff] }
 0x457   :  { %v14030_v49 = vpop.f32.mrf.mxu0  ;;  %14275 = vmatmul.mubr.bf16.vlgmr.msra.gmra.mxu0 %v19333_v6  ;;  %v1863_v48 = vld [vmem:[#allocation8 + $0x2118] sm:$0xff] }
 0x458   :  { %v14031_v57 = vadd.f32 %v14030_v49, %v19483_v5  ;;  %v14071_v58 = vpop.f32.mrf.mxu1  ;;  %14316 = vmatmul.mubr.bf16.vlgmr.msra.gmra.mxu1 %v19331_v1  ;;  %14325 = vmatpush1.bf16.msra.mxu0 %v17808_v53  ;;  %v18033_v5 = vcombine.high %v2167_v54, %v2175_v55  ;;  %v2135_v53 = vld [vmem:[#allocation8 + $0x2998] sm:$0xff]  ;;  %v17744_v55 = vcombine.low %v1879_v43, %v1887_v44 }
 0x459   :  { %14356 = vmatprep.mubr.bf16.mxu0 %v19335_v19  ;;  %14366 = vmatpush1.bf16.msra.mxu1 %v18064_v51  ;;  %v14032_v4 = vpop.f32.mrf.mxu0  ;;  %v18016_v51 = vcombine.low %v2151_v30, %v2159_v22  ;;  %v18001_v47 = vcombine.high %v2135_v53, %v2143_v46  ;;  %v1871_v49 = vld [vmem:[#allocation8 + $0x2158] sm:$0xff] }
 0x45a   :  { %v19493_v0 = vadd.f32 %v14071_v58, %v14031_v57  ;;  %14397 = vmatprep.mubr.bf16.mxu1 %v19337_v20  ;;  %v14033_v9 = vadd.f32 %v14032_v4, %v19487_v45  ;;  %v14073_v18 = vpop.f32.mrf.mxu1  ;;  %14326 = vmatprep.subr.bf16.mxu0 %v17793_v60  ;;  %v17745_v60 = vcombine.high %v1879_v43, %v1887_v44  ;;  %v2127_v54 = vld [vmem:[#allocation8 + $0x2958] sm:$0xff] }
 0x45b   :  { %v14034_v10 = vpop.f32.mrf.mxu0  ;;  %14367 = vmatprep.subr.bf16.mxu1 %v18049_v40  ;;  %v2119_v40 = vld [vmem:[#allocation8 + $0x2918] sm:$0xff]  ;;  %v18000_v57 = vcombine.low %v2135_v53, %v2143_v46  ;;  %v17729_v58 = vcombine.high %v1863_v48, %v1871_v49 }
 0x45c   :  { %v19497_v23 = vadd.f32 %v14073_v18, %v14033_v9  ;;  %v14075_v26 = vpop.f32.mrf.mxu1  ;;  %14327 = vmatpush1.bf16.msra.mxu0 %v17792_v21  ;;  %v17985_v21 = vcombine.high %v2119_v40, %v2127_v54  ;;  %v1847_v4 = vld [vmem:[#allocation8 + $0x2098] sm:$0xff]  ;;  %v17728_v18 = vcombine.low %v1863_v48, %v1871_v49 }
 0x45d   :  { %14368 = vmatpush1.bf16.msra.mxu1 %v18048_v7  ;;  %v14035_v15 = vpop.f32.mrf.mxu0  ;;  %14328 = vmatprep.subr.bf16.mxu0 %v17777_v12  ;;  %v1855_v7 = vld [vmem:[#allocation8 + $0x20d8] sm:$0xff] }
 0x45e   :  { %v14076_v45 = vpop.f32.mrf.mxu1  ;;  %14369 = vmatprep.subr.bf16.mxu1 %v18033_v5  ;;  %v2103_v12 = vld [vmem:[#allocation8 + $0x2898] sm:$0xff]  ;;  %v17984_v5 = vcombine.low %v2119_v40, %v2127_v54  ;;  %v17713_v11 = vcombine.high %v1847_v4, %v1855_v7 }
 0x45f   :  { %v2111_v9 = vld [vmem:[#allocation8 + $0x28d8] sm:$0xff] }
 0x460   :  { %14329 = vmatpush1.bf16.msra.mxu0 %v17776_v16  ;;  %v17969_v27 = vcombine.high %v2103_v12, %v2111_v9  ;;  %v1831_v10 = vld [vmem:[#allocation8 + $0x2018] sm:$0xff]  ;;  %v17712_v16 = vcombine.low %v1847_v4, %v1855_v7  ;;  %v17968_v15 = vcombine.low %v2103_v12, %v2111_v9 }
 0x461   :  { %14370 = vmatpush1.bf16.msra.mxu1 %v18032_v24  ;;  %14330 = vmatprep.subr.bf16.mxu0 %v17761_v36  ;;  %v1839_v30 = vld [vmem:[#allocation8 + $0x2058] sm:$0xff] }
 0x462   :  { %14371 = vmatprep.subr.bf16.mxu1 %v18017_v37  ;;  %v2087_v22 = vld [vmem:[#allocation8 + $0x2818] sm:$0xff]  ;;  %v17697_v24 = vcombine.high %v1831_v10, %v1839_v30  ;;  %v17696_v53 = vcombine.low %v1831_v10, %v1839_v30 }
 0x463   :  { %v2095_v26 = vld [vmem:[#allocation8 + $0x2858] sm:$0xff] }
 0x464   :  { %14331 = vmatpush1.bf16.msra.mxu0 %v17760_v39  ;;  %v17953_v36 = vcombine.high %v2087_v22, %v2095_v26  ;;  %v2071_v45 = vld [vmem:[#allocation8 + $0x2798] sm:$0xff]  ;;  %v17952_v46 = vcombine.low %v2087_v22, %v2095_v26 }
 0x465   :  { %14372 = vmatpush1.bf16.msra.mxu1 %v18016_v51  ;;  %14332 = vmatprep.subr.bf16.mxu0 %v17745_v60  ;;  %v2079_v37 = vld [vmem:[#allocation8 + $0x27d8] sm:$0xff] }
 0x466   :  { %14373 = vmatprep.subr.bf16.mxu1 %v18001_v47  ;;  %v2327_v43 = vld [vmem:[#allocation8 + $0x2f98] sm:$0xff]  ;;  %v17937_v39 = vcombine.high %v2071_v45, %v2079_v37  ;;  %v17936_v40 = vcombine.low %v2071_v45, %v2079_v37 }
 0x467   :  { %v2335_v44 = vld [vmem:[#allocation8 + $0x2fd8] sm:$0xff] }
 0x468   :  { %14333 = vmatpush1.bf16.msra.mxu0 %v17744_v55  ;;  %v18193_v51 = vcombine.high %v2327_v43, %v2335_v44  ;;  %v2055_v60 = vld [vmem:[#allocation8 + $0x2718] sm:$0xff]  ;;  %v18192_v54 = vcombine.low %v2327_v43, %v2335_v44 }
 0x469   :  { %14374 = vmatpush1.bf16.msra.mxu1 %v18000_v57  ;;  %14334 = vmatprep.subr.bf16.mxu0 %v17729_v58  ;;  %v2063_v47 = vld [vmem:[#allocation8 + $0x2758] sm:$0xff] }
 0x46a   :  { %14375 = vmatprep.subr.bf16.mxu1 %v17985_v21  ;;  %v2311_v48 = vld [vmem:[#allocation8 + $0x2f18] sm:$0xff]  ;;  %v17921_v55 = vcombine.high %v2055_v60, %v2063_v47  ;;  %v17920_v12 = vcombine.low %v2055_v60, %v2063_v47 }
 0x46b   :  { %v2319_v49 = vld [vmem:[#allocation8 + $0x2f58] sm:$0xff] }
 0x46c   :  { %14335 = vmatpush1.bf16.msra.mxu0 %v17728_v18  ;;  %v18177_v57 = vcombine.high %v2311_v48, %v2319_v49  ;;  %v2039_v58 = vld [vmem:[#allocation8 + $0x2698] sm:$0xff]  ;;  %v18176_v9 = vcombine.low %v2311_v48, %v2319_v49 }
 0x46d   :  { %14376 = vmatpush1.bf16.msra.mxu1 %v17984_v5  ;;  %14336 = vmatprep.subr.bf16.mxu0 %v17713_v11  ;;  %v2047_v21 = vld [vmem:[#allocation8 + $0x26d8] sm:$0xff] }
 0x46e   :  { %14377 = vmatprep.subr.bf16.mxu1 %v17969_v27  ;;  %v2295_v4 = vld [vmem:[#allocation8 + $0x2e98] sm:$0xff]  ;;  %v17905_v18 = vcombine.high %v2039_v58, %v2047_v21  ;;  %v17904_v22 = vcombine.low %v2039_v58, %v2047_v21 }
 0x46f   :  { %v2303_v7 = vld [vmem:[#allocation8 + $0x2ed8] sm:$0xff] }
 0x470   :  { %14337 = vmatpush1.bf16.msra.mxu0 %v17712_v16  ;;  %v18161_v5 = vcombine.high %v2295_v4, %v2303_v7  ;;  %v2023_v11 = vld [vmem:[#allocation8 + $0x2618] sm:$0xff]  ;;  %v18160_v26 = vcombine.low %v2295_v4, %v2303_v7 }
 0x471   :  { %14378 = vmatpush1.bf16.msra.mxu1 %v17968_v15  ;;  %14338 = vmatprep.subr.bf16.mxu0 %v17697_v24  ;;  %v2031_v27 = vld [vmem:[#allocation8 + $0x2658] sm:$0xff] }
 0x472   :  { %14379 = vmatprep.subr.bf16.mxu1 %v17953_v36  ;;  %v2279_v10 = vld [vmem:[#allocation8 + $0x2e18] sm:$0xff]  ;;  %v17889_v16 = vcombine.high %v2023_v11, %v2031_v27  ;;  %v17888_v43 = vcombine.low %v2023_v11, %v2031_v27 }
 0x473   :  { %v2287_v30 = vld [vmem:[#allocation8 + $0x2e58] sm:$0xff] }
 0x474   :  { %14339 = vmatpush1.bf16.msra.mxu0 %v17696_v53  ;;  %v18145_v15 = vcombine.high %v2279_v10, %v2287_v30  ;;  %v2007_v24 = vld [vmem:[#allocation8 + $0x2598] sm:$0xff]  ;;  %v18144_v44 = vcombine.low %v2279_v10, %v2287_v30 }
 0x475   :  { %14380 = vmatpush1.bf16.msra.mxu1 %v17952_v46  ;;  %14340 = vmatprep.subr.bf16.mxu0 %v17937_v39  ;;  %v2015_v36 = vld [vmem:[#allocation8 + $0x25d8] sm:$0xff] }
 0x476   :  { %14381 = vmatprep.subr.bf16.mxu1 %v18193_v51  ;;  %v2263_v45 = vld [vmem:[#allocation8 + $0x2d98] sm:$0xff]  ;;  %v17873_v53 = vcombine.high %v2007_v24, %v2015_v36  ;;  %v17872_v48 = vcombine.low %v2007_v24, %v2015_v36 }
 0x477   :  { %v2271_v37 = vld [vmem:[#allocation8 + $0x2dd8] sm:$0xff] }
 0x478   :  { %14341 = vmatpush2.bf16.msra.mxu0 %v17936_v40  ;;  %v18129_v46 = vcombine.high %v2263_v45, %v2271_v37  ;;  %v1991_v39 = vld [vmem:[#allocation8 + $0x2518] sm:$0xff]  ;;  %v18128_v49 = vcombine.low %v2263_v45, %v2271_v37 }
 0x479   :  { %14382 = vmatpush2.bf16.msra.mxu1 %v18192_v54  ;;  %14342 = vmatprep.subr.bf16.mxu0 %v17921_v55  ;;  %v1999_v51 = vld [vmem:[#allocation8 + $0x2558] sm:$0xff] }
 0x47a   :  { %14383 = vmatprep.subr.bf16.mxu1 %v18177_v57  ;;  %v2247_v60 = vld [vmem:[#allocation8 + $0x2d18] sm:$0xff]  ;;  %v17857_v40 = vcombine.high %v1991_v39, %v1999_v51  ;;  %v17856_v4 = vcombine.low %v1991_v39, %v1999_v51 }
 0x47b   :  { %v2255_v47 = vld [vmem:[#allocation8 + $0x2d58] sm:$0xff] }
 0x47c   :  { %14343 = vmatpush2.bf16.msra.mxu0 %v17920_v12  ;;  %v18113_v54 = vcombine.high %v2247_v60, %v2255_v47  ;;  %v1975_v55 = vld [vmem:[#allocation8 + $0x2498] sm:$0xff]  ;;  %v18112_v7 = vcombine.low %v2247_v60, %v2255_v47 }
 0x47d   :  { %14384 = vmatpush2.bf16.msra.mxu1 %v18176_v9  ;;  %14344 = vmatprep.subr.bf16.mxu0 %v17905_v18  ;;  %v1983_v57 = vld [vmem:[#allocation8 + $0x24d8] sm:$0xff] }
 0x47e   :  { %14385 = vmatprep.subr.bf16.mxu1 %v18161_v5  ;;  %v2231_v58 = vld [vmem:[#allocation8 + $0x2c98] sm:$0xff]  ;;  %v17841_v12 = vcombine.high %v1975_v55, %v1983_v57  ;;  %v17840_v10 = vcombine.low %v1975_v55, %v1983_v57 }
 0x47f   :  { %v2239_v21 = vld [vmem:[#allocation8 + $0x2cd8] sm:$0xff] }
 0x480   :  { %14345 = vmatpush2.bf16.msra.mxu0 %v17904_v22  ;;  %v18097_v9 = vcombine.high %v2231_v58, %v2239_v21  ;;  %v1959_v18 = vld [vmem:[#allocation8 + $0x2418] sm:$0xff]  ;;  %v18096_v30 = vcombine.low %v2231_v58, %v2239_v21 }
 0x481   :  { %14386 = vmatpush2.bf16.msra.mxu1 %v18160_v26  ;;  %14346 = vmatprep.subr.bf16.mxu0 %v17889_v16  ;;  %v1967_v5 = vld [vmem:[#allocation8 + $0x2458] sm:$0xff] }
 0x482   :  { %14387 = vmatprep.subr.bf16.mxu1 %v18145_v15  ;;  %v2215_v11 = vld [vmem:[#allocation8 + $0x2c18] sm:$0xff]  ;;  %v17825_v22 = vcombine.high %v1959_v18, %v1967_v5  ;;  %v17824_v45 = vcombine.low %v1959_v18, %v1967_v5 }
 0x483   :  { %v2223_v27 = vld [vmem:[#allocation8 + $0x2c58] sm:$0xff] }
 0x484   :  { %14347 = vmatpush2.bf16.msra.mxu0 %v17888_v43  ;;  %v18081_v26 = vcombine.high %v2215_v11, %v2223_v27  ;;  %v2455_v16 = vld [vmem:[#allocation8 + $0x3398] sm:$0xff]  ;;  %v18080_v37 = vcombine.low %v2215_v11, %v2223_v27 }
 0x485   :  { %14388 = vmatpush2.bf16.msra.mxu1 %v18144_v44  ;;  %14348 = vmatprep.subr.bf16.mxu0 %v17873_v53  ;;  %v2463_v15 = vld [vmem:[#allocation8 + $0x33d8] sm:$0xff] }
 0x486   :  { %14389 = vmatprep.subr.bf16.mxu1 %v18129_v46  ;;  %v2711_v24 = vld [vmem:[#allocation8 + $0x3b98] sm:$0xff]  ;;  %v18321_v43 = vcombine.high %v2455_v16, %v2463_v15  ;;  %v18320_v39 = vcombine.low %v2455_v16, %v2463_v15 }
 0x487   :  { %v2719_v36 = vld [vmem:[#allocation8 + $0x3bd8] sm:$0xff] }
 0x488   :  { %14349 = vmatpush2.bf16.msra.mxu0 %v17872_v48  ;;  %v18577_v44 = vcombine.high %v2711_v24, %v2719_v36  ;;  %v2439_v53 = vld [vmem:[#allocation8 + $0x3318] sm:$0xff]  ;;  %v18576_v47 = vcombine.low %v2711_v24, %v2719_v36 }
 0x489   :  { %14390 = vmatpush2.bf16.msra.mxu1 %v18128_v49  ;;  %14350 = vmatprep.subr.bf16.mxu0 %v17857_v40  ;;  %v2447_v46 = vld [vmem:[#allocation8 + $0x3358] sm:$0xff] }
 0x48a   :  { %14391 = vmatprep.subr.bf16.mxu1 %v18113_v54  ;;  %v2695_v51 = vld [vmem:[#allocation8 + $0x3b18] sm:$0xff]  ;;  %v18305_v48 = vcombine.high %v2439_v53, %v2447_v46 }
 0x48b   :  { %v2703_v60 = vld [vmem:[#allocation8 + $0x3b58] sm:$0xff] }
 0x48c   :  { %14351 = vmatpush2.bf16.msra.mxu0 %v17856_v4  ;;  %v2423_v49 = vld [vmem:[#allocation8 + $0x3298] sm:$0xff]  ;;  %v18561_v55 = vcombine.high %v2695_v51, %v2703_v60 }
 0x48d   :  { %14392 = vmatpush2.bf16.msra.mxu1 %v18112_v7  ;;  %14352 = vmatprep.subr.bf16.mxu0 %v17841_v12  ;;  %v2431_v40 = vld [vmem:[#allocation8 + $0x32d8] sm:$0xff]  ;;  %v18304_v7 = vcombine.low %v2439_v53, %v2447_v46 }
 0x48e   :  { %14393 = vmatprep.subr.bf16.mxu1 %v18097_v9  ;;  %v2679_v57 = vld [vmem:[#allocation8 + $0x3a98] sm:$0xff]  ;;  %v18560_v9 = vcombine.low %v2695_v51, %v2703_v60  ;;  %v18289_v18 = vcombine.high %v2423_v49, %v2431_v40  ;;  %v18288_v36 = vcombine.low %v2423_v49, %v2431_v40 }
 0x48f   :  { %v2687_v58 = vld [vmem:[#allocation8 + $0x3ad8] sm:$0xff] }
 0x490   :  { %14353 = vmatpush2.bf16.msra.mxu0 %v17840_v10  ;;  %v2407_v10 = vld [vmem:[#allocation8 + $0x3218] sm:$0xff] }
 0x491   :  { %14394 = vmatpush2.bf16.msra.mxu1 %v18096_v30  ;;  %14354 = vmatprep.subr.bf16.mxu0 %v17825_v22  ;;  %v2415_v30 = vld [vmem:[#allocation8 + $0x3258] sm:$0xff] }
 0x492   :  { %14395 = vmatprep.subr.bf16.mxu1 %v18081_v26  ;;  %v2663_v26 = vld [vmem:[#allocation8 + $0x3a18] sm:$0xff]  ;;  %v18272_v60 = vcombine.low %v2407_v10, %v2415_v30 }
 0x493   :  { %v2671_v16 = vld [vmem:[#allocation8 + $0x3a58] sm:$0xff] }
 0x494   :  { %14355 = vmatpush2.bf16.msra.mxu0 %v17824_v45  ;;  %v2391_v53 = vld [vmem:[#allocation8 + $0x3198] sm:$0xff] }
 0x495   :  { %14396 = vmatpush2.bf16.msra.mxu1 %v18080_v37  ;;  %14406 = vmatprep.subr.bf16.mxu0 %v18321_v43  ;;  %v18544_v37 = vcombine.low %v2679_v57, %v2687_v58  ;;  %v18273_v43 = vcombine.high %v2407_v10, %v2415_v30  ;;  %v2399_v46 = vld [vmem:[#allocation8 + $0x31d8] sm:$0xff] }
 0x496   :  { %14447 = vmatprep.subr.bf16.mxu1 %v18577_v44  ;;  %v18529_v44 = vcombine.high %v2663_v26, %v2671_v16  ;;  %v2655_v51 = vld [vmem:[#allocation8 + $0x39d8] sm:$0xff] }
 0x497   :  { %v14112_v54 = vpop.f32.mrf.mxu0  ;;  %14357 = vmatmul.mubr.bf16.vlgmr.msra.gmra.mxu0 %v19359_v34  ;;  %v2375_v40 = vld [vmem:[#allocation8 + $0x3118] sm:$0xff] }
 0x498   :  { %v14113_v21 = vadd.f32 %v14112_v54, %v19493_v0  ;;  %v14153_v4 = vpop.f32.mrf.mxu1  ;;  %14398 = vmatmul.mubr.bf16.vlgmr.msra.gmra.mxu1 %v19357_v25  ;;  %14407 = vmatpush1.bf16.msra.mxu0 %v18320_v39  ;;  %v18545_v0 = vcombine.high %v2679_v57, %v2687_v58  ;;  %v2647_v39 = vld [vmem:[#allocation8 + $0x3998] sm:$0xff]  ;;  %v18256_v58 = vcombine.low %v2391_v53, %v2399_v46 }
 0x499   :  { %14438 = vmatprep.mubr.bf16.mxu0 %v19361_v41  ;;  %14448 = vmatpush1.bf16.msra.mxu1 %v18576_v47  ;;  %v14114_v12 = vpop.f32.mrf.mxu0  ;;  %v18528_v47 = vcombine.low %v2663_v26, %v2671_v16  ;;  %v18513_v49 = vcombine.high %v2647_v39, %v2655_v51  ;;  %v2383_v54 = vld [vmem:[#allocation8 + $0x3158] sm:$0xff] }
 0x49a   :  { %v19503_v5 = vadd.f32 %v14153_v4, %v14113_v21  ;;  %14479 = vmatprep.mubr.bf16.mxu1 %v19363_v42  ;;  %v14115_v11 = vadd.f32 %v14114_v12, %v19497_v23  ;;  %v14155_v27 = vpop.f32.mrf.mxu1  ;;  %14408 = vmatprep.subr.bf16.mxu0 %v18305_v48  ;;  %v18257_v48 = vcombine.high %v2391_v53, %v2399_v46  ;;  %v2639_v57 = vld [vmem:[#allocation8 + $0x3958] sm:$0xff] }
 0x49b   :  { %v14116_v22 = vpop.f32.mrf.mxu0  ;;  %14449 = vmatprep.subr.bf16.mxu1 %v18561_v55  ;;  %v2631_v55 = vld [vmem:[#allocation8 + $0x3918] sm:$0xff]  ;;  %v18512_v21 = vcombine.low %v2647_v39, %v2655_v51  ;;  %v18241_v4 = vcombine.high %v2375_v40, %v2383_v54 }
 0x49c   :  { %v19507_v15 = vadd.f32 %v14155_v27, %v14115_v11  ;;  %v14157_v24 = vpop.f32.mrf.mxu1  ;;  %14409 = vmatpush1.bf16.msra.mxu0 %v18304_v7  ;;  %v18497_v7 = vcombine.high %v2631_v55, %v2639_v57  ;;  %v2359_v12 = vld [vmem:[#allocation8 + $0x3098] sm:$0xff]  ;;  %v18240_v27 = vcombine.low %v2375_v40, %v2383_v54 }
 0x49d   :  { %14450 = vmatpush1.bf16.msra.mxu1 %v18560_v9  ;;  %v14117_v45 = vpop.f32.mrf.mxu0  ;;  %14410 = vmatprep.subr.bf16.mxu0 %v18289_v18  ;;  %v2367_v9 = vld [vmem:[#allocation8 + $0x30d8] sm:$0xff] }
 0x49e   :  { %v14158_v23 = vpop.f32.mrf.mxu1  ;;  %14451 = vmatprep.subr.bf16.mxu1 %v18545_v0  ;;  %v2615_v18 = vld [vmem:[#allocation8 + $0x3898] sm:$0xff]  ;;  %v18496_v0 = vcombine.low %v2631_v55, %v2639_v57  ;;  %v18225_v10 = vcombine.high %v2359_v12, %v2367_v9 }
 0x49f   :  { %v2623_v11 = vld [vmem:[#allocation8 + $0x38d8] sm:$0xff] }
 0x4a0   :  { %14411 = vmatpush1.bf16.msra.mxu0 %v18288_v36  ;;  %v18481_v30 = vcombine.high %v2615_v18, %v2623_v11  ;;  %v2343_v22 = vld [vmem:[#allocation8 + $0x3018] sm:$0xff]  ;;  %v18224_v36 = vcombine.low %v2359_v12, %v2367_v9  ;;  %v18480_v45 = vcombine.low %v2615_v18, %v2623_v11 }
 0x4a1   :  { %14452 = vmatpush1.bf16.msra.mxu1 %v18544_v37  ;;  %14412 = vmatprep.subr.bf16.mxu0 %v18273_v43  ;;  %v2351_v26 = vld [vmem:[#allocation8 + $0x3058] sm:$0xff] }
 0x4a2   :  { %14453 = vmatprep.subr.bf16.mxu1 %v18529_v44  ;;  %v2599_v16 = vld [vmem:[#allocation8 + $0x3818] sm:$0xff]  ;;  %v18209_v37 = vcombine.high %v2343_v22, %v2351_v26  ;;  %v18208_v39 = vcombine.low %v2343_v22, %v2351_v26 }
 0x4a3   :  { %v2607_v24 = vld [vmem:[#allocation8 + $0x3858] sm:$0xff] }
 0x4a4   :  { %14413 = vmatpush1.bf16.msra.mxu0 %v18272_v60  ;;  %v18465_v43 = vcombine.high %v2599_v16, %v2607_v24  ;;  %v2583_v23 = vld [vmem:[#allocation8 + $0x3798] sm:$0xff]  ;;  %v18464_v51 = vcombine.low %v2599_v16, %v2607_v24 }
 0x4a5   :  { %14454 = vmatpush1.bf16.msra.mxu1 %v18528_v47  ;;  %14414 = vmatprep.subr.bf16.mxu0 %v18257_v48  ;;  %v2591_v44 = vld [vmem:[#allocation8 + $0x37d8] sm:$0xff] }
 0x4a6   :  { %14455 = vmatprep.subr.bf16.mxu1 %v18513_v49  ;;  %v2839_v53 = vld [vmem:[#allocation8 + $0x3f98] sm:$0xff]  ;;  %v18449_v60 = vcombine.high %v2583_v23, %v2591_v44  ;;  %v18448_v55 = vcombine.low %v2583_v23, %v2591_v44 }
 0x4a7   :  { %v2847_v46 = vld [vmem:[#allocation8 + $0x3fd8] sm:$0xff] }
 0x4a8   :  { %14415 = vmatpush1.bf16.msra.mxu0 %v18256_v58  ;;  %v18705_v47 = vcombine.high %v2839_v53, %v2847_v46  ;;  %v2567_v48 = vld [vmem:[#allocation8 + $0x3718] sm:$0xff]  ;;  %v18704_v57 = vcombine.low %v2839_v53, %v2847_v46 }
 0x4a9   :  { %14456 = vmatpush1.bf16.msra.mxu1 %v18512_v21  ;;  %14416 = vmatprep.subr.bf16.mxu0 %v18241_v4  ;;  %v2575_v49 = vld [vmem:[#allocation8 + $0x3758] sm:$0xff] }
 0x4aa   :  { %14457 = vmatprep.subr.bf16.mxu1 %v18497_v7  ;;  %v2823_v40 = vld [vmem:[#allocation8 + $0x3f18] sm:$0xff]  ;;  %v18433_v58 = vcombine.high %v2567_v48, %v2575_v49  ;;  %v18432_v18 = vcombine.low %v2567_v48, %v2575_v49 }
 0x4ab   :  { %v2831_v54 = vld [vmem:[#allocation8 + $0x3f58] sm:$0xff] }
 0x4ac   :  { %14417 = vmatpush1.bf16.msra.mxu0 %v18240_v27  ;;  %v18689_v21 = vcombine.high %v2823_v40, %v2831_v54  ;;  %v2551_v4 = vld [vmem:[#allocation8 + $0x3698] sm:$0xff]  ;;  %v18688_v11 = vcombine.low %v2823_v40, %v2831_v54 }
 0x4ad   :  { %14458 = vmatpush1.bf16.msra.mxu1 %v18496_v0  ;;  %14418 = vmatprep.subr.bf16.mxu0 %v18225_v10  ;;  %v2559_v7 = vld [vmem:[#allocation8 + $0x36d8] sm:$0xff] }
 0x4ae   :  { %14459 = vmatprep.subr.bf16.mxu1 %v18481_v30  ;;  %v2807_v12 = vld [vmem:[#allocation8 + $0x3e98] sm:$0xff]  ;;  %v18417_v27 = vcombine.high %v2551_v4, %v2559_v7  ;;  %v18416_v16 = vcombine.low %v2551_v4, %v2559_v7 }
 0x4af   :  { %v2815_v9 = vld [vmem:[#allocation8 + $0x3ed8] sm:$0xff] }
 0x4b0   :  { %14419 = vmatpush1.bf16.msra.mxu0 %v18224_v36  ;;  %v18673_v0 = vcombine.high %v2807_v12, %v2815_v9  ;;  %v2535_v10 = vld [vmem:[#allocation8 + $0x3618] sm:$0xff]  ;;  %v18672_v24 = vcombine.low %v2807_v12, %v2815_v9 }
 0x4b1   :  { %14460 = vmatpush1.bf16.msra.mxu1 %v18480_v45  ;;  %14420 = vmatprep.subr.bf16.mxu0 %v18209_v37  ;;  %v2543_v30 = vld [vmem:[#allocation8 + $0x3658] sm:$0xff] }
 0x4b2   :  { %14461 = vmatprep.subr.bf16.mxu1 %v18465_v43  ;;  %v2791_v22 = vld [vmem:[#allocation8 + $0x3e18] sm:$0xff]  ;;  %v18401_v36 = vcombine.high %v2535_v10, %v2543_v30  ;;  %v18400_v53 = vcombine.low %v2535_v10, %v2543_v30 }
 0x4b3   :  { %v2799_v26 = vld [vmem:[#allocation8 + $0x3e58] sm:$0xff] }
 0x4b4   :  { %14421 = vmatpush1.bf16.msra.mxu0 %v18208_v39  ;;  %v18657_v45 = vcombine.high %v2791_v22, %v2799_v26  ;;  %v2519_v37 = vld [vmem:[#allocation8 + $0x3598] sm:$0xff]  ;;  %v18656_v46 = vcombine.low %v2791_v22, %v2799_v26 }
 0x4b5   :  { %14462 = vmatpush1.bf16.msra.mxu1 %v18464_v51  ;;  %14422 = vmatprep.subr.bf16.mxu0 %v18449_v60  ;;  %v2527_v43 = vld [vmem:[#allocation8 + $0x35d8] sm:$0xff] }
 0x4b6   :  { %14463 = vmatprep.subr.bf16.mxu1 %v18705_v47  ;;  %v2775_v23 = vld [vmem:[#allocation8 + $0x3d98] sm:$0xff]  ;;  %v18385_v39 = vcombine.high %v2519_v37, %v2527_v43  ;;  %v18384_v40 = vcombine.low %v2519_v37, %v2527_v43  ;;  %v1176_v37 = vld [vmem:[#allocation8 + $0xba0] sm:$0xff] }
 0x4b7   :  { %v2783_v44 = vld [vmem:[#allocation8 + $0x3dd8] sm:$0xff]  ;;  %v1184_v43 = vld [vmem:[#allocation8 + $0xbe0] sm:$0xff] }
 0x4b8   :  { %14423 = vmatpush2.bf16.msra.mxu0 %v18448_v55  ;;  %v18641_v51 = vcombine.high %v2775_v23, %v2783_v44  ;;  %v2503_v60 = vld [vmem:[#allocation8 + $0x3518] sm:$0xff]  ;;  %v18640_v54 = vcombine.low %v2775_v23, %v2783_v44 }
 0x4b9   :  { %14464 = vmatpush2.bf16.msra.mxu1 %v18704_v57  ;;  %14424 = vmatprep.subr.bf16.mxu0 %v18433_v58  ;;  %v2511_v47 = vld [vmem:[#allocation8 + $0x3558] sm:$0xff] }
 0x4ba   :  { %14465 = vmatprep.subr.bf16.mxu1 %v18689_v21  ;;  %v2759_v48 = vld [vmem:[#allocation8 + $0x3d18] sm:$0xff]  ;;  %v18369_v55 = vcombine.high %v2503_v60, %v2511_v47  ;;  %v18368_v12 = vcombine.low %v2503_v60, %v2511_v47  ;;  %v19007_v60 = vld [vmem:[#allocation10] sm:$0xff] }
 0x4bb   :  { %v2767_v49 = vld [vmem:[#allocation8 + $0x3d58] sm:$0xff]  ;;  %v2883_v47 = vrot.slane %v19007_v60, %v19310_v3 }
 0x4bc   :  { %14425 = vmatpush2.bf16.msra.mxu0 %v18432_v18  ;;  %v18625_v57 = vcombine.high %v2759_v48, %v2767_v49  ;;  %v2487_v58 = vld [vmem:[#allocation8 + $0x3498] sm:$0xff]  ;;  %v18624_v9 = vcombine.low %v2759_v48, %v2767_v49  ;;  %v1160_v49 = vld [vmem:[#allocation8 + $0xb20] sm:$0xff] }
 0x4bd   :  { %14466 = vmatpush2.bf16.msra.mxu1 %v18688_v11  ;;  %14426 = vmatprep.subr.bf16.mxu0 %v18417_v27  ;;  %v2495_v21 = vld [vmem:[#allocation8 + $0x34d8] sm:$0xff] }
 0x4be   :  { %14467 = vmatprep.subr.bf16.mxu1 %v18673_v0  ;;  %v2743_v4 = vld [vmem:[#allocation8 + $0x3c98] sm:$0xff]  ;;  %v18353_v18 = vcombine.high %v2487_v58, %v2495_v21  ;;  %v18352_v22 = vcombine.low %v2487_v58, %v2495_v21  ;;  %v888_v58 = vld [vmem:[#allocation8 + $0x2a0] sm:$0xff] }
 0x4bf   :  { %v2751_v7 = vld [vmem:[#allocation8 + $0x3cd8] sm:$0xff]  ;;  %v896_v21 = vld [vmem:[#allocation8 + $0x2e0] sm:$0xff] }
 0x4c0   :  { %14427 = vmatpush2.bf16.msra.mxu0 %v18416_v16  ;;  %v18609_v11 = vcombine.high %v2743_v4, %v2751_v7  ;;  %v2471_v27 = vld [vmem:[#allocation8 + $0x3418] sm:$0xff]  ;;  %v18608_v26 = vcombine.low %v2743_v4, %v2751_v7 }
 0x4c1   :  { %14468 = vmatpush2.bf16.msra.mxu1 %v18672_v24  ;;  %14428 = vmatprep.subr.bf16.mxu0 %v18401_v36  ;;  %v2479_v0 = vld [vmem:[#allocation8 + $0x3458] sm:$0xff]  ;;  %v920_v36 = vld [vmem:[#allocation8 + $0x3a0] sm:$0xff] }
 0x4c2   :  { %14469 = vmatprep.subr.bf16.mxu1 %v18657_v45  ;;  %v2727_v10 = vld [vmem:[#allocation8 + $0x3c18] sm:$0xff]  ;;  %v18337_v16 = vcombine.high %v2471_v27, %v2479_v0  ;;  %v928_v45 = vld [vmem:[#allocation8 + $0x3e0] sm:$0xff]  ;;  %v18336_v23 = vcombine.low %v2471_v27, %v2479_v0 }
 0x4c3   :  { %v2735_v30 = vld [vmem:[#allocation8 + $0x3c58] sm:$0xff]  ;;  %v16786_v48 = vcombine.low %v920_v36, %v928_v45 }
 0x4c4   :  { %14429 = vmatpush2.bf16.msra.mxu0 %v18400_v53  ;;  %v18593_v24 = vcombine.high %v2727_v10, %v2735_v30  ;;  %v18592_v44 = vcombine.low %v2727_v10, %v2735_v30  ;;  %v16787_v53 = vcombine.high %v920_v36, %v928_v45  ;;  %v16755_v30 = vcombine.high %v888_v58, %v896_v21  ;;  %v872_v36 = vld [vmem:[#allocation8 + $0x220] sm:$0xff] }
 0x4c5   :  { %14470 = vmatpush2.bf16.msra.mxu1 %v18656_v46  ;;  %14430 = vmatprep.subr.bf16.mxu0 %v18385_v39  ;;  %v17043_v46 = vcombine.high %v1176_v37, %v1184_v43  ;;  %v904_v39 = vld [vmem:[#allocation8 + $0x320] sm:$0xff] }
 0x4c6   :  { %14471 = vmatprep.subr.bf16.mxu1 %v18641_v51  ;;  %v912_v51 = vld [vmem:[#allocation8 + $0x360] sm:$0xff] }
 0x4c7   :  { %v16770_v27 = vcombine.low %v904_v39, %v912_v51  ;;  %v880_v45 = vld [vmem:[#allocation8 + $0x260] sm:$0xff] }
 0x4c8   :  { %14431 = vmatpush2.bf16.msra.mxu0 %v18384_v40  ;;  %v1168_v40 = vld [vmem:[#allocation8 + $0xb60] sm:$0xff] }
 0x4c9   :  { %14472 = vmatpush2.bf16.msra.mxu1 %v18640_v54  ;;  %14432 = vmatprep.subr.bf16.mxu0 %v18369_v55  ;;  %v17042_v54 = vcombine.low %v1176_v37, %v1184_v43  ;;  %v2887_v55 = vrot.slane %v19007_v60, %v19281_v38  ;;  %v17027_v7 = vcombine.high %v1160_v49, %v1168_v40  ;;  %v1128_v43 = vld [vmem:[#allocation8 + $0xa20] sm:$0xff] }
 0x4ca   :  { %14473 = vmatprep.subr.bf16.mxu1 %v18625_v57  ;;  %v16771_v57 = vcombine.high %v904_v39, %v912_v51  ;;  %v17026_v10 = vcombine.low %v1160_v49, %v1168_v40  ;;  %v16739_v60 = vcombine.high %v872_v36, %v880_v45  ;;  %v856_v49 = vld [vmem:[#allocation8 + $0x1a0] sm:$0xff] }
 0x4cb   :  { %v864_v40 = vld [vmem:[#allocation8 + $0x1e0] sm:$0xff] }
 0x4cc   :  { %14433 = vmatpush2.bf16.msra.mxu0 %v18368_v12  ;;  %v1144_v12 = vld [vmem:[#allocation8 + $0xaa0] sm:$0xff] }
 0x4cd   :  { %14474 = vmatpush2.bf16.msra.mxu1 %v18624_v9  ;;  %14434 = vmatprep.subr.bf16.mxu0 %v18353_v18  ;;  %v1152_v9 = vld [vmem:[#allocation8 + $0xae0] sm:$0xff] }
 0x4ce   :  { %14475 = vmatprep.subr.bf16.mxu1 %v18609_v11  ;;  %v17010_v51 = vcombine.low %v1144_v12, %v1152_v9 }
 0x4d0   :  { %14435 = vmatpush2.bf16.msra.mxu0 %v18352_v22 }
 0x4d1   :  { %14476 = vmatpush2.bf16.msra.mxu1 %v18608_v26  ;;  %14436 = vmatprep.subr.bf16.mxu0 %v18337_v16 }
 0x4d2   :  { %14477 = vmatprep.subr.bf16.mxu1 %v18593_v24  ;;  %v17011_v24 = vcombine.high %v1144_v12, %v1152_v9  ;;  %v1104_v12 = vld [vmem:[#allocation8 + $0x960] sm:$0xff]  ;;  %v16722_v9 = vcombine.low %v856_v49, %v864_v40 }
 0x4d4   :  { %14437 = vmatpush2.bf16.msra.mxu0 %v18336_v23  ;;  %v1136_v23 = vld [vmem:[#allocation8 + $0xa60] sm:$0xff] }
 0x4d5   :  { %14478 = vmatpush2.bf16.msra.mxu1 %v18592_v44  ;;  %14488 = vmatprep.subr.bf16.mxu0 %v16787_v53 }
 0x4d6   :  { %14529 = vmatprep.subr.bf16.mxu1 %v17043_v46  ;;  %v16754_v46 = vcombine.low %v888_v58, %v896_v21  ;;  %v840_v21 = vld [vmem:[#allocation8 + $0x120] sm:$0xff] }
 0x4d7   :  { %v14194_v4 = vpop.f32.mrf.mxu0  ;;  %14439 = vmatmul.mubr.bf16.vlgmr.msra.gmra.mxu0 %v19376_v52 }
 0x4d8   :  { %v14195_v18 = vadd.f32 %v14194_v4, %v2883_v47  ;;  %v14235_v11 = vpop.f32.mrf.mxu1  ;;  %14480 = vmatmul.mubr.bf16.vlgmr.msra.gmra.mxu1 %v19378_v56  ;;  %14489 = vmatpush1.bf16.msra.mxu0 %v16786_v48  ;;  %v16995_v48 = vcombine.high %v1128_v43, %v1136_v23  ;;  %v16994_v4 = vcombine.low %v1128_v43, %v1136_v23  ;;  %v808_v23 = vld [vmem:[#allocation8 + $0x20] sm:$0xff] }
 0x4d9   :  { %14520 = vmatprep.mubr.bf16.mxu0 %v19293_v62  ;;  %14530 = vmatpush1.bf16.msra.mxu1 %v17042_v54  ;;  %v14196_v0 = vpop.f32.mrf.mxu0  ;;  %v1112_v54 = vld [vmem:[#allocation8 + $0x9a0] sm:$0xff] }
 0x4da   :  { %v19514_v22 = vadd.f32 %v14235_v11, %v14195_v18  ;;  %14561 = vmatprep.mubr.bf16.mxu1 %v19295_v63  ;;  %v14197_v26 = vadd.f32 %v14196_v0, %v2887_v55  ;;  %v14237_v16 = vpop.f32.mrf.mxu1  ;;  %14490 = vmatprep.subr.bf16.mxu0 %v16771_v57  ;;  %v1120_v55 = vld [vmem:[#allocation8 + $0x9e0] sm:$0xff]  ;;  %v16738_v57 = vcombine.low %v872_v36, %v880_v45 }
 0x4db   :  { %v14198_v37 = vpop.f32.mrf.mxu0  ;;  %14531 = vmatprep.subr.bf16.mxu1 %v17027_v7  ;;  %v16723_v7 = vcombine.high %v856_v49, %v864_v40  ;;  %v16979_v58 = vcombine.high %v1112_v54, %v1120_v55  ;;  %v848_v18 = vld [vmem:[#allocation8 + $0x160] sm:$0xff] }
 0x4dc   :  { %v19517_v44 = vadd.f32 %v14237_v16, %v14197_v26  ;;  %v14239_v53 = vpop.f32.mrf.mxu1  ;;  %14491 = vmatpush1.bf16.msra.mxu0 %v16770_v27  ;;  %v1096_v11 = vld [vmem:[#allocation8 + $0x920] sm:$0xff]  ;;  %v16978_v27 = vcombine.low %v1112_v54, %v1120_v55  ;;  %v16707_v0 = vcombine.high %v840_v21, %v848_v18  ;;  %v16706_v36 = vcombine.low %v840_v21, %v848_v18 }
 0x4dd   :  { %14532 = vmatpush1.bf16.msra.mxu1 %v17026_v10  ;;  %v14199_v39 = vpop.f32.mrf.mxu0  ;;  %14492 = vmatprep.subr.bf16.mxu0 %v16755_v30  ;;  %v16963_v10 = vcombine.high %v1096_v11, %v1104_v12  ;;  %v824_v30 = vld [vmem:[#allocation8 + $0xa0] sm:$0xff]  ;;  %v16962_v45 = vcombine.low %v1096_v11, %v1104_v12 }
 0x4de   :  { %v14240_v47 = vpop.f32.mrf.mxu1  ;;  %14533 = vmatprep.subr.bf16.mxu1 %v17011_v24  ;;  %v832_v26 = vld [vmem:[#allocation8 + $0xe0] sm:$0xff] }
 0x4df   :  { %v1080_v16 = vld [vmem:[#allocation8 + $0x8a0] sm:$0xff]  ;;  %v16691_v37 = vcombine.high %v824_v30, %v832_v26 }
 0x4e0   :  { %14493 = vmatpush1.bf16.msra.mxu0 %v16754_v46  ;;  %v1088_v24 = vld [vmem:[#allocation8 + $0x8e0] sm:$0xff] }
 0x4e1   :  { %14534 = vmatpush1.bf16.msra.mxu1 %v17010_v51  ;;  %14494 = vmatprep.subr.bf16.mxu0 %v16739_v60  ;;  %v16947_v43 = vcombine.high %v1080_v16, %v1088_v24  ;;  %v816_v53 = vld [vmem:[#allocation8 + $0x60] sm:$0xff]  ;;  %v16690_v51 = vcombine.low %v824_v30, %v832_v26  ;;  %v16946_v60 = vcombine.low %v1080_v16, %v1088_v24 }
 0x4e2   :  { %14535 = vmatprep.subr.bf16.mxu1 %v16995_v48  ;;  %v1064_v46 = vld [vmem:[#allocation8 + $0x820] sm:$0xff]  ;;  %v16675_v47 = vcombine.high %v808_v23, %v816_v53 }
 0x4e3   :  { %v1072_v39 = vld [vmem:[#allocation8 + $0x860] sm:$0xff] }
 0x4e4   :  { %14495 = vmatpush1.bf16.msra.mxu0 %v16738_v57  ;;  %v16931_v48 = vcombine.high %v1064_v46, %v1072_v39  ;;  %v1048_v49 = vld [vmem:[#allocation8 + $0x7a0] sm:$0xff]  ;;  %v16674_v57 = vcombine.low %v808_v23, %v816_v53 }
 0x4e5   :  { %14536 = vmatpush1.bf16.msra.mxu1 %v16994_v4  ;;  %14496 = vmatprep.subr.bf16.mxu0 %v16723_v7  ;;  %v1056_v40 = vld [vmem:[#allocation8 + $0x7e0] sm:$0xff]  ;;  %v16930_v4 = vcombine.low %v1064_v46, %v1072_v39 }
 0x4e6   :  { %14537 = vmatprep.subr.bf16.mxu1 %v16979_v58  ;;  %v1304_v54 = vld [vmem:[#allocation8 + $0xfa0] sm:$0xff]  ;;  %v16915_v7 = vcombine.high %v1048_v49, %v1056_v40 }
 0x4e7   :  { %v1312_v55 = vld [vmem:[#allocation8 + $0xfe0] sm:$0xff] }
 0x4e8   :  { %14497 = vmatpush1.bf16.msra.mxu0 %v16722_v9  ;;  %v17171_v58 = vcombine.high %v1304_v54, %v1312_v55  ;;  %v1032_v21 = vld [vmem:[#allocation8 + $0x720] sm:$0xff]  ;;  %v16914_v9 = vcombine.low %v1048_v49, %v1056_v40 }
 0x4e9   :  { %14538 = vmatpush1.bf16.msra.mxu1 %v16978_v27  ;;  %14498 = vmatprep.subr.bf16.mxu0 %v16707_v0  ;;  %v1040_v18 = vld [vmem:[#allocation8 + $0x760] sm:$0xff]  ;;  %v17170_v27 = vcombine.low %v1304_v54, %v1312_v55 }
 0x4ea   :  { %14539 = vmatprep.subr.bf16.mxu1 %v16963_v10  ;;  %v1288_v11 = vld [vmem:[#allocation8 + $0xf20] sm:$0xff]  ;;  %v16899_v0 = vcombine.high %v1032_v21, %v1040_v18 }
 0x4eb   :  { %v1296_v12 = vld [vmem:[#allocation8 + $0xf60] sm:$0xff] }
 0x4ec   :  { %14499 = vmatpush1.bf16.msra.mxu0 %v16706_v36  ;;  %v17155_v10 = vcombine.high %v1288_v11, %v1296_v12  ;;  %v1016_v30 = vld [vmem:[#allocation8 + $0x6a0] sm:$0xff]  ;;  %v16898_v36 = vcombine.low %v1032_v21, %v1040_v18 }
 0x4ed   :  { %14540 = vmatpush1.bf16.msra.mxu1 %v16962_v45  ;;  %14500 = vmatprep.subr.bf16.mxu0 %v16691_v37  ;;  %v1024_v26 = vld [vmem:[#allocation8 + $0x6e0] sm:$0xff]  ;;  %v17154_v45 = vcombine.low %v1288_v11, %v1296_v12 }
 0x4ee   :  { %14541 = vmatprep.subr.bf16.mxu1 %v16947_v43  ;;  %v1272_v16 = vld [vmem:[#allocation8 + $0xea0] sm:$0xff]  ;;  %v16883_v37 = vcombine.high %v1016_v30, %v1024_v26 }
 0x4ef   :  { %v1280_v24 = vld [vmem:[#allocation8 + $0xee0] sm:$0xff] }
 0x4f0   :  { %14501 = vmatpush1.bf16.msra.mxu0 %v16690_v51  ;;  %v17139_v43 = vcombine.high %v1272_v16, %v1280_v24  ;;  %v1000_v23 = vld [vmem:[#allocation8 + $0x620] sm:$0xff]  ;;  %v16882_v51 = vcombine.low %v1016_v30, %v1024_v26 }
 0x4f1   :  { %14542 = vmatpush1.bf16.msra.mxu1 %v16946_v60  ;;  %14502 = vmatprep.subr.bf16.mxu0 %v16675_v47  ;;  %v1008_v53 = vld [vmem:[#allocation8 + $0x660] sm:$0xff]  ;;  %v17138_v60 = vcombine.low %v1272_v16, %v1280_v24 }
 0x4f2   :  { %14543 = vmatprep.subr.bf16.mxu1 %v16931_v48  ;;  %v1256_v46 = vld [vmem:[#allocation8 + $0xe20] sm:$0xff]  ;;  %v16867_v47 = vcombine.high %v1000_v23, %v1008_v53 }
 0x4f3   :  { %v1264_v39 = vld [vmem:[#allocation8 + $0xe60] sm:$0xff] }
 0x4f4   :  { %14503 = vmatpush1.bf16.msra.mxu0 %v16674_v57  ;;  %v17123_v48 = vcombine.high %v1256_v46, %v1264_v39  ;;  %v984_v49 = vld [vmem:[#allocation8 + $0x5a0] sm:$0xff]  ;;  %v16866_v57 = vcombine.low %v1000_v23, %v1008_v53 }
 0x4f5   :  { %14544 = vmatpush1.bf16.msra.mxu1 %v16930_v4  ;;  %14504 = vmatprep.subr.bf16.mxu0 %v16915_v7  ;;  %v992_v40 = vld [vmem:[#allocation8 + $0x5e0] sm:$0xff]  ;;  %v17122_v4 = vcombine.low %v1256_v46, %v1264_v39 }
 0x4f6   :  { %14545 = vmatprep.subr.bf16.mxu1 %v17171_v58  ;;  %v1240_v54 = vld [vmem:[#allocation8 + $0xda0] sm:$0xff]  ;;  %v16851_v7 = vcombine.high %v984_v49, %v992_v40 }
 0x4f7   :  { %v1248_v55 = vld [vmem:[#allocation8 + $0xde0] sm:$0xff] }
 0x4f8   :  { %14505 = vmatpush2.bf16.msra.mxu0 %v16914_v9  ;;  %v17107_v58 = vcombine.high %v1240_v54, %v1248_v55  ;;  %v968_v21 = vld [vmem:[#allocation8 + $0x520] sm:$0xff]  ;;  %v16850_v9 = vcombine.low %v984_v49, %v992_v40 }
 0x4f9   :  { %14546 = vmatpush2.bf16.msra.mxu1 %v17170_v27  ;;  %14506 = vmatprep.subr.bf16.mxu0 %v16899_v0  ;;  %v976_v18 = vld [vmem:[#allocation8 + $0x560] sm:$0xff]  ;;  %v17106_v27 = vcombine.low %v1240_v54, %v1248_v55 }
 0x4fa   :  { %14547 = vmatprep.subr.bf16.mxu1 %v17155_v10  ;;  %v1224_v11 = vld [vmem:[#allocation8 + $0xd20] sm:$0xff]  ;;  %v16835_v0 = vcombine.high %v968_v21, %v976_v18 }
 0x4fb   :  { %v1232_v12 = vld [vmem:[#allocation8 + $0xd60] sm:$0xff] }
 0x4fc   :  { %14507 = vmatpush2.bf16.msra.mxu0 %v16898_v36  ;;  %v17091_v10 = vcombine.high %v1224_v11, %v1232_v12  ;;  %v952_v30 = vld [vmem:[#allocation8 + $0x4a0] sm:$0xff]  ;;  %v16834_v36 = vcombine.low %v968_v21, %v976_v18 }
 0x4fd   :  { %14548 = vmatpush2.bf16.msra.mxu1 %v17154_v45  ;;  %14508 = vmatprep.subr.bf16.mxu0 %v16883_v37  ;;  %v960_v26 = vld [vmem:[#allocation8 + $0x4e0] sm:$0xff]  ;;  %v17090_v45 = vcombine.low %v1224_v11, %v1232_v12 }
 0x4fe   :  { %14549 = vmatprep.subr.bf16.mxu1 %v17139_v43  ;;  %v1208_v16 = vld [vmem:[#allocation8 + $0xca0] sm:$0xff]  ;;  %v16819_v37 = vcombine.high %v952_v30, %v960_v26 }
 0x4ff   :  { %v1216_v24 = vld [vmem:[#allocation8 + $0xce0] sm:$0xff] }
 0x500   :  { %14509 = vmatpush2.bf16.msra.mxu0 %v16882_v51  ;;  %v17075_v43 = vcombine.high %v1208_v16, %v1216_v24  ;;  %v936_v23 = vld [vmem:[#allocation8 + $0x420] sm:$0xff]  ;;  %v16818_v51 = vcombine.low %v952_v30, %v960_v26 }
 0x501   :  { %14550 = vmatpush2.bf16.msra.mxu1 %v17138_v60  ;;  %14510 = vmatprep.subr.bf16.mxu0 %v16867_v47  ;;  %v944_v53 = vld [vmem:[#allocation8 + $0x460] sm:$0xff]  ;;  %v17074_v60 = vcombine.low %v1208_v16, %v1216_v24 }
 0x502   :  { %14551 = vmatprep.subr.bf16.mxu1 %v17123_v48  ;;  %v1192_v46 = vld [vmem:[#allocation8 + $0xc20] sm:$0xff]  ;;  %v16803_v47 = vcombine.high %v936_v23, %v944_v53 }
 0x503   :  { %v1200_v39 = vld [vmem:[#allocation8 + $0xc60] sm:$0xff] }
 0x504   :  { %14511 = vmatpush2.bf16.msra.mxu0 %v16866_v57  ;;  %v17059_v48 = vcombine.high %v1192_v46, %v1200_v39  ;;  %v1432_v49 = vld [vmem:[#allocation8 + $0x13a0] sm:$0xff]  ;;  %v16802_v57 = vcombine.low %v936_v23, %v944_v53 }
 0x505   :  { %14552 = vmatpush2.bf16.msra.mxu1 %v17122_v4  ;;  %14512 = vmatprep.subr.bf16.mxu0 %v16851_v7  ;;  %v1440_v40 = vld [vmem:[#allocation8 + $0x13e0] sm:$0xff]  ;;  %v17058_v4 = vcombine.low %v1192_v46, %v1200_v39 }
 0x506   :  { %14553 = vmatprep.subr.bf16.mxu1 %v17107_v58  ;;  %v1688_v54 = vld [vmem:[#allocation8 + $0x1ba0] sm:$0xff]  ;;  %v17299_v7 = vcombine.high %v1432_v49, %v1440_v40  ;;  %v17298_v11 = vcombine.low %v1432_v49, %v1440_v40 }
 0x507   :  { %v1696_v55 = vld [vmem:[#allocation8 + $0x1be0] sm:$0xff] }
 0x508   :  { %14513 = vmatpush2.bf16.msra.mxu0 %v16850_v9  ;;  %v17555_v58 = vcombine.high %v1688_v54, %v1696_v55  ;;  %v1416_v21 = vld [vmem:[#allocation8 + $0x1320] sm:$0xff] }
 0x509   :  { %14554 = vmatpush2.bf16.msra.mxu1 %v17106_v27  ;;  %14514 = vmatprep.subr.bf16.mxu0 %v16835_v0  ;;  %v1424_v18 = vld [vmem:[#allocation8 + $0x1360] sm:$0xff]  ;;  %v17554_v27 = vcombine.low %v1688_v54, %v1696_v55 }
 0x50a   :  { %14555 = vmatprep.subr.bf16.mxu1 %v17091_v10  ;;  %v1672_v12 = vld [vmem:[#allocation8 + $0x1b20] sm:$0xff]  ;;  %v17283_v0 = vcombine.high %v1416_v21, %v1424_v18 }
 0x50b   :  { %v1680_v9 = vld [vmem:[#allocation8 + $0x1b60] sm:$0xff] }
 0x50c   :  { %14515 = vmatpush2.bf16.msra.mxu0 %v16834_v36  ;;  %v1400_v10 = vld [vmem:[#allocation8 + $0x12a0] sm:$0xff]  ;;  %v17539_v16 = vcombine.high %v1672_v12, %v1680_v9  ;;  %v17538_v53 = vcombine.low %v1672_v12, %v1680_v9 }
 0x50d   :  { %14556 = vmatpush2.bf16.msra.mxu1 %v17090_v45  ;;  %14516 = vmatprep.subr.bf16.mxu0 %v16819_v37  ;;  %v1408_v30 = vld [vmem:[#allocation8 + $0x12e0] sm:$0xff] }
 0x50e   :  { %14557 = vmatprep.subr.bf16.mxu1 %v17075_v43  ;;  %v1656_v24 = vld [vmem:[#allocation8 + $0x1aa0] sm:$0xff]  ;;  %v17282_v43 = vcombine.low %v1416_v21, %v1424_v18  ;;  %v17267_v46 = vcombine.high %v1400_v10, %v1408_v30 }
 0x50f   :  { %v1664_v36 = vld [vmem:[#allocation8 + $0x1ae0] sm:$0xff] }
 0x510   :  { %14517 = vmatpush2.bf16.msra.mxu0 %v16818_v51  ;;  %v1640_v40 = vld [vmem:[#allocation8 + $0x1a20] sm:$0xff] }
 0x511   :  { %14558 = vmatpush2.bf16.msra.mxu1 %v17074_v60  ;;  %14518 = vmatprep.subr.bf16.mxu0 %v16803_v47  ;;  %v1384_v47 = vld [vmem:[#allocation8 + $0x1220] sm:$0xff] }
 0x512   :  { %14559 = vmatprep.subr.bf16.mxu1 %v17059_v48  ;;  %v1392_v48 = vld [vmem:[#allocation8 + $0x1260] sm:$0xff] }
 0x513   :  { %v1648_v54 = vld [vmem:[#allocation8 + $0x1a60] sm:$0xff]  ;;  %v17251_v21 = vcombine.high %v1384_v47, %v1392_v48 }
 0x514   :  { %14519 = vmatpush2.bf16.msra.mxu0 %v16802_v57  ;;  %v17507_v18 = vcombine.high %v1640_v40, %v1648_v54  ;;  %v1376_v12 = vld [vmem:[#allocation8 + $0x11e0] sm:$0xff] }
 0x515   :  { %14560 = vmatpush2.bf16.msra.mxu1 %v17058_v4  ;;  %14570 = vmatprep.subr.bf16.mxu0 %v17299_v7  ;;  %v17266_v4 = vcombine.low %v1400_v10, %v1408_v30  ;;  %v1624_v9 = vld [vmem:[#allocation8 + $0x19a0] sm:$0xff] }
 0x516   :  { %14611 = vmatprep.subr.bf16.mxu1 %v17555_v58  ;;  %v17522_v58 = vcombine.low %v1656_v24, %v1664_v36  ;;  %v1352_v30 = vld [vmem:[#allocation8 + $0x1120] sm:$0xff] }
 0x517   :  { %v14276_v26 = vpop.f32.mrf.mxu0  ;;  %14521 = vmatmul.mubr.bf16.vlgmr.msra.gmra.mxu0 %v19297_v2 }
 0x518   :  { %v14277_v45 = vadd.f32 %v14276_v26, %v19514_v22  ;;  %v14317_v37 = vpop.f32.mrf.mxu1  ;;  %14562 = vmatmul.mubr.bf16.vlgmr.msra.gmra.mxu1 %v19291_v59  ;;  %14571 = vmatpush1.bf16.msra.mxu0 %v17298_v11  ;;  %v17523_v22 = vcombine.high %v1656_v24, %v1664_v36  ;;  %v1368_v11 = vld [vmem:[#allocation8 + $0x11a0] sm:$0xff]  ;;  %v17506_v26 = vcombine.low %v1640_v40, %v1648_v54 }
 0x519   :  { %14602 = vmatprep.mubr.bf16.mxu0 %v19303_v13  ;;  %14612 = vmatpush1.bf16.msra.mxu1 %v17554_v27  ;;  %v14278_v23 = vpop.f32.mrf.mxu0  ;;  %v1632_v27 = vld [vmem:[#allocation8 + $0x19e0] sm:$0xff]  ;;  %v17234_v36 = vcombine.low %v1368_v11, %v1376_v12 }
 0x51a   :  { %v19523_v39 = vadd.f32 %v14317_v37, %v14277_v45  ;;  %14643 = vmatprep.mubr.bf16.mxu1 %v19305_v14  ;;  %v14279_v51 = vadd.f32 %v14278_v23, %v19517_v44  ;;  %v14319_v60 = vpop.f32.mrf.mxu1  ;;  %14572 = vmatprep.subr.bf16.mxu0 %v17283_v0  ;;  %v17250_v0 = vcombine.low %v1384_v47, %v1392_v48  ;;  %v1360_v45 = vld [vmem:[#allocation8 + $0x1160] sm:$0xff] }
 0x51b   :  { %v14280_v49 = vpop.f32.mrf.mxu0  ;;  %14613 = vmatprep.subr.bf16.mxu1 %v17539_v16  ;;  %v17235_v16 = vcombine.high %v1368_v11, %v1376_v12  ;;  %v17491_v10 = vcombine.high %v1624_v9, %v1632_v27  ;;  %v1608_v37 = vld [vmem:[#allocation8 + $0x1920] sm:$0xff]  ;;  %v17219_v23 = vcombine.high %v1352_v30, %v1360_v45  ;;  %v17218_v47 = vcombine.low %v1352_v30, %v1360_v45 }
 0x51c   :  { %v19527_v55 = vadd.f32 %v14319_v60, %v14279_v51  ;;  %v14321_v57 = vpop.f32.mrf.mxu1  ;;  %14573 = vmatpush1.bf16.msra.mxu0 %v17282_v43  ;;  %v1616_v24 = vld [vmem:[#allocation8 + $0x1960] sm:$0xff]  ;;  %v17490_v43 = vcombine.low %v1624_v9, %v1632_v27 }
 0x51d   :  { %14614 = vmatpush1.bf16.msra.mxu1 %v17538_v53  ;;  %v14281_v7 = vpop.f32.mrf.mxu0  ;;  %14574 = vmatprep.subr.bf16.mxu0 %v17267_v46  ;;  %v17475_v53 = vcombine.high %v1608_v37, %v1616_v24  ;;  %v1336_v46 = vld [vmem:[#allocation8 + $0x10a0] sm:$0xff]  ;;  %v17474_v48 = vcombine.low %v1608_v37, %v1616_v24 }
 0x51e   :  { %v14322_v44 = vpop.f32.mrf.mxu1  ;;  %14615 = vmatprep.subr.bf16.mxu1 %v17523_v22  ;;  %v1344_v51 = vld [vmem:[#allocation8 + $0x10e0] sm:$0xff] }
 0x51f   :  { %v1592_v60 = vld [vmem:[#allocation8 + $0x18a0] sm:$0xff]  ;;  %v17203_v49 = vcombine.high %v1336_v46, %v1344_v51 }
 0x520   :  { %14575 = vmatpush1.bf16.msra.mxu0 %v17266_v4  ;;  %v1600_v22 = vld [vmem:[#allocation8 + $0x18e0] sm:$0xff] }
 0x521   :  { %14616 = vmatpush1.bf16.msra.mxu1 %v17522_v58  ;;  %14576 = vmatprep.subr.bf16.mxu0 %v17251_v21  ;;  %v17459_v40 = vcombine.high %v1592_v60, %v1600_v22  ;;  %v1320_v54 = vld [vmem:[#allocation8 + $0x1020] sm:$0xff]  ;;  %v17202_v58 = vcombine.low %v1336_v46, %v1344_v51  ;;  %v17458_v21 = vcombine.low %v1592_v60, %v1600_v22 }
 0x522   :  { %14617 = vmatprep.subr.bf16.mxu1 %v17507_v18  ;;  %v1328_v57 = vld [vmem:[#allocation8 + $0x1060] sm:$0xff] }
 0x523   :  { %v1576_v4 = vld [vmem:[#allocation8 + $0x1820] sm:$0xff]  ;;  %v17187_v44 = vcombine.high %v1320_v54, %v1328_v57 }
 0x524   :  { %14577 = vmatpush1.bf16.msra.mxu0 %v17250_v0  ;;  %v1584_v7 = vld [vmem:[#allocation8 + $0x1860] sm:$0xff]  ;;  %v17186_v0 = vcombine.low %v1320_v54, %v1328_v57 }
 0x525   :  { %14618 = vmatpush1.bf16.msra.mxu1 %v17506_v26  ;;  %14578 = vmatprep.subr.bf16.mxu0 %v17235_v16  ;;  %v17443_v18 = vcombine.high %v1576_v4, %v1584_v7  ;;  %v1560_v11 = vld [vmem:[#allocation8 + $0x17a0] sm:$0xff]  ;;  %v17442_v26 = vcombine.low %v1576_v4, %v1584_v7 }
 0x526   :  { %14619 = vmatprep.subr.bf16.mxu1 %v17491_v10  ;;  %v1568_v12 = vld [vmem:[#allocation8 + $0x17e0] sm:$0xff] }
 0x527   :  { %v1816_v9 = vld [vmem:[#allocation8 + $0x1fa0] sm:$0xff]  ;;  %v17427_v16 = vcombine.high %v1560_v11, %v1568_v12 }
 0x528   :  { %14579 = vmatpush1.bf16.msra.mxu0 %v17234_v36  ;;  %v1824_v27 = vld [vmem:[#allocation8 + $0x1fe0] sm:$0xff]  ;;  %v17426_v36 = vcombine.low %v1560_v11, %v1568_v12 }
 0x529   :  { %14620 = vmatpush1.bf16.msra.mxu1 %v17490_v43  ;;  %14580 = vmatprep.subr.bf16.mxu0 %v17219_v23  ;;  %v17683_v10 = vcombine.high %v1816_v9, %v1824_v27  ;;  %v1544_v30 = vld [vmem:[#allocation8 + $0x1720] sm:$0xff]  ;;  %v17682_v43 = vcombine.low %v1816_v9, %v1824_v27 }
 0x52a   :  { %14621 = vmatprep.subr.bf16.mxu1 %v17475_v53  ;;  %v1552_v45 = vld [vmem:[#allocation8 + $0x1760] sm:$0xff] }
 0x52b   :  { %v1800_v37 = vld [vmem:[#allocation8 + $0x1f20] sm:$0xff]  ;;  %v17411_v23 = vcombine.high %v1544_v30, %v1552_v45 }
 0x52c   :  { %14581 = vmatpush1.bf16.msra.mxu0 %v17218_v47  ;;  %v1808_v24 = vld [vmem:[#allocation8 + $0x1f60] sm:$0xff]  ;;  %v17410_v47 = vcombine.low %v1544_v30, %v1552_v45 }
 0x52d   :  { %14622 = vmatpush1.bf16.msra.mxu1 %v17474_v48  ;;  %14582 = vmatprep.subr.bf16.mxu0 %v17203_v49  ;;  %v17667_v53 = vcombine.high %v1800_v37, %v1808_v24  ;;  %v1528_v46 = vld [vmem:[#allocation8 + $0x16a0] sm:$0xff]  ;;  %v17666_v48 = vcombine.low %v1800_v37, %v1808_v24 }
 0x52e   :  { %14623 = vmatprep.subr.bf16.mxu1 %v17459_v40  ;;  %v1536_v51 = vld [vmem:[#allocation8 + $0x16e0] sm:$0xff] }
 0x52f   :  { %v1784_v60 = vld [vmem:[#allocation8 + $0x1ea0] sm:$0xff]  ;;  %v17395_v49 = vcombine.high %v1528_v46, %v1536_v51 }
 0x530   :  { %14583 = vmatpush1.bf16.msra.mxu0 %v17202_v58  ;;  %v1792_v22 = vld [vmem:[#allocation8 + $0x1ee0] sm:$0xff]  ;;  %v17394_v58 = vcombine.low %v1528_v46, %v1536_v51 }
 0x531   :  { %14624 = vmatpush1.bf16.msra.mxu1 %v17458_v21  ;;  %14584 = vmatprep.subr.bf16.mxu0 %v17187_v44  ;;  %v17651_v40 = vcombine.high %v1784_v60, %v1792_v22  ;;  %v1512_v54 = vld [vmem:[#allocation8 + $0x1620] sm:$0xff]  ;;  %v17650_v21 = vcombine.low %v1784_v60, %v1792_v22 }
 0x532   :  { %14625 = vmatprep.subr.bf16.mxu1 %v17443_v18  ;;  %v1520_v57 = vld [vmem:[#allocation8 + $0x1660] sm:$0xff] }
 0x533   :  { %v1768_v4 = vld [vmem:[#allocation8 + $0x1e20] sm:$0xff]  ;;  %v17379_v44 = vcombine.high %v1512_v54, %v1520_v57 }
 0x534   :  { %14585 = vmatpush1.bf16.msra.mxu0 %v17186_v0  ;;  %v1776_v7 = vld [vmem:[#allocation8 + $0x1e60] sm:$0xff]  ;;  %v17378_v0 = vcombine.low %v1512_v54, %v1520_v57 }
 0x535   :  { %14626 = vmatpush1.bf16.msra.mxu1 %v17442_v26  ;;  %14586 = vmatprep.subr.bf16.mxu0 %v17427_v16  ;;  %v17635_v18 = vcombine.high %v1768_v4, %v1776_v7  ;;  %v1496_v11 = vld [vmem:[#allocation8 + $0x15a0] sm:$0xff]  ;;  %v17634_v26 = vcombine.low %v1768_v4, %v1776_v7 }
 0x536   :  { %14627 = vmatprep.subr.bf16.mxu1 %v17683_v10  ;;  %v1504_v12 = vld [vmem:[#allocation8 + $0x15e0] sm:$0xff] }
 0x537   :  { %v1752_v9 = vld [vmem:[#allocation8 + $0x1da0] sm:$0xff]  ;;  %v17363_v16 = vcombine.high %v1496_v11, %v1504_v12 }
 0x538   :  { %14587 = vmatpush2.bf16.msra.mxu0 %v17426_v36  ;;  %v1760_v27 = vld [vmem:[#allocation8 + $0x1de0] sm:$0xff]  ;;  %v17362_v36 = vcombine.low %v1496_v11, %v1504_v12 }
 0x539   :  { %14628 = vmatpush2.bf16.msra.mxu1 %v17682_v43  ;;  %14588 = vmatprep.subr.bf16.mxu0 %v17411_v23  ;;  %v17619_v10 = vcombine.high %v1752_v9, %v1760_v27  ;;  %v1480_v30 = vld [vmem:[#allocation8 + $0x1520] sm:$0xff]  ;;  %v17618_v43 = vcombine.low %v1752_v9, %v1760_v27 }
 0x53a   :  { %14629 = vmatprep.subr.bf16.mxu1 %v17667_v53  ;;  %v1488_v45 = vld [vmem:[#allocation8 + $0x1560] sm:$0xff] }
 0x53b   :  { %v1736_v37 = vld [vmem:[#allocation8 + $0x1d20] sm:$0xff]  ;;  %v17347_v23 = vcombine.high %v1480_v30, %v1488_v45 }
 0x53c   :  { %14589 = vmatpush2.bf16.msra.mxu0 %v17410_v47  ;;  %v1744_v24 = vld [vmem:[#allocation8 + $0x1d60] sm:$0xff]  ;;  %v17346_v47 = vcombine.low %v1480_v30, %v1488_v45 }
 0x53d   :  { %14630 = vmatpush2.bf16.msra.mxu1 %v17666_v48  ;;  %14590 = vmatprep.subr.bf16.mxu0 %v17395_v49  ;;  %v17603_v53 = vcombine.high %v1736_v37, %v1744_v24  ;;  %v1464_v46 = vld [vmem:[#allocation8 + $0x14a0] sm:$0xff]  ;;  %v17602_v48 = vcombine.low %v1736_v37, %v1744_v24 }
 0x53e   :  { %14631 = vmatprep.subr.bf16.mxu1 %v17651_v40  ;;  %v1472_v51 = vld [vmem:[#allocation8 + $0x14e0] sm:$0xff] }
 0x53f   :  { %v1720_v60 = vld [vmem:[#allocation8 + $0x1ca0] sm:$0xff]  ;;  %v17331_v49 = vcombine.high %v1464_v46, %v1472_v51 }
 0x540   :  { %14591 = vmatpush2.bf16.msra.mxu0 %v17394_v58  ;;  %v1728_v22 = vld [vmem:[#allocation8 + $0x1ce0] sm:$0xff]  ;;  %v17330_v58 = vcombine.low %v1464_v46, %v1472_v51 }
 0x541   :  { %14632 = vmatpush2.bf16.msra.mxu1 %v17650_v21  ;;  %14592 = vmatprep.subr.bf16.mxu0 %v17379_v44  ;;  %v17587_v40 = vcombine.high %v1720_v60, %v1728_v22  ;;  %v1448_v54 = vld [vmem:[#allocation8 + $0x1420] sm:$0xff]  ;;  %v17586_v21 = vcombine.low %v1720_v60, %v1728_v22 }
 0x542   :  { %14633 = vmatprep.subr.bf16.mxu1 %v17635_v18  ;;  %v1456_v57 = vld [vmem:[#allocation8 + $0x1460] sm:$0xff] }
 0x543   :  { %v1704_v4 = vld [vmem:[#allocation8 + $0x1c20] sm:$0xff]  ;;  %v17315_v44 = vcombine.high %v1448_v54, %v1456_v57 }
 0x544   :  { %14593 = vmatpush2.bf16.msra.mxu0 %v17378_v0  ;;  %v1712_v7 = vld [vmem:[#allocation8 + $0x1c60] sm:$0xff]  ;;  %v17314_v0 = vcombine.low %v1448_v54, %v1456_v57 }
 0x545   :  { %14634 = vmatpush2.bf16.msra.mxu1 %v17634_v26  ;;  %14594 = vmatprep.subr.bf16.mxu0 %v17363_v16  ;;  %v17571_v18 = vcombine.high %v1704_v4, %v1712_v7  ;;  %v1944_v11 = vld [vmem:[#allocation8 + $0x23a0] sm:$0xff]  ;;  %v17570_v26 = vcombine.low %v1704_v4, %v1712_v7 }
 0x546   :  { %14635 = vmatprep.subr.bf16.mxu1 %v17619_v10  ;;  %v1952_v12 = vld [vmem:[#allocation8 + $0x23e0] sm:$0xff] }
 0x547   :  { %v2200_v9 = vld [vmem:[#allocation8 + $0x2ba0] sm:$0xff]  ;;  %v17811_v16 = vcombine.high %v1944_v11, %v1952_v12  ;;  %v17810_v37 = vcombine.low %v1944_v11, %v1952_v12 }
 0x548   :  { %14595 = vmatpush2.bf16.msra.mxu0 %v17362_v36  ;;  %v2208_v27 = vld [vmem:[#allocation8 + $0x2be0] sm:$0xff] }
 0x549   :  { %14636 = vmatpush2.bf16.msra.mxu1 %v17618_v43  ;;  %14596 = vmatprep.subr.bf16.mxu0 %v17347_v23  ;;  %v18067_v10 = vcombine.high %v2200_v9, %v2208_v27  ;;  %v1928_v30 = vld [vmem:[#allocation8 + $0x2320] sm:$0xff]  ;;  %v18066_v43 = vcombine.low %v2200_v9, %v2208_v27 }
 0x54a   :  { %14637 = vmatprep.subr.bf16.mxu1 %v17603_v53  ;;  %v1936_v45 = vld [vmem:[#allocation8 + $0x2360] sm:$0xff] }
 0x54b   :  { %v2184_v24 = vld [vmem:[#allocation8 + $0x2b20] sm:$0xff]  ;;  %v17795_v23 = vcombine.high %v1928_v30, %v1936_v45 }
 0x54c   :  { %14597 = vmatpush2.bf16.msra.mxu0 %v17346_v47  ;;  %v2192_v36 = vld [vmem:[#allocation8 + $0x2b60] sm:$0xff] }
 0x54d   :  { %14638 = vmatpush2.bf16.msra.mxu1 %v17602_v48  ;;  %14598 = vmatprep.subr.bf16.mxu0 %v17331_v49  ;;  %v1912_v53 = vld [vmem:[#allocation8 + $0x22a0] sm:$0xff]  ;;  %v18051_v60 = vcombine.high %v2184_v24, %v2192_v36  ;;  %v18050_v57 = vcombine.low %v2184_v24, %v2192_v36 }
 0x54e   :  { %14639 = vmatprep.subr.bf16.mxu1 %v17587_v40  ;;  %v1920_v46 = vld [vmem:[#allocation8 + $0x22e0] sm:$0xff]  ;;  %v17794_v40 = vcombine.low %v1928_v30, %v1936_v45 }
 0x54f   :  { %v2168_v22 = vld [vmem:[#allocation8 + $0x2aa0] sm:$0xff]  ;;  %v17779_v4 = vcombine.high %v1912_v53, %v1920_v46 }
 0x550   :  { %14599 = vmatpush2.bf16.msra.mxu0 %v17330_v58  ;;  %v2176_v47 = vld [vmem:[#allocation8 + $0x2ae0] sm:$0xff] }
 0x551   :  { %14640 = vmatpush2.bf16.msra.mxu1 %v17586_v21  ;;  %14600 = vmatprep.subr.bf16.mxu0 %v17315_v44  ;;  %v1896_v44 = vld [vmem:[#allocation8 + $0x2220] sm:$0xff] }
 0x552   :  { %14641 = vmatprep.subr.bf16.mxu1 %v17571_v18  ;;  %v1904_v18 = vld [vmem:[#allocation8 + $0x2260] sm:$0xff] }
 0x553   :  { %v2152_v12 = vld [vmem:[#allocation8 + $0x2a20] sm:$0xff]  ;;  %v17763_v30 = vcombine.high %v1896_v44, %v1904_v18 }
 0x554   :  { %14601 = vmatpush2.bf16.msra.mxu0 %v17314_v0  ;;  %v2160_v9 = vld [vmem:[#allocation8 + $0x2a60] sm:$0xff] }
 0x555   :  { %14642 = vmatpush2.bf16.msra.mxu1 %v17570_v26  ;;  %14652 = vmatprep.subr.bf16.mxu0 %v17811_v16  ;;  %v17778_v26 = vcombine.low %v1912_v53, %v1920_v46  ;;  %v18019_v45 = vcombine.high %v2152_v12, %v2160_v9  ;;  %v1888_v24 = vld [vmem:[#allocation8 + $0x21e0] sm:$0xff] }
 0x556   :  { %14693 = vmatprep.subr.bf16.mxu1 %v18067_v10  ;;  %v18034_v10 = vcombine.low %v2168_v22, %v2176_v47  ;;  %v2136_v36 = vld [vmem:[#allocation8 + $0x29a0] sm:$0xff] }
 0x557   :  { %v14358_v51 = vpop.f32.mrf.mxu0  ;;  %14603 = vmatmul.mubr.bf16.vlgmr.msra.gmra.mxu0 %v19333_v6  ;;  %v1864_v46 = vld [vmem:[#allocation8 + $0x2120] sm:$0xff] }
 0x558   :  { %v14359_v48 = vadd.f32 %v14358_v51, %v19523_v39  ;;  %v14399_v49 = vpop.f32.mrf.mxu1  ;;  %14644 = vmatmul.mubr.bf16.vlgmr.msra.gmra.mxu1 %v19331_v1  ;;  %14653 = vmatpush1.bf16.msra.mxu0 %v17810_v37  ;;  %v18035_v39 = vcombine.high %v2168_v22, %v2176_v47  ;;  %v1880_v37 = vld [vmem:[#allocation8 + $0x21a0] sm:$0xff]  ;;  %v18018_v51 = vcombine.low %v2152_v12, %v2160_v9 }
 0x559   :  { %14684 = vmatprep.mubr.bf16.mxu0 %v19335_v19  ;;  %14694 = vmatpush1.bf16.msra.mxu1 %v18066_v43  ;;  %v14360_v54 = vpop.f32.mrf.mxu0  ;;  %v2144_v43 = vld [vmem:[#allocation8 + $0x29e0] sm:$0xff]  ;;  %v17746_v47 = vcombine.low %v1880_v37, %v1888_v24 }
 0x55a   :  { %v19533_v7 = vadd.f32 %v14399_v49, %v14359_v48  ;;  %14725 = vmatprep.mubr.bf16.mxu1 %v19337_v20  ;;  %v14361_v58 = vadd.f32 %v14360_v54, %v19527_v55  ;;  %v14401_v21 = vpop.f32.mrf.mxu1  ;;  %14654 = vmatprep.subr.bf16.mxu0 %v17795_v23  ;;  %v17762_v23 = vcombine.low %v1896_v44, %v1904_v18  ;;  %v1872_v48 = vld [vmem:[#allocation8 + $0x2160] sm:$0xff] }
 0x55b   :  { %v14362_v11 = vpop.f32.mrf.mxu0  ;;  %14695 = vmatprep.subr.bf16.mxu1 %v18051_v60  ;;  %v17747_v60 = vcombine.high %v1880_v37, %v1888_v24  ;;  %v18003_v53 = vcombine.high %v2136_v36, %v2144_v43  ;;  %v2120_v49 = vld [vmem:[#allocation8 + $0x2920] sm:$0xff]  ;;  %v17731_v54 = vcombine.high %v1864_v46, %v1872_v48  ;;  %v17730_v44 = vcombine.low %v1864_v46, %v1872_v48 }
 0x55c   :  { %v19537_v27 = vadd.f32 %v14401_v21, %v14361_v58  ;;  %v14403_v0 = vpop.f32.mrf.mxu1  ;;  %14655 = vmatpush1.bf16.msra.mxu0 %v17794_v40  ;;  %v2128_v22 = vld [vmem:[#allocation8 + $0x2960] sm:$0xff]  ;;  %v18002_v40 = vcombine.low %v2136_v36, %v2144_v43 }
 0x55d   :  { %14696 = vmatpush1.bf16.msra.mxu1 %v18050_v57  ;;  %v14363_v16 = vpop.f32.mrf.mxu0  ;;  %14656 = vmatprep.subr.bf16.mxu0 %v17779_v4  ;;  %v17987_v57 = vcombine.high %v2120_v49, %v2128_v22  ;;  %v1848_v4 = vld [vmem:[#allocation8 + $0x20a0] sm:$0xff]  ;;  %v17986_v18 = vcombine.low %v2120_v49, %v2128_v22 }
 0x55e   :  { %v14404_v55 = vpop.f32.mrf.mxu1  ;;  %14697 = vmatprep.subr.bf16.mxu1 %v18035_v39  ;;  %v1856_v58 = vld [vmem:[#allocation8 + $0x20e0] sm:$0xff] }
 0x55f   :  { %v2104_v21 = vld [vmem:[#allocation8 + $0x28a0] sm:$0xff]  ;;  %v17715_v11 = vcombine.high %v1848_v4, %v1856_v58 }
 0x560   :  { %14657 = vmatpush1.bf16.msra.mxu0 %v17778_v26  ;;  %v2112_v39 = vld [vmem:[#allocation8 + $0x28e0] sm:$0xff] }
 0x561   :  { %14698 = vmatpush1.bf16.msra.mxu1 %v18034_v10  ;;  %14658 = vmatprep.subr.bf16.mxu0 %v17763_v30  ;;  %v17971_v12 = vcombine.high %v2104_v21, %v2112_v39  ;;  %v1832_v9 = vld [vmem:[#allocation8 + $0x2020] sm:$0xff]  ;;  %v17714_v10 = vcombine.low %v1848_v4, %v1856_v58  ;;  %v17970_v30 = vcombine.low %v2104_v21, %v2112_v39 }
 0x562   :  { %14699 = vmatprep.subr.bf16.mxu1 %v18019_v45  ;;  %v1840_v0 = vld [vmem:[#allocation8 + $0x2060] sm:$0xff] }
 0x563   :  { %v2088_v26 = vld [vmem:[#allocation8 + $0x2820] sm:$0xff]  ;;  %v17699_v55 = vcombine.high %v1832_v9, %v1840_v0 }
 0x564   :  { %14659 = vmatpush1.bf16.msra.mxu0 %v17762_v23  ;;  %v2096_v16 = vld [vmem:[#allocation8 + $0x2860] sm:$0xff]  ;;  %v17698_v23 = vcombine.low %v1832_v9, %v1840_v0 }
 0x565   :  { %14700 = vmatpush1.bf16.msra.mxu1 %v18018_v51  ;;  %14660 = vmatprep.subr.bf16.mxu0 %v17747_v60  ;;  %v17955_v45 = vcombine.high %v2088_v26, %v2096_v16  ;;  %v2072_v37 = vld [vmem:[#allocation8 + $0x27a0] sm:$0xff]  ;;  %v17954_v51 = vcombine.low %v2088_v26, %v2096_v16 }
 0x566   :  { %14701 = vmatprep.subr.bf16.mxu1 %v18003_v53  ;;  %v2080_v24 = vld [vmem:[#allocation8 + $0x27e0] sm:$0xff] }
 0x567   :  { %v2328_v36 = vld [vmem:[#allocation8 + $0x2fa0] sm:$0xff]  ;;  %v17939_v60 = vcombine.high %v2072_v37, %v2080_v24 }
 0x568   :  { %14661 = vmatpush1.bf16.msra.mxu0 %v17746_v47  ;;  %v2336_v43 = vld [vmem:[#allocation8 + $0x2fe0] sm:$0xff]  ;;  %v17938_v47 = vcombine.low %v2072_v37, %v2080_v24 }
 0x569   :  { %14702 = vmatpush1.bf16.msra.mxu1 %v18002_v40  ;;  %14662 = vmatprep.subr.bf16.mxu0 %v17731_v54  ;;  %v18195_v53 = vcombine.high %v2328_v36, %v2336_v43  ;;  %v2056_v46 = vld [vmem:[#allocation8 + $0x2720] sm:$0xff]  ;;  %v18194_v40 = vcombine.low %v2328_v36, %v2336_v43 }
 0x56a   :  { %14703 = vmatprep.subr.bf16.mxu1 %v17987_v57  ;;  %v2064_v48 = vld [vmem:[#allocation8 + $0x2760] sm:$0xff] }
 0x56b   :  { %v2312_v49 = vld [vmem:[#allocation8 + $0x2f20] sm:$0xff]  ;;  %v17923_v54 = vcombine.high %v2056_v46, %v2064_v48 }
 0x56c   :  { %14663 = vmatpush1.bf16.msra.mxu0 %v17730_v44  ;;  %v2320_v22 = vld [vmem:[#allocation8 + $0x2f60] sm:$0xff]  ;;  %v17922_v44 = vcombine.low %v2056_v46, %v2064_v48 }
 0x56d   :  { %14704 = vmatpush1.bf16.msra.mxu1 %v17986_v18  ;;  %14664 = vmatprep.subr.bf16.mxu0 %v17715_v11  ;;  %v18179_v57 = vcombine.high %v2312_v49, %v2320_v22  ;;  %v2040_v4 = vld [vmem:[#allocation8 + $0x26a0] sm:$0xff]  ;;  %v18178_v18 = vcombine.low %v2312_v49, %v2320_v22 }
 0x56e   :  { %14705 = vmatprep.subr.bf16.mxu1 %v17971_v12  ;;  %v2048_v58 = vld [vmem:[#allocation8 + $0x26e0] sm:$0xff] }
 0x56f   :  { %v2296_v21 = vld [vmem:[#allocation8 + $0x2ea0] sm:$0xff]  ;;  %v17907_v11 = vcombine.high %v2040_v4, %v2048_v58 }
 0x570   :  { %14665 = vmatpush1.bf16.msra.mxu0 %v17714_v10  ;;  %v2304_v39 = vld [vmem:[#allocation8 + $0x2ee0] sm:$0xff]  ;;  %v17906_v10 = vcombine.low %v2040_v4, %v2048_v58 }
 0x571   :  { %14706 = vmatpush1.bf16.msra.mxu1 %v17970_v30  ;;  %14666 = vmatprep.subr.bf16.mxu0 %v17699_v55  ;;  %v18163_v12 = vcombine.high %v2296_v21, %v2304_v39  ;;  %v2024_v9 = vld [vmem:[#allocation8 + $0x2620] sm:$0xff]  ;;  %v18162_v30 = vcombine.low %v2296_v21, %v2304_v39 }
 0x572   :  { %14707 = vmatprep.subr.bf16.mxu1 %v17955_v45  ;;  %v2032_v0 = vld [vmem:[#allocation8 + $0x2660] sm:$0xff] }
 0x573   :  { %v2280_v26 = vld [vmem:[#allocation8 + $0x2e20] sm:$0xff]  ;;  %v17891_v55 = vcombine.high %v2024_v9, %v2032_v0 }
 0x574   :  { %14667 = vmatpush1.bf16.msra.mxu0 %v17698_v23  ;;  %v2288_v16 = vld [vmem:[#allocation8 + $0x2e60] sm:$0xff]  ;;  %v17890_v23 = vcombine.low %v2024_v9, %v2032_v0 }
 0x575   :  { %14708 = vmatpush1.bf16.msra.mxu1 %v17954_v51  ;;  %14668 = vmatprep.subr.bf16.mxu0 %v17939_v60  ;;  %v18147_v45 = vcombine.high %v2280_v26, %v2288_v16  ;;  %v2008_v37 = vld [vmem:[#allocation8 + $0x25a0] sm:$0xff]  ;;  %v18146_v51 = vcombine.low %v2280_v26, %v2288_v16 }
 0x576   :  { %14709 = vmatprep.subr.bf16.mxu1 %v18195_v53  ;;  %v2016_v24 = vld [vmem:[#allocation8 + $0x25e0] sm:$0xff] }
 0x577   :  { %v2264_v36 = vld [vmem:[#allocation8 + $0x2da0] sm:$0xff]  ;;  %v17875_v60 = vcombine.high %v2008_v37, %v2016_v24 }
 0x578   :  { %14669 = vmatpush2.bf16.msra.mxu0 %v17938_v47  ;;  %v2272_v43 = vld [vmem:[#allocation8 + $0x2de0] sm:$0xff]  ;;  %v17874_v47 = vcombine.low %v2008_v37, %v2016_v24 }
 0x579   :  { %14710 = vmatpush2.bf16.msra.mxu1 %v18194_v40  ;;  %14670 = vmatprep.subr.bf16.mxu0 %v17923_v54  ;;  %v18131_v53 = vcombine.high %v2264_v36, %v2272_v43  ;;  %v1992_v46 = vld [vmem:[#allocation8 + $0x2520] sm:$0xff]  ;;  %v18130_v40 = vcombine.low %v2264_v36, %v2272_v43 }
 0x57a   :  { %14711 = vmatprep.subr.bf16.mxu1 %v18179_v57  ;;  %v2000_v48 = vld [vmem:[#allocation8 + $0x2560] sm:$0xff] }
 0x57b   :  { %v2248_v49 = vld [vmem:[#allocation8 + $0x2d20] sm:$0xff]  ;;  %v17859_v54 = vcombine.high %v1992_v46, %v2000_v48 }
 0x57c   :  { %14671 = vmatpush2.bf16.msra.mxu0 %v17922_v44  ;;  %v2256_v22 = vld [vmem:[#allocation8 + $0x2d60] sm:$0xff]  ;;  %v17858_v44 = vcombine.low %v1992_v46, %v2000_v48 }
 0x57d   :  { %14712 = vmatpush2.bf16.msra.mxu1 %v18178_v18  ;;  %14672 = vmatprep.subr.bf16.mxu0 %v17907_v11  ;;  %v18115_v57 = vcombine.high %v2248_v49, %v2256_v22  ;;  %v1976_v4 = vld [vmem:[#allocation8 + $0x24a0] sm:$0xff]  ;;  %v18114_v18 = vcombine.low %v2248_v49, %v2256_v22 }
 0x57e   :  { %14713 = vmatprep.subr.bf16.mxu1 %v18163_v12  ;;  %v1984_v58 = vld [vmem:[#allocation8 + $0x24e0] sm:$0xff] }
 0x57f   :  { %v2232_v21 = vld [vmem:[#allocation8 + $0x2ca0] sm:$0xff]  ;;  %v17843_v11 = vcombine.high %v1976_v4, %v1984_v58 }
 0x580   :  { %14673 = vmatpush2.bf16.msra.mxu0 %v17906_v10  ;;  %v2240_v39 = vld [vmem:[#allocation8 + $0x2ce0] sm:$0xff]  ;;  %v17842_v10 = vcombine.low %v1976_v4, %v1984_v58 }
 0x581   :  { %14714 = vmatpush2.bf16.msra.mxu1 %v18162_v30  ;;  %14674 = vmatprep.subr.bf16.mxu0 %v17891_v55  ;;  %v18099_v12 = vcombine.high %v2232_v21, %v2240_v39  ;;  %v1960_v9 = vld [vmem:[#allocation8 + $0x2420] sm:$0xff]  ;;  %v18098_v30 = vcombine.low %v2232_v21, %v2240_v39 }
 0x582   :  { %14715 = vmatprep.subr.bf16.mxu1 %v18147_v45  ;;  %v1968_v0 = vld [vmem:[#allocation8 + $0x2460] sm:$0xff] }
 0x583   :  { %v2216_v26 = vld [vmem:[#allocation8 + $0x2c20] sm:$0xff]  ;;  %v17827_v55 = vcombine.high %v1960_v9, %v1968_v0 }
 0x584   :  { %14675 = vmatpush2.bf16.msra.mxu0 %v17890_v23  ;;  %v2224_v16 = vld [vmem:[#allocation8 + $0x2c60] sm:$0xff]  ;;  %v17826_v23 = vcombine.low %v1960_v9, %v1968_v0 }
 0x585   :  { %14716 = vmatpush2.bf16.msra.mxu1 %v18146_v51  ;;  %14676 = vmatprep.subr.bf16.mxu0 %v17875_v60  ;;  %v18083_v45 = vcombine.high %v2216_v26, %v2224_v16  ;;  %v2456_v37 = vld [vmem:[#allocation8 + $0x33a0] sm:$0xff]  ;;  %v18082_v51 = vcombine.low %v2216_v26, %v2224_v16 }
 0x586   :  { %14717 = vmatprep.subr.bf16.mxu1 %v18131_v53  ;;  %v2464_v24 = vld [vmem:[#allocation8 + $0x33e0] sm:$0xff] }
 0x587   :  { %v2712_v36 = vld [vmem:[#allocation8 + $0x3ba0] sm:$0xff]  ;;  %v18323_v60 = vcombine.high %v2456_v37, %v2464_v24  ;;  %v18322_v49 = vcombine.low %v2456_v37, %v2464_v24 }
 0x588   :  { %14677 = vmatpush2.bf16.msra.mxu0 %v17874_v47  ;;  %v2720_v43 = vld [vmem:[#allocation8 + $0x3be0] sm:$0xff] }
 0x589   :  { %14718 = vmatpush2.bf16.msra.mxu1 %v18130_v40  ;;  %14678 = vmatprep.subr.bf16.mxu0 %v17859_v54  ;;  %v18579_v53 = vcombine.high %v2712_v36, %v2720_v43  ;;  %v2440_v46 = vld [vmem:[#allocation8 + $0x3320] sm:$0xff]  ;;  %v18578_v40 = vcombine.low %v2712_v36, %v2720_v43 }
 0x58a   :  { %14719 = vmatprep.subr.bf16.mxu1 %v18115_v57  ;;  %v2448_v48 = vld [vmem:[#allocation8 + $0x3360] sm:$0xff] }
 0x58b   :  { %v2696_v22 = vld [vmem:[#allocation8 + $0x3b20] sm:$0xff]  ;;  %v18307_v54 = vcombine.high %v2440_v46, %v2448_v48 }
 0x58c   :  { %14679 = vmatpush2.bf16.msra.mxu0 %v17858_v44  ;;  %v2704_v47 = vld [vmem:[#allocation8 + $0x3b60] sm:$0xff] }
 0x58d   :  { %14720 = vmatpush2.bf16.msra.mxu1 %v18114_v18  ;;  %14680 = vmatprep.subr.bf16.mxu0 %v17843_v11  ;;  %v2424_v57 = vld [vmem:[#allocation8 + $0x32a0] sm:$0xff]  ;;  %v18563_v21 = vcombine.high %v2696_v22, %v2704_v47  ;;  %v18562_v0 = vcombine.low %v2696_v22, %v2704_v47 }
 0x58e   :  { %14721 = vmatprep.subr.bf16.mxu1 %v18099_v12  ;;  %v2432_v4 = vld [vmem:[#allocation8 + $0x32e0] sm:$0xff]  ;;  %v18306_v12 = vcombine.low %v2440_v46, %v2448_v48 }
 0x58f   :  { %v2680_v39 = vld [vmem:[#allocation8 + $0x3aa0] sm:$0xff]  ;;  %v18291_v26 = vcombine.high %v2424_v57, %v2432_v4 }
 0x590   :  { %14681 = vmatpush2.bf16.msra.mxu0 %v17842_v10  ;;  %v2688_v44 = vld [vmem:[#allocation8 + $0x3ae0] sm:$0xff] }
 0x591   :  { %14722 = vmatpush2.bf16.msra.mxu1 %v18098_v30  ;;  %14682 = vmatprep.subr.bf16.mxu0 %v17827_v55  ;;  %v2408_v55 = vld [vmem:[#allocation8 + $0x3220] sm:$0xff] }
 0x592   :  { %14723 = vmatprep.subr.bf16.mxu1 %v18083_v45  ;;  %v2416_v45 = vld [vmem:[#allocation8 + $0x3260] sm:$0xff] }
 0x593   :  { %v2664_v24 = vld [vmem:[#allocation8 + $0x3a20] sm:$0xff]  ;;  %v18275_v46 = vcombine.high %v2408_v55, %v2416_v45 }
 0x594   :  { %14683 = vmatpush2.bf16.msra.mxu0 %v17826_v23  ;;  %v2672_v36 = vld [vmem:[#allocation8 + $0x3a60] sm:$0xff] }
 0x595   :  { %14724 = vmatpush2.bf16.msra.mxu1 %v18082_v51  ;;  %14734 = vmatprep.subr.bf16.mxu0 %v18323_v60  ;;  %v18290_v51 = vcombine.low %v2424_v57, %v2432_v4  ;;  %v18531_v48 = vcombine.high %v2664_v24, %v2672_v36  ;;  %v2400_v22 = vld [vmem:[#allocation8 + $0x31e0] sm:$0xff] }
 0x596   :  { %14775 = vmatprep.subr.bf16.mxu1 %v18579_v53  ;;  %v18546_v53 = vcombine.low %v2680_v39, %v2688_v44  ;;  %v2648_v47 = vld [vmem:[#allocation8 + $0x39a0] sm:$0xff] }
 0x597   :  { %v14440_v58 = vpop.f32.mrf.mxu0  ;;  %14685 = vmatmul.mubr.bf16.vlgmr.msra.gmra.mxu0 %v19359_v34  ;;  %v2376_v4 = vld [vmem:[#allocation8 + $0x3120] sm:$0xff] }
 0x598   :  { %v14441_v18 = vadd.f32 %v14440_v58, %v19533_v7  ;;  %v14481_v11 = vpop.f32.mrf.mxu1  ;;  %14726 = vmatmul.mubr.bf16.vlgmr.msra.gmra.mxu1 %v19357_v25  ;;  %14735 = vmatpush1.bf16.msra.mxu0 %v18322_v49  ;;  %v18547_v7 = vcombine.high %v2680_v39, %v2688_v44  ;;  %v2392_v49 = vld [vmem:[#allocation8 + $0x31a0] sm:$0xff]  ;;  %v18530_v58 = vcombine.low %v2664_v24, %v2672_v36 }
 0x599   :  { %14766 = vmatprep.mubr.bf16.mxu0 %v19361_v41  ;;  %14776 = vmatpush1.bf16.msra.mxu1 %v18578_v40  ;;  %v14442_v9 = vpop.f32.mrf.mxu0  ;;  %v2656_v40 = vld [vmem:[#allocation8 + $0x39e0] sm:$0xff]  ;;  %v18258_v44 = vcombine.low %v2392_v49, %v2400_v22 }
 0x59a   :  { %v19543_v16 = vadd.f32 %v14481_v11, %v14441_v18  ;;  %14807 = vmatprep.mubr.bf16.mxu1 %v19363_v42  ;;  %v14443_v10 = vadd.f32 %v14442_v9, %v19537_v27  ;;  %v14483_v30 = vpop.f32.mrf.mxu1  ;;  %14736 = vmatprep.subr.bf16.mxu0 %v18307_v54  ;;  %v18274_v54 = vcombine.low %v2408_v55, %v2416_v45  ;;  %v2384_v18 = vld [vmem:[#allocation8 + $0x3160] sm:$0xff] }
 0x59b   :  { %v14444_v37 = vpop.f32.mrf.mxu0  ;;  %14777 = vmatprep.subr.bf16.mxu1 %v18563_v21  ;;  %v18259_v21 = vcombine.high %v2392_v49, %v2400_v22  ;;  %v18515_v57 = vcombine.high %v2648_v47, %v2656_v40  ;;  %v2632_v11 = vld [vmem:[#allocation8 + $0x3920] sm:$0xff]  ;;  %v18243_v9 = vcombine.high %v2376_v4, %v2384_v18  ;;  %v18242_v55 = vcombine.low %v2376_v4, %v2384_v18 }
 0x59c   :  { %v19547_v43 = vadd.f32 %v14483_v30, %v14443_v10  ;;  %v14485_v23 = vpop.f32.mrf.mxu1  ;;  %14737 = vmatpush1.bf16.msra.mxu0 %v18306_v12  ;;  %v2640_v39 = vld [vmem:[#allocation8 + $0x3960] sm:$0xff]  ;;  %v18514_v12 = vcombine.low %v2648_v47, %v2656_v40 }
 0x59d   :  { %14778 = vmatpush1.bf16.msra.mxu1 %v18562_v0  ;;  %v14445_v60 = vpop.f32.mrf.mxu0  ;;  %14738 = vmatprep.subr.bf16.mxu0 %v18291_v26  ;;  %v18499_v0 = vcombine.high %v2632_v11, %v2640_v39  ;;  %v2360_v26 = vld [vmem:[#allocation8 + $0x30a0] sm:$0xff]  ;;  %v18498_v45 = vcombine.low %v2632_v11, %v2640_v39 }
 0x59e   :  { %v14486_v27 = vpop.f32.mrf.mxu1  ;;  %14779 = vmatprep.subr.bf16.mxu1 %v18547_v7  ;;  %v2368_v10 = vld [vmem:[#allocation8 + $0x30e0] sm:$0xff] }
 0x59f   :  { %v2616_v30 = vld [vmem:[#allocation8 + $0x38a0] sm:$0xff]  ;;  %v18227_v37 = vcombine.high %v2360_v26, %v2368_v10 }
 0x5a0   :  { %14739 = vmatpush1.bf16.msra.mxu0 %v18290_v51  ;;  %v2624_v7 = vld [vmem:[#allocation8 + $0x38e0] sm:$0xff] }
 0x5a1   :  { %14780 = vmatpush1.bf16.msra.mxu1 %v18546_v53  ;;  %14740 = vmatprep.subr.bf16.mxu0 %v18275_v46  ;;  %v18483_v24 = vcombine.high %v2616_v30, %v2624_v7  ;;  %v2344_v36 = vld [vmem:[#allocation8 + $0x3020] sm:$0xff]  ;;  %v18226_v53 = vcombine.low %v2360_v26, %v2368_v10  ;;  %v18482_v46 = vcombine.low %v2616_v30, %v2624_v7 }
 0x5a2   :  { %14781 = vmatprep.subr.bf16.mxu1 %v18531_v48  ;;  %v2352_v23 = vld [vmem:[#allocation8 + $0x3060] sm:$0xff] }
 0x5a3   :  { %v2600_v51 = vld [vmem:[#allocation8 + $0x3820] sm:$0xff]  ;;  %v18211_v27 = vcombine.high %v2344_v36, %v2352_v23 }
 0x5a4   :  { %14741 = vmatpush1.bf16.msra.mxu0 %v18274_v54  ;;  %v2608_v60 = vld [vmem:[#allocation8 + $0x3860] sm:$0xff]  ;;  %v18210_v54 = vcombine.low %v2344_v36, %v2352_v23 }
 0x5a5   :  { %14782 = vmatpush1.bf16.msra.mxu1 %v18530_v58  ;;  %14742 = vmatprep.subr.bf16.mxu0 %v18259_v21  ;;  %v18467_v48 = vcombine.high %v2600_v51, %v2608_v60  ;;  %v2584_v49 = vld [vmem:[#allocation8 + $0x37a0] sm:$0xff]  ;;  %v18466_v58 = vcombine.low %v2600_v51, %v2608_v60 }
 0x5a6   :  { %14783 = vmatprep.subr.bf16.mxu1 %v18515_v57  ;;  %v2592_v22 = vld [vmem:[#allocation8 + $0x37e0] sm:$0xff] }
 0x5a7   :  { %v2840_v47 = vld [vmem:[#allocation8 + $0x3fa0] sm:$0xff]  ;;  %v18451_v21 = vcombine.high %v2584_v49, %v2592_v22 }
 0x5a8   :  { %14743 = vmatpush1.bf16.msra.mxu0 %v18258_v44  ;;  %v2848_v40 = vld [vmem:[#allocation8 + $0x3fe0] sm:$0xff]  ;;  %v18450_v44 = vcombine.low %v2584_v49, %v2592_v22 }
 0x5a9   :  { %14784 = vmatpush1.bf16.msra.mxu1 %v18514_v12  ;;  %14744 = vmatprep.subr.bf16.mxu0 %v18243_v9  ;;  %v18707_v57 = vcombine.high %v2840_v47, %v2848_v40  ;;  %v2568_v4 = vld [vmem:[#allocation8 + $0x3720] sm:$0xff]  ;;  %v18706_v12 = vcombine.low %v2840_v47, %v2848_v40 }
 0x5aa   :  { %14785 = vmatprep.subr.bf16.mxu1 %v18499_v0  ;;  %v2576_v18 = vld [vmem:[#allocation8 + $0x3760] sm:$0xff] }
 0x5ab   :  { %v2824_v11 = vld [vmem:[#allocation8 + $0x3f20] sm:$0xff]  ;;  %v18435_v9 = vcombine.high %v2568_v4, %v2576_v18 }
 0x5ac   :  { %14745 = vmatpush1.bf16.msra.mxu0 %v18242_v55  ;;  %v2832_v39 = vld [vmem:[#allocation8 + $0x3f60] sm:$0xff]  ;;  %v18434_v55 = vcombine.low %v2568_v4, %v2576_v18 }
 0x5ad   :  { %14786 = vmatpush1.bf16.msra.mxu1 %v18498_v45  ;;  %14746 = vmatprep.subr.bf16.mxu0 %v18227_v37  ;;  %v18691_v0 = vcombine.high %v2824_v11, %v2832_v39  ;;  %v2552_v26 = vld [vmem:[#allocation8 + $0x36a0] sm:$0xff]  ;;  %v18690_v45 = vcombine.low %v2824_v11, %v2832_v39 }
 0x5ae   :  { %14787 = vmatprep.subr.bf16.mxu1 %v18483_v24  ;;  %v2560_v10 = vld [vmem:[#allocation8 + $0x36e0] sm:$0xff] }
 0x5af   :  { %v2808_v30 = vld [vmem:[#allocation8 + $0x3ea0] sm:$0xff]  ;;  %v18419_v37 = vcombine.high %v2552_v26, %v2560_v10 }
 0x5b0   :  { %14747 = vmatpush1.bf16.msra.mxu0 %v18226_v53  ;;  %v2816_v7 = vld [vmem:[#allocation8 + $0x3ee0] sm:$0xff]  ;;  %v18418_v53 = vcombine.low %v2552_v26, %v2560_v10 }
 0x5b1   :  { %14788 = vmatpush1.bf16.msra.mxu1 %v18482_v46  ;;  %14748 = vmatprep.subr.bf16.mxu0 %v18211_v27  ;;  %v18675_v24 = vcombine.high %v2808_v30, %v2816_v7  ;;  %v2536_v36 = vld [vmem:[#allocation8 + $0x3620] sm:$0xff]  ;;  %v18674_v46 = vcombine.low %v2808_v30, %v2816_v7 }
 0x5b2   :  { %14789 = vmatprep.subr.bf16.mxu1 %v18467_v48  ;;  %v2544_v23 = vld [vmem:[#allocation8 + $0x3660] sm:$0xff] }
 0x5b3   :  { %v2792_v51 = vld [vmem:[#allocation8 + $0x3e20] sm:$0xff]  ;;  %v18403_v27 = vcombine.high %v2536_v36, %v2544_v23 }
 0x5b4   :  { %14749 = vmatpush1.bf16.msra.mxu0 %v18210_v54  ;;  %v2800_v60 = vld [vmem:[#allocation8 + $0x3e60] sm:$0xff]  ;;  %v18402_v54 = vcombine.low %v2536_v36, %v2544_v23 }
 0x5b5   :  { %14790 = vmatpush1.bf16.msra.mxu1 %v18466_v58  ;;  %14750 = vmatprep.subr.bf16.mxu0 %v18451_v21  ;;  %v18659_v48 = vcombine.high %v2792_v51, %v2800_v60  ;;  %v2520_v49 = vld [vmem:[#allocation8 + $0x35a0] sm:$0xff]  ;;  %v18658_v58 = vcombine.low %v2792_v51, %v2800_v60 }
 0x5b6   :  { %14791 = vmatprep.subr.bf16.mxu1 %v18707_v57  ;;  %v2528_v22 = vld [vmem:[#allocation8 + $0x35e0] sm:$0xff] }
 0x5b7   :  { %v2776_v47 = vld [vmem:[#allocation8 + $0x3da0] sm:$0xff]  ;;  %v18387_v21 = vcombine.high %v2520_v49, %v2528_v22 }
 0x5b8   :  { %14751 = vmatpush2.bf16.msra.mxu0 %v18450_v44  ;;  %v2784_v40 = vld [vmem:[#allocation8 + $0x3de0] sm:$0xff]  ;;  %v18386_v44 = vcombine.low %v2520_v49, %v2528_v22  ;;  %v921_v49 = vld [vmem:[#allocation8 + $0x3a8] sm:$0xff] }
 0x5b9   :  { %14792 = vmatpush2.bf16.msra.mxu1 %v18706_v12  ;;  %14752 = vmatprep.subr.bf16.mxu0 %v18435_v9  ;;  %v18643_v57 = vcombine.high %v2776_v47, %v2784_v40  ;;  %v2504_v4 = vld [vmem:[#allocation8 + $0x3520] sm:$0xff]  ;;  %v18642_v12 = vcombine.low %v2776_v47, %v2784_v40  ;;  %v929_v22 = vld [vmem:[#allocation8 + $0x3e8] sm:$0xff] }
 0x5ba   :  { %14793 = vmatprep.subr.bf16.mxu1 %v18691_v0  ;;  %v2512_v18 = vld [vmem:[#allocation8 + $0x3560] sm:$0xff]  ;;  %v1177_v47 = vld [vmem:[#allocation8 + $0xba8] sm:$0xff] }
 0x5bb   :  { %v2760_v11 = vld [vmem:[#allocation8 + $0x3d20] sm:$0xff]  ;;  %v18371_v9 = vcombine.high %v2504_v4, %v2512_v18  ;;  %v1185_v40 = vld [vmem:[#allocation8 + $0xbe8] sm:$0xff] }
 0x5bc   :  { %14753 = vmatpush2.bf16.msra.mxu0 %v18434_v55  ;;  %v2768_v39 = vld [vmem:[#allocation8 + $0x3d60] sm:$0xff]  ;;  %v18370_v55 = vcombine.low %v2504_v4, %v2512_v18  ;;  %v17045_v4 = vcombine.high %v1177_v47, %v1185_v40  ;;  %v905_v18 = vld [vmem:[#allocation8 + $0x328] sm:$0xff] }
 0x5bd   :  { %14794 = vmatpush2.bf16.msra.mxu1 %v18690_v45  ;;  %14754 = vmatprep.subr.bf16.mxu0 %v18419_v37  ;;  %v18627_v0 = vcombine.high %v2760_v11, %v2768_v39  ;;  %v2488_v26 = vld [vmem:[#allocation8 + $0x34a0] sm:$0xff]  ;;  %v18626_v45 = vcombine.low %v2760_v11, %v2768_v39  ;;  %v913_v11 = vld [vmem:[#allocation8 + $0x368] sm:$0xff] }
 0x5be   :  { %14795 = vmatprep.subr.bf16.mxu1 %v18675_v24  ;;  %v2496_v10 = vld [vmem:[#allocation8 + $0x34e0] sm:$0xff] }
 0x5bf   :  { %v2744_v30 = vld [vmem:[#allocation8 + $0x3ca0] sm:$0xff]  ;;  %v18355_v37 = vcombine.high %v2488_v26, %v2496_v10 }
 0x5c0   :  { %14755 = vmatpush2.bf16.msra.mxu0 %v18418_v53  ;;  %v2752_v7 = vld [vmem:[#allocation8 + $0x3ce0] sm:$0xff]  ;;  %v18354_v53 = vcombine.low %v2488_v26, %v2496_v10  ;;  %v16773_v10 = vcombine.high %v905_v18, %v913_v11 }
 0x5c1   :  { %14796 = vmatpush2.bf16.msra.mxu1 %v18674_v46  ;;  %14756 = vmatprep.subr.bf16.mxu0 %v18403_v27  ;;  %v18611_v24 = vcombine.high %v2744_v30, %v2752_v7  ;;  %v2472_v36 = vld [vmem:[#allocation8 + $0x3420] sm:$0xff]  ;;  %v18610_v46 = vcombine.low %v2744_v30, %v2752_v7  ;;  %v889_v30 = vld [vmem:[#allocation8 + $0x2a8] sm:$0xff] }
 0x5c2   :  { %14797 = vmatprep.subr.bf16.mxu1 %v18659_v48  ;;  %v2480_v23 = vld [vmem:[#allocation8 + $0x3460] sm:$0xff]  ;;  %v897_v7 = vld [vmem:[#allocation8 + $0x2e8] sm:$0xff] }
 0x5c3   :  { %v2728_v51 = vld [vmem:[#allocation8 + $0x3c20] sm:$0xff]  ;;  %v18339_v27 = vcombine.high %v2472_v36, %v2480_v23 }
 0x5c4   :  { %14757 = vmatpush2.bf16.msra.mxu0 %v18402_v54  ;;  %v2736_v60 = vld [vmem:[#allocation8 + $0x3c60] sm:$0xff]  ;;  %v18338_v54 = vcombine.low %v2472_v36, %v2480_v23  ;;  %v16772_v23 = vcombine.low %v905_v18, %v913_v11 }
 0x5c5   :  { %14798 = vmatpush2.bf16.msra.mxu1 %v18658_v58  ;;  %14758 = vmatprep.subr.bf16.mxu0 %v18387_v21  ;;  %v18595_v48 = vcombine.high %v2728_v51, %v2736_v60  ;;  %v18594_v58 = vcombine.low %v2728_v51, %v2736_v60  ;;  %v2853_v21 = vld [vmem:[#allocation10 + $0x8] sm:$0xff]  ;;  %v16757_v60 = vcombine.high %v889_v30, %v897_v7 }
 0x5c6   :  { %14799 = vmatprep.subr.bf16.mxu1 %v18643_v57  ;;  %v16789_v57 = vcombine.high %v921_v49, %v929_v22  ;;  %v2891_v39 = vrot.slane %v2853_v21, %v19256_v28  ;;  %v2895_v26 = vrot.slane %v2853_v21, %v19264_v31 }
 0x5c8   :  { %14759 = vmatpush2.bf16.msra.mxu0 %v18386_v44  ;;  %v16788_v44 = vcombine.low %v921_v49, %v929_v22  ;;  %v873_v49 = vld [vmem:[#allocation8 + $0x228] sm:$0xff] }
 0x5c9   :  { %14800 = vmatpush2.bf16.msra.mxu1 %v18642_v12  ;;  %14760 = vmatprep.subr.bf16.mxu0 %v18371_v9  ;;  %v1161_v12 = vld [vmem:[#allocation8 + $0xb28] sm:$0xff] }
 0x5ca   :  { %14801 = vmatprep.subr.bf16.mxu1 %v18627_v0  ;;  %v1169_v9 = vld [vmem:[#allocation8 + $0xb68] sm:$0xff]  ;;  %v17044_v0 = vcombine.low %v1177_v47, %v1185_v40 }
 0x5cb   :  { %v17028_v31 = vcombine.low %v1161_v12, %v1169_v9  ;;  %v881_v22 = vld [vmem:[#allocation8 + $0x268] sm:$0xff] }
 0x5cc   :  { %14761 = vmatpush2.bf16.msra.mxu0 %v18370_v55  ;;  %v1129_v40 = vld [vmem:[#allocation8 + $0xa28] sm:$0xff]  ;;  %v16741_v11 = vcombine.high %v873_v49, %v881_v22 }
 0x5cd   :  { %14802 = vmatpush2.bf16.msra.mxu1 %v18626_v45  ;;  %14762 = vmatprep.subr.bf16.mxu0 %v18355_v37  ;;  %v17029_v45 = vcombine.high %v1161_v12, %v1169_v9  ;;  %v1145_v37 = vld [vmem:[#allocation8 + $0xaa8] sm:$0xff] }
 0x5ce   :  { %14803 = vmatprep.subr.bf16.mxu1 %v18611_v24  ;;  %v1153_v24 = vld [vmem:[#allocation8 + $0xae8] sm:$0xff] }
 0x5cf   :  { %v17012_v18 = vcombine.low %v1145_v37, %v1153_v24  ;;  %v857_v12 = vld [vmem:[#allocation8 + $0x1a8] sm:$0xff] }
 0x5d0   :  { %14763 = vmatpush2.bf16.msra.mxu0 %v18354_v53  ;;  %v865_v9 = vld [vmem:[#allocation8 + $0x1e8] sm:$0xff] }
 0x5d1   :  { %14804 = vmatpush2.bf16.msra.mxu1 %v18610_v46  ;;  %14764 = vmatprep.subr.bf16.mxu0 %v18339_v27 }
 0x5d2   :  { %14805 = vmatprep.subr.bf16.mxu1 %v18595_v48  ;;  %v17013_v48 = vcombine.high %v1145_v37, %v1153_v24  ;;  %v1105_v37 = vld [vmem:[#allocation8 + $0x968] sm:$0xff]  ;;  %v16724_v24 = vcombine.low %v857_v12, %v865_v9 }
 0x5d4   :  { %14765 = vmatpush2.bf16.msra.mxu0 %v18338_v54  ;;  %v1137_v54 = vld [vmem:[#allocation8 + $0xa68] sm:$0xff] }
 0x5d5   :  { %14806 = vmatpush2.bf16.msra.mxu1 %v18594_v58  ;;  %14816 = vmatprep.subr.bf16.mxu0 %v16789_v57  ;;  %v16756_v57 = vcombine.low %v889_v30, %v897_v7  ;;  %v841_v7 = vld [vmem:[#allocation8 + $0x128] sm:$0xff] }
 0x5d6   :  { %14857 = vmatprep.subr.bf16.mxu1 %v17045_v4 }
 0x5d7   :  { %v14522_v55 = vpop.f32.mrf.mxu0  ;;  %14767 = vmatmul.mubr.bf16.vlgmr.msra.gmra.mxu0 %v19376_v52 }
 0x5d8   :  { %v14523_v36 = vadd.f32 %v14522_v55, %v2891_v39  ;;  %v14563_v28 = vpop.f32.mrf.mxu1  ;;  %14808 = vmatmul.mubr.bf16.vlgmr.msra.gmra.mxu1 %v19378_v56  ;;  %14817 = vmatpush1.bf16.msra.mxu0 %v16788_v44  ;;  %v16997_v44 = vcombine.high %v1129_v40, %v1137_v54  ;;  %v16996_v55 = vcombine.low %v1129_v40, %v1137_v54  ;;  %v809_v54 = vld [vmem:[#allocation8 + $0x28] sm:$0xff] }
 0x5d9   :  { %14848 = vmatprep.mubr.bf16.mxu0 %v19293_v62  ;;  %14858 = vmatpush1.bf16.msra.mxu1 %v17044_v0  ;;  %v14524_v51 = vpop.f32.mrf.mxu0  ;;  %v1113_v0 = vld [vmem:[#allocation8 + $0x9a8] sm:$0xff] }
 0x5da   :  { %v19554_v53 = vadd.f32 %v14563_v28, %v14523_v36  ;;  %14889 = vmatprep.mubr.bf16.mxu1 %v19295_v63  ;;  %v14525_v46 = vadd.f32 %v14524_v51, %v2895_v26  ;;  %v14565_v27 = vpop.f32.mrf.mxu1  ;;  %14818 = vmatprep.subr.bf16.mxu0 %v16773_v10  ;;  %v1121_v26 = vld [vmem:[#allocation8 + $0x9e8] sm:$0xff]  ;;  %v16740_v10 = vcombine.low %v873_v49, %v881_v22 }
 0x5db   :  { %v14526_v47 = vpop.f32.mrf.mxu0  ;;  %14859 = vmatprep.subr.bf16.mxu1 %v17029_v45  ;;  %v16725_v45 = vcombine.high %v857_v12, %v865_v9  ;;  %v16981_v30 = vcombine.high %v1113_v0, %v1121_v26  ;;  %v849_v36 = vld [vmem:[#allocation8 + $0x168] sm:$0xff] }
 0x5dc   :  { %v19557_v58 = vadd.f32 %v14565_v27, %v14525_v46  ;;  %v14567_v21 = vpop.f32.mrf.mxu1  ;;  %14819 = vmatpush1.bf16.msra.mxu0 %v16772_v23  ;;  %v1097_v28 = vld [vmem:[#allocation8 + $0x928] sm:$0xff]  ;;  %v16980_v23 = vcombine.low %v1113_v0, %v1121_v26  ;;  %v16709_v51 = vcombine.high %v841_v7, %v849_v36  ;;  %v16708_v49 = vcombine.low %v841_v7, %v849_v36 }
 0x5dd   :  { %14860 = vmatpush1.bf16.msra.mxu1 %v17028_v31  ;;  %v14527_v4 = vpop.f32.mrf.mxu0  ;;  %14820 = vmatprep.subr.bf16.mxu0 %v16757_v60  ;;  %v16965_v31 = vcombine.high %v1097_v28, %v1105_v37  ;;  %v825_v60 = vld [vmem:[#allocation8 + $0xa8] sm:$0xff]  ;;  %v16964_v22 = vcombine.low %v1097_v28, %v1105_v37 }
 0x5de   :  { %v14568_v39 = vpop.f32.mrf.mxu1  ;;  %14861 = vmatprep.subr.bf16.mxu1 %v17013_v48  ;;  %v833_v46 = vld [vmem:[#allocation8 + $0xe8] sm:$0xff] }
 0x5df   :  { %v1081_v27 = vld [vmem:[#allocation8 + $0x8a8] sm:$0xff]  ;;  %v16693_v47 = vcombine.high %v825_v60, %v833_v46 }
 0x5e0   :  { %14821 = vmatpush1.bf16.msra.mxu0 %v16756_v57  ;;  %v1089_v48 = vld [vmem:[#allocation8 + $0x8e8] sm:$0xff] }
 0x5e1   :  { %14862 = vmatpush1.bf16.msra.mxu1 %v17012_v18  ;;  %14822 = vmatprep.subr.bf16.mxu0 %v16741_v11  ;;  %v16949_v40 = vcombine.high %v1081_v27, %v1089_v48  ;;  %v817_v21 = vld [vmem:[#allocation8 + $0x68] sm:$0xff]  ;;  %v16692_v18 = vcombine.low %v825_v60, %v833_v46  ;;  %v16948_v11 = vcombine.low %v1081_v27, %v1089_v48 }
 0x5e2   :  { %14863 = vmatprep.subr.bf16.mxu1 %v16997_v44  ;;  %v1065_v57 = vld [vmem:[#allocation8 + $0x828] sm:$0xff]  ;;  %v16677_v39 = vcombine.high %v809_v54, %v817_v21 }
 0x5e3   :  { %v1073_v4 = vld [vmem:[#allocation8 + $0x868] sm:$0xff] }
 0x5e4   :  { %14823 = vmatpush1.bf16.msra.mxu0 %v16740_v10  ;;  %v16933_v44 = vcombine.high %v1065_v57, %v1073_v4  ;;  %v1049_v12 = vld [vmem:[#allocation8 + $0x7a8] sm:$0xff]  ;;  %v16676_v10 = vcombine.low %v809_v54, %v817_v21 }
 0x5e5   :  { %14864 = vmatpush1.bf16.msra.mxu1 %v16996_v55  ;;  %14824 = vmatprep.subr.bf16.mxu0 %v16725_v45  ;;  %v1057_v9 = vld [vmem:[#allocation8 + $0x7e8] sm:$0xff]  ;;  %v16932_v55 = vcombine.low %v1065_v57, %v1073_v4 }
 0x5e6   :  { %14865 = vmatprep.subr.bf16.mxu1 %v16981_v30  ;;  %v1305_v0 = vld [vmem:[#allocation8 + $0xfa8] sm:$0xff]  ;;  %v16917_v45 = vcombine.high %v1049_v12, %v1057_v9 }
 0x5e7   :  { %v1313_v26 = vld [vmem:[#allocation8 + $0xfe8] sm:$0xff] }
 0x5e8   :  { %14825 = vmatpush1.bf16.msra.mxu0 %v16724_v24  ;;  %v17173_v30 = vcombine.high %v1305_v0, %v1313_v26  ;;  %v1033_v7 = vld [vmem:[#allocation8 + $0x728] sm:$0xff]  ;;  %v16916_v24 = vcombine.low %v1049_v12, %v1057_v9 }
 0x5e9   :  { %14866 = vmatpush1.bf16.msra.mxu1 %v16980_v23  ;;  %14826 = vmatprep.subr.bf16.mxu0 %v16709_v51  ;;  %v1041_v36 = vld [vmem:[#allocation8 + $0x768] sm:$0xff]  ;;  %v17172_v23 = vcombine.low %v1305_v0, %v1313_v26 }
 0x5ea   :  { %14867 = vmatprep.subr.bf16.mxu1 %v16965_v31  ;;  %v1289_v28 = vld [vmem:[#allocation8 + $0xf28] sm:$0xff]  ;;  %v16901_v51 = vcombine.high %v1033_v7, %v1041_v36 }
 0x5eb   :  { %v1297_v37 = vld [vmem:[#allocation8 + $0xf68] sm:$0xff] }
 0x5ec   :  { %14827 = vmatpush1.bf16.msra.mxu0 %v16708_v49  ;;  %v17157_v31 = vcombine.high %v1289_v28, %v1297_v37  ;;  %v1017_v60 = vld [vmem:[#allocation8 + $0x6a8] sm:$0xff]  ;;  %v16900_v49 = vcombine.low %v1033_v7, %v1041_v36 }
 0x5ed   :  { %14868 = vmatpush1.bf16.msra.mxu1 %v16964_v22  ;;  %14828 = vmatprep.subr.bf16.mxu0 %v16693_v47  ;;  %v1025_v46 = vld [vmem:[#allocation8 + $0x6e8] sm:$0xff]  ;;  %v17156_v22 = vcombine.low %v1289_v28, %v1297_v37 }
 0x5ee   :  { %14869 = vmatprep.subr.bf16.mxu1 %v16949_v40  ;;  %v1273_v27 = vld [vmem:[#allocation8 + $0xea8] sm:$0xff]  ;;  %v16885_v47 = vcombine.high %v1017_v60, %v1025_v46 }
 0x5ef   :  { %v1281_v48 = vld [vmem:[#allocation8 + $0xee8] sm:$0xff] }
 0x5f0   :  { %14829 = vmatpush1.bf16.msra.mxu0 %v16692_v18  ;;  %v17141_v40 = vcombine.high %v1273_v27, %v1281_v48  ;;  %v1001_v54 = vld [vmem:[#allocation8 + $0x628] sm:$0xff]  ;;  %v16884_v18 = vcombine.low %v1017_v60, %v1025_v46 }
 0x5f1   :  { %14870 = vmatpush1.bf16.msra.mxu1 %v16948_v11  ;;  %14830 = vmatprep.subr.bf16.mxu0 %v16677_v39  ;;  %v1009_v21 = vld [vmem:[#allocation8 + $0x668] sm:$0xff]  ;;  %v17140_v11 = vcombine.low %v1273_v27, %v1281_v48 }
 0x5f2   :  { %14871 = vmatprep.subr.bf16.mxu1 %v16933_v44  ;;  %v1257_v57 = vld [vmem:[#allocation8 + $0xe28] sm:$0xff]  ;;  %v16869_v39 = vcombine.high %v1001_v54, %v1009_v21 }
 0x5f3   :  { %v1265_v4 = vld [vmem:[#allocation8 + $0xe68] sm:$0xff] }
 0x5f4   :  { %14831 = vmatpush1.bf16.msra.mxu0 %v16676_v10  ;;  %v17125_v44 = vcombine.high %v1257_v57, %v1265_v4  ;;  %v985_v12 = vld [vmem:[#allocation8 + $0x5a8] sm:$0xff]  ;;  %v16868_v10 = vcombine.low %v1001_v54, %v1009_v21 }
 0x5f5   :  { %14872 = vmatpush1.bf16.msra.mxu1 %v16932_v55  ;;  %14832 = vmatprep.subr.bf16.mxu0 %v16917_v45  ;;  %v993_v9 = vld [vmem:[#allocation8 + $0x5e8] sm:$0xff]  ;;  %v17124_v55 = vcombine.low %v1257_v57, %v1265_v4 }
 0x5f6   :  { %14873 = vmatprep.subr.bf16.mxu1 %v17173_v30  ;;  %v1241_v0 = vld [vmem:[#allocation8 + $0xda8] sm:$0xff]  ;;  %v16853_v45 = vcombine.high %v985_v12, %v993_v9 }
 0x5f7   :  { %v1249_v26 = vld [vmem:[#allocation8 + $0xde8] sm:$0xff] }
 0x5f8   :  { %14833 = vmatpush2.bf16.msra.mxu0 %v16916_v24  ;;  %v17109_v30 = vcombine.high %v1241_v0, %v1249_v26  ;;  %v969_v7 = vld [vmem:[#allocation8 + $0x528] sm:$0xff]  ;;  %v16852_v24 = vcombine.low %v985_v12, %v993_v9 }
 0x5f9   :  { %14874 = vmatpush2.bf16.msra.mxu1 %v17172_v23  ;;  %14834 = vmatprep.subr.bf16.mxu0 %v16901_v51  ;;  %v977_v36 = vld [vmem:[#allocation8 + $0x568] sm:$0xff]  ;;  %v17108_v23 = vcombine.low %v1241_v0, %v1249_v26 }
 0x5fa   :  { %14875 = vmatprep.subr.bf16.mxu1 %v17157_v31  ;;  %v1225_v28 = vld [vmem:[#allocation8 + $0xd28] sm:$0xff]  ;;  %v16837_v51 = vcombine.high %v969_v7, %v977_v36 }
 0x5fb   :  { %v1233_v37 = vld [vmem:[#allocation8 + $0xd68] sm:$0xff] }
 0x5fc   :  { %14835 = vmatpush2.bf16.msra.mxu0 %v16900_v49  ;;  %v17093_v31 = vcombine.high %v1225_v28, %v1233_v37  ;;  %v953_v60 = vld [vmem:[#allocation8 + $0x4a8] sm:$0xff]  ;;  %v16836_v49 = vcombine.low %v969_v7, %v977_v36 }
 0x5fd   :  { %14876 = vmatpush2.bf16.msra.mxu1 %v17156_v22  ;;  %14836 = vmatprep.subr.bf16.mxu0 %v16885_v47  ;;  %v961_v46 = vld [vmem:[#allocation8 + $0x4e8] sm:$0xff]  ;;  %v17092_v22 = vcombine.low %v1225_v28, %v1233_v37 }
 0x5fe   :  { %14877 = vmatprep.subr.bf16.mxu1 %v17141_v40  ;;  %v1209_v27 = vld [vmem:[#allocation8 + $0xca8] sm:$0xff]  ;;  %v16821_v47 = vcombine.high %v953_v60, %v961_v46 }
 0x5ff   :  { %v1217_v48 = vld [vmem:[#allocation8 + $0xce8] sm:$0xff] }
 0x600   :  { %14837 = vmatpush2.bf16.msra.mxu0 %v16884_v18  ;;  %v17077_v40 = vcombine.high %v1209_v27, %v1217_v48  ;;  %v937_v54 = vld [vmem:[#allocation8 + $0x428] sm:$0xff]  ;;  %v16820_v18 = vcombine.low %v953_v60, %v961_v46 }
 0x601   :  { %14878 = vmatpush2.bf16.msra.mxu1 %v17140_v11  ;;  %14838 = vmatprep.subr.bf16.mxu0 %v16869_v39  ;;  %v945_v21 = vld [vmem:[#allocation8 + $0x468] sm:$0xff]  ;;  %v17076_v11 = vcombine.low %v1209_v27, %v1217_v48 }
 0x602   :  { %14879 = vmatprep.subr.bf16.mxu1 %v17125_v44  ;;  %v1193_v57 = vld [vmem:[#allocation8 + $0xc28] sm:$0xff]  ;;  %v16805_v39 = vcombine.high %v937_v54, %v945_v21 }
 0x603   :  { %v1201_v4 = vld [vmem:[#allocation8 + $0xc68] sm:$0xff] }
 0x604   :  { %14839 = vmatpush2.bf16.msra.mxu0 %v16868_v10  ;;  %v17061_v44 = vcombine.high %v1193_v57, %v1201_v4  ;;  %v1433_v12 = vld [vmem:[#allocation8 + $0x13a8] sm:$0xff]  ;;  %v16804_v10 = vcombine.low %v937_v54, %v945_v21 }
 0x605   :  { %14880 = vmatpush2.bf16.msra.mxu1 %v17124_v55  ;;  %14840 = vmatprep.subr.bf16.mxu0 %v16853_v45  ;;  %v1441_v9 = vld [vmem:[#allocation8 + $0x13e8] sm:$0xff]  ;;  %v17060_v55 = vcombine.low %v1193_v57, %v1201_v4 }
 0x606   :  { %14881 = vmatprep.subr.bf16.mxu1 %v17109_v30  ;;  %v1689_v0 = vld [vmem:[#allocation8 + $0x1ba8] sm:$0xff]  ;;  %v17301_v45 = vcombine.high %v1433_v12, %v1441_v9  ;;  %v17300_v28 = vcombine.low %v1433_v12, %v1441_v9 }
 0x607   :  { %v1697_v26 = vld [vmem:[#allocation8 + $0x1be8] sm:$0xff] }
 0x608   :  { %14841 = vmatpush2.bf16.msra.mxu0 %v16852_v24  ;;  %v17557_v30 = vcombine.high %v1689_v0, %v1697_v26  ;;  %v1417_v7 = vld [vmem:[#allocation8 + $0x1328] sm:$0xff] }
 0x609   :  { %14882 = vmatpush2.bf16.msra.mxu1 %v17108_v23  ;;  %14842 = vmatprep.subr.bf16.mxu0 %v16837_v51  ;;  %v1425_v36 = vld [vmem:[#allocation8 + $0x1368] sm:$0xff]  ;;  %v17556_v23 = vcombine.low %v1689_v0, %v1697_v26 }
 0x60a   :  { %14883 = vmatprep.subr.bf16.mxu1 %v17093_v31  ;;  %v1673_v37 = vld [vmem:[#allocation8 + $0x1b28] sm:$0xff]  ;;  %v17285_v51 = vcombine.high %v1417_v7, %v1425_v36 }
 0x60b   :  { %v1681_v24 = vld [vmem:[#allocation8 + $0x1b68] sm:$0xff] }
 0x60c   :  { %14843 = vmatpush2.bf16.msra.mxu0 %v16836_v49  ;;  %v1401_v31 = vld [vmem:[#allocation8 + $0x12a8] sm:$0xff]  ;;  %v17541_v27 = vcombine.high %v1673_v37, %v1681_v24  ;;  %v17540_v21 = vcombine.low %v1673_v37, %v1681_v24 }
 0x60d   :  { %14884 = vmatpush2.bf16.msra.mxu1 %v17092_v22  ;;  %14844 = vmatprep.subr.bf16.mxu0 %v16821_v47  ;;  %v1409_v60 = vld [vmem:[#allocation8 + $0x12e8] sm:$0xff] }
 0x60e   :  { %14885 = vmatprep.subr.bf16.mxu1 %v17077_v40  ;;  %v1657_v48 = vld [vmem:[#allocation8 + $0x1aa8] sm:$0xff]  ;;  %v17284_v40 = vcombine.low %v1417_v7, %v1425_v36  ;;  %v17269_v57 = vcombine.high %v1401_v31, %v1409_v60 }
 0x60f   :  { %v1665_v49 = vld [vmem:[#allocation8 + $0x1ae8] sm:$0xff] }
 0x610   :  { %14845 = vmatpush2.bf16.msra.mxu0 %v16820_v18  ;;  %v1641_v9 = vld [vmem:[#allocation8 + $0x1a28] sm:$0xff] }
 0x611   :  { %14886 = vmatpush2.bf16.msra.mxu1 %v17076_v11  ;;  %14846 = vmatprep.subr.bf16.mxu0 %v16805_v39  ;;  %v1385_v39 = vld [vmem:[#allocation8 + $0x1228] sm:$0xff] }
 0x612   :  { %14887 = vmatprep.subr.bf16.mxu1 %v17061_v44  ;;  %v1393_v44 = vld [vmem:[#allocation8 + $0x1268] sm:$0xff] }
 0x613   :  { %v1649_v0 = vld [vmem:[#allocation8 + $0x1a68] sm:$0xff]  ;;  %v17253_v7 = vcombine.high %v1385_v39, %v1393_v44 }
 0x614   :  { %14847 = vmatpush2.bf16.msra.mxu0 %v16804_v10  ;;  %v17509_v36 = vcombine.high %v1641_v9, %v1649_v0  ;;  %v1377_v37 = vld [vmem:[#allocation8 + $0x11e8] sm:$0xff] }
 0x615   :  { %14888 = vmatpush2.bf16.msra.mxu1 %v17060_v55  ;;  %14898 = vmatprep.subr.bf16.mxu0 %v17301_v45  ;;  %v17268_v55 = vcombine.low %v1401_v31, %v1409_v60  ;;  %v1625_v24 = vld [vmem:[#allocation8 + $0x19a8] sm:$0xff] }
 0x616   :  { %14939 = vmatprep.subr.bf16.mxu1 %v17557_v30  ;;  %v17524_v30 = vcombine.low %v1657_v48, %v1665_v49  ;;  %v1353_v60 = vld [vmem:[#allocation8 + $0x1128] sm:$0xff] }
 0x617   :  { %v14604_v46 = vpop.f32.mrf.mxu0  ;;  %14849 = vmatmul.mubr.bf16.vlgmr.msra.gmra.mxu0 %v19297_v2 }
 0x618   :  { %v14605_v22 = vadd.f32 %v14604_v46, %v19554_v53  ;;  %v14645_v47 = vpop.f32.mrf.mxu1  ;;  %14890 = vmatmul.mubr.bf16.vlgmr.msra.gmra.mxu1 %v19291_v59  ;;  %14899 = vmatpush1.bf16.msra.mxu0 %v17300_v28  ;;  %v17525_v53 = vcombine.high %v1657_v48, %v1665_v49  ;;  %v1369_v28 = vld [vmem:[#allocation8 + $0x11a8] sm:$0xff]  ;;  %v17508_v46 = vcombine.low %v1641_v9, %v1649_v0 }
 0x619   :  { %14930 = vmatprep.mubr.bf16.mxu0 %v19303_v13  ;;  %14940 = vmatpush1.bf16.msra.mxu1 %v17556_v23  ;;  %v14606_v54 = vpop.f32.mrf.mxu0  ;;  %v1633_v23 = vld [vmem:[#allocation8 + $0x19e8] sm:$0xff]  ;;  %v17236_v49 = vcombine.low %v1369_v28, %v1377_v37 }
 0x61a   :  { %v19563_v4 = vadd.f32 %v14645_v47, %v14605_v22  ;;  %14971 = vmatprep.mubr.bf16.mxu1 %v19305_v14  ;;  %v14607_v18 = vadd.f32 %v14606_v54, %v19557_v58  ;;  %v14647_v11 = vpop.f32.mrf.mxu1  ;;  %14900 = vmatprep.subr.bf16.mxu0 %v17285_v51  ;;  %v17252_v51 = vcombine.low %v1385_v39, %v1393_v44  ;;  %v1361_v22 = vld [vmem:[#allocation8 + $0x1168] sm:$0xff] }
 0x61b   :  { %v14608_v12 = vpop.f32.mrf.mxu0  ;;  %14941 = vmatprep.subr.bf16.mxu1 %v17541_v27  ;;  %v17237_v27 = vcombine.high %v1369_v28, %v1377_v37  ;;  %v17493_v31 = vcombine.high %v1625_v24, %v1633_v23  ;;  %v1609_v47 = vld [vmem:[#allocation8 + $0x1928] sm:$0xff]  ;;  %v17221_v54 = vcombine.high %v1353_v60, %v1361_v22  ;;  %v17220_v39 = vcombine.low %v1353_v60, %v1361_v22 }
 0x61c   :  { %v19567_v26 = vadd.f32 %v14647_v11, %v14607_v18  ;;  %v14649_v10 = vpop.f32.mrf.mxu1  ;;  %14901 = vmatpush1.bf16.msra.mxu0 %v17284_v40  ;;  %v1617_v48 = vld [vmem:[#allocation8 + $0x1968] sm:$0xff]  ;;  %v17492_v40 = vcombine.low %v1625_v24, %v1633_v23 }
 0x61d   :  { %14942 = vmatpush1.bf16.msra.mxu1 %v17540_v21  ;;  %v14609_v45 = vpop.f32.mrf.mxu0  ;;  %14902 = vmatprep.subr.bf16.mxu0 %v17269_v57  ;;  %v17477_v21 = vcombine.high %v1609_v47, %v1617_v48  ;;  %v1337_v57 = vld [vmem:[#allocation8 + $0x10a8] sm:$0xff]  ;;  %v17476_v44 = vcombine.low %v1609_v47, %v1617_v48 }
 0x61e   :  { %v14650_v58 = vpop.f32.mrf.mxu1  ;;  %14943 = vmatprep.subr.bf16.mxu1 %v17525_v53  ;;  %v1345_v18 = vld [vmem:[#allocation8 + $0x10e8] sm:$0xff] }
 0x61f   :  { %v1593_v11 = vld [vmem:[#allocation8 + $0x18a8] sm:$0xff]  ;;  %v17205_v12 = vcombine.high %v1337_v57, %v1345_v18 }
 0x620   :  { %14903 = vmatpush1.bf16.msra.mxu0 %v17268_v55  ;;  %v1601_v53 = vld [vmem:[#allocation8 + $0x18e8] sm:$0xff] }
 0x621   :  { %14944 = vmatpush1.bf16.msra.mxu1 %v17524_v30  ;;  %14904 = vmatprep.subr.bf16.mxu0 %v17253_v7  ;;  %v17461_v9 = vcombine.high %v1593_v11, %v1601_v53  ;;  %v1321_v0 = vld [vmem:[#allocation8 + $0x1028] sm:$0xff]  ;;  %v17204_v30 = vcombine.low %v1337_v57, %v1345_v18  ;;  %v17460_v7 = vcombine.low %v1593_v11, %v1601_v53 }
 0x622   :  { %14945 = vmatprep.subr.bf16.mxu1 %v17509_v36  ;;  %v1329_v10 = vld [vmem:[#allocation8 + $0x1068] sm:$0xff] }
 0x623   :  { %v1577_v55 = vld [vmem:[#allocation8 + $0x1828] sm:$0xff]  ;;  %v17189_v58 = vcombine.high %v1321_v0, %v1329_v10 }
 0x624   :  { %14905 = vmatpush1.bf16.msra.mxu0 %v17252_v51  ;;  %v1585_v45 = vld [vmem:[#allocation8 + $0x1868] sm:$0xff]  ;;  %v17188_v51 = vcombine.low %v1321_v0, %v1329_v10 }
 0x625   :  { %14946 = vmatpush1.bf16.msra.mxu1 %v17508_v46  ;;  %14906 = vmatprep.subr.bf16.mxu0 %v17237_v27  ;;  %v17445_v36 = vcombine.high %v1577_v55, %v1585_v45  ;;  %v1561_v28 = vld [vmem:[#allocation8 + $0x17a8] sm:$0xff]  ;;  %v17444_v46 = vcombine.low %v1577_v55, %v1585_v45 }
 0x626   :  { %14947 = vmatprep.subr.bf16.mxu1 %v17493_v31  ;;  %v1569_v37 = vld [vmem:[#allocation8 + $0x17e8] sm:$0xff] }
 0x627   :  { %v1817_v24 = vld [vmem:[#allocation8 + $0x1fa8] sm:$0xff]  ;;  %v17429_v27 = vcombine.high %v1561_v28, %v1569_v37 }
 0x628   :  { %14907 = vmatpush1.bf16.msra.mxu0 %v17236_v49  ;;  %v1825_v23 = vld [vmem:[#allocation8 + $0x1fe8] sm:$0xff]  ;;  %v17428_v49 = vcombine.low %v1561_v28, %v1569_v37 }
 0x629   :  { %14948 = vmatpush1.bf16.msra.mxu1 %v17492_v40  ;;  %14908 = vmatprep.subr.bf16.mxu0 %v17221_v54  ;;  %v17685_v31 = vcombine.high %v1817_v24, %v1825_v23  ;;  %v1545_v60 = vld [vmem:[#allocation8 + $0x1728] sm:$0xff]  ;;  %v17684_v40 = vcombine.low %v1817_v24, %v1825_v23 }
 0x62a   :  { %14949 = vmatprep.subr.bf16.mxu1 %v17477_v21  ;;  %v1553_v22 = vld [vmem:[#allocation8 + $0x1768] sm:$0xff] }
 0x62b   :  { %v1801_v47 = vld [vmem:[#allocation8 + $0x1f28] sm:$0xff]  ;;  %v17413_v54 = vcombine.high %v1545_v60, %v1553_v22 }
 0x62c   :  { %14909 = vmatpush1.bf16.msra.mxu0 %v17220_v39  ;;  %v1809_v48 = vld [vmem:[#allocation8 + $0x1f68] sm:$0xff]  ;;  %v17412_v39 = vcombine.low %v1545_v60, %v1553_v22 }
 0x62d   :  { %14950 = vmatpush1.bf16.msra.mxu1 %v17476_v44  ;;  %14910 = vmatprep.subr.bf16.mxu0 %v17205_v12  ;;  %v17669_v21 = vcombine.high %v1801_v47, %v1809_v48  ;;  %v1529_v57 = vld [vmem:[#allocation8 + $0x16a8] sm:$0xff]  ;;  %v17668_v44 = vcombine.low %v1801_v47, %v1809_v48 }
 0x62e   :  { %14951 = vmatprep.subr.bf16.mxu1 %v17461_v9  ;;  %v1537_v18 = vld [vmem:[#allocation8 + $0x16e8] sm:$0xff] }
 0x62f   :  { %v1785_v11 = vld [vmem:[#allocation8 + $0x1ea8] sm:$0xff]  ;;  %v17397_v12 = vcombine.high %v1529_v57, %v1537_v18 }
 0x630   :  { %14911 = vmatpush1.bf16.msra.mxu0 %v17204_v30  ;;  %v1793_v53 = vld [vmem:[#allocation8 + $0x1ee8] sm:$0xff]  ;;  %v17396_v30 = vcombine.low %v1529_v57, %v1537_v18 }
 0x631   :  { %14952 = vmatpush1.bf16.msra.mxu1 %v17460_v7  ;;  %14912 = vmatprep.subr.bf16.mxu0 %v17189_v58  ;;  %v17653_v9 = vcombine.high %v1785_v11, %v1793_v53  ;;  %v1513_v0 = vld [vmem:[#allocation8 + $0x1628] sm:$0xff]  ;;  %v17652_v7 = vcombine.low %v1785_v11, %v1793_v53 }
 0x632   :  { %14953 = vmatprep.subr.bf16.mxu1 %v17445_v36  ;;  %v1521_v10 = vld [vmem:[#allocation8 + $0x1668] sm:$0xff] }
 0x633   :  { %v1769_v55 = vld [vmem:[#allocation8 + $0x1e28] sm:$0xff]  ;;  %v17381_v58 = vcombine.high %v1513_v0, %v1521_v10 }
 0x634   :  { %14913 = vmatpush1.bf16.msra.mxu0 %v17188_v51  ;;  %v1777_v45 = vld [vmem:[#allocation8 + $0x1e68] sm:$0xff]  ;;  %v17380_v51 = vcombine.low %v1513_v0, %v1521_v10 }
 0x635   :  { %14954 = vmatpush1.bf16.msra.mxu1 %v17444_v46  ;;  %14914 = vmatprep.subr.bf16.mxu0 %v17429_v27  ;;  %v17637_v36 = vcombine.high %v1769_v55, %v1777_v45  ;;  %v1497_v28 = vld [vmem:[#allocation8 + $0x15a8] sm:$0xff]  ;;  %v17636_v46 = vcombine.low %v1769_v55, %v1777_v45 }
 0x636   :  { %14955 = vmatprep.subr.bf16.mxu1 %v17685_v31  ;;  %v1505_v37 = vld [vmem:[#allocation8 + $0x15e8] sm:$0xff] }
 0x637   :  { %v1753_v24 = vld [vmem:[#allocation8 + $0x1da8] sm:$0xff]  ;;  %v17365_v27 = vcombine.high %v1497_v28, %v1505_v37 }
 0x638   :  { %14915 = vmatpush2.bf16.msra.mxu0 %v17428_v49  ;;  %v1761_v23 = vld [vmem:[#allocation8 + $0x1de8] sm:$0xff]  ;;  %v17364_v49 = vcombine.low %v1497_v28, %v1505_v37 }
 0x639   :  { %14956 = vmatpush2.bf16.msra.mxu1 %v17684_v40  ;;  %14916 = vmatprep.subr.bf16.mxu0 %v17413_v54  ;;  %v17621_v31 = vcombine.high %v1753_v24, %v1761_v23  ;;  %v1481_v60 = vld [vmem:[#allocation8 + $0x1528] sm:$0xff]  ;;  %v17620_v40 = vcombine.low %v1753_v24, %v1761_v23 }
 0x63a   :  { %14957 = vmatprep.subr.bf16.mxu1 %v17669_v21  ;;  %v1489_v22 = vld [vmem:[#allocation8 + $0x1568] sm:$0xff] }
 0x63b   :  { %v1737_v47 = vld [vmem:[#allocation8 + $0x1d28] sm:$0xff]  ;;  %v17349_v54 = vcombine.high %v1481_v60, %v1489_v22 }
 0x63c   :  { %14917 = vmatpush2.bf16.msra.mxu0 %v17412_v39  ;;  %v1745_v48 = vld [vmem:[#allocation8 + $0x1d68] sm:$0xff]  ;;  %v17348_v39 = vcombine.low %v1481_v60, %v1489_v22 }
 0x63d   :  { %14958 = vmatpush2.bf16.msra.mxu1 %v17668_v44  ;;  %14918 = vmatprep.subr.bf16.mxu0 %v17397_v12  ;;  %v17605_v21 = vcombine.high %v1737_v47, %v1745_v48  ;;  %v1465_v57 = vld [vmem:[#allocation8 + $0x14a8] sm:$0xff]  ;;  %v17604_v44 = vcombine.low %v1737_v47, %v1745_v48 }
 0x63e   :  { %14959 = vmatprep.subr.bf16.mxu1 %v17653_v9  ;;  %v1473_v18 = vld [vmem:[#allocation8 + $0x14e8] sm:$0xff] }
 0x63f   :  { %v1721_v11 = vld [vmem:[#allocation8 + $0x1ca8] sm:$0xff]  ;;  %v17333_v12 = vcombine.high %v1465_v57, %v1473_v18 }
 0x640   :  { %14919 = vmatpush2.bf16.msra.mxu0 %v17396_v30  ;;  %v1729_v53 = vld [vmem:[#allocation8 + $0x1ce8] sm:$0xff]  ;;  %v17332_v30 = vcombine.low %v1465_v57, %v1473_v18 }
 0x641   :  { %14960 = vmatpush2.bf16.msra.mxu1 %v17652_v7  ;;  %14920 = vmatprep.subr.bf16.mxu0 %v17381_v58  ;;  %v17589_v9 = vcombine.high %v1721_v11, %v1729_v53  ;;  %v1449_v0 = vld [vmem:[#allocation8 + $0x1428] sm:$0xff]  ;;  %v17588_v7 = vcombine.low %v1721_v11, %v1729_v53 }
 0x642   :  { %14961 = vmatprep.subr.bf16.mxu1 %v17637_v36  ;;  %v1457_v10 = vld [vmem:[#allocation8 + $0x1468] sm:$0xff] }
 0x643   :  { %v1705_v55 = vld [vmem:[#allocation8 + $0x1c28] sm:$0xff]  ;;  %v17317_v58 = vcombine.high %v1449_v0, %v1457_v10 }
 0x644   :  { %14921 = vmatpush2.bf16.msra.mxu0 %v17380_v51  ;;  %v1713_v45 = vld [vmem:[#allocation8 + $0x1c68] sm:$0xff]  ;;  %v17316_v51 = vcombine.low %v1449_v0, %v1457_v10 }
 0x645   :  { %14962 = vmatpush2.bf16.msra.mxu1 %v17636_v46  ;;  %14922 = vmatprep.subr.bf16.mxu0 %v17365_v27  ;;  %v17573_v36 = vcombine.high %v1705_v55, %v1713_v45  ;;  %v1945_v28 = vld [vmem:[#allocation8 + $0x23a8] sm:$0xff]  ;;  %v17572_v46 = vcombine.low %v1705_v55, %v1713_v45 }
 0x646   :  { %14963 = vmatprep.subr.bf16.mxu1 %v17621_v31  ;;  %v1953_v37 = vld [vmem:[#allocation8 + $0x23e8] sm:$0xff] }
 0x647   :  { %v2201_v24 = vld [vmem:[#allocation8 + $0x2ba8] sm:$0xff]  ;;  %v17813_v27 = vcombine.high %v1945_v28, %v1953_v37  ;;  %v17812_v47 = vcombine.low %v1945_v28, %v1953_v37 }
 0x648   :  { %14923 = vmatpush2.bf16.msra.mxu0 %v17364_v49  ;;  %v2209_v23 = vld [vmem:[#allocation8 + $0x2be8] sm:$0xff] }
 0x649   :  { %14964 = vmatpush2.bf16.msra.mxu1 %v17620_v40  ;;  %14924 = vmatprep.subr.bf16.mxu0 %v17349_v54  ;;  %v18069_v31 = vcombine.high %v2201_v24, %v2209_v23  ;;  %v1929_v60 = vld [vmem:[#allocation8 + $0x2328] sm:$0xff]  ;;  %v18068_v40 = vcombine.low %v2201_v24, %v2209_v23 }
 0x64a   :  { %14965 = vmatprep.subr.bf16.mxu1 %v17605_v21  ;;  %v1937_v22 = vld [vmem:[#allocation8 + $0x2368] sm:$0xff] }
 0x64b   :  { %v2185_v48 = vld [vmem:[#allocation8 + $0x2b28] sm:$0xff]  ;;  %v17797_v54 = vcombine.high %v1929_v60, %v1937_v22 }
 0x64c   :  { %14925 = vmatpush2.bf16.msra.mxu0 %v17348_v39  ;;  %v2193_v49 = vld [vmem:[#allocation8 + $0x2b68] sm:$0xff] }
 0x64d   :  { %14966 = vmatpush2.bf16.msra.mxu1 %v17604_v44  ;;  %14926 = vmatprep.subr.bf16.mxu0 %v17333_v12  ;;  %v1913_v21 = vld [vmem:[#allocation8 + $0x22a8] sm:$0xff]  ;;  %v18053_v11 = vcombine.high %v2185_v48, %v2193_v49  ;;  %v18052_v10 = vcombine.low %v2185_v48, %v2193_v49 }
 0x64e   :  { %14967 = vmatprep.subr.bf16.mxu1 %v17589_v9  ;;  %v1921_v57 = vld [vmem:[#allocation8 + $0x22e8] sm:$0xff]  ;;  %v17796_v9 = vcombine.low %v1929_v60, %v1937_v22 }
 0x64f   :  { %v2169_v53 = vld [vmem:[#allocation8 + $0x2aa8] sm:$0xff]  ;;  %v17781_v55 = vcombine.high %v1913_v21, %v1921_v57 }
 0x650   :  { %14927 = vmatpush2.bf16.msra.mxu0 %v17332_v30  ;;  %v2177_v39 = vld [vmem:[#allocation8 + $0x2ae8] sm:$0xff] }
 0x651   :  { %14968 = vmatpush2.bf16.msra.mxu1 %v17588_v7  ;;  %14928 = vmatprep.subr.bf16.mxu0 %v17317_v58  ;;  %v1897_v58 = vld [vmem:[#allocation8 + $0x2228] sm:$0xff] }
 0x652   :  { %14969 = vmatprep.subr.bf16.mxu1 %v17573_v36  ;;  %v1905_v36 = vld [vmem:[#allocation8 + $0x2268] sm:$0xff] }
 0x653   :  { %v2153_v37 = vld [vmem:[#allocation8 + $0x2a28] sm:$0xff]  ;;  %v17765_v60 = vcombine.high %v1897_v58, %v1905_v36 }
 0x654   :  { %14929 = vmatpush2.bf16.msra.mxu0 %v17316_v51  ;;  %v2161_v24 = vld [vmem:[#allocation8 + $0x2a68] sm:$0xff] }
 0x655   :  { %14970 = vmatpush2.bf16.msra.mxu1 %v17572_v46  ;;  %14980 = vmatprep.subr.bf16.mxu0 %v17813_v27  ;;  %v17780_v46 = vcombine.low %v1913_v21, %v1921_v57  ;;  %v18021_v22 = vcombine.high %v2153_v37, %v2161_v24  ;;  %v1889_v48 = vld [vmem:[#allocation8 + $0x21e8] sm:$0xff] }
 0x656   :  { %15021 = vmatprep.subr.bf16.mxu1 %v18069_v31  ;;  %v18036_v31 = vcombine.low %v2169_v53, %v2177_v39  ;;  %v2137_v49 = vld [vmem:[#allocation8 + $0x29a8] sm:$0xff] }
 0x657   :  { %v14686_v18 = vpop.f32.mrf.mxu0  ;;  %14931 = vmatmul.mubr.bf16.vlgmr.msra.gmra.mxu0 %v19333_v6  ;;  %v1865_v57 = vld [vmem:[#allocation8 + $0x2128] sm:$0xff] }
 0x658   :  { %v14687_v44 = vadd.f32 %v14686_v18, %v19563_v4  ;;  %v14727_v12 = vpop.f32.mrf.mxu1  ;;  %14972 = vmatmul.mubr.bf16.vlgmr.msra.gmra.mxu1 %v19331_v1  ;;  %14981 = vmatpush1.bf16.msra.mxu0 %v17812_v47  ;;  %v18037_v4 = vcombine.high %v2169_v53, %v2177_v39  ;;  %v1881_v47 = vld [vmem:[#allocation8 + $0x21a8] sm:$0xff]  ;;  %v18020_v18 = vcombine.low %v2153_v37, %v2161_v24 }
 0x659   :  { %15012 = vmatprep.mubr.bf16.mxu0 %v19335_v19  ;;  %15022 = vmatpush1.bf16.msra.mxu1 %v18068_v40  ;;  %v14688_v0 = vpop.f32.mrf.mxu0  ;;  %v2145_v40 = vld [vmem:[#allocation8 + $0x29e8] sm:$0xff]  ;;  %v17748_v39 = vcombine.low %v1881_v47, %v1889_v48 }
 0x65a   :  { %v19573_v45 = vadd.f32 %v14727_v12, %v14687_v44  ;;  %15053 = vmatprep.mubr.bf16.mxu1 %v19337_v20  ;;  %v14689_v30 = vadd.f32 %v14688_v0, %v19567_v26  ;;  %v14729_v7 = vpop.f32.mrf.mxu1  ;;  %14982 = vmatprep.subr.bf16.mxu0 %v17797_v54  ;;  %v17764_v54 = vcombine.low %v1897_v58, %v1905_v36  ;;  %v1873_v44 = vld [vmem:[#allocation8 + $0x2168] sm:$0xff] }
 0x65b   :  { %v14690_v28 = vpop.f32.mrf.mxu0  ;;  %15023 = vmatprep.subr.bf16.mxu1 %v18053_v11  ;;  %v17749_v11 = vcombine.high %v1881_v47, %v1889_v48  ;;  %v18005_v21 = vcombine.high %v2137_v49, %v2145_v40  ;;  %v2121_v12 = vld [vmem:[#allocation8 + $0x2928] sm:$0xff]  ;;  %v17733_v0 = vcombine.high %v1865_v57, %v1873_v44  ;;  %v17732_v58 = vcombine.low %v1865_v57, %v1873_v44 }
 0x65c   :  { %v19577_v23 = vadd.f32 %v14729_v7, %v14689_v30  ;;  %v14731_v51 = vpop.f32.mrf.mxu1  ;;  %14983 = vmatpush1.bf16.msra.mxu0 %v17796_v9  ;;  %v2129_v53 = vld [vmem:[#allocation8 + $0x2968] sm:$0xff]  ;;  %v18004_v9 = vcombine.low %v2137_v49, %v2145_v40 }
 0x65d   :  { %15024 = vmatpush1.bf16.msra.mxu1 %v18052_v10  ;;  %v14691_v27 = vpop.f32.mrf.mxu0  ;;  %14984 = vmatprep.subr.bf16.mxu0 %v17781_v55  ;;  %v17989_v10 = vcombine.high %v2121_v12, %v2129_v53  ;;  %v1849_v55 = vld [vmem:[#allocation8 + $0x20a8] sm:$0xff]  ;;  %v17988_v36 = vcombine.low %v2121_v12, %v2129_v53 }
 0x65e   :  { %v14732_v26 = vpop.f32.mrf.mxu1  ;;  %15025 = vmatprep.subr.bf16.mxu1 %v18037_v4  ;;  %v1857_v30 = vld [vmem:[#allocation8 + $0x20e8] sm:$0xff] }
 0x65f   :  { %v2105_v7 = vld [vmem:[#allocation8 + $0x28a8] sm:$0xff]  ;;  %v17717_v28 = vcombine.high %v1849_v55, %v1857_v30 }
 0x660   :  { %14985 = vmatpush1.bf16.msra.mxu0 %v17780_v46  ;;  %v2113_v4 = vld [vmem:[#allocation8 + $0x28e8] sm:$0xff] }
 0x661   :  { %15026 = vmatpush1.bf16.msra.mxu1 %v18036_v31  ;;  %14986 = vmatprep.subr.bf16.mxu0 %v17765_v60  ;;  %v17973_v37 = vcombine.high %v2105_v7, %v2113_v4  ;;  %v1833_v24 = vld [vmem:[#allocation8 + $0x2028] sm:$0xff]  ;;  %v17716_v31 = vcombine.low %v1849_v55, %v1857_v30  ;;  %v17972_v60 = vcombine.low %v2105_v7, %v2113_v4 }
 0x662   :  { %15027 = vmatprep.subr.bf16.mxu1 %v18021_v22  ;;  %v1841_v51 = vld [vmem:[#allocation8 + $0x2068] sm:$0xff] }
 0x663   :  { %v2089_v46 = vld [vmem:[#allocation8 + $0x2828] sm:$0xff]  ;;  %v17701_v26 = vcombine.high %v1833_v24, %v1841_v51 }
 0x664   :  { %14987 = vmatpush1.bf16.msra.mxu0 %v17764_v54  ;;  %v2097_v27 = vld [vmem:[#allocation8 + $0x2868] sm:$0xff]  ;;  %v17700_v54 = vcombine.low %v1833_v24, %v1841_v51 }
 0x665   :  { %15028 = vmatpush1.bf16.msra.mxu1 %v18020_v18  ;;  %14988 = vmatprep.subr.bf16.mxu0 %v17749_v11  ;;  %v17957_v22 = vcombine.high %v2089_v46, %v2097_v27  ;;  %v2073_v47 = vld [vmem:[#allocation8 + $0x27a8] sm:$0xff]  ;;  %v17956_v18 = vcombine.low %v2089_v46, %v2097_v27 }
 0x666   :  { %15029 = vmatprep.subr.bf16.mxu1 %v18005_v21  ;;  %v2081_v48 = vld [vmem:[#allocation8 + $0x27e8] sm:$0xff] }
 0x667   :  { %v2329_v49 = vld [vmem:[#allocation8 + $0x2fa8] sm:$0xff]  ;;  %v17941_v11 = vcombine.high %v2073_v47, %v2081_v48 }
 0x668   :  { %14989 = vmatpush1.bf16.msra.mxu0 %v17748_v39  ;;  %v2337_v40 = vld [vmem:[#allocation8 + $0x2fe8] sm:$0xff]  ;;  %v17940_v39 = vcombine.low %v2073_v47, %v2081_v48 }
 0x669   :  { %15030 = vmatpush1.bf16.msra.mxu1 %v18004_v9  ;;  %14990 = vmatprep.subr.bf16.mxu0 %v17733_v0  ;;  %v18197_v21 = vcombine.high %v2329_v49, %v2337_v40  ;;  %v2057_v57 = vld [vmem:[#allocation8 + $0x2728] sm:$0xff]  ;;  %v18196_v9 = vcombine.low %v2329_v49, %v2337_v40 }
 0x66a   :  { %15031 = vmatprep.subr.bf16.mxu1 %v17989_v10  ;;  %v2065_v44 = vld [vmem:[#allocation8 + $0x2768] sm:$0xff] }
 0x66b   :  { %v2313_v12 = vld [vmem:[#allocation8 + $0x2f28] sm:$0xff]  ;;  %v17925_v0 = vcombine.high %v2057_v57, %v2065_v44 }
 0x66c   :  { %14991 = vmatpush1.bf16.msra.mxu0 %v17732_v58  ;;  %v2321_v53 = vld [vmem:[#allocation8 + $0x2f68] sm:$0xff]  ;;  %v17924_v58 = vcombine.low %v2057_v57, %v2065_v44 }
 0x66d   :  { %15032 = vmatpush1.bf16.msra.mxu1 %v17988_v36  ;;  %14992 = vmatprep.subr.bf16.mxu0 %v17717_v28  ;;  %v18181_v10 = vcombine.high %v2313_v12, %v2321_v53  ;;  %v2041_v55 = vld [vmem:[#allocation8 + $0x26a8] sm:$0xff]  ;;  %v18180_v36 = vcombine.low %v2313_v12, %v2321_v53 }
 0x66e   :  { %15033 = vmatprep.subr.bf16.mxu1 %v17973_v37  ;;  %v2049_v30 = vld [vmem:[#allocation8 + $0x26e8] sm:$0xff] }
 0x66f   :  { %v2297_v7 = vld [vmem:[#allocation8 + $0x2ea8] sm:$0xff]  ;;  %v17909_v28 = vcombine.high %v2041_v55, %v2049_v30 }
 0x670   :  { %14993 = vmatpush1.bf16.msra.mxu0 %v17716_v31  ;;  %v2305_v4 = vld [vmem:[#allocation8 + $0x2ee8] sm:$0xff]  ;;  %v17908_v31 = vcombine.low %v2041_v55, %v2049_v30 }
 0x671   :  { %15034 = vmatpush1.bf16.msra.mxu1 %v17972_v60  ;;  %14994 = vmatprep.subr.bf16.mxu0 %v17701_v26  ;;  %v18165_v37 = vcombine.high %v2297_v7, %v2305_v4  ;;  %v2025_v24 = vld [vmem:[#allocation8 + $0x2628] sm:$0xff]  ;;  %v18164_v60 = vcombine.low %v2297_v7, %v2305_v4 }
 0x672   :  { %15035 = vmatprep.subr.bf16.mxu1 %v17957_v22  ;;  %v2033_v51 = vld [vmem:[#allocation8 + $0x2668] sm:$0xff] }
 0x673   :  { %v2281_v46 = vld [vmem:[#allocation8 + $0x2e28] sm:$0xff]  ;;  %v17893_v26 = vcombine.high %v2025_v24, %v2033_v51 }
 0x674   :  { %14995 = vmatpush1.bf16.msra.mxu0 %v17700_v54  ;;  %v2289_v27 = vld [vmem:[#allocation8 + $0x2e68] sm:$0xff]  ;;  %v17892_v54 = vcombine.low %v2025_v24, %v2033_v51 }
 0x675   :  { %15036 = vmatpush1.bf16.msra.mxu1 %v17956_v18  ;;  %14996 = vmatprep.subr.bf16.mxu0 %v17941_v11  ;;  %v18149_v22 = vcombine.high %v2281_v46, %v2289_v27  ;;  %v2009_v47 = vld [vmem:[#allocation8 + $0x25a8] sm:$0xff]  ;;  %v18148_v18 = vcombine.low %v2281_v46, %v2289_v27 }
 0x676   :  { %15037 = vmatprep.subr.bf16.mxu1 %v18197_v21  ;;  %v2017_v48 = vld [vmem:[#allocation8 + $0x25e8] sm:$0xff] }
 0x677   :  { %v2265_v49 = vld [vmem:[#allocation8 + $0x2da8] sm:$0xff]  ;;  %v17877_v11 = vcombine.high %v2009_v47, %v2017_v48 }
 0x678   :  { %14997 = vmatpush2.bf16.msra.mxu0 %v17940_v39  ;;  %v2273_v40 = vld [vmem:[#allocation8 + $0x2de8] sm:$0xff]  ;;  %v17876_v39 = vcombine.low %v2009_v47, %v2017_v48 }
 0x679   :  { %15038 = vmatpush2.bf16.msra.mxu1 %v18196_v9  ;;  %14998 = vmatprep.subr.bf16.mxu0 %v17925_v0  ;;  %v18133_v21 = vcombine.high %v2265_v49, %v2273_v40  ;;  %v1993_v57 = vld [vmem:[#allocation8 + $0x2528] sm:$0xff]  ;;  %v18132_v9 = vcombine.low %v2265_v49, %v2273_v40 }
 0x67a   :  { %15039 = vmatprep.subr.bf16.mxu1 %v18181_v10  ;;  %v2001_v44 = vld [vmem:[#allocation8 + $0x2568] sm:$0xff] }
 0x67b   :  { %v2249_v12 = vld [vmem:[#allocation8 + $0x2d28] sm:$0xff]  ;;  %v17861_v0 = vcombine.high %v1993_v57, %v2001_v44 }
 0x67c   :  { %14999 = vmatpush2.bf16.msra.mxu0 %v17924_v58  ;;  %v2257_v53 = vld [vmem:[#allocation8 + $0x2d68] sm:$0xff]  ;;  %v17860_v58 = vcombine.low %v1993_v57, %v2001_v44 }
 0x67d   :  { %15040 = vmatpush2.bf16.msra.mxu1 %v18180_v36  ;;  %15000 = vmatprep.subr.bf16.mxu0 %v17909_v28  ;;  %v18117_v10 = vcombine.high %v2249_v12, %v2257_v53  ;;  %v1977_v55 = vld [vmem:[#allocation8 + $0x24a8] sm:$0xff]  ;;  %v18116_v36 = vcombine.low %v2249_v12, %v2257_v53 }
 0x67e   :  { %15041 = vmatprep.subr.bf16.mxu1 %v18165_v37  ;;  %v1985_v30 = vld [vmem:[#allocation8 + $0x24e8] sm:$0xff] }
 0x67f   :  { %v2233_v7 = vld [vmem:[#allocation8 + $0x2ca8] sm:$0xff]  ;;  %v17845_v28 = vcombine.high %v1977_v55, %v1985_v30 }
 0x680   :  { %15001 = vmatpush2.bf16.msra.mxu0 %v17908_v31  ;;  %v2241_v4 = vld [vmem:[#allocation8 + $0x2ce8] sm:$0xff]  ;;  %v17844_v31 = vcombine.low %v1977_v55, %v1985_v30 }
 0x681   :  { %15042 = vmatpush2.bf16.msra.mxu1 %v18164_v60  ;;  %15002 = vmatprep.subr.bf16.mxu0 %v17893_v26  ;;  %v18101_v37 = vcombine.high %v2233_v7, %v2241_v4  ;;  %v1961_v24 = vld [vmem:[#allocation8 + $0x2428] sm:$0xff]  ;;  %v18100_v60 = vcombine.low %v2233_v7, %v2241_v4 }
 0x682   :  { %15043 = vmatprep.subr.bf16.mxu1 %v18149_v22  ;;  %v1969_v51 = vld [vmem:[#allocation8 + $0x2468] sm:$0xff] }
 0x683   :  { %v2217_v46 = vld [vmem:[#allocation8 + $0x2c28] sm:$0xff]  ;;  %v17829_v26 = vcombine.high %v1961_v24, %v1969_v51 }
 0x684   :  { %15003 = vmatpush2.bf16.msra.mxu0 %v17892_v54  ;;  %v2225_v27 = vld [vmem:[#allocation8 + $0x2c68] sm:$0xff]  ;;  %v17828_v54 = vcombine.low %v1961_v24, %v1969_v51 }
 0x685   :  { %15044 = vmatpush2.bf16.msra.mxu1 %v18148_v18  ;;  %15004 = vmatprep.subr.bf16.mxu0 %v17877_v11  ;;  %v18085_v22 = vcombine.high %v2217_v46, %v2225_v27  ;;  %v2457_v47 = vld [vmem:[#allocation8 + $0x33a8] sm:$0xff]  ;;  %v18084_v18 = vcombine.low %v2217_v46, %v2225_v27 }
 0x686   :  { %15045 = vmatprep.subr.bf16.mxu1 %v18133_v21  ;;  %v2465_v48 = vld [vmem:[#allocation8 + $0x33e8] sm:$0xff] }
 0x687   :  { %v2713_v49 = vld [vmem:[#allocation8 + $0x3ba8] sm:$0xff]  ;;  %v18325_v11 = vcombine.high %v2457_v47, %v2465_v48  ;;  %v18324_v12 = vcombine.low %v2457_v47, %v2465_v48 }
 0x688   :  { %15005 = vmatpush2.bf16.msra.mxu0 %v17876_v39  ;;  %v2721_v40 = vld [vmem:[#allocation8 + $0x3be8] sm:$0xff] }
 0x689   :  { %15046 = vmatpush2.bf16.msra.mxu1 %v18132_v9  ;;  %15006 = vmatprep.subr.bf16.mxu0 %v17861_v0  ;;  %v18581_v21 = vcombine.high %v2713_v49, %v2721_v40  ;;  %v2441_v57 = vld [vmem:[#allocation8 + $0x3328] sm:$0xff]  ;;  %v18580_v9 = vcombine.low %v2713_v49, %v2721_v40 }
 0x68a   :  { %15047 = vmatprep.subr.bf16.mxu1 %v18117_v10  ;;  %v2449_v44 = vld [vmem:[#allocation8 + $0x3368] sm:$0xff] }
 0x68b   :  { %v2697_v53 = vld [vmem:[#allocation8 + $0x3b28] sm:$0xff]  ;;  %v18309_v0 = vcombine.high %v2441_v57, %v2449_v44 }
 0x68c   :  { %15007 = vmatpush2.bf16.msra.mxu0 %v17860_v58  ;;  %v2705_v39 = vld [vmem:[#allocation8 + $0x3b68] sm:$0xff] }
 0x68d   :  { %15048 = vmatpush2.bf16.msra.mxu1 %v18116_v36  ;;  %15008 = vmatprep.subr.bf16.mxu0 %v17845_v28  ;;  %v2425_v10 = vld [vmem:[#allocation8 + $0x32a8] sm:$0xff]  ;;  %v18565_v7 = vcombine.high %v2697_v53, %v2705_v39  ;;  %v18564_v51 = vcombine.low %v2697_v53, %v2705_v39 }
 0x68e   :  { %15049 = vmatprep.subr.bf16.mxu1 %v18101_v37  ;;  %v2433_v55 = vld [vmem:[#allocation8 + $0x32e8] sm:$0xff]  ;;  %v18308_v37 = vcombine.low %v2441_v57, %v2449_v44 }
 0x68f   :  { %v2681_v4 = vld [vmem:[#allocation8 + $0x3aa8] sm:$0xff]  ;;  %v18293_v46 = vcombine.high %v2425_v10, %v2433_v55 }
 0x690   :  { %15009 = vmatpush2.bf16.msra.mxu0 %v17844_v31  ;;  %v2689_v58 = vld [vmem:[#allocation8 + $0x3ae8] sm:$0xff] }
 0x691   :  { %15050 = vmatpush2.bf16.msra.mxu1 %v18100_v60  ;;  %15010 = vmatprep.subr.bf16.mxu0 %v17829_v26  ;;  %v2409_v26 = vld [vmem:[#allocation8 + $0x3228] sm:$0xff] }
 0x692   :  { %15051 = vmatprep.subr.bf16.mxu1 %v18085_v22  ;;  %v2417_v22 = vld [vmem:[#allocation8 + $0x3268] sm:$0xff] }
 0x693   :  { %v2665_v48 = vld [vmem:[#allocation8 + $0x3a28] sm:$0xff]  ;;  %v18277_v57 = vcombine.high %v2409_v26, %v2417_v22 }
 0x694   :  { %15011 = vmatpush2.bf16.msra.mxu0 %v17828_v54  ;;  %v2673_v49 = vld [vmem:[#allocation8 + $0x3a68] sm:$0xff] }
 0x695   :  { %15052 = vmatpush2.bf16.msra.mxu1 %v18084_v18  ;;  %15062 = vmatprep.subr.bf16.mxu0 %v18325_v11  ;;  %v18292_v18 = vcombine.low %v2425_v10, %v2433_v55  ;;  %v18533_v44 = vcombine.high %v2665_v48, %v2673_v49  ;;  %v2401_v53 = vld [vmem:[#allocation8 + $0x31e8] sm:$0xff] }
 0x696   :  { %15103 = vmatprep.subr.bf16.mxu1 %v18581_v21  ;;  %v18548_v21 = vcombine.low %v2681_v4, %v2689_v58  ;;  %v2649_v39 = vld [vmem:[#allocation8 + $0x39a8] sm:$0xff] }
 0x697   :  { %v14768_v30 = vpop.f32.mrf.mxu0  ;;  %15013 = vmatmul.mubr.bf16.vlgmr.msra.gmra.mxu0 %v19359_v34  ;;  %v2377_v55 = vld [vmem:[#allocation8 + $0x3128] sm:$0xff] }
 0x698   :  { %v14769_v36 = vadd.f32 %v14768_v30, %v19573_v45  ;;  %v14809_v28 = vpop.f32.mrf.mxu1  ;;  %15054 = vmatmul.mubr.bf16.vlgmr.msra.gmra.mxu1 %v19357_v25  ;;  %15063 = vmatpush1.bf16.msra.mxu0 %v18324_v12  ;;  %v18549_v45 = vcombine.high %v2681_v4, %v2689_v58  ;;  %v2393_v12 = vld [vmem:[#allocation8 + $0x31a8] sm:$0xff]  ;;  %v18532_v30 = vcombine.low %v2665_v48, %v2673_v49 }
 0x699   :  { %15094 = vmatprep.mubr.bf16.mxu0 %v19361_v41  ;;  %15104 = vmatpush1.bf16.msra.mxu1 %v18580_v9  ;;  %v14770_v24 = vpop.f32.mrf.mxu0  ;;  %v2657_v9 = vld [vmem:[#allocation8 + $0x39e8] sm:$0xff]  ;;  %v18260_v58 = vcombine.low %v2393_v12, %v2401_v53 }
 0x69a   :  { %v19583_v27 = vadd.f32 %v14809_v28, %v14769_v36  ;;  %15135 = vmatprep.mubr.bf16.mxu1 %v19363_v42  ;;  %v14771_v31 = vadd.f32 %v14770_v24, %v19577_v23  ;;  %v14811_v60 = vpop.f32.mrf.mxu1  ;;  %15064 = vmatprep.subr.bf16.mxu0 %v18309_v0  ;;  %v18276_v0 = vcombine.low %v2409_v26, %v2417_v22  ;;  %v2385_v36 = vld [vmem:[#allocation8 + $0x3168] sm:$0xff] }
 0x69b   :  { %v14772_v47 = vpop.f32.mrf.mxu0  ;;  %15105 = vmatprep.subr.bf16.mxu1 %v18565_v7  ;;  %v18261_v7 = vcombine.high %v2393_v12, %v2401_v53  ;;  %v18517_v10 = vcombine.high %v2649_v39, %v2657_v9  ;;  %v2633_v28 = vld [vmem:[#allocation8 + $0x3928] sm:$0xff]  ;;  %v18245_v24 = vcombine.high %v2377_v55, %v2385_v36  ;;  %v18244_v26 = vcombine.low %v2377_v55, %v2385_v36 }
 0x69c   :  { %v19587_v40 = vadd.f32 %v14811_v60, %v14771_v31  ;;  %v14813_v54 = vpop.f32.mrf.mxu1  ;;  %15065 = vmatpush1.bf16.msra.mxu0 %v18308_v37  ;;  %v2641_v4 = vld [vmem:[#allocation8 + $0x3968] sm:$0xff]  ;;  %v18516_v37 = vcombine.low %v2649_v39, %v2657_v9 }
 0x69d   :  { %15106 = vmatpush1.bf16.msra.mxu1 %v18564_v51  ;;  %v14773_v11 = vpop.f32.mrf.mxu0  ;;  %15066 = vmatprep.subr.bf16.mxu0 %v18293_v46  ;;  %v18501_v51 = vcombine.high %v2633_v28, %v2641_v4  ;;  %v2361_v46 = vld [vmem:[#allocation8 + $0x30a8] sm:$0xff]  ;;  %v18500_v22 = vcombine.low %v2633_v28, %v2641_v4 }
 0x69e   :  { %v14814_v23 = vpop.f32.mrf.mxu1  ;;  %15107 = vmatprep.subr.bf16.mxu1 %v18549_v45  ;;  %v2369_v31 = vld [vmem:[#allocation8 + $0x30e8] sm:$0xff] }
 0x69f   :  { %v2617_v60 = vld [vmem:[#allocation8 + $0x38a8] sm:$0xff]  ;;  %v18229_v47 = vcombine.high %v2361_v46, %v2369_v31 }
 0x6a0   :  { %15067 = vmatpush1.bf16.msra.mxu0 %v18292_v18  ;;  %v2625_v45 = vld [vmem:[#allocation8 + $0x38e8] sm:$0xff] }
 0x6a1   :  { %15108 = vmatpush1.bf16.msra.mxu1 %v18548_v21  ;;  %15068 = vmatprep.subr.bf16.mxu0 %v18277_v57  ;;  %v18485_v48 = vcombine.high %v2617_v60, %v2625_v45  ;;  %v2345_v49 = vld [vmem:[#allocation8 + $0x3028] sm:$0xff]  ;;  %v18228_v21 = vcombine.low %v2361_v46, %v2369_v31  ;;  %v18484_v57 = vcombine.low %v2617_v60, %v2625_v45 }
 0x6a2   :  { %15109 = vmatprep.subr.bf16.mxu1 %v18533_v44  ;;  %v2353_v54 = vld [vmem:[#allocation8 + $0x3068] sm:$0xff] }
 0x6a3   :  { %v2601_v18 = vld [vmem:[#allocation8 + $0x3828] sm:$0xff]  ;;  %v18213_v23 = vcombine.high %v2345_v49, %v2353_v54 }
 0x6a4   :  { %15069 = vmatpush1.bf16.msra.mxu0 %v18276_v0  ;;  %v2609_v11 = vld [vmem:[#allocation8 + $0x3868] sm:$0xff]  ;;  %v18212_v0 = vcombine.low %v2345_v49, %v2353_v54 }
 0x6a5   :  { %15110 = vmatpush1.bf16.msra.mxu1 %v18532_v30  ;;  %15070 = vmatprep.subr.bf16.mxu0 %v18261_v7  ;;  %v18469_v44 = vcombine.high %v2601_v18, %v2609_v11  ;;  %v2585_v12 = vld [vmem:[#allocation8 + $0x37a8] sm:$0xff]  ;;  %v18468_v30 = vcombine.low %v2601_v18, %v2609_v11 }
 0x6a6   :  { %15111 = vmatprep.subr.bf16.mxu1 %v18517_v10  ;;  %v2593_v53 = vld [vmem:[#allocation8 + $0x37e8] sm:$0xff] }
 0x6a7   :  { %v2841_v39 = vld [vmem:[#allocation8 + $0x3fa8] sm:$0xff]  ;;  %v18453_v7 = vcombine.high %v2585_v12, %v2593_v53 }
 0x6a8   :  { %15071 = vmatpush1.bf16.msra.mxu0 %v18260_v58  ;;  %v2849_v9 = vld [vmem:[#allocation8 + $0x3fe8] sm:$0xff]  ;;  %v18452_v58 = vcombine.low %v2585_v12, %v2593_v53 }
 0x6a9   :  { %15112 = vmatpush1.bf16.msra.mxu1 %v18516_v37  ;;  %15072 = vmatprep.subr.bf16.mxu0 %v18245_v24  ;;  %v18709_v10 = vcombine.high %v2841_v39, %v2849_v9  ;;  %v2569_v55 = vld [vmem:[#allocation8 + $0x3728] sm:$0xff]  ;;  %v18708_v37 = vcombine.low %v2841_v39, %v2849_v9 }
 0x6aa   :  { %15113 = vmatprep.subr.bf16.mxu1 %v18501_v51  ;;  %v2577_v36 = vld [vmem:[#allocation8 + $0x3768] sm:$0xff] }
 0x6ab   :  { %v2825_v28 = vld [vmem:[#allocation8 + $0x3f28] sm:$0xff]  ;;  %v18437_v24 = vcombine.high %v2569_v55, %v2577_v36 }
 0x6ac   :  { %15073 = vmatpush1.bf16.msra.mxu0 %v18244_v26  ;;  %v2833_v4 = vld [vmem:[#allocation8 + $0x3f68] sm:$0xff]  ;;  %v18436_v26 = vcombine.low %v2569_v55, %v2577_v36 }
 0x6ad   :  { %15114 = vmatpush1.bf16.msra.mxu1 %v18500_v22  ;;  %15074 = vmatprep.subr.bf16.mxu0 %v18229_v47  ;;  %v18693_v51 = vcombine.high %v2825_v28, %v2833_v4  ;;  %v2553_v46 = vld [vmem:[#allocation8 + $0x36a8] sm:$0xff]  ;;  %v18692_v22 = vcombine.low %v2825_v28, %v2833_v4 }
 0x6ae   :  { %15115 = vmatprep.subr.bf16.mxu1 %v18485_v48  ;;  %v2561_v31 = vld [vmem:[#allocation8 + $0x36e8] sm:$0xff] }
 0x6af   :  { %v2809_v60 = vld [vmem:[#allocation8 + $0x3ea8] sm:$0xff]  ;;  %v18421_v47 = vcombine.high %v2553_v46, %v2561_v31 }
 0x6b0   :  { %15075 = vmatpush1.bf16.msra.mxu0 %v18228_v21  ;;  %v2817_v45 = vld [vmem:[#allocation8 + $0x3ee8] sm:$0xff]  ;;  %v18420_v21 = vcombine.low %v2553_v46, %v2561_v31 }
 0x6b1   :  { %15116 = vmatpush1.bf16.msra.mxu1 %v18484_v57  ;;  %15076 = vmatprep.subr.bf16.mxu0 %v18213_v23  ;;  %v18677_v48 = vcombine.high %v2809_v60, %v2817_v45  ;;  %v2537_v49 = vld [vmem:[#allocation8 + $0x3628] sm:$0xff]  ;;  %v18676_v57 = vcombine.low %v2809_v60, %v2817_v45 }
 0x6b2   :  { %15117 = vmatprep.subr.bf16.mxu1 %v18469_v44  ;;  %v2545_v54 = vld [vmem:[#allocation8 + $0x3668] sm:$0xff] }
 0x6b3   :  { %v2793_v18 = vld [vmem:[#allocation8 + $0x3e28] sm:$0xff]  ;;  %v18405_v23 = vcombine.high %v2537_v49, %v2545_v54 }
 0x6b4   :  { %15077 = vmatpush1.bf16.msra.mxu0 %v18212_v0  ;;  %v2801_v11 = vld [vmem:[#allocation8 + $0x3e68] sm:$0xff]  ;;  %v18404_v0 = vcombine.low %v2537_v49, %v2545_v54 }
 0x6b5   :  { %15118 = vmatpush1.bf16.msra.mxu1 %v18468_v30  ;;  %15078 = vmatprep.subr.bf16.mxu0 %v18453_v7  ;;  %v18661_v44 = vcombine.high %v2793_v18, %v2801_v11  ;;  %v2521_v12 = vld [vmem:[#allocation8 + $0x35a8] sm:$0xff]  ;;  %v18660_v30 = vcombine.low %v2793_v18, %v2801_v11 }
 0x6b6   :  { %15119 = vmatprep.subr.bf16.mxu1 %v18709_v10  ;;  %v2529_v53 = vld [vmem:[#allocation8 + $0x35e8] sm:$0xff] }
 0x6b7   :  { %v2777_v39 = vld [vmem:[#allocation8 + $0x3da8] sm:$0xff]  ;;  %v18389_v7 = vcombine.high %v2521_v12, %v2529_v53 }
 0x6b8   :  { %15079 = vmatpush2.bf16.msra.mxu0 %v18452_v58  ;;  %v2785_v9 = vld [vmem:[#allocation8 + $0x3de8] sm:$0xff]  ;;  %v18388_v58 = vcombine.low %v2521_v12, %v2529_v53  ;;  %v922_v12 = vld [vmem:[#allocation8 + $0x3b0] sm:$0xff] }
 0x6b9   :  { %15120 = vmatpush2.bf16.msra.mxu1 %v18708_v37  ;;  %15080 = vmatprep.subr.bf16.mxu0 %v18437_v24  ;;  %v18645_v10 = vcombine.high %v2777_v39, %v2785_v9  ;;  %v2505_v55 = vld [vmem:[#allocation8 + $0x3528] sm:$0xff]  ;;  %v18644_v37 = vcombine.low %v2777_v39, %v2785_v9  ;;  %v930_v53 = vld [vmem:[#allocation8 + $0x3f0] sm:$0xff] }
 0x6ba   :  { %15121 = vmatprep.subr.bf16.mxu1 %v18693_v51  ;;  %v2513_v36 = vld [vmem:[#allocation8 + $0x3568] sm:$0xff]  ;;  %v1178_v39 = vld [vmem:[#allocation8 + $0xbb0] sm:$0xff] }
 0x6bb   :  { %v2761_v28 = vld [vmem:[#allocation8 + $0x3d28] sm:$0xff]  ;;  %v18373_v24 = vcombine.high %v2505_v55, %v2513_v36  ;;  %v1186_v9 = vld [vmem:[#allocation8 + $0xbf0] sm:$0xff] }
 0x6bc   :  { %15081 = vmatpush2.bf16.msra.mxu0 %v18436_v26  ;;  %v2769_v4 = vld [vmem:[#allocation8 + $0x3d68] sm:$0xff]  ;;  %v18372_v26 = vcombine.low %v2505_v55, %v2513_v36  ;;  %v906_v55 = vld [vmem:[#allocation8 + $0x330] sm:$0xff] }
 0x6bd   :  { %15122 = vmatpush2.bf16.msra.mxu1 %v18692_v22  ;;  %15082 = vmatprep.subr.bf16.mxu0 %v18421_v47  ;;  %v18629_v51 = vcombine.high %v2761_v28, %v2769_v4  ;;  %v2489_v46 = vld [vmem:[#allocation8 + $0x34a8] sm:$0xff]  ;;  %v18628_v22 = vcombine.low %v2761_v28, %v2769_v4  ;;  %v914_v36 = vld [vmem:[#allocation8 + $0x370] sm:$0xff] }
 0x6be   :  { %15123 = vmatprep.subr.bf16.mxu1 %v18677_v48  ;;  %v2497_v31 = vld [vmem:[#allocation8 + $0x34e8] sm:$0xff] }
 0x6bf   :  { %v2745_v60 = vld [vmem:[#allocation8 + $0x3ca8] sm:$0xff]  ;;  %v18357_v47 = vcombine.high %v2489_v46, %v2497_v31 }
 0x6c0   :  { %15083 = vmatpush2.bf16.msra.mxu0 %v18420_v21  ;;  %v2753_v45 = vld [vmem:[#allocation8 + $0x3ce8] sm:$0xff]  ;;  %v18356_v21 = vcombine.low %v2489_v46, %v2497_v31  ;;  %v16775_v31 = vcombine.high %v906_v55, %v914_v36 }
 0x6c1   :  { %15124 = vmatpush2.bf16.msra.mxu1 %v18676_v57  ;;  %15084 = vmatprep.subr.bf16.mxu0 %v18405_v23  ;;  %v18613_v48 = vcombine.high %v2745_v60, %v2753_v45  ;;  %v2473_v49 = vld [vmem:[#allocation8 + $0x3428] sm:$0xff]  ;;  %v18612_v57 = vcombine.low %v2745_v60, %v2753_v45  ;;  %v890_v60 = vld [vmem:[#allocation8 + $0x2b0] sm:$0xff] }
 0x6c2   :  { %15125 = vmatprep.subr.bf16.mxu1 %v18661_v44  ;;  %v2481_v54 = vld [vmem:[#allocation8 + $0x3468] sm:$0xff]  ;;  %v898_v45 = vld [vmem:[#allocation8 + $0x2f0] sm:$0xff] }
 0x6c3   :  { %v2729_v18 = vld [vmem:[#allocation8 + $0x3c28] sm:$0xff]  ;;  %v18341_v23 = vcombine.high %v2473_v49, %v2481_v54 }
 0x6c4   :  { %15085 = vmatpush2.bf16.msra.mxu0 %v18404_v0  ;;  %v2737_v11 = vld [vmem:[#allocation8 + $0x3c68] sm:$0xff]  ;;  %v18340_v0 = vcombine.low %v2473_v49, %v2481_v54  ;;  %v16774_v54 = vcombine.low %v906_v55, %v914_v36 }
 0x6c5   :  { %15126 = vmatpush2.bf16.msra.mxu1 %v18660_v30  ;;  %15086 = vmatprep.subr.bf16.mxu0 %v18389_v7  ;;  %v18597_v44 = vcombine.high %v2729_v18, %v2737_v11  ;;  %v18596_v30 = vcombine.low %v2729_v18, %v2737_v11  ;;  %v16791_v7 = vcombine.high %v922_v12, %v930_v53  ;;  %v19008_v28 = vld [vmem:[#allocation10 + $0x8] sm:$0xff] }
 0x6c6   :  { %15127 = vmatprep.subr.bf16.mxu1 %v18645_v10  ;;  %v17047_v10 = vcombine.high %v1178_v39, %v1186_v9  ;;  %v2899_v4 = vrot.slane %v19008_v28, %v19259_v29  ;;  %v2903_v46 = vrot.slane %v19008_v28, %v19267_v32  ;;  %v16759_v11 = vcombine.high %v890_v60, %v898_v45 }
 0x6c8   :  { %15087 = vmatpush2.bf16.msra.mxu0 %v18388_v58  ;;  %v16790_v58 = vcombine.low %v922_v12, %v930_v53  ;;  %v874_v12 = vld [vmem:[#allocation8 + $0x230] sm:$0xff] }
 0x6c9   :  { %15128 = vmatpush2.bf16.msra.mxu1 %v18644_v37  ;;  %15088 = vmatprep.subr.bf16.mxu0 %v18373_v24  ;;  %v1162_v37 = vld [vmem:[#allocation8 + $0xb30] sm:$0xff] }
 0x6ca   :  { %15129 = vmatprep.subr.bf16.mxu1 %v18629_v51  ;;  %v1170_v24 = vld [vmem:[#allocation8 + $0xb70] sm:$0xff]  ;;  %v17046_v51 = vcombine.low %v1178_v39, %v1186_v9 }
 0x6cb   :  { %v17030_v32 = vcombine.low %v1162_v37, %v1170_v24  ;;  %v882_v53 = vld [vmem:[#allocation8 + $0x270] sm:$0xff] }
 0x6cc   :  { %15089 = vmatpush2.bf16.msra.mxu0 %v18372_v26  ;;  %v1130_v9 = vld [vmem:[#allocation8 + $0xa30] sm:$0xff]  ;;  %v16743_v28 = vcombine.high %v874_v12, %v882_v53 }
 0x6cd   :  { %15130 = vmatpush2.bf16.msra.mxu1 %v18628_v22  ;;  %15090 = vmatprep.subr.bf16.mxu0 %v18357_v47  ;;  %v17031_v22 = vcombine.high %v1162_v37, %v1170_v24  ;;  %v1146_v47 = vld [vmem:[#allocation8 + $0xab0] sm:$0xff] }
 0x6ce   :  { %15131 = vmatprep.subr.bf16.mxu1 %v18613_v48  ;;  %v1154_v48 = vld [vmem:[#allocation8 + $0xaf0] sm:$0xff] }
 0x6cf   :  { %v17014_v36 = vcombine.low %v1146_v47, %v1154_v48  ;;  %v858_v37 = vld [vmem:[#allocation8 + $0x1b0] sm:$0xff] }
 0x6d0   :  { %15091 = vmatpush2.bf16.msra.mxu0 %v18356_v21  ;;  %v866_v24 = vld [vmem:[#allocation8 + $0x1f0] sm:$0xff] }
 0x6d1   :  { %15132 = vmatpush2.bf16.msra.mxu1 %v18612_v57  ;;  %15092 = vmatprep.subr.bf16.mxu0 %v18341_v23 }
 0x6d2   :  { %15133 = vmatprep.subr.bf16.mxu1 %v18597_v44  ;;  %v17015_v44 = vcombine.high %v1146_v47, %v1154_v48  ;;  %v1106_v47 = vld [vmem:[#allocation8 + $0x970] sm:$0xff]  ;;  %v16726_v48 = vcombine.low %v858_v37, %v866_v24 }
 0x6d4   :  { %15093 = vmatpush2.bf16.msra.mxu0 %v18340_v0  ;;  %v1138_v0 = vld [vmem:[#allocation8 + $0xa70] sm:$0xff] }
 0x6d5   :  { %15134 = vmatpush2.bf16.msra.mxu1 %v18596_v30  ;;  %15144 = vmatprep.subr.bf16.mxu0 %v16791_v7 }
 0x6d6   :  { %15185 = vmatprep.subr.bf16.mxu1 %v17047_v10  ;;  %v16758_v10 = vcombine.low %v890_v60, %v898_v45  ;;  %v842_v45 = vld [vmem:[#allocation8 + $0x130] sm:$0xff] }
 0x6d7   :  { %v14850_v26 = vpop.f32.mrf.mxu0  ;;  %15095 = vmatmul.mubr.bf16.vlgmr.msra.gmra.mxu0 %v19376_v52 }
 0x6d8   :  { %v14851_v49 = vadd.f32 %v14850_v26, %v2899_v4  ;;  %v14891_v29 = vpop.f32.mrf.mxu1  ;;  %15136 = vmatmul.mubr.bf16.vlgmr.msra.gmra.mxu1 %v19378_v56  ;;  %15145 = vmatpush1.bf16.msra.mxu0 %v16790_v58  ;;  %v16999_v58 = vcombine.high %v1130_v9, %v1138_v0  ;;  %v16998_v26 = vcombine.low %v1130_v9, %v1138_v0  ;;  %v810_v0 = vld [vmem:[#allocation8 + $0x30] sm:$0xff] }
 0x6d9   :  { %15176 = vmatprep.mubr.bf16.mxu0 %v19293_v62  ;;  %15186 = vmatpush1.bf16.msra.mxu1 %v17046_v51  ;;  %v14852_v18 = vpop.f32.mrf.mxu0  ;;  %v1114_v51 = vld [vmem:[#allocation8 + $0x9b0] sm:$0xff] }
 0x6da   :  { %v19594_v21 = vadd.f32 %v14891_v29, %v14851_v49  ;;  %15217 = vmatprep.mubr.bf16.mxu1 %v19295_v63  ;;  %v14853_v57 = vadd.f32 %v14852_v18, %v2903_v46  ;;  %v14893_v23 = vpop.f32.mrf.mxu1  ;;  %15146 = vmatprep.subr.bf16.mxu0 %v16775_v31  ;;  %v1122_v46 = vld [vmem:[#allocation8 + $0x9f0] sm:$0xff]  ;;  %v16742_v31 = vcombine.low %v874_v12, %v882_v53 }
 0x6db   :  { %v14854_v39 = vpop.f32.mrf.mxu0  ;;  %15187 = vmatprep.subr.bf16.mxu1 %v17031_v22  ;;  %v16727_v22 = vcombine.high %v858_v37, %v866_v24  ;;  %v16983_v60 = vcombine.high %v1114_v51, %v1122_v46  ;;  %v850_v49 = vld [vmem:[#allocation8 + $0x170] sm:$0xff] }
 0x6dc   :  { %v19597_v30 = vadd.f32 %v14893_v23, %v14853_v57  ;;  %v14895_v7 = vpop.f32.mrf.mxu1  ;;  %15147 = vmatpush1.bf16.msra.mxu0 %v16774_v54  ;;  %v1098_v29 = vld [vmem:[#allocation8 + $0x930] sm:$0xff]  ;;  %v16982_v54 = vcombine.low %v1114_v51, %v1122_v46  ;;  %v16711_v18 = vcombine.high %v842_v45, %v850_v49  ;;  %v16710_v12 = vcombine.low %v842_v45, %v850_v49 }
 0x6dd   :  { %15188 = vmatpush1.bf16.msra.mxu1 %v17030_v32  ;;  %v14855_v55 = vpop.f32.mrf.mxu0  ;;  %15148 = vmatprep.subr.bf16.mxu0 %v16759_v11  ;;  %v16967_v32 = vcombine.high %v1098_v29, %v1106_v47  ;;  %v826_v11 = vld [vmem:[#allocation8 + $0xb0] sm:$0xff]  ;;  %v16966_v53 = vcombine.low %v1098_v29, %v1106_v47 }
 0x6de   :  { %v14896_v4 = vpop.f32.mrf.mxu1  ;;  %15189 = vmatprep.subr.bf16.mxu1 %v17015_v44  ;;  %v834_v57 = vld [vmem:[#allocation8 + $0xf0] sm:$0xff] }
 0x6df   :  { %v1082_v23 = vld [vmem:[#allocation8 + $0x8b0] sm:$0xff]  ;;  %v16695_v39 = vcombine.high %v826_v11, %v834_v57 }
 0x6e0   :  { %15149 = vmatpush1.bf16.msra.mxu0 %v16758_v10  ;;  %v1090_v44 = vld [vmem:[#allocation8 + $0x8f0] sm:$0xff] }
 0x6e1   :  { %15190 = vmatpush1.bf16.msra.mxu1 %v17014_v36  ;;  %15150 = vmatprep.subr.bf16.mxu0 %v16743_v28  ;;  %v16951_v9 = vcombine.high %v1082_v23, %v1090_v44  ;;  %v818_v7 = vld [vmem:[#allocation8 + $0x70] sm:$0xff]  ;;  %v16694_v36 = vcombine.low %v826_v11, %v834_v57  ;;  %v16950_v28 = vcombine.low %v1082_v23, %v1090_v44 }
 0x6e2   :  { %15191 = vmatprep.subr.bf16.mxu1 %v16999_v58  ;;  %v1066_v10 = vld [vmem:[#allocation8 + $0x830] sm:$0xff]  ;;  %v16679_v4 = vcombine.high %v810_v0, %v818_v7 }
 0x6e3   :  { %v1074_v55 = vld [vmem:[#allocation8 + $0x870] sm:$0xff] }
 0x6e4   :  { %15151 = vmatpush1.bf16.msra.mxu0 %v16742_v31  ;;  %v16935_v58 = vcombine.high %v1066_v10, %v1074_v55  ;;  %v1050_v37 = vld [vmem:[#allocation8 + $0x7b0] sm:$0xff]  ;;  %v16678_v31 = vcombine.low %v810_v0, %v818_v7 }
 0x6e5   :  { %15192 = vmatpush1.bf16.msra.mxu1 %v16998_v26  ;;  %15152 = vmatprep.subr.bf16.mxu0 %v16727_v22  ;;  %v1058_v24 = vld [vmem:[#allocation8 + $0x7f0] sm:$0xff]  ;;  %v16934_v26 = vcombine.low %v1066_v10, %v1074_v55 }
 0x6e6   :  { %15193 = vmatprep.subr.bf16.mxu1 %v16983_v60  ;;  %v1306_v51 = vld [vmem:[#allocation8 + $0xfb0] sm:$0xff]  ;;  %v16919_v22 = vcombine.high %v1050_v37, %v1058_v24 }
 0x6e7   :  { %v1314_v46 = vld [vmem:[#allocation8 + $0xff0] sm:$0xff] }
 0x6e8   :  { %15153 = vmatpush1.bf16.msra.mxu0 %v16726_v48  ;;  %v17175_v60 = vcombine.high %v1306_v51, %v1314_v46  ;;  %v1034_v45 = vld [vmem:[#allocation8 + $0x730] sm:$0xff]  ;;  %v16918_v48 = vcombine.low %v1050_v37, %v1058_v24 }
 0x6e9   :  { %15194 = vmatpush1.bf16.msra.mxu1 %v16982_v54  ;;  %15154 = vmatprep.subr.bf16.mxu0 %v16711_v18  ;;  %v1042_v49 = vld [vmem:[#allocation8 + $0x770] sm:$0xff]  ;;  %v17174_v54 = vcombine.low %v1306_v51, %v1314_v46 }
 0x6ea   :  { %15195 = vmatprep.subr.bf16.mxu1 %v16967_v32  ;;  %v1290_v29 = vld [vmem:[#allocation8 + $0xf30] sm:$0xff]  ;;  %v16903_v18 = vcombine.high %v1034_v45, %v1042_v49 }
 0x6eb   :  { %v1298_v47 = vld [vmem:[#allocation8 + $0xf70] sm:$0xff] }
 0x6ec   :  { %15155 = vmatpush1.bf16.msra.mxu0 %v16710_v12  ;;  %v17159_v32 = vcombine.high %v1290_v29, %v1298_v47  ;;  %v1018_v11 = vld [vmem:[#allocation8 + $0x6b0] sm:$0xff]  ;;  %v16902_v12 = vcombine.low %v1034_v45, %v1042_v49 }
 0x6ed   :  { %15196 = vmatpush1.bf16.msra.mxu1 %v16966_v53  ;;  %15156 = vmatprep.subr.bf16.mxu0 %v16695_v39  ;;  %v1026_v57 = vld [vmem:[#allocation8 + $0x6f0] sm:$0xff]  ;;  %v17158_v53 = vcombine.low %v1290_v29, %v1298_v47 }
 0x6ee   :  { %15197 = vmatprep.subr.bf16.mxu1 %v16951_v9  ;;  %v1274_v23 = vld [vmem:[#allocation8 + $0xeb0] sm:$0xff]  ;;  %v16887_v39 = vcombine.high %v1018_v11, %v1026_v57 }
 0x6ef   :  { %v1282_v44 = vld [vmem:[#allocation8 + $0xef0] sm:$0xff] }
 0x6f0   :  { %15157 = vmatpush1.bf16.msra.mxu0 %v16694_v36  ;;  %v17143_v9 = vcombine.high %v1274_v23, %v1282_v44  ;;  %v1002_v0 = vld [vmem:[#allocation8 + $0x630] sm:$0xff]  ;;  %v16886_v36 = vcombine.low %v1018_v11, %v1026_v57 }
 0x6f1   :  { %15198 = vmatpush1.bf16.msra.mxu1 %v16950_v28  ;;  %15158 = vmatprep.subr.bf16.mxu0 %v16679_v4  ;;  %v1010_v7 = vld [vmem:[#allocation8 + $0x670] sm:$0xff]  ;;  %v17142_v28 = vcombine.low %v1274_v23, %v1282_v44 }
 0x6f2   :  { %15199 = vmatprep.subr.bf16.mxu1 %v16935_v58  ;;  %v1258_v10 = vld [vmem:[#allocation8 + $0xe30] sm:$0xff]  ;;  %v16871_v4 = vcombine.high %v1002_v0, %v1010_v7 }
 0x6f3   :  { %v1266_v55 = vld [vmem:[#allocation8 + $0xe70] sm:$0xff] }
 0x6f4   :  { %15159 = vmatpush1.bf16.msra.mxu0 %v16678_v31  ;;  %v17127_v58 = vcombine.high %v1258_v10, %v1266_v55  ;;  %v986_v37 = vld [vmem:[#allocation8 + $0x5b0] sm:$0xff]  ;;  %v16870_v31 = vcombine.low %v1002_v0, %v1010_v7 }
 0x6f5   :  { %15200 = vmatpush1.bf16.msra.mxu1 %v16934_v26  ;;  %15160 = vmatprep.subr.bf16.mxu0 %v16919_v22  ;;  %v994_v24 = vld [vmem:[#allocation8 + $0x5f0] sm:$0xff]  ;;  %v17126_v26 = vcombine.low %v1258_v10, %v1266_v55 }
 0x6f6   :  { %15201 = vmatprep.subr.bf16.mxu1 %v17175_v60  ;;  %v1242_v51 = vld [vmem:[#allocation8 + $0xdb0] sm:$0xff]  ;;  %v16855_v22 = vcombine.high %v986_v37, %v994_v24 }
 0x6f7   :  { %v1250_v46 = vld [vmem:[#allocation8 + $0xdf0] sm:$0xff] }
 0x6f8   :  { %15161 = vmatpush2.bf16.msra.mxu0 %v16918_v48  ;;  %v17111_v60 = vcombine.high %v1242_v51, %v1250_v46  ;;  %v970_v45 = vld [vmem:[#allocation8 + $0x530] sm:$0xff]  ;;  %v16854_v48 = vcombine.low %v986_v37, %v994_v24 }
 0x6f9   :  { %15202 = vmatpush2.bf16.msra.mxu1 %v17174_v54  ;;  %15162 = vmatprep.subr.bf16.mxu0 %v16903_v18  ;;  %v978_v49 = vld [vmem:[#allocation8 + $0x570] sm:$0xff]  ;;  %v17110_v54 = vcombine.low %v1242_v51, %v1250_v46 }
 0x6fa   :  { %15203 = vmatprep.subr.bf16.mxu1 %v17159_v32  ;;  %v1226_v29 = vld [vmem:[#allocation8 + $0xd30] sm:$0xff]  ;;  %v16839_v18 = vcombine.high %v970_v45, %v978_v49 }
 0x6fb   :  { %v1234_v47 = vld [vmem:[#allocation8 + $0xd70] sm:$0xff] }
 0x6fc   :  { %15163 = vmatpush2.bf16.msra.mxu0 %v16902_v12  ;;  %v17095_v32 = vcombine.high %v1226_v29, %v1234_v47  ;;  %v954_v11 = vld [vmem:[#allocation8 + $0x4b0] sm:$0xff]  ;;  %v16838_v12 = vcombine.low %v970_v45, %v978_v49 }
 0x6fd   :  { %15204 = vmatpush2.bf16.msra.mxu1 %v17158_v53  ;;  %15164 = vmatprep.subr.bf16.mxu0 %v16887_v39  ;;  %v962_v57 = vld [vmem:[#allocation8 + $0x4f0] sm:$0xff]  ;;  %v17094_v53 = vcombine.low %v1226_v29, %v1234_v47 }
 0x6fe   :  { %15205 = vmatprep.subr.bf16.mxu1 %v17143_v9  ;;  %v1210_v23 = vld [vmem:[#allocation8 + $0xcb0] sm:$0xff]  ;;  %v16823_v39 = vcombine.high %v954_v11, %v962_v57 }
 0x6ff   :  { %v1218_v44 = vld [vmem:[#allocation8 + $0xcf0] sm:$0xff] }
 0x700   :  { %15165 = vmatpush2.bf16.msra.mxu0 %v16886_v36  ;;  %v17079_v9 = vcombine.high %v1210_v23, %v1218_v44  ;;  %v938_v0 = vld [vmem:[#allocation8 + $0x430] sm:$0xff]  ;;  %v16822_v36 = vcombine.low %v954_v11, %v962_v57 }
 0x701   :  { %15206 = vmatpush2.bf16.msra.mxu1 %v17142_v28  ;;  %15166 = vmatprep.subr.bf16.mxu0 %v16871_v4  ;;  %v946_v7 = vld [vmem:[#allocation8 + $0x470] sm:$0xff]  ;;  %v17078_v28 = vcombine.low %v1210_v23, %v1218_v44 }
 0x702   :  { %15207 = vmatprep.subr.bf16.mxu1 %v17127_v58  ;;  %v1194_v10 = vld [vmem:[#allocation8 + $0xc30] sm:$0xff]  ;;  %v16807_v4 = vcombine.high %v938_v0, %v946_v7 }
 0x703   :  { %v1202_v55 = vld [vmem:[#allocation8 + $0xc70] sm:$0xff] }
 0x704   :  { %15167 = vmatpush2.bf16.msra.mxu0 %v16870_v31  ;;  %v17063_v58 = vcombine.high %v1194_v10, %v1202_v55  ;;  %v1434_v37 = vld [vmem:[#allocation8 + $0x13b0] sm:$0xff]  ;;  %v16806_v31 = vcombine.low %v938_v0, %v946_v7 }
 0x705   :  { %15208 = vmatpush2.bf16.msra.mxu1 %v17126_v26  ;;  %15168 = vmatprep.subr.bf16.mxu0 %v16855_v22  ;;  %v1442_v24 = vld [vmem:[#allocation8 + $0x13f0] sm:$0xff]  ;;  %v17062_v26 = vcombine.low %v1194_v10, %v1202_v55 }
 0x706   :  { %15209 = vmatprep.subr.bf16.mxu1 %v17111_v60  ;;  %v1690_v51 = vld [vmem:[#allocation8 + $0x1bb0] sm:$0xff]  ;;  %v17303_v22 = vcombine.high %v1434_v37, %v1442_v24  ;;  %v17302_v29 = vcombine.low %v1434_v37, %v1442_v24 }
 0x707   :  { %v1698_v46 = vld [vmem:[#allocation8 + $0x1bf0] sm:$0xff] }
 0x708   :  { %15169 = vmatpush2.bf16.msra.mxu0 %v16854_v48  ;;  %v17559_v60 = vcombine.high %v1690_v51, %v1698_v46  ;;  %v1418_v45 = vld [vmem:[#allocation8 + $0x1330] sm:$0xff] }
 0x709   :  { %15210 = vmatpush2.bf16.msra.mxu1 %v17110_v54  ;;  %15170 = vmatprep.subr.bf16.mxu0 %v16839_v18  ;;  %v1426_v49 = vld [vmem:[#allocation8 + $0x1370] sm:$0xff]  ;;  %v17558_v54 = vcombine.low %v1690_v51, %v1698_v46 }
 0x70a   :  { %15211 = vmatprep.subr.bf16.mxu1 %v17095_v32  ;;  %v1674_v47 = vld [vmem:[#allocation8 + $0x1b30] sm:$0xff]  ;;  %v17287_v18 = vcombine.high %v1418_v45, %v1426_v49 }
 0x70b   :  { %v1682_v48 = vld [vmem:[#allocation8 + $0x1b70] sm:$0xff] }
 0x70c   :  { %15171 = vmatpush2.bf16.msra.mxu0 %v16838_v12  ;;  %v1402_v32 = vld [vmem:[#allocation8 + $0x12b0] sm:$0xff]  ;;  %v17543_v23 = vcombine.high %v1674_v47, %v1682_v48  ;;  %v17542_v7 = vcombine.low %v1674_v47, %v1682_v48 }
 0x70d   :  { %15212 = vmatpush2.bf16.msra.mxu1 %v17094_v53  ;;  %15172 = vmatprep.subr.bf16.mxu0 %v16823_v39  ;;  %v1410_v11 = vld [vmem:[#allocation8 + $0x12f0] sm:$0xff] }
 0x70e   :  { %15213 = vmatprep.subr.bf16.mxu1 %v17079_v9  ;;  %v1658_v44 = vld [vmem:[#allocation8 + $0x1ab0] sm:$0xff]  ;;  %v17286_v9 = vcombine.low %v1418_v45, %v1426_v49  ;;  %v17271_v10 = vcombine.high %v1402_v32, %v1410_v11 }
 0x70f   :  { %v1666_v12 = vld [vmem:[#allocation8 + $0x1af0] sm:$0xff] }
 0x710   :  { %15173 = vmatpush2.bf16.msra.mxu0 %v16822_v36  ;;  %v1642_v24 = vld [vmem:[#allocation8 + $0x1a30] sm:$0xff] }
 0x711   :  { %15214 = vmatpush2.bf16.msra.mxu1 %v17078_v28  ;;  %15174 = vmatprep.subr.bf16.mxu0 %v16807_v4  ;;  %v1386_v4 = vld [vmem:[#allocation8 + $0x1230] sm:$0xff] }
 0x712   :  { %15215 = vmatprep.subr.bf16.mxu1 %v17063_v58  ;;  %v1394_v58 = vld [vmem:[#allocation8 + $0x1270] sm:$0xff] }
 0x713   :  { %v1650_v51 = vld [vmem:[#allocation8 + $0x1a70] sm:$0xff]  ;;  %v17255_v45 = vcombine.high %v1386_v4, %v1394_v58 }
 0x714   :  { %15175 = vmatpush2.bf16.msra.mxu0 %v16806_v31  ;;  %v17511_v49 = vcombine.high %v1642_v24, %v1650_v51  ;;  %v1378_v47 = vld [vmem:[#allocation8 + $0x11f0] sm:$0xff] }
 0x715   :  { %15216 = vmatpush2.bf16.msra.mxu1 %v17062_v26  ;;  %15226 = vmatprep.subr.bf16.mxu0 %v17303_v22  ;;  %v17270_v26 = vcombine.low %v1402_v32, %v1410_v11  ;;  %v1626_v48 = vld [vmem:[#allocation8 + $0x19b0] sm:$0xff] }
 0x716   :  { %15267 = vmatprep.subr.bf16.mxu1 %v17559_v60  ;;  %v17526_v60 = vcombine.low %v1658_v44, %v1666_v12  ;;  %v1354_v11 = vld [vmem:[#allocation8 + $0x1130] sm:$0xff] }
 0x717   :  { %v14932_v57 = vpop.f32.mrf.mxu0  ;;  %15177 = vmatmul.mubr.bf16.vlgmr.msra.gmra.mxu0 %v19297_v2 }
 0x718   :  { %v14933_v53 = vadd.f32 %v14932_v57, %v19594_v21  ;;  %v14973_v39 = vpop.f32.mrf.mxu1  ;;  %15218 = vmatmul.mubr.bf16.vlgmr.msra.gmra.mxu1 %v19291_v59  ;;  %15227 = vmatpush1.bf16.msra.mxu0 %v17302_v29  ;;  %v17527_v21 = vcombine.high %v1658_v44, %v1666_v12  ;;  %v1370_v29 = vld [vmem:[#allocation8 + $0x11b0] sm:$0xff]  ;;  %v17510_v57 = vcombine.low %v1642_v24, %v1650_v51 }
 0x719   :  { %15258 = vmatprep.mubr.bf16.mxu0 %v19303_v13  ;;  %15268 = vmatpush1.bf16.msra.mxu1 %v17558_v54  ;;  %v14934_v0 = vpop.f32.mrf.mxu0  ;;  %v1634_v54 = vld [vmem:[#allocation8 + $0x19f0] sm:$0xff]  ;;  %v17238_v12 = vcombine.low %v1370_v29, %v1378_v47 }
 0x71a   :  { %v19603_v55 = vadd.f32 %v14973_v39, %v14933_v53  ;;  %15299 = vmatprep.mubr.bf16.mxu1 %v19305_v14  ;;  %v14935_v36 = vadd.f32 %v14934_v0, %v19597_v30  ;;  %v14975_v28 = vpop.f32.mrf.mxu1  ;;  %15228 = vmatprep.subr.bf16.mxu0 %v17287_v18  ;;  %v17254_v18 = vcombine.low %v1386_v4, %v1394_v58  ;;  %v1362_v53 = vld [vmem:[#allocation8 + $0x1170] sm:$0xff] }
 0x71b   :  { %v14936_v37 = vpop.f32.mrf.mxu0  ;;  %15269 = vmatprep.subr.bf16.mxu1 %v17543_v23  ;;  %v17239_v23 = vcombine.high %v1370_v29, %v1378_v47  ;;  %v17495_v32 = vcombine.high %v1626_v48, %v1634_v54  ;;  %v1610_v39 = vld [vmem:[#allocation8 + $0x1930] sm:$0xff]  ;;  %v17223_v0 = vcombine.high %v1354_v11, %v1362_v53  ;;  %v17222_v4 = vcombine.low %v1354_v11, %v1362_v53 }
 0x71c   :  { %v19607_v46 = vadd.f32 %v14975_v28, %v14935_v36  ;;  %v14977_v31 = vpop.f32.mrf.mxu1  ;;  %15229 = vmatpush1.bf16.msra.mxu0 %v17286_v9  ;;  %v1618_v44 = vld [vmem:[#allocation8 + $0x1970] sm:$0xff]  ;;  %v17494_v9 = vcombine.low %v1626_v48, %v1634_v54 }
 0x71d   :  { %15270 = vmatpush1.bf16.msra.mxu1 %v17542_v7  ;;  %v14937_v22 = vpop.f32.mrf.mxu0  ;;  %15230 = vmatprep.subr.bf16.mxu0 %v17271_v10  ;;  %v17479_v7 = vcombine.high %v1610_v39, %v1618_v44  ;;  %v1338_v10 = vld [vmem:[#allocation8 + $0x10b0] sm:$0xff]  ;;  %v17478_v58 = vcombine.low %v1610_v39, %v1618_v44 }
 0x71e   :  { %v14978_v30 = vpop.f32.mrf.mxu1  ;;  %15271 = vmatprep.subr.bf16.mxu1 %v17527_v21  ;;  %v1346_v36 = vld [vmem:[#allocation8 + $0x10f0] sm:$0xff] }
 0x71f   :  { %v1594_v28 = vld [vmem:[#allocation8 + $0x18b0] sm:$0xff]  ;;  %v17207_v37 = vcombine.high %v1338_v10, %v1346_v36 }
 0x720   :  { %15231 = vmatpush1.bf16.msra.mxu0 %v17270_v26  ;;  %v1602_v21 = vld [vmem:[#allocation8 + $0x18f0] sm:$0xff] }
 0x721   :  { %15272 = vmatpush1.bf16.msra.mxu1 %v17526_v60  ;;  %15232 = vmatprep.subr.bf16.mxu0 %v17255_v45  ;;  %v17463_v24 = vcombine.high %v1594_v28, %v1602_v21  ;;  %v1322_v51 = vld [vmem:[#allocation8 + $0x1030] sm:$0xff]  ;;  %v17206_v60 = vcombine.low %v1338_v10, %v1346_v36  ;;  %v17462_v45 = vcombine.low %v1594_v28, %v1602_v21 }
 0x722   :  { %15273 = vmatprep.subr.bf16.mxu1 %v17511_v49  ;;  %v1330_v31 = vld [vmem:[#allocation8 + $0x1070] sm:$0xff] }
 0x723   :  { %v1578_v26 = vld [vmem:[#allocation8 + $0x1830] sm:$0xff]  ;;  %v17191_v30 = vcombine.high %v1322_v51, %v1330_v31 }
 0x724   :  { %15233 = vmatpush1.bf16.msra.mxu0 %v17254_v18  ;;  %v1586_v22 = vld [vmem:[#allocation8 + $0x1870] sm:$0xff]  ;;  %v17190_v18 = vcombine.low %v1322_v51, %v1330_v31 }
 0x725   :  { %15274 = vmatpush1.bf16.msra.mxu1 %v17510_v57  ;;  %15234 = vmatprep.subr.bf16.mxu0 %v17239_v23  ;;  %v17447_v49 = vcombine.high %v1578_v26, %v1586_v22  ;;  %v1562_v29 = vld [vmem:[#allocation8 + $0x17b0] sm:$0xff]  ;;  %v17446_v57 = vcombine.low %v1578_v26, %v1586_v22 }
 0x726   :  { %15275 = vmatprep.subr.bf16.mxu1 %v17495_v32  ;;  %v1570_v47 = vld [vmem:[#allocation8 + $0x17f0] sm:$0xff] }
 0x727   :  { %v1818_v48 = vld [vmem:[#allocation8 + $0x1fb0] sm:$0xff]  ;;  %v17431_v23 = vcombine.high %v1562_v29, %v1570_v47 }
 0x728   :  { %15235 = vmatpush1.bf16.msra.mxu0 %v17238_v12  ;;  %v1826_v54 = vld [vmem:[#allocation8 + $0x1ff0] sm:$0xff]  ;;  %v17430_v12 = vcombine.low %v1562_v29, %v1570_v47 }
 0x729   :  { %15276 = vmatpush1.bf16.msra.mxu1 %v17494_v9  ;;  %15236 = vmatprep.subr.bf16.mxu0 %v17223_v0  ;;  %v17687_v32 = vcombine.high %v1818_v48, %v1826_v54  ;;  %v1546_v11 = vld [vmem:[#allocation8 + $0x1730] sm:$0xff]  ;;  %v17686_v9 = vcombine.low %v1818_v48, %v1826_v54 }
 0x72a   :  { %15277 = vmatprep.subr.bf16.mxu1 %v17479_v7  ;;  %v1554_v53 = vld [vmem:[#allocation8 + $0x1770] sm:$0xff] }
 0x72b   :  { %v1802_v39 = vld [vmem:[#allocation8 + $0x1f30] sm:$0xff]  ;;  %v17415_v0 = vcombine.high %v1546_v11, %v1554_v53 }
 0x72c   :  { %15237 = vmatpush1.bf16.msra.mxu0 %v17222_v4  ;;  %v1810_v44 = vld [vmem:[#allocation8 + $0x1f70] sm:$0xff]  ;;  %v17414_v4 = vcombine.low %v1546_v11, %v1554_v53 }
 0x72d   :  { %15278 = vmatpush1.bf16.msra.mxu1 %v17478_v58  ;;  %15238 = vmatprep.subr.bf16.mxu0 %v17207_v37  ;;  %v17671_v7 = vcombine.high %v1802_v39, %v1810_v44  ;;  %v1530_v10 = vld [vmem:[#allocation8 + $0x16b0] sm:$0xff]  ;;  %v17670_v58 = vcombine.low %v1802_v39, %v1810_v44 }
 0x72e   :  { %15279 = vmatprep.subr.bf16.mxu1 %v17463_v24  ;;  %v1538_v36 = vld [vmem:[#allocation8 + $0x16f0] sm:$0xff] }
 0x72f   :  { %v1786_v28 = vld [vmem:[#allocation8 + $0x1eb0] sm:$0xff]  ;;  %v17399_v37 = vcombine.high %v1530_v10, %v1538_v36 }
 0x730   :  { %15239 = vmatpush1.bf16.msra.mxu0 %v17206_v60  ;;  %v1794_v21 = vld [vmem:[#allocation8 + $0x1ef0] sm:$0xff]  ;;  %v17398_v60 = vcombine.low %v1530_v10, %v1538_v36 }
 0x731   :  { %15280 = vmatpush1.bf16.msra.mxu1 %v17462_v45  ;;  %15240 = vmatprep.subr.bf16.mxu0 %v17191_v30  ;;  %v17655_v24 = vcombine.high %v1786_v28, %v1794_v21  ;;  %v1514_v51 = vld [vmem:[#allocation8 + $0x1630] sm:$0xff]  ;;  %v17654_v45 = vcombine.low %v1786_v28, %v1794_v21 }
 0x732   :  { %15281 = vmatprep.subr.bf16.mxu1 %v17447_v49  ;;  %v1522_v31 = vld [vmem:[#allocation8 + $0x1670] sm:$0xff] }
 0x733   :  { %v1770_v26 = vld [vmem:[#allocation8 + $0x1e30] sm:$0xff]  ;;  %v17383_v30 = vcombine.high %v1514_v51, %v1522_v31 }
 0x734   :  { %15241 = vmatpush1.bf16.msra.mxu0 %v17190_v18  ;;  %v1778_v22 = vld [vmem:[#allocation8 + $0x1e70] sm:$0xff]  ;;  %v17382_v18 = vcombine.low %v1514_v51, %v1522_v31 }
 0x735   :  { %15282 = vmatpush1.bf16.msra.mxu1 %v17446_v57  ;;  %15242 = vmatprep.subr.bf16.mxu0 %v17431_v23  ;;  %v17639_v49 = vcombine.high %v1770_v26, %v1778_v22  ;;  %v1498_v29 = vld [vmem:[#allocation8 + $0x15b0] sm:$0xff]  ;;  %v17638_v57 = vcombine.low %v1770_v26, %v1778_v22 }
 0x736   :  { %15283 = vmatprep.subr.bf16.mxu1 %v17687_v32  ;;  %v1506_v47 = vld [vmem:[#allocation8 + $0x15f0] sm:$0xff] }
 0x737   :  { %v1754_v48 = vld [vmem:[#allocation8 + $0x1db0] sm:$0xff]  ;;  %v17367_v23 = vcombine.high %v1498_v29, %v1506_v47 }
 0x738   :  { %15243 = vmatpush2.bf16.msra.mxu0 %v17430_v12  ;;  %v1762_v54 = vld [vmem:[#allocation8 + $0x1df0] sm:$0xff]  ;;  %v17366_v12 = vcombine.low %v1498_v29, %v1506_v47 }
 0x739   :  { %15284 = vmatpush2.bf16.msra.mxu1 %v17686_v9  ;;  %15244 = vmatprep.subr.bf16.mxu0 %v17415_v0  ;;  %v17623_v32 = vcombine.high %v1754_v48, %v1762_v54  ;;  %v1482_v11 = vld [vmem:[#allocation8 + $0x1530] sm:$0xff]  ;;  %v17622_v9 = vcombine.low %v1754_v48, %v1762_v54 }
 0x73a   :  { %15285 = vmatprep.subr.bf16.mxu1 %v17671_v7  ;;  %v1490_v53 = vld [vmem:[#allocation8 + $0x1570] sm:$0xff] }
 0x73b   :  { %v1738_v39 = vld [vmem:[#allocation8 + $0x1d30] sm:$0xff]  ;;  %v17351_v0 = vcombine.high %v1482_v11, %v1490_v53 }
 0x73c   :  { %15245 = vmatpush2.bf16.msra.mxu0 %v17414_v4  ;;  %v1746_v44 = vld [vmem:[#allocation8 + $0x1d70] sm:$0xff]  ;;  %v17350_v4 = vcombine.low %v1482_v11, %v1490_v53 }
 0x73d   :  { %15286 = vmatpush2.bf16.msra.mxu1 %v17670_v58  ;;  %15246 = vmatprep.subr.bf16.mxu0 %v17399_v37  ;;  %v17607_v7 = vcombine.high %v1738_v39, %v1746_v44  ;;  %v1466_v10 = vld [vmem:[#allocation8 + $0x14b0] sm:$0xff]  ;;  %v17606_v58 = vcombine.low %v1738_v39, %v1746_v44 }
 0x73e   :  { %15287 = vmatprep.subr.bf16.mxu1 %v17655_v24  ;;  %v1474_v36 = vld [vmem:[#allocation8 + $0x14f0] sm:$0xff] }
 0x73f   :  { %v1722_v28 = vld [vmem:[#allocation8 + $0x1cb0] sm:$0xff]  ;;  %v17335_v37 = vcombine.high %v1466_v10, %v1474_v36 }
 0x740   :  { %15247 = vmatpush2.bf16.msra.mxu0 %v17398_v60  ;;  %v1730_v21 = vld [vmem:[#allocation8 + $0x1cf0] sm:$0xff]  ;;  %v17334_v60 = vcombine.low %v1466_v10, %v1474_v36 }
 0x741   :  { %15288 = vmatpush2.bf16.msra.mxu1 %v17654_v45  ;;  %15248 = vmatprep.subr.bf16.mxu0 %v17383_v30  ;;  %v17591_v24 = vcombine.high %v1722_v28, %v1730_v21  ;;  %v1450_v51 = vld [vmem:[#allocation8 + $0x1430] sm:$0xff]  ;;  %v17590_v45 = vcombine.low %v1722_v28, %v1730_v21 }
 0x742   :  { %15289 = vmatprep.subr.bf16.mxu1 %v17639_v49  ;;  %v1458_v31 = vld [vmem:[#allocation8 + $0x1470] sm:$0xff] }
 0x743   :  { %v1706_v26 = vld [vmem:[#allocation8 + $0x1c30] sm:$0xff]  ;;  %v17319_v30 = vcombine.high %v1450_v51, %v1458_v31 }
 0x744   :  { %15249 = vmatpush2.bf16.msra.mxu0 %v17382_v18  ;;  %v1714_v22 = vld [vmem:[#allocation8 + $0x1c70] sm:$0xff]  ;;  %v17318_v18 = vcombine.low %v1450_v51, %v1458_v31 }
 0x745   :  { %15290 = vmatpush2.bf16.msra.mxu1 %v17638_v57  ;;  %15250 = vmatprep.subr.bf16.mxu0 %v17367_v23  ;;  %v17575_v49 = vcombine.high %v1706_v26, %v1714_v22  ;;  %v1946_v29 = vld [vmem:[#allocation8 + $0x23b0] sm:$0xff]  ;;  %v17574_v57 = vcombine.low %v1706_v26, %v1714_v22 }
 0x746   :  { %15291 = vmatprep.subr.bf16.mxu1 %v17623_v32  ;;  %v1954_v47 = vld [vmem:[#allocation8 + $0x23f0] sm:$0xff] }
 0x747   :  { %v2202_v48 = vld [vmem:[#allocation8 + $0x2bb0] sm:$0xff]  ;;  %v17815_v23 = vcombine.high %v1946_v29, %v1954_v47  ;;  %v17814_v39 = vcombine.low %v1946_v29, %v1954_v47 }
 0x748   :  { %15251 = vmatpush2.bf16.msra.mxu0 %v17366_v12  ;;  %v2210_v54 = vld [vmem:[#allocation8 + $0x2bf0] sm:$0xff] }
 0x749   :  { %15292 = vmatpush2.bf16.msra.mxu1 %v17622_v9  ;;  %15252 = vmatprep.subr.bf16.mxu0 %v17351_v0  ;;  %v18071_v32 = vcombine.high %v2202_v48, %v2210_v54  ;;  %v1930_v11 = vld [vmem:[#allocation8 + $0x2330] sm:$0xff]  ;;  %v18070_v9 = vcombine.low %v2202_v48, %v2210_v54 }
 0x74a   :  { %15293 = vmatprep.subr.bf16.mxu1 %v17607_v7  ;;  %v1938_v53 = vld [vmem:[#allocation8 + $0x2370] sm:$0xff] }
 0x74b   :  { %v2186_v44 = vld [vmem:[#allocation8 + $0x2b30] sm:$0xff]  ;;  %v17799_v0 = vcombine.high %v1930_v11, %v1938_v53 }
 0x74c   :  { %15253 = vmatpush2.bf16.msra.mxu0 %v17350_v4  ;;  %v2194_v12 = vld [vmem:[#allocation8 + $0x2b70] sm:$0xff] }
 0x74d   :  { %15294 = vmatpush2.bf16.msra.mxu1 %v17606_v58  ;;  %15254 = vmatprep.subr.bf16.mxu0 %v17335_v37  ;;  %v1914_v7 = vld [vmem:[#allocation8 + $0x22b0] sm:$0xff]  ;;  %v18055_v28 = vcombine.high %v2186_v44, %v2194_v12  ;;  %v18054_v31 = vcombine.low %v2186_v44, %v2194_v12 }
 0x74e   :  { %15295 = vmatprep.subr.bf16.mxu1 %v17591_v24  ;;  %v1922_v10 = vld [vmem:[#allocation8 + $0x22f0] sm:$0xff]  ;;  %v17798_v24 = vcombine.low %v1930_v11, %v1938_v53 }
 0x74f   :  { %v2170_v21 = vld [vmem:[#allocation8 + $0x2ab0] sm:$0xff]  ;;  %v17783_v26 = vcombine.high %v1914_v7, %v1922_v10 }
 0x750   :  { %15255 = vmatpush2.bf16.msra.mxu0 %v17334_v60  ;;  %v2178_v4 = vld [vmem:[#allocation8 + $0x2af0] sm:$0xff] }
 0x751   :  { %15296 = vmatpush2.bf16.msra.mxu1 %v17590_v45  ;;  %15256 = vmatprep.subr.bf16.mxu0 %v17319_v30  ;;  %v1898_v30 = vld [vmem:[#allocation8 + $0x2230] sm:$0xff] }
 0x752   :  { %15297 = vmatprep.subr.bf16.mxu1 %v17575_v49  ;;  %v1906_v49 = vld [vmem:[#allocation8 + $0x2270] sm:$0xff] }
 0x753   :  { %v2154_v47 = vld [vmem:[#allocation8 + $0x2a30] sm:$0xff]  ;;  %v17767_v11 = vcombine.high %v1898_v30, %v1906_v49 }
 0x754   :  { %15257 = vmatpush2.bf16.msra.mxu0 %v17318_v18  ;;  %v2162_v48 = vld [vmem:[#allocation8 + $0x2a70] sm:$0xff] }
 0x755   :  { %15298 = vmatpush2.bf16.msra.mxu1 %v17574_v57  ;;  %15308 = vmatprep.subr.bf16.mxu0 %v17815_v23  ;;  %v17782_v57 = vcombine.low %v1914_v7, %v1922_v10  ;;  %v18023_v53 = vcombine.high %v2154_v47, %v2162_v48  ;;  %v1890_v44 = vld [vmem:[#allocation8 + $0x21f0] sm:$0xff] }
 0x756   :  { %15349 = vmatprep.subr.bf16.mxu1 %v18071_v32  ;;  %v18038_v32 = vcombine.low %v2170_v21, %v2178_v4  ;;  %v2138_v12 = vld [vmem:[#allocation8 + $0x29b0] sm:$0xff] }
 0x757   :  { %v15014_v36 = vpop.f32.mrf.mxu0  ;;  %15259 = vmatmul.mubr.bf16.vlgmr.msra.gmra.mxu0 %v19333_v6  ;;  %v1866_v10 = vld [vmem:[#allocation8 + $0x2130] sm:$0xff] }
 0x758   :  { %v15015_v58 = vadd.f32 %v15014_v36, %v19603_v55  ;;  %v15055_v37 = vpop.f32.mrf.mxu1  ;;  %15300 = vmatmul.mubr.bf16.vlgmr.msra.gmra.mxu1 %v19331_v1  ;;  %15309 = vmatpush1.bf16.msra.mxu0 %v17814_v39  ;;  %v18039_v55 = vcombine.high %v2170_v21, %v2178_v4  ;;  %v1882_v39 = vld [vmem:[#allocation8 + $0x21b0] sm:$0xff]  ;;  %v18022_v36 = vcombine.low %v2154_v47, %v2162_v48 }
 0x759   :  { %15340 = vmatprep.mubr.bf16.mxu0 %v19335_v19  ;;  %15350 = vmatpush1.bf16.msra.mxu1 %v18070_v9  ;;  %v15016_v51 = vpop.f32.mrf.mxu0  ;;  %v2146_v9 = vld [vmem:[#allocation8 + $0x29f0] sm:$0xff]  ;;  %v17750_v4 = vcombine.low %v1882_v39, %v1890_v44 }
 0x75a   :  { %v19613_v22 = vadd.f32 %v15055_v37, %v15015_v58  ;;  %15381 = vmatprep.mubr.bf16.mxu1 %v19337_v20  ;;  %v15017_v60 = vadd.f32 %v15016_v51, %v19607_v46  ;;  %v15057_v45 = vpop.f32.mrf.mxu1  ;;  %15310 = vmatprep.subr.bf16.mxu0 %v17799_v0  ;;  %v17766_v0 = vcombine.low %v1898_v30, %v1906_v49  ;;  %v1874_v58 = vld [vmem:[#allocation8 + $0x2170] sm:$0xff] }
 0x75b   :  { %v15018_v29 = vpop.f32.mrf.mxu0  ;;  %15351 = vmatprep.subr.bf16.mxu1 %v18055_v28  ;;  %v17751_v28 = vcombine.high %v1882_v39, %v1890_v44  ;;  %v18007_v7 = vcombine.high %v2138_v12, %v2146_v9  ;;  %v2122_v37 = vld [vmem:[#allocation8 + $0x2930] sm:$0xff]  ;;  %v17735_v51 = vcombine.high %v1866_v10, %v1874_v58  ;;  %v17734_v30 = vcombine.low %v1866_v10, %v1874_v58 }
 0x75c   :  { %v19617_v54 = vadd.f32 %v15057_v45, %v15017_v60  ;;  %v15059_v18 = vpop.f32.mrf.mxu1  ;;  %15311 = vmatpush1.bf16.msra.mxu0 %v17798_v24  ;;  %v2130_v21 = vld [vmem:[#allocation8 + $0x2970] sm:$0xff]  ;;  %v18006_v24 = vcombine.low %v2138_v12, %v2146_v9 }
 0x75d   :  { %15352 = vmatpush1.bf16.msra.mxu1 %v18054_v31  ;;  %v15019_v23 = vpop.f32.mrf.mxu0  ;;  %15312 = vmatprep.subr.bf16.mxu0 %v17783_v26  ;;  %v17991_v31 = vcombine.high %v2122_v37, %v2130_v21  ;;  %v1850_v26 = vld [vmem:[#allocation8 + $0x20b0] sm:$0xff]  ;;  %v17990_v49 = vcombine.low %v2122_v37, %v2130_v21 }
 0x75e   :  { %v15060_v46 = vpop.f32.mrf.mxu1  ;;  %15353 = vmatprep.subr.bf16.mxu1 %v18039_v55  ;;  %v1858_v60 = vld [vmem:[#allocation8 + $0x20f0] sm:$0xff] }
 0x75f   :  { %v2106_v45 = vld [vmem:[#allocation8 + $0x28b0] sm:$0xff]  ;;  %v17719_v29 = vcombine.high %v1850_v26, %v1858_v60 }
 0x760   :  { %15313 = vmatpush1.bf16.msra.mxu0 %v17782_v57  ;;  %v2114_v55 = vld [vmem:[#allocation8 + $0x28f0] sm:$0xff] }
 0x761   :  { %15354 = vmatpush1.bf16.msra.mxu1 %v18038_v32  ;;  %15314 = vmatprep.subr.bf16.mxu0 %v17767_v11  ;;  %v17975_v47 = vcombine.high %v2106_v45, %v2114_v55  ;;  %v1834_v48 = vld [vmem:[#allocation8 + $0x2030] sm:$0xff]  ;;  %v17718_v32 = vcombine.low %v1850_v26, %v1858_v60  ;;  %v17974_v11 = vcombine.low %v2106_v45, %v2114_v55 }
 0x762   :  { %15355 = vmatprep.subr.bf16.mxu1 %v18023_v53  ;;  %v1842_v18 = vld [vmem:[#allocation8 + $0x2070] sm:$0xff] }
 0x763   :  { %v2090_v57 = vld [vmem:[#allocation8 + $0x2830] sm:$0xff]  ;;  %v17703_v46 = vcombine.high %v1834_v48, %v1842_v18 }
 0x764   :  { %15315 = vmatpush1.bf16.msra.mxu0 %v17766_v0  ;;  %v2098_v23 = vld [vmem:[#allocation8 + $0x2870] sm:$0xff]  ;;  %v17702_v0 = vcombine.low %v1834_v48, %v1842_v18 }
 0x765   :  { %15356 = vmatpush1.bf16.msra.mxu1 %v18022_v36  ;;  %15316 = vmatprep.subr.bf16.mxu0 %v17751_v28  ;;  %v17959_v53 = vcombine.high %v2090_v57, %v2098_v23  ;;  %v2074_v39 = vld [vmem:[#allocation8 + $0x27b0] sm:$0xff]  ;;  %v17958_v36 = vcombine.low %v2090_v57, %v2098_v23 }
 0x766   :  { %15357 = vmatprep.subr.bf16.mxu1 %v18007_v7  ;;  %v2082_v44 = vld [vmem:[#allocation8 + $0x27f0] sm:$0xff] }
 0x767   :  { %v2330_v12 = vld [vmem:[#allocation8 + $0x2fb0] sm:$0xff]  ;;  %v17943_v28 = vcombine.high %v2074_v39, %v2082_v44 }
 0x768   :  { %15317 = vmatpush1.bf16.msra.mxu0 %v17750_v4  ;;  %v2338_v9 = vld [vmem:[#allocation8 + $0x2ff0] sm:$0xff]  ;;  %v17942_v4 = vcombine.low %v2074_v39, %v2082_v44 }
 0x769   :  { %15358 = vmatpush1.bf16.msra.mxu1 %v18006_v24  ;;  %15318 = vmatprep.subr.bf16.mxu0 %v17735_v51  ;;  %v18199_v7 = vcombine.high %v2330_v12, %v2338_v9  ;;  %v2058_v10 = vld [vmem:[#allocation8 + $0x2730] sm:$0xff]  ;;  %v18198_v24 = vcombine.low %v2330_v12, %v2338_v9 }
 0x76a   :  { %15359 = vmatprep.subr.bf16.mxu1 %v17991_v31  ;;  %v2066_v58 = vld [vmem:[#allocation8 + $0x2770] sm:$0xff] }
 0x76b   :  { %v2314_v37 = vld [vmem:[#allocation8 + $0x2f30] sm:$0xff]  ;;  %v17927_v51 = vcombine.high %v2058_v10, %v2066_v58 }
 0x76c   :  { %15319 = vmatpush1.bf16.msra.mxu0 %v17734_v30  ;;  %v2322_v21 = vld [vmem:[#allocation8 + $0x2f70] sm:$0xff]  ;;  %v17926_v30 = vcombine.low %v2058_v10, %v2066_v58 }
 0x76d   :  { %15360 = vmatpush1.bf16.msra.mxu1 %v17990_v49  ;;  %15320 = vmatprep.subr.bf16.mxu0 %v17719_v29  ;;  %v18183_v31 = vcombine.high %v2314_v37, %v2322_v21  ;;  %v2042_v26 = vld [vmem:[#allocation8 + $0x26b0] sm:$0xff]  ;;  %v18182_v49 = vcombine.low %v2314_v37, %v2322_v21 }
 0x76e   :  { %15361 = vmatprep.subr.bf16.mxu1 %v17975_v47  ;;  %v2050_v60 = vld [vmem:[#allocation8 + $0x26f0] sm:$0xff] }
 0x76f   :  { %v2298_v45 = vld [vmem:[#allocation8 + $0x2eb0] sm:$0xff]  ;;  %v17911_v29 = vcombine.high %v2042_v26, %v2050_v60 }
 0x770   :  { %15321 = vmatpush1.bf16.msra.mxu0 %v17718_v32  ;;  %v2306_v55 = vld [vmem:[#allocation8 + $0x2ef0] sm:$0xff]  ;;  %v17910_v32 = vcombine.low %v2042_v26, %v2050_v60 }
 0x771   :  { %15362 = vmatpush1.bf16.msra.mxu1 %v17974_v11  ;;  %15322 = vmatprep.subr.bf16.mxu0 %v17703_v46  ;;  %v18167_v47 = vcombine.high %v2298_v45, %v2306_v55  ;;  %v2026_v48 = vld [vmem:[#allocation8 + $0x2630] sm:$0xff]  ;;  %v18166_v11 = vcombine.low %v2298_v45, %v2306_v55 }
 0x772   :  { %15363 = vmatprep.subr.bf16.mxu1 %v17959_v53  ;;  %v2034_v18 = vld [vmem:[#allocation8 + $0x2670] sm:$0xff] }
 0x773   :  { %v2282_v57 = vld [vmem:[#allocation8 + $0x2e30] sm:$0xff]  ;;  %v17895_v46 = vcombine.high %v2026_v48, %v2034_v18 }
 0x774   :  { %15323 = vmatpush1.bf16.msra.mxu0 %v17702_v0  ;;  %v2290_v23 = vld [vmem:[#allocation8 + $0x2e70] sm:$0xff]  ;;  %v17894_v0 = vcombine.low %v2026_v48, %v2034_v18 }
 0x775   :  { %15364 = vmatpush1.bf16.msra.mxu1 %v17958_v36  ;;  %15324 = vmatprep.subr.bf16.mxu0 %v17943_v28  ;;  %v18151_v53 = vcombine.high %v2282_v57, %v2290_v23  ;;  %v2010_v39 = vld [vmem:[#allocation8 + $0x25b0] sm:$0xff]  ;;  %v18150_v36 = vcombine.low %v2282_v57, %v2290_v23 }
 0x776   :  { %15365 = vmatprep.subr.bf16.mxu1 %v18199_v7  ;;  %v2018_v44 = vld [vmem:[#allocation8 + $0x25f0] sm:$0xff] }
 0x777   :  { %v2266_v12 = vld [vmem:[#allocation8 + $0x2db0] sm:$0xff]  ;;  %v17879_v28 = vcombine.high %v2010_v39, %v2018_v44 }
 0x778   :  { %15325 = vmatpush2.bf16.msra.mxu0 %v17942_v4  ;;  %v2274_v9 = vld [vmem:[#allocation8 + $0x2df0] sm:$0xff]  ;;  %v17878_v4 = vcombine.low %v2010_v39, %v2018_v44 }
 0x779   :  { %15366 = vmatpush2.bf16.msra.mxu1 %v18198_v24  ;;  %15326 = vmatprep.subr.bf16.mxu0 %v17927_v51  ;;  %v18135_v7 = vcombine.high %v2266_v12, %v2274_v9  ;;  %v1994_v10 = vld [vmem:[#allocation8 + $0x2530] sm:$0xff]  ;;  %v18134_v24 = vcombine.low %v2266_v12, %v2274_v9 }
 0x77a   :  { %15367 = vmatprep.subr.bf16.mxu1 %v18183_v31  ;;  %v2002_v58 = vld [vmem:[#allocation8 + $0x2570] sm:$0xff] }
 0x77b   :  { %v2250_v37 = vld [vmem:[#allocation8 + $0x2d30] sm:$0xff]  ;;  %v17863_v51 = vcombine.high %v1994_v10, %v2002_v58 }
 0x77c   :  { %15327 = vmatpush2.bf16.msra.mxu0 %v17926_v30  ;;  %v2258_v21 = vld [vmem:[#allocation8 + $0x2d70] sm:$0xff]  ;;  %v17862_v30 = vcombine.low %v1994_v10, %v2002_v58 }
 0x77d   :  { %15368 = vmatpush2.bf16.msra.mxu1 %v18182_v49  ;;  %15328 = vmatprep.subr.bf16.mxu0 %v17911_v29  ;;  %v18119_v31 = vcombine.high %v2250_v37, %v2258_v21  ;;  %v1978_v26 = vld [vmem:[#allocation8 + $0x24b0] sm:$0xff]  ;;  %v18118_v49 = vcombine.low %v2250_v37, %v2258_v21 }
 0x77e   :  { %15369 = vmatprep.subr.bf16.mxu1 %v18167_v47  ;;  %v1986_v60 = vld [vmem:[#allocation8 + $0x24f0] sm:$0xff] }
 0x77f   :  { %v2234_v45 = vld [vmem:[#allocation8 + $0x2cb0] sm:$0xff]  ;;  %v17847_v29 = vcombine.high %v1978_v26, %v1986_v60 }
 0x780   :  { %15329 = vmatpush2.bf16.msra.mxu0 %v17910_v32  ;;  %v2242_v55 = vld [vmem:[#allocation8 + $0x2cf0] sm:$0xff]  ;;  %v17846_v32 = vcombine.low %v1978_v26, %v1986_v60 }
 0x781   :  { %15370 = vmatpush2.bf16.msra.mxu1 %v18166_v11  ;;  %15330 = vmatprep.subr.bf16.mxu0 %v17895_v46  ;;  %v18103_v47 = vcombine.high %v2234_v45, %v2242_v55  ;;  %v1962_v48 = vld [vmem:[#allocation8 + $0x2430] sm:$0xff]  ;;  %v18102_v11 = vcombine.low %v2234_v45, %v2242_v55 }
 0x782   :  { %15371 = vmatprep.subr.bf16.mxu1 %v18151_v53  ;;  %v1970_v18 = vld [vmem:[#allocation8 + $0x2470] sm:$0xff] }
 0x783   :  { %v2218_v57 = vld [vmem:[#allocation8 + $0x2c30] sm:$0xff]  ;;  %v17831_v46 = vcombine.high %v1962_v48, %v1970_v18 }
 0x784   :  { %15331 = vmatpush2.bf16.msra.mxu0 %v17894_v0  ;;  %v2226_v23 = vld [vmem:[#allocation8 + $0x2c70] sm:$0xff]  ;;  %v17830_v0 = vcombine.low %v1962_v48, %v1970_v18 }
 0x785   :  { %15372 = vmatpush2.bf16.msra.mxu1 %v18150_v36  ;;  %15332 = vmatprep.subr.bf16.mxu0 %v17879_v28  ;;  %v18087_v53 = vcombine.high %v2218_v57, %v2226_v23  ;;  %v2458_v39 = vld [vmem:[#allocation8 + $0x33b0] sm:$0xff]  ;;  %v18086_v36 = vcombine.low %v2218_v57, %v2226_v23 }
 0x786   :  { %15373 = vmatprep.subr.bf16.mxu1 %v18135_v7  ;;  %v2466_v44 = vld [vmem:[#allocation8 + $0x33f0] sm:$0xff] }
 0x787   :  { %v2714_v12 = vld [vmem:[#allocation8 + $0x3bb0] sm:$0xff]  ;;  %v18327_v28 = vcombine.high %v2458_v39, %v2466_v44  ;;  %v18326_v37 = vcombine.low %v2458_v39, %v2466_v44 }
 0x788   :  { %15333 = vmatpush2.bf16.msra.mxu0 %v17878_v4  ;;  %v2722_v9 = vld [vmem:[#allocation8 + $0x3bf0] sm:$0xff] }
 0x789   :  { %15374 = vmatpush2.bf16.msra.mxu1 %v18134_v24  ;;  %15334 = vmatprep.subr.bf16.mxu0 %v17863_v51  ;;  %v18583_v7 = vcombine.high %v2714_v12, %v2722_v9  ;;  %v2442_v10 = vld [vmem:[#allocation8 + $0x3330] sm:$0xff]  ;;  %v18582_v24 = vcombine.low %v2714_v12, %v2722_v9 }
 0x78a   :  { %15375 = vmatprep.subr.bf16.mxu1 %v18119_v31  ;;  %v2450_v58 = vld [vmem:[#allocation8 + $0x3370] sm:$0xff] }
 0x78b   :  { %v2698_v21 = vld [vmem:[#allocation8 + $0x3b30] sm:$0xff]  ;;  %v18311_v51 = vcombine.high %v2442_v10, %v2450_v58 }
 0x78c   :  { %15335 = vmatpush2.bf16.msra.mxu0 %v17862_v30  ;;  %v2706_v4 = vld [vmem:[#allocation8 + $0x3b70] sm:$0xff] }
 0x78d   :  { %15376 = vmatpush2.bf16.msra.mxu1 %v18118_v49  ;;  %15336 = vmatprep.subr.bf16.mxu0 %v17847_v29  ;;  %v2426_v31 = vld [vmem:[#allocation8 + $0x32b0] sm:$0xff]  ;;  %v18567_v45 = vcombine.high %v2698_v21, %v2706_v4  ;;  %v18566_v18 = vcombine.low %v2698_v21, %v2706_v4 }
 0x78e   :  { %15377 = vmatprep.subr.bf16.mxu1 %v18103_v47  ;;  %v2434_v26 = vld [vmem:[#allocation8 + $0x32f0] sm:$0xff]  ;;  %v18310_v47 = vcombine.low %v2442_v10, %v2450_v58 }
 0x78f   :  { %v2682_v55 = vld [vmem:[#allocation8 + $0x3ab0] sm:$0xff]  ;;  %v18295_v57 = vcombine.high %v2426_v31, %v2434_v26 }
 0x790   :  { %15337 = vmatpush2.bf16.msra.mxu0 %v17846_v32  ;;  %v2690_v30 = vld [vmem:[#allocation8 + $0x3af0] sm:$0xff] }
 0x791   :  { %15378 = vmatpush2.bf16.msra.mxu1 %v18102_v11  ;;  %15338 = vmatprep.subr.bf16.mxu0 %v17831_v46  ;;  %v2410_v46 = vld [vmem:[#allocation8 + $0x3230] sm:$0xff] }
 0x792   :  { %15379 = vmatprep.subr.bf16.mxu1 %v18087_v53  ;;  %v2418_v53 = vld [vmem:[#allocation8 + $0x3270] sm:$0xff] }
 0x793   :  { %v2666_v44 = vld [vmem:[#allocation8 + $0x3a30] sm:$0xff]  ;;  %v18279_v10 = vcombine.high %v2410_v46, %v2418_v53 }
 0x794   :  { %15339 = vmatpush2.bf16.msra.mxu0 %v17830_v0  ;;  %v2674_v12 = vld [vmem:[#allocation8 + $0x3a70] sm:$0xff] }
 0x795   :  { %15380 = vmatpush2.bf16.msra.mxu1 %v18086_v36  ;;  %15390 = vmatprep.subr.bf16.mxu0 %v18327_v28  ;;  %v18294_v36 = vcombine.low %v2426_v31, %v2434_v26  ;;  %v18535_v58 = vcombine.high %v2666_v44, %v2674_v12  ;;  %v2402_v21 = vld [vmem:[#allocation8 + $0x31f0] sm:$0xff] }
 0x796   :  { %15431 = vmatprep.subr.bf16.mxu1 %v18583_v7  ;;  %v18550_v7 = vcombine.low %v2682_v55, %v2690_v30  ;;  %v2650_v4 = vld [vmem:[#allocation8 + $0x39b0] sm:$0xff] }
 0x797   :  { %v15096_v60 = vpop.f32.mrf.mxu0  ;;  %15341 = vmatmul.mubr.bf16.vlgmr.msra.gmra.mxu0 %v19359_v34  ;;  %v2378_v26 = vld [vmem:[#allocation8 + $0x3130] sm:$0xff] }
 0x798   :  { %v15097_v49 = vadd.f32 %v15096_v60, %v19613_v22  ;;  %v15137_v29 = vpop.f32.mrf.mxu1  ;;  %15382 = vmatmul.mubr.bf16.vlgmr.msra.gmra.mxu1 %v19357_v25  ;;  %15391 = vmatpush1.bf16.msra.mxu0 %v18326_v37  ;;  %v18551_v22 = vcombine.high %v2682_v55, %v2690_v30  ;;  %v2394_v37 = vld [vmem:[#allocation8 + $0x31b0] sm:$0xff]  ;;  %v18534_v60 = vcombine.low %v2666_v44, %v2674_v12 }
 0x799   :  { %15422 = vmatprep.mubr.bf16.mxu0 %v19361_v41  ;;  %15432 = vmatpush1.bf16.msra.mxu1 %v18582_v24  ;;  %v15098_v48 = vpop.f32.mrf.mxu0  ;;  %v2658_v24 = vld [vmem:[#allocation8 + $0x39f0] sm:$0xff]  ;;  %v18262_v30 = vcombine.low %v2394_v37, %v2402_v21 }
 0x79a   :  { %v19623_v23 = vadd.f32 %v15137_v29, %v15097_v49  ;;  %15463 = vmatprep.mubr.bf16.mxu1 %v19363_v42  ;;  %v15099_v32 = vadd.f32 %v15098_v48, %v19617_v54  ;;  %v15139_v11 = vpop.f32.mrf.mxu1  ;;  %15392 = vmatprep.subr.bf16.mxu0 %v18311_v51  ;;  %v18278_v51 = vcombine.low %v2410_v46, %v2418_v53  ;;  %v2386_v49 = vld [vmem:[#allocation8 + $0x3170] sm:$0xff] }
 0x79b   :  { %v15100_v39 = vpop.f32.mrf.mxu0  ;;  %15433 = vmatprep.subr.bf16.mxu1 %v18567_v45  ;;  %v18263_v45 = vcombine.high %v2394_v37, %v2402_v21  ;;  %v18519_v31 = vcombine.high %v2650_v4, %v2658_v24  ;;  %v2634_v29 = vld [vmem:[#allocation8 + $0x3930] sm:$0xff]  ;;  %v18247_v48 = vcombine.high %v2378_v26, %v2386_v49  ;;  %v18246_v46 = vcombine.low %v2378_v26, %v2386_v49 }
 0x79c   :  { %v19627_v9 = vadd.f32 %v15139_v11, %v15099_v32  ;;  %v15141_v0 = vpop.f32.mrf.mxu1  ;;  %15393 = vmatpush1.bf16.msra.mxu0 %v18310_v47  ;;  %v2642_v55 = vld [vmem:[#allocation8 + $0x3970] sm:$0xff]  ;;  %v18518_v47 = vcombine.low %v2650_v4, %v2658_v24 }
 0x79d   :  { %15434 = vmatpush1.bf16.msra.mxu1 %v18566_v18  ;;  %v15101_v28 = vpop.f32.mrf.mxu0  ;;  %15394 = vmatprep.subr.bf16.mxu0 %v18295_v57  ;;  %v18503_v18 = vcombine.high %v2634_v29, %v2642_v55  ;;  %v2362_v57 = vld [vmem:[#allocation8 + $0x30b0] sm:$0xff]  ;;  %v18502_v53 = vcombine.low %v2634_v29, %v2642_v55 }
 0x79e   :  { %v15142_v54 = vpop.f32.mrf.mxu1  ;;  %15435 = vmatprep.subr.bf16.mxu1 %v18551_v22  ;;  %v2370_v32 = vld [vmem:[#allocation8 + $0x30f0] sm:$0xff] }
 0x79f   :  { %v2618_v11 = vld [vmem:[#allocation8 + $0x38b0] sm:$0xff]  ;;  %v18231_v39 = vcombine.high %v2362_v57, %v2370_v32 }
 0x7a0   :  { %15395 = vmatpush1.bf16.msra.mxu0 %v18294_v36  ;;  %v2626_v22 = vld [vmem:[#allocation8 + $0x38f0] sm:$0xff] }
 0x7a1   :  { %15436 = vmatpush1.bf16.msra.mxu1 %v18550_v7  ;;  %15396 = vmatprep.subr.bf16.mxu0 %v18279_v10  ;;  %v18487_v44 = vcombine.high %v2618_v11, %v2626_v22  ;;  %v2346_v12 = vld [vmem:[#allocation8 + $0x3030] sm:$0xff]  ;;  %v18230_v7 = vcombine.low %v2362_v57, %v2370_v32  ;;  %v18486_v10 = vcombine.low %v2618_v11, %v2626_v22 }
 0x7a2   :  { %15437 = vmatprep.subr.bf16.mxu1 %v18535_v58  ;;  %v2354_v0 = vld [vmem:[#allocation8 + $0x3070] sm:$0xff] }
 0x7a3   :  { %v2602_v36 = vld [vmem:[#allocation8 + $0x3830] sm:$0xff]  ;;  %v18215_v54 = vcombine.high %v2346_v12, %v2354_v0 }
 0x7a4   :  { %15397 = vmatpush1.bf16.msra.mxu0 %v18278_v51  ;;  %v2610_v28 = vld [vmem:[#allocation8 + $0x3870] sm:$0xff]  ;;  %v18214_v51 = vcombine.low %v2346_v12, %v2354_v0 }
 0x7a5   :  { %15438 = vmatpush1.bf16.msra.mxu1 %v18534_v60  ;;  %15398 = vmatprep.subr.bf16.mxu0 %v18263_v45  ;;  %v18471_v58 = vcombine.high %v2602_v36, %v2610_v28  ;;  %v2586_v37 = vld [vmem:[#allocation8 + $0x37b0] sm:$0xff]  ;;  %v18470_v60 = vcombine.low %v2602_v36, %v2610_v28 }
 0x7a6   :  { %15439 = vmatprep.subr.bf16.mxu1 %v18519_v31  ;;  %v2594_v21 = vld [vmem:[#allocation8 + $0x37f0] sm:$0xff] }
 0x7a7   :  { %v2842_v4 = vld [vmem:[#allocation8 + $0x3fb0] sm:$0xff]  ;;  %v18455_v45 = vcombine.high %v2586_v37, %v2594_v21 }
 0x7a8   :  { %15399 = vmatpush1.bf16.msra.mxu0 %v18262_v30  ;;  %v2850_v24 = vld [vmem:[#allocation8 + $0x3ff0] sm:$0xff]  ;;  %v18454_v30 = vcombine.low %v2586_v37, %v2594_v21 }
 0x7a9   :  { %15440 = vmatpush1.bf16.msra.mxu1 %v18518_v47  ;;  %15400 = vmatprep.subr.bf16.mxu0 %v18247_v48  ;;  %v18711_v31 = vcombine.high %v2842_v4, %v2850_v24  ;;  %v2570_v26 = vld [vmem:[#allocation8 + $0x3730] sm:$0xff]  ;;  %v18710_v47 = vcombine.low %v2842_v4, %v2850_v24 }
 0x7aa   :  { %15441 = vmatprep.subr.bf16.mxu1 %v18503_v18  ;;  %v2578_v49 = vld [vmem:[#allocation8 + $0x3770] sm:$0xff] }
 0x7ab   :  { %v2826_v29 = vld [vmem:[#allocation8 + $0x3f30] sm:$0xff]  ;;  %v18439_v48 = vcombine.high %v2570_v26, %v2578_v49 }
 0x7ac   :  { %15401 = vmatpush1.bf16.msra.mxu0 %v18246_v46  ;;  %v2834_v55 = vld [vmem:[#allocation8 + $0x3f70] sm:$0xff]  ;;  %v18438_v46 = vcombine.low %v2570_v26, %v2578_v49 }
 0x7ad   :  { %15442 = vmatpush1.bf16.msra.mxu1 %v18502_v53  ;;  %15402 = vmatprep.subr.bf16.mxu0 %v18231_v39  ;;  %v18695_v18 = vcombine.high %v2826_v29, %v2834_v55  ;;  %v2554_v57 = vld [vmem:[#allocation8 + $0x36b0] sm:$0xff]  ;;  %v18694_v53 = vcombine.low %v2826_v29, %v2834_v55 }
 0x7ae   :  { %15443 = vmatprep.subr.bf16.mxu1 %v18487_v44  ;;  %v2562_v32 = vld [vmem:[#allocation8 + $0x36f0] sm:$0xff] }
 0x7af   :  { %v2810_v11 = vld [vmem:[#allocation8 + $0x3eb0] sm:$0xff]  ;;  %v18423_v39 = vcombine.high %v2554_v57, %v2562_v32 }
 0x7b0   :  { %15403 = vmatpush1.bf16.msra.mxu0 %v18230_v7  ;;  %v2818_v22 = vld [vmem:[#allocation8 + $0x3ef0] sm:$0xff]  ;;  %v18422_v7 = vcombine.low %v2554_v57, %v2562_v32 }
 0x7b1   :  { %15444 = vmatpush1.bf16.msra.mxu1 %v18486_v10  ;;  %15404 = vmatprep.subr.bf16.mxu0 %v18215_v54  ;;  %v18679_v44 = vcombine.high %v2810_v11, %v2818_v22  ;;  %v2538_v12 = vld [vmem:[#allocation8 + $0x3630] sm:$0xff]  ;;  %v18678_v10 = vcombine.low %v2810_v11, %v2818_v22 }
 0x7b2   :  { %15445 = vmatprep.subr.bf16.mxu1 %v18471_v58  ;;  %v2546_v0 = vld [vmem:[#allocation8 + $0x3670] sm:$0xff] }
 0x7b3   :  { %v2794_v36 = vld [vmem:[#allocation8 + $0x3e30] sm:$0xff]  ;;  %v18407_v54 = vcombine.high %v2538_v12, %v2546_v0 }
 0x7b4   :  { %15405 = vmatpush1.bf16.msra.mxu0 %v18214_v51  ;;  %v2802_v28 = vld [vmem:[#allocation8 + $0x3e70] sm:$0xff]  ;;  %v18406_v51 = vcombine.low %v2538_v12, %v2546_v0 }
 0x7b5   :  { %15446 = vmatpush1.bf16.msra.mxu1 %v18470_v60  ;;  %15406 = vmatprep.subr.bf16.mxu0 %v18455_v45  ;;  %v18663_v58 = vcombine.high %v2794_v36, %v2802_v28  ;;  %v2522_v37 = vld [vmem:[#allocation8 + $0x35b0] sm:$0xff]  ;;  %v18662_v60 = vcombine.low %v2794_v36, %v2802_v28 }
 0x7b6   :  { %15447 = vmatprep.subr.bf16.mxu1 %v18711_v31  ;;  %v2530_v21 = vld [vmem:[#allocation8 + $0x35f0] sm:$0xff] }
 0x7b7   :  { %v2778_v4 = vld [vmem:[#allocation8 + $0x3db0] sm:$0xff]  ;;  %v18391_v45 = vcombine.high %v2522_v37, %v2530_v21 }
 0x7b8   :  { %15407 = vmatpush2.bf16.msra.mxu0 %v18454_v30  ;;  %v2786_v24 = vld [vmem:[#allocation8 + $0x3df0] sm:$0xff]  ;;  %v18390_v30 = vcombine.low %v2522_v37, %v2530_v21  ;;  %v923_v37 = vld [vmem:[#allocation8 + $0x3b8] sm:$0xff] }
 0x7b9   :  { %15448 = vmatpush2.bf16.msra.mxu1 %v18710_v47  ;;  %15408 = vmatprep.subr.bf16.mxu0 %v18439_v48  ;;  %v18647_v31 = vcombine.high %v2778_v4, %v2786_v24  ;;  %v2506_v26 = vld [vmem:[#allocation8 + $0x3530] sm:$0xff]  ;;  %v18646_v47 = vcombine.low %v2778_v4, %v2786_v24  ;;  %v931_v21 = vld [vmem:[#allocation8 + $0x3f8] sm:$0xff] }
 0x7ba   :  { %15449 = vmatprep.subr.bf16.mxu1 %v18695_v18  ;;  %v2514_v49 = vld [vmem:[#allocation8 + $0x3570] sm:$0xff]  ;;  %v1179_v4 = vld [vmem:[#allocation8 + $0xbb8] sm:$0xff] }
 0x7bb   :  { %v2762_v29 = vld [vmem:[#allocation8 + $0x3d30] sm:$0xff]  ;;  %v18375_v48 = vcombine.high %v2506_v26, %v2514_v49  ;;  %v1187_v24 = vld [vmem:[#allocation8 + $0xbf8] sm:$0xff] }
 0x7bc   :  { %15409 = vmatpush2.bf16.msra.mxu0 %v18438_v46  ;;  %v2770_v55 = vld [vmem:[#allocation8 + $0x3d70] sm:$0xff]  ;;  %v18374_v46 = vcombine.low %v2506_v26, %v2514_v49  ;;  %v907_v26 = vld [vmem:[#allocation8 + $0x338] sm:$0xff] }
 0x7bd   :  { %15450 = vmatpush2.bf16.msra.mxu1 %v18694_v53  ;;  %15410 = vmatprep.subr.bf16.mxu0 %v18423_v39  ;;  %v18631_v18 = vcombine.high %v2762_v29, %v2770_v55  ;;  %v2490_v57 = vld [vmem:[#allocation8 + $0x34b0] sm:$0xff]  ;;  %v18630_v53 = vcombine.low %v2762_v29, %v2770_v55  ;;  %v915_v49 = vld [vmem:[#allocation8 + $0x378] sm:$0xff]  ;;  %v19009_v29 = vld [vmem:[#allocation10 + $0x8] sm:$0xff] }
 0x7be   :  { %15451 = vmatprep.subr.bf16.mxu1 %v18679_v44  ;;  %v2498_v32 = vld [vmem:[#allocation8 + $0x34f0] sm:$0xff]  ;;  %v2907_v55 = vrot.slane %v19009_v29, %v19313_v8 }
 0x7bf   :  { %v2746_v11 = vld [vmem:[#allocation8 + $0x3cb0] sm:$0xff]  ;;  %v18359_v39 = vcombine.high %v2490_v57, %v2498_v32 }
 0x7c0   :  { %15411 = vmatpush2.bf16.msra.mxu0 %v18422_v7  ;;  %v2754_v22 = vld [vmem:[#allocation8 + $0x3cf0] sm:$0xff]  ;;  %v18358_v7 = vcombine.low %v2490_v57, %v2498_v32  ;;  %v2911_v57 = vrot.slane %v19009_v29, %v19274_v35  ;;  %v16777_v32 = vcombine.high %v907_v26, %v915_v49 }
 0x7c1   :  { %15452 = vmatpush2.bf16.msra.mxu1 %v18678_v10  ;;  %15412 = vmatprep.subr.bf16.mxu0 %v18407_v54  ;;  %v18615_v44 = vcombine.high %v2746_v11, %v2754_v22  ;;  %v2474_v12 = vld [vmem:[#allocation8 + $0x3430] sm:$0xff]  ;;  %v18614_v10 = vcombine.low %v2746_v11, %v2754_v22  ;;  %v891_v11 = vld [vmem:[#allocation8 + $0x2b8] sm:$0xff] }
 0x7c2   :  { %15453 = vmatprep.subr.bf16.mxu1 %v18663_v58  ;;  %v2482_v0 = vld [vmem:[#allocation8 + $0x3470] sm:$0xff]  ;;  %v899_v22 = vld [vmem:[#allocation8 + $0x2f8] sm:$0xff] }
 0x7c3   :  { %v2730_v36 = vld [vmem:[#allocation8 + $0x3c30] sm:$0xff]  ;;  %v18343_v54 = vcombine.high %v2474_v12, %v2482_v0 }
 0x7c4   :  { %15413 = vmatpush2.bf16.msra.mxu0 %v18406_v51  ;;  %v2738_v28 = vld [vmem:[#allocation8 + $0x3c70] sm:$0xff]  ;;  %v18342_v51 = vcombine.low %v2474_v12, %v2482_v0  ;;  %v16776_v0 = vcombine.low %v907_v26, %v915_v49 }
 0x7c5   :  { %15454 = vmatpush2.bf16.msra.mxu1 %v18662_v60  ;;  %15414 = vmatprep.subr.bf16.mxu0 %v18391_v45  ;;  %v18599_v58 = vcombine.high %v2730_v36, %v2738_v28  ;;  %v18598_v60 = vcombine.low %v2730_v36, %v2738_v28  ;;  %v16793_v45 = vcombine.high %v923_v37, %v931_v21 }
 0x7c6   :  { %15455 = vmatprep.subr.bf16.mxu1 %v18647_v31  ;;  %v17049_v31 = vcombine.high %v1179_v4, %v1187_v24  ;;  %v16761_v28 = vcombine.high %v891_v11, %v899_v22 }
 0x7c8   :  { %15415 = vmatpush2.bf16.msra.mxu0 %v18390_v30  ;;  %v16792_v30 = vcombine.low %v923_v37, %v931_v21  ;;  %v875_v37 = vld [vmem:[#allocation8 + $0x238] sm:$0xff] }
 0x7c9   :  { %15456 = vmatpush2.bf16.msra.mxu1 %v18646_v47  ;;  %15416 = vmatprep.subr.bf16.mxu0 %v18375_v48  ;;  %v1163_v47 = vld [vmem:[#allocation8 + $0xb38] sm:$0xff] }
 0x7ca   :  { %15457 = vmatprep.subr.bf16.mxu1 %v18631_v18  ;;  %v1171_v48 = vld [vmem:[#allocation8 + $0xb78] sm:$0xff]  ;;  %v17048_v18 = vcombine.low %v1179_v4, %v1187_v24 }
 0x7cb   :  { %v17032_v35 = vcombine.low %v1163_v47, %v1171_v48  ;;  %v883_v21 = vld [vmem:[#allocation8 + $0x278] sm:$0xff] }
 0x7cc   :  { %15417 = vmatpush2.bf16.msra.mxu0 %v18374_v46  ;;  %v1131_v24 = vld [vmem:[#allocation8 + $0xa38] sm:$0xff] }
 0x7cd   :  { %15458 = vmatpush2.bf16.msra.mxu1 %v18630_v53  ;;  %15418 = vmatprep.subr.bf16.mxu0 %v18359_v39  ;;  %v17033_v53 = vcombine.high %v1163_v47, %v1171_v48  ;;  %v1147_v39 = vld [vmem:[#allocation8 + $0xab8] sm:$0xff] }
 0x7ce   :  { %15459 = vmatprep.subr.bf16.mxu1 %v18615_v44  ;;  %v1155_v44 = vld [vmem:[#allocation8 + $0xaf8] sm:$0xff] }
 0x7cf   :  { %v17016_v26 = vcombine.low %v1147_v39, %v1155_v44  ;;  %v1115_v47 = vld [vmem:[#allocation8 + $0x9b8] sm:$0xff] }
 0x7d0   :  { %15419 = vmatpush2.bf16.msra.mxu0 %v18358_v7  ;;  %v1123_v48 = vld [vmem:[#allocation8 + $0x9f8] sm:$0xff] }
 0x7d1   :  { %15460 = vmatpush2.bf16.msra.mxu1 %v18614_v10  ;;  %15420 = vmatprep.subr.bf16.mxu0 %v18343_v54 }
 0x7d2   :  { %15461 = vmatprep.subr.bf16.mxu1 %v18599_v58  ;;  %v17017_v58 = vcombine.high %v1147_v39, %v1155_v44  ;;  %v1107_v39 = vld [vmem:[#allocation8 + $0x978] sm:$0xff] }
 0x7d4   :  { %15421 = vmatpush2.bf16.msra.mxu0 %v18342_v51  ;;  %v1139_v51 = vld [vmem:[#allocation8 + $0xa78] sm:$0xff] }
 0x7d5   :  { %15462 = vmatpush2.bf16.msra.mxu1 %v18598_v60  ;;  %15472 = vmatprep.subr.bf16.mxu0 %v16793_v45  ;;  %v16760_v45 = vcombine.low %v891_v11, %v899_v22  ;;  %v17001_v29 = vcombine.high %v1131_v24, %v1139_v51  ;;  %v16985_v11 = vcombine.high %v1115_v47, %v1123_v48  ;;  %v843_v22 = vld [vmem:[#allocation8 + $0x138] sm:$0xff] }
 0x7d6   :  { %15513 = vmatprep.subr.bf16.mxu1 %v17049_v31 }
 0x7d7   :  { %v15178_v46 = vpop.f32.mrf.mxu0  ;;  %15423 = vmatmul.mubr.bf16.vlgmr.msra.gmra.mxu0 %v19376_v52 }
 0x7d8   :  { %v15179_v12 = vadd.f32 %v15178_v46, %v2907_v55  ;;  %v15219_v8 = vpop.f32.mrf.mxu1  ;;  %15464 = vmatmul.mubr.bf16.vlgmr.msra.gmra.mxu1 %v19378_v56  ;;  %15473 = vmatpush1.bf16.msra.mxu0 %v16792_v30  ;;  %v859_v55 = vld [vmem:[#allocation8 + $0x1b8] sm:$0xff] }
 0x7d9   :  { %15504 = vmatprep.mubr.bf16.mxu0 %v19293_v62  ;;  %15514 = vmatpush1.bf16.msra.mxu1 %v17048_v18  ;;  %v15180_v36 = vpop.f32.mrf.mxu0  ;;  %v867_v30 = vld [vmem:[#allocation8 + $0x1f8] sm:$0xff]  ;;  %v16744_v18 = vcombine.low %v875_v37, %v883_v21 }
 0x7da   :  { %v19634_v7 = vadd.f32 %v15219_v8, %v15179_v12  ;;  %15545 = vmatprep.mubr.bf16.mxu1 %v19295_v63  ;;  %v15181_v10 = vadd.f32 %v15180_v36, %v2911_v57  ;;  %v15221_v54 = vpop.f32.mrf.mxu1  ;;  %15474 = vmatprep.subr.bf16.mxu0 %v16777_v32  ;;  %v16745_v63 = vcombine.high %v875_v37, %v883_v21  ;;  %v851_v46 = vld [vmem:[#allocation8 + $0x178] sm:$0xff] }
 0x7db   :  { %v15182_v4 = vpop.f32.mrf.mxu0  ;;  %15515 = vmatprep.subr.bf16.mxu1 %v17033_v53  ;;  %v17000_v57 = vcombine.low %v1131_v24, %v1139_v51  ;;  %v16729_v32 = vcombine.high %v859_v55, %v867_v30  ;;  %v1099_v53 = vld [vmem:[#allocation8 + $0x938] sm:$0xff]  ;;  %v16728_v44 = vcombine.low %v859_v55, %v867_v30  ;;  %v16984_v12 = vcombine.low %v1115_v47, %v1123_v48 }
 0x7dc   :  { %v19637_v60 = vadd.f32 %v15221_v54, %v15181_v10  ;;  %v15223_v62 = vpop.f32.mrf.mxu1  ;;  %15475 = vmatpush1.bf16.msra.mxu0 %v16776_v0  ;;  %v16713_v8 = vcombine.high %v843_v22, %v851_v46  ;;  %v16969_v0 = vcombine.high %v1099_v53, %v1107_v39  ;;  %v827_v36 = vld [vmem:[#allocation8 + $0xb8] sm:$0xff]  ;;  %v16712_v54 = vcombine.low %v843_v22, %v851_v46 }
 0x7dd   :  { %15516 = vmatpush1.bf16.msra.mxu1 %v17032_v35  ;;  %v15183_v31 = vpop.f32.mrf.mxu0  ;;  %15476 = vmatprep.subr.bf16.mxu0 %v16761_v28  ;;  %v835_v35 = vld [vmem:[#allocation8 + $0xf8] sm:$0xff] }
 0x7de   :  { %v15224_v49 = vpop.f32.mrf.mxu1  ;;  %15517 = vmatprep.subr.bf16.mxu1 %v17017_v58  ;;  %v1083_v28 = vld [vmem:[#allocation8 + $0x8b8] sm:$0xff]  ;;  %v16968_v58 = vcombine.low %v1099_v53, %v1107_v39  ;;  %v16697_v37 = vcombine.high %v827_v36, %v835_v35 }
 0x7df   :  { %v1091_v10 = vld [vmem:[#allocation8 + $0x8f8] sm:$0xff] }
 0x7e0   :  { %15477 = vmatpush1.bf16.msra.mxu0 %v16760_v45  ;;  %v16953_v21 = vcombine.high %v1083_v28, %v1091_v10  ;;  %v811_v4 = vld [vmem:[#allocation8 + $0x38] sm:$0xff]  ;;  %v16696_v45 = vcombine.low %v827_v36, %v835_v35  ;;  %v16952_v31 = vcombine.low %v1083_v28, %v1091_v10 }
 0x7e1   :  { %15518 = vmatpush1.bf16.msra.mxu1 %v17016_v26  ;;  %15478 = vmatprep.subr.bf16.mxu0 %v16745_v63  ;;  %v819_v24 = vld [vmem:[#allocation8 + $0x78] sm:$0xff] }
 0x7e2   :  { %15519 = vmatprep.subr.bf16.mxu1 %v17001_v29  ;;  %v1067_v51 = vld [vmem:[#allocation8 + $0x838] sm:$0xff]  ;;  %v16681_v26 = vcombine.high %v811_v4, %v819_v24  ;;  %v16680_v47 = vcombine.low %v811_v4, %v819_v24 }
 0x7e3   :  { %v1075_v62 = vld [vmem:[#allocation8 + $0x878] sm:$0xff] }
 0x7e4   :  { %15479 = vmatpush1.bf16.msra.mxu0 %v16744_v18  ;;  %v16937_v63 = vcombine.high %v1067_v51, %v1075_v62  ;;  %v1051_v49 = vld [vmem:[#allocation8 + $0x7b8] sm:$0xff]  ;;  %v16936_v48 = vcombine.low %v1067_v51, %v1075_v62 }
 0x7e5   :  { %15520 = vmatpush1.bf16.msra.mxu1 %v17000_v57  ;;  %15480 = vmatprep.subr.bf16.mxu0 %v16729_v32  ;;  %v1059_v29 = vld [vmem:[#allocation8 + $0x7f8] sm:$0xff] }
 0x7e6   :  { %15521 = vmatprep.subr.bf16.mxu1 %v16985_v11  ;;  %v1307_v55 = vld [vmem:[#allocation8 + $0xfb8] sm:$0xff]  ;;  %v16921_v18 = vcombine.high %v1051_v49, %v1059_v29  ;;  %v16920_v53 = vcombine.low %v1051_v49, %v1059_v29 }
 0x7e7   :  { %v1315_v30 = vld [vmem:[#allocation8 + $0xff8] sm:$0xff] }
 0x7e8   :  { %15481 = vmatpush1.bf16.msra.mxu0 %v16728_v44  ;;  %v17177_v57 = vcombine.high %v1307_v55, %v1315_v30  ;;  %v1035_v32 = vld [vmem:[#allocation8 + $0x738] sm:$0xff]  ;;  %v17176_v39 = vcombine.low %v1307_v55, %v1315_v30 }
 0x7e9   :  { %15522 = vmatpush1.bf16.msra.mxu1 %v16984_v12  ;;  %15482 = vmatprep.subr.bf16.mxu0 %v16713_v8  ;;  %v1043_v11 = vld [vmem:[#allocation8 + $0x778] sm:$0xff] }
 0x7ea   :  { %15523 = vmatprep.subr.bf16.mxu1 %v16969_v0  ;;  %v1291_v22 = vld [vmem:[#allocation8 + $0xf38] sm:$0xff]  ;;  %v16905_v44 = vcombine.high %v1035_v32, %v1043_v11  ;;  %v16904_v28 = vcombine.low %v1035_v32, %v1043_v11 }
 0x7eb   :  { %v1299_v46 = vld [vmem:[#allocation8 + $0xf78] sm:$0xff] }
 0x7ec   :  { %15483 = vmatpush1.bf16.msra.mxu0 %v16712_v54  ;;  %v17161_v12 = vcombine.high %v1291_v22, %v1299_v46  ;;  %v1019_v8 = vld [vmem:[#allocation8 + $0x6b8] sm:$0xff]  ;;  %v17160_v10 = vcombine.low %v1291_v22, %v1299_v46 }
 0x7ed   :  { %15524 = vmatpush1.bf16.msra.mxu1 %v16968_v58  ;;  %15484 = vmatprep.subr.bf16.mxu0 %v16697_v37  ;;  %v1027_v0 = vld [vmem:[#allocation8 + $0x6f8] sm:$0xff] }
 0x7ee   :  { %15525 = vmatprep.subr.bf16.mxu1 %v16953_v21  ;;  %v1275_v36 = vld [vmem:[#allocation8 + $0xeb8] sm:$0xff]  ;;  %v16889_v54 = vcombine.high %v1019_v8, %v1027_v0  ;;  %v16888_v51 = vcombine.low %v1019_v8, %v1027_v0 }
 0x7ef   :  { %v1283_v35 = vld [vmem:[#allocation8 + $0xef8] sm:$0xff] }
 0x7f0   :  { %15485 = vmatpush1.bf16.msra.mxu0 %v16696_v45  ;;  %v17145_v58 = vcombine.high %v1275_v36, %v1283_v35  ;;  %v1003_v37 = vld [vmem:[#allocation8 + $0x638] sm:$0xff]  ;;  %v17144_v62 = vcombine.low %v1275_v36, %v1283_v35 }
 0x7f1   :  { %15526 = vmatpush1.bf16.msra.mxu1 %v16952_v31  ;;  %15486 = vmatprep.subr.bf16.mxu0 %v16681_v26  ;;  %v1011_v21 = vld [vmem:[#allocation8 + $0x678] sm:$0xff] }
 0x7f2   :  { %15527 = vmatprep.subr.bf16.mxu1 %v16937_v63  ;;  %v1259_v4 = vld [vmem:[#allocation8 + $0xe38] sm:$0xff]  ;;  %v16873_v45 = vcombine.high %v1003_v37, %v1011_v21  ;;  %v16872_v55 = vcombine.low %v1003_v37, %v1011_v21 }
 0x7f3   :  { %v1267_v24 = vld [vmem:[#allocation8 + $0xe78] sm:$0xff] }
 0x7f4   :  { %15487 = vmatpush1.bf16.msra.mxu0 %v16680_v47  ;;  %v17129_v31 = vcombine.high %v1259_v4, %v1267_v24  ;;  %v987_v26 = vld [vmem:[#allocation8 + $0x5b8] sm:$0xff]  ;;  %v17128_v30 = vcombine.low %v1259_v4, %v1267_v24 }
 0x7f5   :  { %15528 = vmatpush1.bf16.msra.mxu1 %v16936_v48  ;;  %15488 = vmatprep.subr.bf16.mxu0 %v16921_v18  ;;  %v995_v63 = vld [vmem:[#allocation8 + $0x5f8] sm:$0xff] }
 0x7f6   :  { %15529 = vmatprep.subr.bf16.mxu1 %v17177_v57  ;;  %v1243_v49 = vld [vmem:[#allocation8 + $0xdb8] sm:$0xff]  ;;  %v16857_v47 = vcombine.high %v987_v26, %v995_v63  ;;  %v16856_v22 = vcombine.low %v987_v26, %v995_v63 }
 0x7f7   :  { %v1251_v29 = vld [vmem:[#allocation8 + $0xdf8] sm:$0xff] }
 0x7f8   :  { %15489 = vmatpush2.bf16.msra.mxu0 %v16920_v53  ;;  %v17113_v48 = vcombine.high %v1243_v49, %v1251_v29  ;;  %v971_v18 = vld [vmem:[#allocation8 + $0x538] sm:$0xff]  ;;  %v17112_v46 = vcombine.low %v1243_v49, %v1251_v29 }
 0x7f9   :  { %15530 = vmatpush2.bf16.msra.mxu1 %v17176_v39  ;;  %15490 = vmatprep.subr.bf16.mxu0 %v16905_v44  ;;  %v979_v57 = vld [vmem:[#allocation8 + $0x578] sm:$0xff] }
 0x7fa   :  { %15531 = vmatprep.subr.bf16.mxu1 %v17161_v12  ;;  %v1227_v32 = vld [vmem:[#allocation8 + $0xd38] sm:$0xff]  ;;  %v16841_v53 = vcombine.high %v971_v18, %v979_v57  ;;  %v16840_v36 = vcombine.low %v971_v18, %v979_v57 }
 0x7fb   :  { %v1235_v11 = vld [vmem:[#allocation8 + $0xd78] sm:$0xff] }
 0x7fc   :  { %15491 = vmatpush2.bf16.msra.mxu0 %v16904_v28  ;;  %v17097_v39 = vcombine.high %v1227_v32, %v1235_v11  ;;  %v955_v44 = vld [vmem:[#allocation8 + $0x4b8] sm:$0xff]  ;;  %v17096_v35 = vcombine.low %v1227_v32, %v1235_v11 }
 0x7fd   :  { %15532 = vmatpush2.bf16.msra.mxu1 %v17160_v10  ;;  %15492 = vmatprep.subr.bf16.mxu0 %v16889_v54  ;;  %v963_v12 = vld [vmem:[#allocation8 + $0x4f8] sm:$0xff] }
 0x7fe   :  { %15533 = vmatprep.subr.bf16.mxu1 %v17145_v58  ;;  %v1211_v8 = vld [vmem:[#allocation8 + $0xcb8] sm:$0xff]  ;;  %v16825_v28 = vcombine.high %v955_v44, %v963_v12  ;;  %v16824_v4 = vcombine.low %v955_v44, %v963_v12 }
 0x7ff   :  { %v1219_v0 = vld [vmem:[#allocation8 + $0xcf8] sm:$0xff] }
 0x800   :  { %15493 = vmatpush2.bf16.msra.mxu0 %v16888_v51  ;;  %v17081_v10 = vcombine.high %v1211_v8, %v1219_v0  ;;  %v939_v54 = vld [vmem:[#allocation8 + $0x438] sm:$0xff]  ;;  %v17080_v24 = vcombine.low %v1211_v8, %v1219_v0 }
 0x801   :  { %15534 = vmatpush2.bf16.msra.mxu1 %v17144_v62  ;;  %15494 = vmatprep.subr.bf16.mxu0 %v16873_v45  ;;  %v947_v58 = vld [vmem:[#allocation8 + $0x478] sm:$0xff] }
 0x802   :  { %15535 = vmatprep.subr.bf16.mxu1 %v17129_v31  ;;  %v1195_v37 = vld [vmem:[#allocation8 + $0xc38] sm:$0xff]  ;;  %v16809_v51 = vcombine.high %v939_v54, %v947_v58  ;;  %v16808_v49 = vcombine.low %v939_v54, %v947_v58 }
 0x803   :  { %v1203_v21 = vld [vmem:[#allocation8 + $0xc78] sm:$0xff] }
 0x804   :  { %15495 = vmatpush2.bf16.msra.mxu0 %v16872_v55  ;;  %v17065_v62 = vcombine.high %v1195_v37, %v1203_v21  ;;  %v1435_v45 = vld [vmem:[#allocation8 + $0x13b8] sm:$0xff]  ;;  %v17064_v29 = vcombine.low %v1195_v37, %v1203_v21 }
 0x805   :  { %15536 = vmatpush2.bf16.msra.mxu1 %v17128_v30  ;;  %15496 = vmatprep.subr.bf16.mxu0 %v16857_v47  ;;  %v1443_v31 = vld [vmem:[#allocation8 + $0x13f8] sm:$0xff] }
 0x806   :  { %15537 = vmatprep.subr.bf16.mxu1 %v17113_v48  ;;  %v1691_v26 = vld [vmem:[#allocation8 + $0x1bb8] sm:$0xff]  ;;  %v17305_v55 = vcombine.high %v1435_v45, %v1443_v31  ;;  %v17304_v18 = vcombine.low %v1435_v45, %v1443_v31 }
 0x807   :  { %v1699_v63 = vld [vmem:[#allocation8 + $0x1bf8] sm:$0xff] }
 0x808   :  { %15497 = vmatpush2.bf16.msra.mxu0 %v16856_v22  ;;  %v17561_v30 = vcombine.high %v1691_v26, %v1699_v63  ;;  %v1419_v47 = vld [vmem:[#allocation8 + $0x1338] sm:$0xff]  ;;  %v17560_v11 = vcombine.low %v1691_v26, %v1699_v63 }
 0x809   :  { %15538 = vmatpush2.bf16.msra.mxu1 %v17112_v46  ;;  %15498 = vmatprep.subr.bf16.mxu0 %v16841_v53  ;;  %v1427_v48 = vld [vmem:[#allocation8 + $0x1378] sm:$0xff] }
 0x80a   :  { %15539 = vmatprep.subr.bf16.mxu1 %v17097_v39  ;;  %v1675_v57 = vld [vmem:[#allocation8 + $0x1b38] sm:$0xff]  ;;  %v17289_v22 = vcombine.high %v1419_v47, %v1427_v48 }
 0x80b   :  { %v1683_v32 = vld [vmem:[#allocation8 + $0x1b78] sm:$0xff] }
 0x80c   :  { %15499 = vmatpush2.bf16.msra.mxu0 %v16840_v36  ;;  %v1403_v46 = vld [vmem:[#allocation8 + $0x12b8] sm:$0xff]  ;;  %v17545_v44 = vcombine.high %v1675_v57, %v1683_v32 }
 0x80d   :  { %15540 = vmatpush2.bf16.msra.mxu1 %v17096_v35  ;;  %15500 = vmatprep.subr.bf16.mxu0 %v16825_v28  ;;  %v1411_v53 = vld [vmem:[#allocation8 + $0x12f8] sm:$0xff]  ;;  %v17288_v35 = vcombine.low %v1419_v47, %v1427_v48 }
 0x80e   :  { %15541 = vmatprep.subr.bf16.mxu1 %v17081_v10  ;;  %v1659_v12 = vld [vmem:[#allocation8 + $0x1ab8] sm:$0xff]  ;;  %v17544_v10 = vcombine.low %v1675_v57, %v1683_v32  ;;  %v17273_v54 = vcombine.high %v1403_v46, %v1411_v53  ;;  %v17272_v45 = vcombine.low %v1403_v46, %v1411_v53 }
 0x80f   :  { %v1667_v8 = vld [vmem:[#allocation8 + $0x1af8] sm:$0xff] }
 0x810   :  { %15501 = vmatpush2.bf16.msra.mxu0 %v16824_v4  ;;  %v1387_v21 = vld [vmem:[#allocation8 + $0x1238] sm:$0xff] }
 0x811   :  { %15542 = vmatpush2.bf16.msra.mxu1 %v17080_v24  ;;  %15502 = vmatprep.subr.bf16.mxu0 %v16809_v51  ;;  %v1395_v4 = vld [vmem:[#allocation8 + $0x1278] sm:$0xff] }
 0x812   :  { %15543 = vmatprep.subr.bf16.mxu1 %v17065_v62  ;;  %v1643_v24 = vld [vmem:[#allocation8 + $0x1a38] sm:$0xff]  ;;  %v17257_v26 = vcombine.high %v1387_v21, %v1395_v4  ;;  %v17256_v47 = vcombine.low %v1387_v21, %v1395_v4 }
 0x813   :  { %v1651_v51 = vld [vmem:[#allocation8 + $0x1a78] sm:$0xff] }
 0x814   :  { %15503 = vmatpush2.bf16.msra.mxu0 %v16808_v49  ;;  %v17513_v63 = vcombine.high %v1643_v24, %v1651_v51  ;;  %v1371_v49 = vld [vmem:[#allocation8 + $0x11b8] sm:$0xff]  ;;  %v17512_v48 = vcombine.low %v1643_v24, %v1651_v51 }
 0x815   :  { %15544 = vmatpush2.bf16.msra.mxu1 %v17064_v29  ;;  %15554 = vmatprep.subr.bf16.mxu0 %v17305_v55  ;;  %v1379_v29 = vld [vmem:[#allocation8 + $0x11f8] sm:$0xff] }
 0x816   :  { %15595 = vmatprep.subr.bf16.mxu1 %v17561_v30  ;;  %v1627_v55 = vld [vmem:[#allocation8 + $0x19b8] sm:$0xff]  ;;  %v17240_v53 = vcombine.low %v1371_v49, %v1379_v29 }
 0x817   :  { %v15260_v39 = vpop.f32.mrf.mxu0  ;;  %15505 = vmatmul.mubr.bf16.vlgmr.msra.gmra.mxu0 %v19297_v2  ;;  %v1635_v30 = vld [vmem:[#allocation8 + $0x19f8] sm:$0xff] }
 0x818   :  { %v15261_v0 = vadd.f32 %v15260_v39, %v19634_v7  ;;  %v15301_v36 = vpop.f32.mrf.mxu1  ;;  %15546 = vmatmul.mubr.bf16.vlgmr.msra.gmra.mxu1 %v19291_v59  ;;  %15555 = vmatpush1.bf16.msra.mxu0 %v17304_v18  ;;  %v17529_v7 = vcombine.high %v1659_v12, %v1667_v8  ;;  %v17241_v18 = vcombine.high %v1371_v49, %v1379_v29  ;;  %v1355_v32 = vld [vmem:[#allocation8 + $0x1138] sm:$0xff] }
 0x819   :  { %15586 = vmatprep.mubr.bf16.mxu0 %v19303_v13  ;;  %15596 = vmatpush1.bf16.msra.mxu1 %v17560_v11  ;;  %v15262_v28 = vpop.f32.mrf.mxu0  ;;  %v17497_v57 = vcombine.high %v1627_v55, %v1635_v30  ;;  %v1363_v11 = vld [vmem:[#allocation8 + $0x1178] sm:$0xff]  ;;  %v17496_v39 = vcombine.low %v1627_v55, %v1635_v30 }
 0x81a   :  { %v19643_v58 = vadd.f32 %v15301_v36, %v15261_v0  ;;  %15627 = vmatprep.mubr.bf16.mxu1 %v19305_v14  ;;  %v15263_v2 = vadd.f32 %v15262_v28, %v19637_v60  ;;  %v15303_v37 = vpop.f32.mrf.mxu1  ;;  %15556 = vmatprep.subr.bf16.mxu0 %v17289_v22  ;;  %v17528_v14 = vcombine.low %v1659_v12, %v1667_v8  ;;  %v1611_v22 = vld [vmem:[#allocation8 + $0x1938] sm:$0xff] }
 0x81b   :  { %v15264_v59 = vpop.f32.mrf.mxu0  ;;  %15597 = vmatprep.subr.bf16.mxu1 %v17545_v44  ;;  %v1619_v46 = vld [vmem:[#allocation8 + $0x1978] sm:$0xff]  ;;  %v17225_v44 = vcombine.high %v1355_v32, %v1363_v11  ;;  %v17224_v28 = vcombine.low %v1355_v32, %v1363_v11 }
 0x81c   :  { %v19647_v13 = vadd.f32 %v15303_v37, %v15263_v2  ;;  %v15305_v62 = vpop.f32.mrf.mxu1  ;;  %15557 = vmatpush1.bf16.msra.mxu0 %v17288_v35  ;;  %v17481_v12 = vcombine.high %v1611_v22, %v1619_v46  ;;  %v1339_v8 = vld [vmem:[#allocation8 + $0x10b8] sm:$0xff] }
 0x81d   :  { %15598 = vmatpush1.bf16.msra.mxu1 %v17544_v10  ;;  %v15265_v31 = vpop.f32.mrf.mxu0  ;;  %15558 = vmatprep.subr.bf16.mxu0 %v17273_v54  ;;  %v1347_v0 = vld [vmem:[#allocation8 + $0x10f8] sm:$0xff]  ;;  %v17480_v10 = vcombine.low %v1611_v22, %v1619_v46 }
 0x81e   :  { %v15306_v60 = vpop.f32.mrf.mxu1  ;;  %15599 = vmatprep.subr.bf16.mxu1 %v17529_v7  ;;  %v1595_v36 = vld [vmem:[#allocation8 + $0x18b8] sm:$0xff]  ;;  %v17209_v54 = vcombine.high %v1339_v8, %v1347_v0  ;;  %v17208_v59 = vcombine.low %v1339_v8, %v1347_v0 }
 0x81f   :  { %v1603_v35 = vld [vmem:[#allocation8 + $0x18f8] sm:$0xff] }
 0x820   :  { %15559 = vmatpush1.bf16.msra.mxu0 %v17272_v45  ;;  %v17465_v2 = vcombine.high %v1595_v36, %v1603_v35  ;;  %v1323_v37 = vld [vmem:[#allocation8 + $0x1038] sm:$0xff]  ;;  %v17464_v24 = vcombine.low %v1595_v36, %v1603_v35 }
 0x821   :  { %15600 = vmatpush1.bf16.msra.mxu1 %v17528_v14  ;;  %15560 = vmatprep.subr.bf16.mxu0 %v17257_v26  ;;  %v1331_v7 = vld [vmem:[#allocation8 + $0x1078] sm:$0xff] }
 0x822   :  { %15601 = vmatprep.subr.bf16.mxu1 %v17513_v63  ;;  %v1579_v21 = vld [vmem:[#allocation8 + $0x1838] sm:$0xff]  ;;  %v17193_v51 = vcombine.high %v1323_v37, %v1331_v7  ;;  %v17192_v60 = vcombine.low %v1323_v37, %v1331_v7 }
 0x823   :  { %v1587_v4 = vld [vmem:[#allocation8 + $0x1878] sm:$0xff] }
 0x824   :  { %15561 = vmatpush1.bf16.msra.mxu0 %v17256_v47  ;;  %v17449_v62 = vcombine.high %v1579_v21, %v1587_v4  ;;  %v1563_v45 = vld [vmem:[#allocation8 + $0x17b8] sm:$0xff]  ;;  %v17448_v63 = vcombine.low %v1579_v21, %v1587_v4 }
 0x825   :  { %15602 = vmatpush1.bf16.msra.mxu1 %v17512_v48  ;;  %15562 = vmatprep.subr.bf16.mxu0 %v17241_v18  ;;  %v1571_v31 = vld [vmem:[#allocation8 + $0x17f8] sm:$0xff] }
 0x826   :  { %15603 = vmatprep.subr.bf16.mxu1 %v17497_v57  ;;  %v1819_v14 = vld [vmem:[#allocation8 + $0x1fb8] sm:$0xff]  ;;  %v17433_v49 = vcombine.high %v1563_v45, %v1571_v31  ;;  %v17432_v18 = vcombine.low %v1563_v45, %v1571_v31 }
 0x827   :  { %v1827_v26 = vld [vmem:[#allocation8 + $0x1ff8] sm:$0xff] }
 0x828   :  { %15563 = vmatpush1.bf16.msra.mxu0 %v17240_v53  ;;  %v17689_v29 = vcombine.high %v1819_v14, %v1827_v26  ;;  %v1547_v55 = vld [vmem:[#allocation8 + $0x1738] sm:$0xff]  ;;  %v17688_v57 = vcombine.low %v1819_v14, %v1827_v26 }
 0x829   :  { %15604 = vmatpush1.bf16.msra.mxu1 %v17496_v39  ;;  %15564 = vmatprep.subr.bf16.mxu0 %v17225_v44  ;;  %v1555_v30 = vld [vmem:[#allocation8 + $0x1778] sm:$0xff] }
 0x82a   :  { %15605 = vmatprep.subr.bf16.mxu1 %v17481_v12  ;;  %v1803_v47 = vld [vmem:[#allocation8 + $0x1f38] sm:$0xff]  ;;  %v17417_v32 = vcombine.high %v1547_v55, %v1555_v30  ;;  %v17416_v44 = vcombine.low %v1547_v55, %v1555_v30 }
 0x82b   :  { %v1811_v48 = vld [vmem:[#allocation8 + $0x1f78] sm:$0xff] }
 0x82c   :  { %15565 = vmatpush1.bf16.msra.mxu0 %v17224_v28  ;;  %v17673_v11 = vcombine.high %v1803_v47, %v1811_v48  ;;  %v1531_v22 = vld [vmem:[#allocation8 + $0x16b8] sm:$0xff]  ;;  %v17672_v12 = vcombine.low %v1803_v47, %v1811_v48 }
 0x82d   :  { %15606 = vmatpush1.bf16.msra.mxu1 %v17480_v10  ;;  %15566 = vmatprep.subr.bf16.mxu0 %v17209_v54  ;;  %v1539_v46 = vld [vmem:[#allocation8 + $0x16f8] sm:$0xff] }
 0x82e   :  { %15607 = vmatprep.subr.bf16.mxu1 %v17465_v2  ;;  %v1787_v53 = vld [vmem:[#allocation8 + $0x1eb8] sm:$0xff]  ;;  %v17401_v8 = vcombine.high %v1531_v22, %v1539_v46  ;;  %v17400_v54 = vcombine.low %v1531_v22, %v1539_v46 }
 0x82f   :  { %v1795_v39 = vld [vmem:[#allocation8 + $0x1ef8] sm:$0xff] }
 0x830   :  { %15567 = vmatpush1.bf16.msra.mxu0 %v17208_v59  ;;  %v17657_v0 = vcombine.high %v1787_v53, %v1795_v39  ;;  %v1515_v36 = vld [vmem:[#allocation8 + $0x1638] sm:$0xff]  ;;  %v17656_v2 = vcombine.low %v1787_v53, %v1795_v39 }
 0x831   :  { %15608 = vmatpush1.bf16.msra.mxu1 %v17464_v24  ;;  %15568 = vmatprep.subr.bf16.mxu0 %v17193_v51  ;;  %v1523_v35 = vld [vmem:[#allocation8 + $0x1678] sm:$0xff] }
 0x832   :  { %15609 = vmatprep.subr.bf16.mxu1 %v17449_v62  ;;  %v1771_v28 = vld [vmem:[#allocation8 + $0x1e38] sm:$0xff]  ;;  %v17385_v37 = vcombine.high %v1515_v36, %v1523_v35  ;;  %v17384_v51 = vcombine.low %v1515_v36, %v1523_v35 }
 0x833   :  { %v1779_v10 = vld [vmem:[#allocation8 + $0x1e78] sm:$0xff] }
 0x834   :  { %15569 = vmatpush1.bf16.msra.mxu0 %v17192_v60  ;;  %v17641_v7 = vcombine.high %v1771_v28, %v1779_v10  ;;  %v1499_v21 = vld [vmem:[#allocation8 + $0x15b8] sm:$0xff]  ;;  %v17640_v62 = vcombine.low %v1771_v28, %v1779_v10 }
 0x835   :  { %15610 = vmatpush1.bf16.msra.mxu1 %v17448_v63  ;;  %15570 = vmatprep.subr.bf16.mxu0 %v17433_v49  ;;  %v1507_v4 = vld [vmem:[#allocation8 + $0x15f8] sm:$0xff] }
 0x836   :  { %15611 = vmatprep.subr.bf16.mxu1 %v17689_v29  ;;  %v1755_v59 = vld [vmem:[#allocation8 + $0x1db8] sm:$0xff]  ;;  %v17369_v45 = vcombine.high %v1499_v21, %v1507_v4  ;;  %v17368_v49 = vcombine.low %v1499_v21, %v1507_v4 }
 0x837   :  { %v1763_v24 = vld [vmem:[#allocation8 + $0x1df8] sm:$0xff] }
 0x838   :  { %15571 = vmatpush2.bf16.msra.mxu0 %v17432_v18  ;;  %v17625_v31 = vcombine.high %v1755_v59, %v1763_v24  ;;  %v1483_v14 = vld [vmem:[#allocation8 + $0x1538] sm:$0xff]  ;;  %v17624_v29 = vcombine.low %v1755_v59, %v1763_v24 }
 0x839   :  { %15612 = vmatpush2.bf16.msra.mxu1 %v17688_v57  ;;  %15572 = vmatprep.subr.bf16.mxu0 %v17417_v32  ;;  %v1491_v26 = vld [vmem:[#allocation8 + $0x1578] sm:$0xff] }
 0x83a   :  { %15613 = vmatprep.subr.bf16.mxu1 %v17673_v11  ;;  %v1739_v60 = vld [vmem:[#allocation8 + $0x1d38] sm:$0xff]  ;;  %v17353_v55 = vcombine.high %v1483_v14, %v1491_v26  ;;  %v17352_v32 = vcombine.low %v1483_v14, %v1491_v26 }
 0x83b   :  { %v1747_v63 = vld [vmem:[#allocation8 + $0x1d78] sm:$0xff] }
 0x83c   :  { %15573 = vmatpush2.bf16.msra.mxu0 %v17416_v44  ;;  %v17609_v30 = vcombine.high %v1739_v60, %v1747_v63  ;;  %v1467_v47 = vld [vmem:[#allocation8 + $0x14b8] sm:$0xff]  ;;  %v17608_v11 = vcombine.low %v1739_v60, %v1747_v63 }
 0x83d   :  { %15614 = vmatpush2.bf16.msra.mxu1 %v17672_v12  ;;  %15574 = vmatprep.subr.bf16.mxu0 %v17401_v8  ;;  %v1475_v48 = vld [vmem:[#allocation8 + $0x14f8] sm:$0xff] }
 0x83e   :  { %15615 = vmatprep.subr.bf16.mxu1 %v17657_v0  ;;  %v1723_v18 = vld [vmem:[#allocation8 + $0x1cb8] sm:$0xff]  ;;  %v17337_v22 = vcombine.high %v1467_v47, %v1475_v48  ;;  %v17336_v8 = vcombine.low %v1467_v47, %v1475_v48 }
 0x83f   :  { %v1731_v57 = vld [vmem:[#allocation8 + $0x1cf8] sm:$0xff] }
 0x840   :  { %15575 = vmatpush2.bf16.msra.mxu0 %v17400_v54  ;;  %v17593_v46 = vcombine.high %v1723_v18, %v1731_v57  ;;  %v1451_v53 = vld [vmem:[#allocation8 + $0x1438] sm:$0xff]  ;;  %v17592_v0 = vcombine.low %v1723_v18, %v1731_v57 }
 0x841   :  { %15616 = vmatpush2.bf16.msra.mxu1 %v17656_v2  ;;  %15576 = vmatprep.subr.bf16.mxu0 %v17385_v37  ;;  %v1459_v39 = vld [vmem:[#allocation8 + $0x1478] sm:$0xff] }
 0x842   :  { %15617 = vmatprep.subr.bf16.mxu1 %v17641_v7  ;;  %v1707_v44 = vld [vmem:[#allocation8 + $0x1c38] sm:$0xff]  ;;  %v17321_v36 = vcombine.high %v1451_v53, %v1459_v39  ;;  %v17320_v37 = vcombine.low %v1451_v53, %v1459_v39 }
 0x843   :  { %v1715_v12 = vld [vmem:[#allocation8 + $0x1c78] sm:$0xff] }
 0x844   :  { %15577 = vmatpush2.bf16.msra.mxu0 %v17384_v51  ;;  %v17577_v35 = vcombine.high %v1707_v44, %v1715_v12  ;;  %v1947_v28 = vld [vmem:[#allocation8 + $0x23b8] sm:$0xff]  ;;  %v17576_v7 = vcombine.low %v1707_v44, %v1715_v12 }
 0x845   :  { %15618 = vmatpush2.bf16.msra.mxu1 %v17640_v62  ;;  %15578 = vmatprep.subr.bf16.mxu0 %v17369_v45  ;;  %v1955_v10 = vld [vmem:[#allocation8 + $0x23f8] sm:$0xff] }
 0x846   :  { %15619 = vmatprep.subr.bf16.mxu1 %v17625_v31  ;;  %v2203_v54 = vld [vmem:[#allocation8 + $0x2bb8] sm:$0xff]  ;;  %v17817_v21 = vcombine.high %v1947_v28, %v1955_v10  ;;  %v17816_v51 = vcombine.low %v1947_v28, %v1955_v10 }
 0x847   :  { %v2211_v2 = vld [vmem:[#allocation8 + $0x2bf8] sm:$0xff] }
 0x848   :  { %15579 = vmatpush2.bf16.msra.mxu0 %v17368_v49  ;;  %v18073_v4 = vcombine.high %v2203_v54, %v2211_v2  ;;  %v1931_v59 = vld [vmem:[#allocation8 + $0x2338] sm:$0xff]  ;;  %v18072_v31 = vcombine.low %v2203_v54, %v2211_v2 }
 0x849   :  { %15620 = vmatpush2.bf16.msra.mxu1 %v17624_v29  ;;  %15580 = vmatprep.subr.bf16.mxu0 %v17353_v55  ;;  %v1939_v24 = vld [vmem:[#allocation8 + $0x2378] sm:$0xff] }
 0x84a   :  { %15621 = vmatprep.subr.bf16.mxu1 %v17609_v30  ;;  %v2187_v62 = vld [vmem:[#allocation8 + $0x2b38] sm:$0xff]  ;;  %v17801_v14 = vcombine.high %v1931_v59, %v1939_v24  ;;  %v17800_v48 = vcombine.low %v1931_v59, %v1939_v24 }
 0x84b   :  { %v2195_v45 = vld [vmem:[#allocation8 + $0x2b78] sm:$0xff] }
 0x84c   :  { %15581 = vmatpush2.bf16.msra.mxu0 %v17352_v32  ;;  %v1915_v26 = vld [vmem:[#allocation8 + $0x22b8] sm:$0xff]  ;;  %v18057_v49 = vcombine.high %v2187_v62, %v2195_v45  ;;  %v18056_v57 = vcombine.low %v2187_v62, %v2195_v45 }
 0x84d   :  { %15622 = vmatpush2.bf16.msra.mxu1 %v17608_v11  ;;  %15582 = vmatprep.subr.bf16.mxu0 %v17337_v22  ;;  %v1923_v60 = vld [vmem:[#allocation8 + $0x22f8] sm:$0xff] }
 0x84e   :  { %15623 = vmatprep.subr.bf16.mxu1 %v17593_v46  ;;  %v2171_v29 = vld [vmem:[#allocation8 + $0x2ab8] sm:$0xff]  ;;  %v17785_v32 = vcombine.high %v1915_v26, %v1923_v60 }
 0x84f   :  { %v2179_v55 = vld [vmem:[#allocation8 + $0x2af8] sm:$0xff] }
 0x850   :  { %15583 = vmatpush2.bf16.msra.mxu0 %v17336_v8  ;;  %v1899_v46 = vld [vmem:[#allocation8 + $0x2238] sm:$0xff]  ;;  %v17784_v8 = vcombine.low %v1915_v26, %v1923_v60 }
 0x851   :  { %15624 = vmatpush2.bf16.msra.mxu1 %v17592_v0  ;;  %15584 = vmatprep.subr.bf16.mxu0 %v17321_v36  ;;  %v1907_v53 = vld [vmem:[#allocation8 + $0x2278] sm:$0xff] }
 0x852   :  { %15625 = vmatprep.subr.bf16.mxu1 %v17577_v35  ;;  %v2155_v39 = vld [vmem:[#allocation8 + $0x2a38] sm:$0xff]  ;;  %v17769_v36 = vcombine.high %v1899_v46, %v1907_v53 }
 0x853   :  { %v2163_v44 = vld [vmem:[#allocation8 + $0x2a78] sm:$0xff] }
 0x854   :  { %15585 = vmatpush2.bf16.msra.mxu0 %v17320_v37  ;;  %v18025_v35 = vcombine.high %v2155_v39, %v2163_v44  ;;  %v1883_v28 = vld [vmem:[#allocation8 + $0x21b8] sm:$0xff]  ;;  %v17768_v37 = vcombine.low %v1899_v46, %v1907_v53 }
 0x855   :  { %15626 = vmatpush2.bf16.msra.mxu1 %v17576_v7  ;;  %15636 = vmatprep.subr.bf16.mxu0 %v17817_v21  ;;  %v1891_v10 = vld [vmem:[#allocation8 + $0x21f8] sm:$0xff]  ;;  %v18024_v7 = vcombine.low %v2155_v39, %v2163_v44 }
 0x856   :  { %15677 = vmatprep.subr.bf16.mxu1 %v18073_v4  ;;  %v2139_v54 = vld [vmem:[#allocation8 + $0x29b8] sm:$0xff]  ;;  %v17753_v21 = vcombine.high %v1883_v28, %v1891_v10  ;;  %v17752_v45 = vcombine.low %v1883_v28, %v1891_v10 }
 0x857   :  { %v15342_v63 = vpop.f32.mrf.mxu0  ;;  %15587 = vmatmul.mubr.bf16.vlgmr.msra.gmra.mxu0 %v19333_v6  ;;  %v2147_v2 = vld [vmem:[#allocation8 + $0x29f8] sm:$0xff] }
 0x858   :  { %v15343_v30 = vadd.f32 %v15342_v63, %v19643_v58  ;;  %v15383_v47 = vpop.f32.mrf.mxu1  ;;  %15628 = vmatmul.mubr.bf16.vlgmr.msra.gmra.mxu1 %v19331_v1  ;;  %15637 = vmatpush1.bf16.msra.mxu0 %v17816_v51  ;;  %v18041_v58 = vcombine.high %v2171_v29, %v2179_v55  ;;  %v18009_v4 = vcombine.high %v2139_v54, %v2147_v2  ;;  %v1867_v59 = vld [vmem:[#allocation8 + $0x2138] sm:$0xff] }
 0x859   :  { %15668 = vmatprep.mubr.bf16.mxu0 %v19335_v19  ;;  %15678 = vmatpush1.bf16.msra.mxu1 %v18072_v31  ;;  %v15344_v18 = vpop.f32.mrf.mxu0  ;;  %v1875_v24 = vld [vmem:[#allocation8 + $0x2178] sm:$0xff]  ;;  %v18008_v31 = vcombine.low %v2139_v54, %v2147_v2 }
 0x85a   :  { %v19653_v11 = vadd.f32 %v15383_v47, %v15343_v30  ;;  %15709 = vmatprep.mubr.bf16.mxu1 %v19337_v20  ;;  %v15345_v6 = vadd.f32 %v15344_v18, %v19647_v13  ;;  %v15385_v22 = vpop.f32.mrf.mxu1  ;;  %15638 = vmatprep.subr.bf16.mxu0 %v17801_v14  ;;  %v18040_v20 = vcombine.low %v2171_v29, %v2179_v55  ;;  %v2123_v51 = vld [vmem:[#allocation8 + $0x2938] sm:$0xff] }
 0x85b   :  { %v15346_v1 = vpop.f32.mrf.mxu0  ;;  %15679 = vmatprep.subr.bf16.mxu1 %v18057_v49  ;;  %v2131_v62 = vld [vmem:[#allocation8 + $0x2978] sm:$0xff]  ;;  %v17737_v14 = vcombine.high %v1867_v59, %v1875_v24  ;;  %v17736_v55 = vcombine.low %v1867_v59, %v1875_v24 }
 0x85c   :  { %v19657_v19 = vadd.f32 %v15385_v22, %v15345_v6  ;;  %v15387_v12 = vpop.f32.mrf.mxu1  ;;  %15639 = vmatpush1.bf16.msra.mxu0 %v17800_v48  ;;  %v17993_v26 = vcombine.high %v2123_v51, %v2131_v62  ;;  %v1851_v60 = vld [vmem:[#allocation8 + $0x20b8] sm:$0xff]  ;;  %v17992_v30 = vcombine.low %v2123_v51, %v2131_v62 }
 0x85d   :  { %15680 = vmatpush1.bf16.msra.mxu1 %v18056_v57  ;;  %v15347_v0 = vpop.f32.mrf.mxu0  ;;  %15640 = vmatprep.subr.bf16.mxu0 %v17785_v32  ;;  %v1859_v63 = vld [vmem:[#allocation8 + $0x20f8] sm:$0xff] }
 0x85e   :  { %v15388_v13 = vpop.f32.mrf.mxu1  ;;  %15681 = vmatprep.subr.bf16.mxu1 %v18041_v58  ;;  %v2107_v49 = vld [vmem:[#allocation8 + $0x28b8] sm:$0xff]  ;;  %v17721_v47 = vcombine.high %v1851_v60, %v1859_v63  ;;  %v17720_v22 = vcombine.low %v1851_v60, %v1859_v63 }
 0x85f   :  { %v2115_v29 = vld [vmem:[#allocation8 + $0x28f8] sm:$0xff] }
 0x860   :  { %15641 = vmatpush1.bf16.msra.mxu0 %v17784_v8  ;;  %v17977_v48 = vcombine.high %v2107_v49, %v2115_v29  ;;  %v1835_v18 = vld [vmem:[#allocation8 + $0x2038] sm:$0xff]  ;;  %v17976_v58 = vcombine.low %v2107_v49, %v2115_v29 }
 0x861   :  { %15682 = vmatpush1.bf16.msra.mxu1 %v18040_v20  ;;  %15642 = vmatprep.subr.bf16.mxu0 %v17769_v36  ;;  %v1843_v57 = vld [vmem:[#allocation8 + $0x2078] sm:$0xff] }
 0x862   :  { %15683 = vmatprep.subr.bf16.mxu1 %v18025_v35  ;;  %v2091_v32 = vld [vmem:[#allocation8 + $0x2838] sm:$0xff]  ;;  %v17705_v46 = vcombine.high %v1835_v18, %v1843_v57  ;;  %v17704_v8 = vcombine.low %v1835_v18, %v1843_v57 }
 0x863   :  { %v2099_v6 = vld [vmem:[#allocation8 + $0x2878] sm:$0xff] }
 0x864   :  { %15643 = vmatpush1.bf16.msra.mxu0 %v17768_v37  ;;  %v17961_v53 = vcombine.high %v2091_v32, %v2099_v6  ;;  %v2075_v1 = vld [vmem:[#allocation8 + $0x27b8] sm:$0xff]  ;;  %v17960_v0 = vcombine.low %v2091_v32, %v2099_v6 }
 0x865   :  { %15684 = vmatpush1.bf16.msra.mxu1 %v18024_v7  ;;  %15644 = vmatprep.subr.bf16.mxu0 %v17753_v21  ;;  %v2083_v39 = vld [vmem:[#allocation8 + $0x27f8] sm:$0xff] }
 0x866   :  { %15685 = vmatprep.subr.bf16.mxu1 %v18009_v4  ;;  %v2331_v44 = vld [vmem:[#allocation8 + $0x2fb8] sm:$0xff]  ;;  %v17945_v20 = vcombine.high %v2075_v1, %v2083_v39  ;;  %v17944_v54 = vcombine.low %v2075_v1, %v2083_v39 }
 0x867   :  { %v2339_v12 = vld [vmem:[#allocation8 + $0x2ff8] sm:$0xff] }
 0x868   :  { %15645 = vmatpush1.bf16.msra.mxu0 %v17752_v45  ;;  %v18201_v36 = vcombine.high %v2331_v44, %v2339_v12  ;;  %v2059_v13 = vld [vmem:[#allocation8 + $0x2738] sm:$0xff]  ;;  %v18200_v2 = vcombine.low %v2331_v44, %v2339_v12 }
 0x869   :  { %15686 = vmatpush1.bf16.msra.mxu1 %v18008_v31  ;;  %15646 = vmatprep.subr.bf16.mxu0 %v17737_v14  ;;  %v2067_v35 = vld [vmem:[#allocation8 + $0x2778] sm:$0xff] }
 0x86a   :  { %15687 = vmatprep.subr.bf16.mxu1 %v17993_v26  ;;  %v2315_v28 = vld [vmem:[#allocation8 + $0x2f38] sm:$0xff]  ;;  %v17929_v37 = vcombine.high %v2059_v13, %v2067_v35  ;;  %v17928_v51 = vcombine.low %v2059_v13, %v2067_v35 }
 0x86b   :  { %v2323_v10 = vld [vmem:[#allocation8 + $0x2f78] sm:$0xff] }
 0x86c   :  { %15647 = vmatpush1.bf16.msra.mxu0 %v17736_v55  ;;  %v18185_v7 = vcombine.high %v2315_v28, %v2323_v10  ;;  %v2043_v21 = vld [vmem:[#allocation8 + $0x26b8] sm:$0xff]  ;;  %v18184_v62 = vcombine.low %v2315_v28, %v2323_v10 }
 0x86d   :  { %15688 = vmatpush1.bf16.msra.mxu1 %v17992_v30  ;;  %15648 = vmatprep.subr.bf16.mxu0 %v17721_v47  ;;  %v2051_v4 = vld [vmem:[#allocation8 + $0x26f8] sm:$0xff] }
 0x86e   :  { %15689 = vmatprep.subr.bf16.mxu1 %v17977_v48  ;;  %v2299_v59 = vld [vmem:[#allocation8 + $0x2eb8] sm:$0xff]  ;;  %v17913_v45 = vcombine.high %v2043_v21, %v2051_v4  ;;  %v17912_v49 = vcombine.low %v2043_v21, %v2051_v4 }
 0x86f   :  { %v2307_v24 = vld [vmem:[#allocation8 + $0x2ef8] sm:$0xff] }
 0x870   :  { %15649 = vmatpush1.bf16.msra.mxu0 %v17720_v22  ;;  %v18169_v31 = vcombine.high %v2299_v59, %v2307_v24  ;;  %v2027_v14 = vld [vmem:[#allocation8 + $0x2638] sm:$0xff]  ;;  %v18168_v29 = vcombine.low %v2299_v59, %v2307_v24 }
 0x871   :  { %15690 = vmatpush1.bf16.msra.mxu1 %v17976_v58  ;;  %15650 = vmatprep.subr.bf16.mxu0 %v17705_v46  ;;  %v2035_v26 = vld [vmem:[#allocation8 + $0x2678] sm:$0xff] }
 0x872   :  { %15691 = vmatprep.subr.bf16.mxu1 %v17961_v53  ;;  %v2283_v60 = vld [vmem:[#allocation8 + $0x2e38] sm:$0xff]  ;;  %v17897_v55 = vcombine.high %v2027_v14, %v2035_v26  ;;  %v17896_v32 = vcombine.low %v2027_v14, %v2035_v26 }
 0x873   :  { %v2291_v63 = vld [vmem:[#allocation8 + $0x2e78] sm:$0xff] }
 0x874   :  { %15651 = vmatpush1.bf16.msra.mxu0 %v17704_v8  ;;  %v18153_v30 = vcombine.high %v2283_v60, %v2291_v63  ;;  %v2011_v47 = vld [vmem:[#allocation8 + $0x25b8] sm:$0xff]  ;;  %v18152_v6 = vcombine.low %v2283_v60, %v2291_v63 }
 0x875   :  { %15692 = vmatpush1.bf16.msra.mxu1 %v17960_v0  ;;  %15652 = vmatprep.subr.bf16.mxu0 %v17945_v20  ;;  %v2019_v48 = vld [vmem:[#allocation8 + $0x25f8] sm:$0xff] }
 0x876   :  { %15693 = vmatprep.subr.bf16.mxu1 %v18201_v36  ;;  %v2267_v18 = vld [vmem:[#allocation8 + $0x2db8] sm:$0xff]  ;;  %v17881_v22 = vcombine.high %v2011_v47, %v2019_v48  ;;  %v17880_v44 = vcombine.low %v2011_v47, %v2019_v48 }
 0x877   :  { %v2275_v57 = vld [vmem:[#allocation8 + $0x2df8] sm:$0xff] }
 0x878   :  { %15653 = vmatpush2.bf16.msra.mxu0 %v17944_v54  ;;  %v18137_v58 = vcombine.high %v2267_v18, %v2275_v57  ;;  %v1995_v46 = vld [vmem:[#allocation8 + $0x2538] sm:$0xff]  ;;  %v18136_v12 = vcombine.low %v2267_v18, %v2275_v57 }
 0x879   :  { %15694 = vmatpush2.bf16.msra.mxu1 %v18200_v2  ;;  %15654 = vmatprep.subr.bf16.mxu0 %v17929_v37  ;;  %v2003_v53 = vld [vmem:[#allocation8 + $0x2578] sm:$0xff] }
 0x87a   :  { %15695 = vmatprep.subr.bf16.mxu1 %v18185_v7  ;;  %v2251_v1 = vld [vmem:[#allocation8 + $0x2d38] sm:$0xff]  ;;  %v17865_v8 = vcombine.high %v1995_v46, %v2003_v53  ;;  %v17864_v28 = vcombine.low %v1995_v46, %v2003_v53 }
 0x87b   :  { %v2259_v39 = vld [vmem:[#allocation8 + $0x2d78] sm:$0xff] }
 0x87c   :  { %15655 = vmatpush2.bf16.msra.mxu0 %v17928_v51  ;;  %v18121_v0 = vcombine.high %v2251_v1, %v2259_v39  ;;  %v1979_v20 = vld [vmem:[#allocation8 + $0x24b8] sm:$0xff]  ;;  %v18120_v10 = vcombine.low %v2251_v1, %v2259_v39 }
 0x87d   :  { %15696 = vmatpush2.bf16.msra.mxu1 %v18184_v62  ;;  %15656 = vmatprep.subr.bf16.mxu0 %v17913_v45  ;;  %v1987_v36 = vld [vmem:[#allocation8 + $0x24f8] sm:$0xff] }
 0x87e   :  { %15697 = vmatprep.subr.bf16.mxu1 %v18169_v31  ;;  %v2235_v13 = vld [vmem:[#allocation8 + $0x2cb8] sm:$0xff]  ;;  %v17849_v54 = vcombine.high %v1979_v20, %v1987_v36  ;;  %v17848_v59 = vcombine.low %v1979_v20, %v1987_v36 }
 0x87f   :  { %v2243_v35 = vld [vmem:[#allocation8 + $0x2cf8] sm:$0xff] }
 0x880   :  { %15657 = vmatpush2.bf16.msra.mxu0 %v17912_v49  ;;  %v18105_v2 = vcombine.high %v2235_v13, %v2243_v35  ;;  %v1963_v37 = vld [vmem:[#allocation8 + $0x2438] sm:$0xff]  ;;  %v18104_v24 = vcombine.low %v2235_v13, %v2243_v35 }
 0x881   :  { %15698 = vmatpush2.bf16.msra.mxu1 %v18168_v29  ;;  %15658 = vmatprep.subr.bf16.mxu0 %v17897_v55  ;;  %v1971_v7 = vld [vmem:[#allocation8 + $0x2478] sm:$0xff] }
 0x882   :  { %15699 = vmatprep.subr.bf16.mxu1 %v18153_v30  ;;  %v2219_v21 = vld [vmem:[#allocation8 + $0x2c38] sm:$0xff]  ;;  %v17833_v51 = vcombine.high %v1963_v37, %v1971_v7  ;;  %v17832_v60 = vcombine.low %v1963_v37, %v1971_v7 }
 0x883   :  { %v2227_v4 = vld [vmem:[#allocation8 + $0x2c78] sm:$0xff] }
 0x884   :  { %15659 = vmatpush2.bf16.msra.mxu0 %v17896_v32  ;;  %v18089_v62 = vcombine.high %v2219_v21, %v2227_v4  ;;  %v2459_v45 = vld [vmem:[#allocation8 + $0x33b8] sm:$0xff]  ;;  %v18088_v63 = vcombine.low %v2219_v21, %v2227_v4 }
 0x885   :  { %15700 = vmatpush2.bf16.msra.mxu1 %v18152_v6  ;;  %15660 = vmatprep.subr.bf16.mxu0 %v17881_v22  ;;  %v2467_v31 = vld [vmem:[#allocation8 + $0x33f8] sm:$0xff] }
 0x886   :  { %15701 = vmatprep.subr.bf16.mxu1 %v18137_v58  ;;  %v2715_v14 = vld [vmem:[#allocation8 + $0x3bb8] sm:$0xff]  ;;  %v18329_v49 = vcombine.high %v2459_v45, %v2467_v31  ;;  %v18328_v47 = vcombine.low %v2459_v45, %v2467_v31 }
 0x887   :  { %v2723_v26 = vld [vmem:[#allocation8 + $0x3bf8] sm:$0xff] }
 0x888   :  { %15661 = vmatpush2.bf16.msra.mxu0 %v17880_v44  ;;  %v18585_v29 = vcombine.high %v2715_v14, %v2723_v26  ;;  %v2443_v55 = vld [vmem:[#allocation8 + $0x3338] sm:$0xff]  ;;  %v18584_v57 = vcombine.low %v2715_v14, %v2723_v26 }
 0x889   :  { %15702 = vmatpush2.bf16.msra.mxu1 %v18136_v12  ;;  %15662 = vmatprep.subr.bf16.mxu0 %v17865_v8  ;;  %v2451_v30 = vld [vmem:[#allocation8 + $0x3378] sm:$0xff] }
 0x88a   :  { %15703 = vmatprep.subr.bf16.mxu1 %v18121_v0  ;;  %v2699_v48 = vld [vmem:[#allocation8 + $0x3b38] sm:$0xff]  ;;  %v18313_v32 = vcombine.high %v2443_v55, %v2451_v30  ;;  %v18312_v12 = vcombine.low %v2443_v55, %v2451_v30 }
 0x88b   :  { %v2707_v18 = vld [vmem:[#allocation8 + $0x3b78] sm:$0xff] }
 0x88c   :  { %15663 = vmatpush2.bf16.msra.mxu0 %v17864_v28  ;;  %v2427_v6 = vld [vmem:[#allocation8 + $0x32b8] sm:$0xff]  ;;  %v18569_v46 = vcombine.high %v2699_v48, %v2707_v18  ;;  %v18568_v0 = vcombine.low %v2699_v48, %v2707_v18 }
 0x88d   :  { %15704 = vmatpush2.bf16.msra.mxu1 %v18120_v10  ;;  %15664 = vmatprep.subr.bf16.mxu0 %v17849_v54  ;;  %v2435_v22 = vld [vmem:[#allocation8 + $0x32f8] sm:$0xff] }
 0x88e   :  { %15705 = vmatprep.subr.bf16.mxu1 %v18105_v2  ;;  %v2683_v53 = vld [vmem:[#allocation8 + $0x3ab8] sm:$0xff]  ;;  %v18297_v20 = vcombine.high %v2427_v6, %v2435_v22  ;;  %v18296_v37 = vcombine.low %v2427_v6, %v2435_v22 }
 0x88f   :  { %v2691_v1 = vld [vmem:[#allocation8 + $0x3af8] sm:$0xff] }
 0x890   :  { %15665 = vmatpush2.bf16.msra.mxu0 %v17848_v59  ;;  %v2411_v35 = vld [vmem:[#allocation8 + $0x3238] sm:$0xff] }
 0x891   :  { %15706 = vmatpush2.bf16.msra.mxu1 %v18104_v24  ;;  %15666 = vmatprep.subr.bf16.mxu0 %v17833_v51  ;;  %v2419_v28 = vld [vmem:[#allocation8 + $0x3278] sm:$0xff] }
 0x892   :  { %15707 = vmatprep.subr.bf16.mxu1 %v18089_v62  ;;  %v2667_v10 = vld [vmem:[#allocation8 + $0x3a38] sm:$0xff]  ;;  %v18281_v21 = vcombine.high %v2411_v35, %v2419_v28  ;;  %v18280_v45 = vcombine.low %v2411_v35, %v2419_v28 }
 0x893   :  { %v2675_v54 = vld [vmem:[#allocation8 + $0x3a78] sm:$0xff] }
 0x894   :  { %15667 = vmatpush2.bf16.msra.mxu0 %v17832_v60  ;;  %v18537_v4 = vcombine.high %v2667_v10, %v2675_v54  ;;  %v2395_v59 = vld [vmem:[#allocation8 + $0x31b8] sm:$0xff]  ;;  %v18536_v31 = vcombine.low %v2667_v10, %v2675_v54 }
 0x895   :  { %15708 = vmatpush2.bf16.msra.mxu1 %v18088_v63  ;;  %15718 = vmatprep.subr.bf16.mxu0 %v18329_v49  ;;  %v2403_v24 = vld [vmem:[#allocation8 + $0x31f8] sm:$0xff] }
 0x896   :  { %15759 = vmatprep.subr.bf16.mxu1 %v18585_v29  ;;  %v2651_v51 = vld [vmem:[#allocation8 + $0x39b8] sm:$0xff]  ;;  %v18265_v14 = vcombine.high %v2395_v59, %v2403_v24  ;;  %v18264_v55 = vcombine.low %v2395_v59, %v2403_v24 }
 0x897   :  { %v15424_v58 = vpop.f32.mrf.mxu0  ;;  %15669 = vmatmul.mubr.bf16.vlgmr.msra.gmra.mxu0 %v19359_v34  ;;  %v2659_v62 = vld [vmem:[#allocation8 + $0x39f8] sm:$0xff] }
 0x898   :  { %v15425_v39 = vadd.f32 %v15424_v58, %v19653_v11  ;;  %v15465_v44 = vpop.f32.mrf.mxu1  ;;  %15710 = vmatmul.mubr.bf16.vlgmr.msra.gmra.mxu1 %v19357_v25  ;;  %15719 = vmatpush1.bf16.msra.mxu0 %v18328_v47  ;;  %v18553_v11 = vcombine.high %v2683_v53, %v2691_v1  ;;  %v18521_v26 = vcombine.high %v2651_v51, %v2659_v62  ;;  %v2379_v60 = vld [vmem:[#allocation8 + $0x3138] sm:$0xff] }
 0x899   :  { %15750 = vmatprep.mubr.bf16.mxu0 %v19361_v41  ;;  %15760 = vmatpush1.bf16.msra.mxu1 %v18584_v57  ;;  %v15426_v8 = vpop.f32.mrf.mxu0  ;;  %v2387_v63 = vld [vmem:[#allocation8 + $0x3178] sm:$0xff]  ;;  %v18520_v30 = vcombine.low %v2651_v51, %v2659_v62 }
 0x89a   :  { %v19663_v36 = vadd.f32 %v15465_v44, %v15425_v39  ;;  %15791 = vmatprep.mubr.bf16.mxu1 %v19363_v42  ;;  %v15427_v34 = vadd.f32 %v15426_v8, %v19657_v19  ;;  %v15467_v13 = vpop.f32.mrf.mxu1  ;;  %15720 = vmatprep.subr.bf16.mxu0 %v18313_v32  ;;  %v18552_v42 = vcombine.low %v2683_v53, %v2691_v1  ;;  %v2635_v49 = vld [vmem:[#allocation8 + $0x3938] sm:$0xff] }
 0x89b   :  { %v15428_v25 = vpop.f32.mrf.mxu0  ;;  %15761 = vmatprep.subr.bf16.mxu1 %v18569_v46  ;;  %v2643_v29 = vld [vmem:[#allocation8 + $0x3978] sm:$0xff]  ;;  %v18249_v47 = vcombine.high %v2379_v60, %v2387_v63  ;;  %v18248_v22 = vcombine.low %v2379_v60, %v2387_v63 }
 0x89c   :  { %v19667_v41 = vadd.f32 %v15467_v13, %v15427_v34  ;;  %v15469_v2 = vpop.f32.mrf.mxu1  ;;  %15721 = vmatpush1.bf16.msra.mxu0 %v18312_v12  ;;  %v18505_v48 = vcombine.high %v2635_v49, %v2643_v29  ;;  %v2363_v18 = vld [vmem:[#allocation8 + $0x30b8] sm:$0xff]  ;;  %v18504_v58 = vcombine.low %v2635_v49, %v2643_v29 }
 0x89d   :  { %15762 = vmatpush1.bf16.msra.mxu1 %v18568_v0  ;;  %v15429_v7 = vpop.f32.mrf.mxu0  ;;  %15722 = vmatprep.subr.bf16.mxu0 %v18297_v20  ;;  %v2371_v57 = vld [vmem:[#allocation8 + $0x30f8] sm:$0xff] }
 0x89e   :  { %v15470_v19 = vpop.f32.mrf.mxu1  ;;  %15763 = vmatprep.subr.bf16.mxu1 %v18553_v11  ;;  %v2619_v32 = vld [vmem:[#allocation8 + $0x38b8] sm:$0xff]  ;;  %v18233_v46 = vcombine.high %v2363_v18, %v2371_v57  ;;  %v18232_v8 = vcombine.low %v2363_v18, %v2371_v57 }
 0x89f   :  { %v2627_v6 = vld [vmem:[#allocation8 + $0x38f8] sm:$0xff] }
 0x8a0   :  { %15723 = vmatpush1.bf16.msra.mxu0 %v18296_v37  ;;  %v18489_v53 = vcombine.high %v2619_v32, %v2627_v6  ;;  %v2347_v1 = vld [vmem:[#allocation8 + $0x3038] sm:$0xff]  ;;  %v18488_v0 = vcombine.low %v2619_v32, %v2627_v6 }
 0x8a1   :  { %15764 = vmatpush1.bf16.msra.mxu1 %v18552_v42  ;;  %15724 = vmatprep.subr.bf16.mxu0 %v18281_v21  ;;  %v2355_v39 = vld [vmem:[#allocation8 + $0x3078] sm:$0xff] }
 0x8a2   :  { %15765 = vmatprep.subr.bf16.mxu1 %v18537_v4  ;;  %v2603_v44 = vld [vmem:[#allocation8 + $0x3838] sm:$0xff]  ;;  %v18217_v20 = vcombine.high %v2347_v1, %v2355_v39  ;;  %v18216_v25 = vcombine.low %v2347_v1, %v2355_v39 }
 0x8a3   :  { %v2611_v12 = vld [vmem:[#allocation8 + $0x3878] sm:$0xff] }
 0x8a4   :  { %15725 = vmatpush1.bf16.msra.mxu0 %v18280_v45  ;;  %v18473_v34 = vcombine.high %v2603_v44, %v2611_v12  ;;  %v2587_v13 = vld [vmem:[#allocation8 + $0x37b8] sm:$0xff]  ;;  %v18472_v10 = vcombine.low %v2603_v44, %v2611_v12 }
 0x8a5   :  { %15766 = vmatpush1.bf16.msra.mxu1 %v18536_v31  ;;  %15726 = vmatprep.subr.bf16.mxu0 %v18265_v14  ;;  %v2595_v11 = vld [vmem:[#allocation8 + $0x37f8] sm:$0xff] }
 0x8a6   :  { %15767 = vmatprep.subr.bf16.mxu1 %v18521_v26  ;;  %v2843_v35 = vld [vmem:[#allocation8 + $0x3fb8] sm:$0xff]  ;;  %v18457_v54 = vcombine.high %v2587_v13, %v2595_v11  ;;  %v18456_v19 = vcombine.low %v2587_v13, %v2595_v11 }
 0x8a7   :  { %v2851_v28 = vld [vmem:[#allocation8 + $0x3ff8] sm:$0xff] }
 0x8a8   :  { %15727 = vmatpush1.bf16.msra.mxu0 %v18264_v55  ;;  %v18713_v2 = vcombine.high %v2843_v35, %v2851_v28  ;;  %v2571_v37 = vld [vmem:[#allocation8 + $0x3738] sm:$0xff]  ;;  %v18712_v4 = vcombine.low %v2843_v35, %v2851_v28 }
 0x8a9   :  { %15768 = vmatpush1.bf16.msra.mxu1 %v18520_v30  ;;  %15728 = vmatprep.subr.bf16.mxu0 %v18249_v47  ;;  %v2579_v7 = vld [vmem:[#allocation8 + $0x3778] sm:$0xff] }
 0x8aa   :  { %15769 = vmatprep.subr.bf16.mxu1 %v18505_v48  ;;  %v2827_v42 = vld [vmem:[#allocation8 + $0x3f38] sm:$0xff]  ;;  %v18441_v59 = vcombine.high %v2571_v37, %v2579_v7  ;;  %v18440_v14 = vcombine.low %v2571_v37, %v2579_v7 }
 0x8ab   :  { %v2835_v21 = vld [vmem:[#allocation8 + $0x3f78] sm:$0xff] }
 0x8ac   :  { %15729 = vmatpush1.bf16.msra.mxu0 %v18248_v22  ;;  %v18697_v24 = vcombine.high %v2827_v42, %v2835_v21  ;;  %v2555_v51 = vld [vmem:[#allocation8 + $0x36b8] sm:$0xff]  ;;  %v18696_v26 = vcombine.low %v2827_v42, %v2835_v21 }
 0x8ad   :  { %15770 = vmatpush1.bf16.msra.mxu1 %v18504_v58  ;;  %15730 = vmatprep.subr.bf16.mxu0 %v18233_v46  ;;  %v2563_v62 = vld [vmem:[#allocation8 + $0x36f8] sm:$0xff] }
 0x8ae   :  { %15771 = vmatprep.subr.bf16.mxu1 %v18489_v53  ;;  %v2811_v45 = vld [vmem:[#allocation8 + $0x3eb8] sm:$0xff]  ;;  %v18425_v60 = vcombine.high %v2555_v51, %v2563_v62  ;;  %v18424_v47 = vcombine.low %v2555_v51, %v2563_v62 }
 0x8af   :  { %v2819_v31 = vld [vmem:[#allocation8 + $0x3ef8] sm:$0xff] }
 0x8b0   :  { %15731 = vmatpush1.bf16.msra.mxu0 %v18232_v8  ;;  %v18681_v63 = vcombine.high %v2811_v45, %v2819_v31  ;;  %v2539_v49 = vld [vmem:[#allocation8 + $0x3638] sm:$0xff]  ;;  %v18680_v48 = vcombine.low %v2811_v45, %v2819_v31 }
 0x8b1   :  { %15772 = vmatpush1.bf16.msra.mxu1 %v18488_v0  ;;  %15732 = vmatprep.subr.bf16.mxu0 %v18217_v20  ;;  %v2547_v29 = vld [vmem:[#allocation8 + $0x3678] sm:$0xff] }
 0x8b2   :  { %15773 = vmatprep.subr.bf16.mxu1 %v18473_v34  ;;  %v2795_v55 = vld [vmem:[#allocation8 + $0x3e38] sm:$0xff]  ;;  %v18409_v18 = vcombine.high %v2539_v49, %v2547_v29  ;;  %v18408_v46 = vcombine.low %v2539_v49, %v2547_v29  ;;  %v15831_v49 = vld [vmem:[%s20476_s5 + $0x78] sm:$0xff] }
 0x8b3   :  { %v2803_v30 = vld [vmem:[#allocation8 + $0x3e78] sm:$0xff]  ;;  %v15863_v29 = vld [vmem:[%s20476_s5 + $0x178] sm:$0xff] }
 0x8b4   :  { %15733 = vmatpush1.bf16.msra.mxu0 %v18216_v25  ;;  %v18665_v57 = vcombine.high %v2795_v55, %v2803_v30  ;;  %v2523_v32 = vld [vmem:[#allocation8 + $0x35b8] sm:$0xff]  ;;  %v18664_v53 = vcombine.low %v2795_v55, %v2803_v30  ;;  %v15801_v30 = vmax.f32 %v19417_v33, 0.0 }
 0x8b5   :  { %15774 = vmatpush1.bf16.msra.mxu1 %v18472_v10  ;;  %15734 = vmatprep.subr.bf16.mxu0 %v18457_v54  ;;  %v2531_v6 = vld [vmem:[#allocation8 + $0x35f8] sm:$0xff] }
 0x8b6   :  { %15775 = vmatprep.subr.bf16.mxu1 %v18713_v2  ;;  %v2779_v22 = vld [vmem:[#allocation8 + $0x3db8] sm:$0xff]  ;;  %v18393_v1 = vcombine.high %v2523_v32, %v2531_v6  ;;  %v18392_v20 = vcombine.low %v2523_v32, %v2531_v6 }
 0x8b7   :  { %v2787_v58 = vld [vmem:[#allocation8 + $0x3df8] sm:$0xff] }
 0x8b8   :  { %15735 = vmatpush2.bf16.msra.mxu0 %v18456_v19  ;;  %v18649_v39 = vcombine.high %v2779_v22, %v2787_v58  ;;  %v2507_v44 = vld [vmem:[#allocation8 + $0x3538] sm:$0xff]  ;;  %v18648_v34 = vcombine.low %v2779_v22, %v2787_v58  ;;  %v15877_v58 = vld [vmem:[%s20476_s5 + $0x1e8] sm:$0xff] }
 0x8b9   :  { %15776 = vmatpush2.bf16.msra.mxu1 %v18712_v4  ;;  %15736 = vmatprep.subr.bf16.mxu0 %v18441_v59  ;;  %v2515_v12 = vld [vmem:[#allocation8 + $0x3578] sm:$0xff] }
 0x8ba   :  { %15777 = vmatprep.subr.bf16.mxu1 %v18697_v24  ;;  %v2763_v8 = vld [vmem:[#allocation8 + $0x3d38] sm:$0xff]  ;;  %v18377_v13 = vcombine.high %v2507_v44, %v2515_v12  ;;  %v18376_v54 = vcombine.low %v2507_v44, %v2515_v12 }
 0x8bb   :  { %v2771_v0 = vld [vmem:[#allocation8 + $0x3d78] sm:$0xff] }
 0x8bc   :  { %15737 = vmatpush2.bf16.msra.mxu0 %v18440_v14  ;;  %v18633_v11 = vcombine.high %v2763_v8, %v2771_v0  ;;  %v2491_v35 = vld [vmem:[#allocation8 + $0x34b8] sm:$0xff]  ;;  %v18632_v2 = vcombine.low %v2763_v8, %v2771_v0  ;;  %v15847_v14 = vld [vmem:[%s20476_s5 + $0xf8] sm:$0xff]  ;;  %v15876_v8 = vld [vmem:[%s20476_s5 + $0x1e0] sm:$0xff] }
 0x8bd   :  { %15778 = vmatpush2.bf16.msra.mxu1 %v18696_v26  ;;  %15738 = vmatprep.subr.bf16.mxu0 %v18425_v60  ;;  %v2499_v28 = vld [vmem:[#allocation8 + $0x34f8] sm:$0xff]  ;;  %v15879_v26 = vld [vmem:[%s20476_s5 + $0x1f8] sm:$0xff]  ;;  %v19010_v60 = vld [vmem:[#allocation10 + $0x8] sm:$0xff] }
 0x8be   :  { %15779 = vmatprep.subr.bf16.mxu1 %v18681_v63  ;;  %v2747_v25 = vld [vmem:[#allocation8 + $0x3cb8] sm:$0xff]  ;;  %v18361_v37 = vcombine.high %v2491_v35, %v2499_v28  ;;  %v18360_v59 = vcombine.low %v2491_v35, %v2499_v28  ;;  %v2915_v63 = vrot.slane %v19010_v60, %v19310_v3  ;;  %v2919_v55 = vrot.slane %v19010_v60, %v19281_v38  ;;  %v15828_v0 = vld [vmem:[%s20476_s5 + $0x60] sm:$0xff]  ;;  %v15875_v35 = vld [vmem:[%s20476_s5 + $0x1d8] sm:$0xff] }
 0x8bf   :  { %v2755_v10 = vld [vmem:[#allocation8 + $0x3cf8] sm:$0xff]  ;;  %v15827_v28 = vld [vmem:[%s20476_s5 + $0x58] sm:$0xff] }
 0x8c0   :  { %15739 = vmatpush2.bf16.msra.mxu0 %v18424_v47  ;;  %v18617_v7 = vcombine.high %v2747_v25, %v2755_v10  ;;  %v2475_v42 = vld [vmem:[#allocation8 + $0x3438] sm:$0xff]  ;;  %v18616_v24 = vcombine.low %v2747_v25, %v2755_v10  ;;  %v15859_v25 = vld [vmem:[%s20476_s5 + $0x158] sm:$0xff] }
 0x8c1   :  { %15780 = vmatpush2.bf16.msra.mxu1 %v18680_v48  ;;  %15740 = vmatprep.subr.bf16.mxu0 %v18409_v18  ;;  %v2483_v21 = vld [vmem:[#allocation8 + $0x3478] sm:$0xff]  ;;  %v15803_v48 = vmax.f32 %v19467_v61, 0.0 }
 0x8c2   :  { %15781 = vmatprep.subr.bf16.mxu1 %v18665_v57  ;;  %v2731_v19 = vld [vmem:[#allocation8 + $0x3c38] sm:$0xff]  ;;  %v18345_v51 = vcombine.high %v2475_v42, %v2483_v21  ;;  %v18344_v45 = vcombine.low %v2475_v42, %v2483_v21  ;;  %v15873_v42 = vld [vmem:[%s20476_s5 + $0x1c8] sm:$0xff] }
 0x8c3   :  { %v2739_v4 = vld [vmem:[#allocation8 + $0x3c78] sm:$0xff]  ;;  %v15825_v21 = vld [vmem:[%s20476_s5 + $0x48] sm:$0xff] }
 0x8c4   :  { %15741 = vmatpush2.bf16.msra.mxu0 %v18408_v46  ;;  %v18601_v62 = vcombine.high %v2731_v19, %v2739_v4  ;;  %v18600_v31 = vcombine.low %v2731_v19, %v2739_v4  ;;  %v15846_v3 = vld [vmem:[%s20476_s5 + $0xf0] sm:$0xff]  ;;  %v15829_v46 = vld [vmem:[%s20476_s5 + $0x68] sm:$0xff]  ;;  %v15840_v4 = vld [vmem:[%s20476_s5 + $0xc0] sm:$0xff] }
 0x8c5   :  { %15782 = vmatpush2.bf16.msra.mxu1 %v18664_v53  ;;  %15742 = vmatprep.subr.bf16.mxu0 %v18393_v1  ;;  %v15878_v38 = vld [vmem:[%s20476_s5 + $0x1f0] sm:$0xff]  ;;  %v15861_v1 = vld [vmem:[%s20476_s5 + $0x168] sm:$0xff] }
 0x8c6   :  { %15783 = vmatprep.subr.bf16.mxu1 %v18649_v39  ;;  %v15830_v33 = vld [vmem:[%s20476_s5 + $0x70] sm:$0xff]  ;;  %v15844_v39 = vld [vmem:[%s20476_s5 + $0xe0] sm:$0xff]  ;;  %v15857_v19 = vld [vmem:[%s20476_s5 + $0x148] sm:$0xff] }
 0x8c7   :  { %v15862_v61 = vld [vmem:[%s20476_s5 + $0x170] sm:$0xff] }
 0x8c8   :  { %15743 = vmatpush2.bf16.msra.mxu0 %v18392_v20  ;;  %v15842_v10 = vld [vmem:[%s20476_s5 + $0xd0] sm:$0xff] }
 0x8c9   :  { %15784 = vmatpush2.bf16.msra.mxu1 %v18648_v34  ;;  %15744 = vmatprep.subr.bf16.mxu0 %v18377_v13  ;;  %v15860_v34 = vld [vmem:[%s20476_s5 + $0x160] sm:$0xff]  ;;  %v15843_v13 = vld [vmem:[%s20476_s5 + $0xd8] sm:$0xff]  ;;  %v15870_v60 = vld [vmem:[%s20476_s5 + $0x1b0] sm:$0xff] }
 0x8ca   :  { %15785 = vmatprep.subr.bf16.mxu1 %v18633_v11 }
 0x8cc   :  { %15745 = vmatpush2.bf16.msra.mxu0 %v18376_v54  ;;  %v15874_v54 = vld [vmem:[%s20476_s5 + $0x1d0] sm:$0xff] }
 0x8cd   :  { %15786 = vmatpush2.bf16.msra.mxu1 %v18632_v2  ;;  %15746 = vmatprep.subr.bf16.mxu0 %v18361_v37  ;;  %v15826_v2 = vld [vmem:[%s20476_s5 + $0x50] sm:$0xff] }
 0x8ce   :  { %15787 = vmatprep.subr.bf16.mxu1 %v18617_v7  ;;  %v15858_v37 = vld [vmem:[%s20476_s5 + $0x150] sm:$0xff]  ;;  %v15841_v7 = vld [vmem:[%s20476_s5 + $0xc8] sm:$0xff] }
 0x8d0   :  { %15747 = vmatpush2.bf16.msra.mxu0 %v18360_v59  ;;  %v15872_v59 = vld [vmem:[%s20476_s5 + $0x1c0] sm:$0xff] }
 0x8d1   :  { %15788 = vmatpush2.bf16.msra.mxu1 %v18616_v24  ;;  %15748 = vmatprep.subr.bf16.mxu0 %v18345_v51  ;;  %v15824_v24 = vld [vmem:[%s20476_s5 + $0x40] sm:$0xff] }
 0x8d2   :  { %15789 = vmatprep.subr.bf16.mxu1 %v18601_v62  ;;  %v15856_v51 = vld [vmem:[%s20476_s5 + $0x140] sm:$0xff]  ;;  %v15839_v62 = vld [vmem:[%s20476_s5 + $0xb8] sm:$0xff] }
 0x8d4   :  { %15749 = vmatpush2.bf16.msra.mxu0 %v18344_v45  ;;  %v15871_v45 = vld [vmem:[%s20476_s5 + $0x1b8] sm:$0xff] }
 0x8d5   :  { %15790 = vmatpush2.bf16.msra.mxu1 %v18600_v31  ;;  %18715 = vmatprep.subr.mxu0 %v15847_v14  ;;  %v15823_v31 = vld [vmem:[%s20476_s5 + $0x38] sm:$0xff] }
 0x8d6   :  { %18750 = vmatprep.subr.mxu1 %v15879_v26  ;;  %v15855_v14 = vld [vmem:[%s20476_s5 + $0x138] sm:$0xff]  ;;  %v15838_v26 = vld [vmem:[%s20476_s5 + $0xb0] sm:$0xff] }
 0x8d7   :  { %v15506_v47 = vpop.f32.mrf.mxu0  ;;  %15751 = vmatmul.mubr.bf16.vlgmr.msra.gmra.mxu0 %v19376_v52 }
 0x8d8   :  { %v15507_v18 = vadd.f32 %v15506_v47, %v2915_v63  ;;  %v15547_v57 = vpop.f32.mrf.mxu1  ;;  %15792 = vmatmul.mubr.bf16.vlgmr.msra.gmra.mxu1 %v19378_v56  ;;  %18716 = vmatpush3.msra.mxu0 %v15831_v49  ;;  %v15845_v56 = vld [vmem:[%s20476_s5 + $0xe8] sm:$0xff]  ;;  %v15822_v63 = vld [vmem:[%s20476_s5 + $0x30] sm:$0xff] }
 0x8d9   :  { %16143 = vmatprep.mubr.f32.mxu0 %v15801_v30  ;;  %18751 = vmatpush3.msra.mxu1 %v15863_v29  ;;  %v15508_v52 = vpop.f32.mrf.mxu0  ;;  %v15854_v49 = vld [vmem:[%s20476_s5 + $0x130] sm:$0xff]  ;;  %v15837_v29 = vld [vmem:[%s20476_s5 + $0xa8] sm:$0xff] }
 0x8da   :  { %v19702_v32 = vadd.f32 %v15547_v57, %v15507_v18  ;;  %16213 = vmatprep.mubr.f32.mxu1 %v15803_v48  ;;  %v15509_v6 = vadd.f32 %v15508_v52, %v2919_v55  ;;  %v15549_v22 = vpop.f32.mrf.mxu1  ;;  %18717 = vmatprep.subr.mxu0 %v15846_v3  ;;  %v15869_v55 = vld [vmem:[%s20476_s5 + $0x1a8] sm:$0xff]  ;;  %v15836_v3 = vld [vmem:[%s20476_s5 + $0xa0] sm:$0xff]  ;;  %v15819_v52 = vld [vmem:[%s20476_s5 + $0x18] sm:$0xff] }
 0x8db   :  { %18752 = vmatprep.subr.mxu1 %v15878_v38  ;;  %18718 = vmatpush3.msra.mxu0 %v15830_v33  ;;  %v15510_v53 = vpop.f32.mrf.mxu0  ;;  %v15821_v30 = vld [vmem:[%s20476_s5 + $0x28] sm:$0xff]  ;;  %v15868_v48 = vld [vmem:[%s20476_s5 + $0x1a0] sm:$0xff]  ;;  %v15835_v38 = vld [vmem:[%s20476_s5 + $0x98] sm:$0xff] }
 0x8dc   :  { %v19716_v44 = vadd.f32 %v15549_v22, %v15509_v6  ;;  %18753 = vmatpush3.msra.mxu1 %v15862_v61  ;;  %v15551_v12 = vpop.f32.mrf.mxu1  ;;  %18719 = vmatprep.subr.mxu0 %v15845_v56  ;;  %v15853_v47 = vld [vmem:[%s20476_s5 + $0x128] sm:$0xff]  ;;  %v15820_v18 = vld [vmem:[%s20476_s5 + $0x20] sm:$0xff]  ;;  %v15867_v33 = vld [vmem:[%s20476_s5 + $0x198] sm:$0xff] }
 0x8dd   :  { %18754 = vmatprep.subr.mxu1 %v15877_v58  ;;  %18720 = vmatpush3.msra.mxu0 %v15829_v46  ;;  %v15511_v20 = vpop.f32.mrf.mxu0  ;;  %v15852_v57 = vld [vmem:[%s20476_s5 + $0x120] sm:$0xff]  ;;  %v15851_v61 = vld [vmem:[%s20476_s5 + $0x118] sm:$0xff]  ;;  %v15834_v56 = vld [vmem:[%s20476_s5 + $0x90] sm:$0xff] }
 0x8de   :  { %18755 = vmatpush3.msra.mxu1 %v15861_v1  ;;  %v15552_v11 = vpop.f32.mrf.mxu1  ;;  %18721 = vmatprep.subr.mxu0 %v15844_v39  ;;  %v15866_v6 = vld [vmem:[%s20476_s5 + $0x190] sm:$0xff]  ;;  %v15833_v46 = vld [vmem:[%s20476_s5 + $0x88] sm:$0xff]  ;;  %v15832_v12 = vld [vmem:[%s20476_s5 + $0x80] sm:$0xff] }
 0x8df   :  { %18756 = vmatprep.subr.mxu1 %v15876_v8  ;;  %18722 = vmatpush3.msra.mxu0 %v15828_v0  ;;  %v15818_v22 = vld [vmem:[%s20476_s5 + $0x10] sm:$0xff]  ;;  %v15865_v53 = vld [vmem:[%s20476_s5 + $0x188] sm:$0xff]  ;;  %v15864_v8 = vld [vmem:[%s20476_s5 + $0x180] sm:$0xff]  ;;  %v15802_v11 = vmax.f32 %v19463_v50, 0.0 }
 0x8e0   :  { %18757 = vmatpush3.msra.mxu1 %v15860_v34  ;;  %18723 = vmatprep.subr.mxu0 %v15843_v13  ;;  %v15850_v58 = vld [vmem:[%s20476_s5 + $0x110] sm:$0xff]  ;;  %v15817_v1 = vld [vmem:[%s20476_s5 + $0x8] sm:$0xff]  ;;  %v15816_v0 = vld [vmem:[%s20476_s5] sm:$0xff]  ;;  %v15800_v34 = vmax.f32 %v19413_v17, 0.0 }
 0x8e1   :  { %18758 = vmatprep.subr.mxu1 %v15875_v35  ;;  %18724 = vmatpush3.msra.mxu0 %v15827_v28  ;;  %v15849_v39 = vld [vmem:[%s20476_s5 + $0x108] sm:$0xff]  ;;  %v15848_v20 = vld [vmem:[%s20476_s5 + $0x100] sm:$0xff]  ;;  %v15911_v13 = vld [vmem:[%s20476_s5 + $0x2f8] sm:$0xff] }
 0x8e2   :  { %18759 = vmatpush3.msra.mxu1 %v15859_v25  ;;  %18725 = vmatprep.subr.mxu0 %v15842_v10  ;;  %v15943_v35 = vld [vmem:[%s20476_s5 + $0x3f8] sm:$0xff]  ;;  %v15805_v25 = vmax.f32 %v19507_v15, 0.0  ;;  %v15910_v50 = vld [vmem:[%s20476_s5 + $0x2f0] sm:$0xff]  ;;  %v15807_v10 = vmax.f32 %v19547_v43, 0.0  ;;  %v15909_v43 = vld [vmem:[%s20476_s5 + $0x2e8] sm:$0xff] }
 0x8e3   :  { %18760 = vmatprep.subr.mxu1 %v15874_v54  ;;  %18726 = vmatpush3.msra.mxu0 %v15826_v2  ;;  %v15895_v28 = vld [vmem:[%s20476_s5 + $0x278] sm:$0xff]  ;;  %v15942_v54 = vld [vmem:[%s20476_s5 + $0x3f0] sm:$0xff] }
 0x8e4   :  { %18761 = vmatpush3.msra.mxu1 %v15858_v37  ;;  %18727 = vmatprep.subr.mxu0 %v15841_v7  ;;  %v15927_v17 = vld [vmem:[%s20476_s5 + $0x378] sm:$0xff]  ;;  %v15894_v2 = vld [vmem:[%s20476_s5 + $0x270] sm:$0xff]  ;;  %v15941_v37 = vld [vmem:[%s20476_s5 + $0x3e8] sm:$0xff] }
 0x8e5   :  { %18762 = vmatprep.subr.mxu1 %v15873_v42  ;;  %18728 = vmatpush3.msra.mxu0 %v15825_v21  ;;  %v15926_v15 = vld [vmem:[%s20476_s5 + $0x370] sm:$0xff]  ;;  %v15893_v7 = vld [vmem:[%s20476_s5 + $0x268] sm:$0xff]  ;;  %v15908_v21 = vld [vmem:[%s20476_s5 + $0x2e0] sm:$0xff] }
 0x8e6   :  { %18763 = vmatpush3.msra.mxu1 %v15857_v19  ;;  %18729 = vmatprep.subr.mxu0 %v15840_v4  ;;  %v15925_v42 = vld [vmem:[%s20476_s5 + $0x368] sm:$0xff]  ;;  %v15940_v19 = vld [vmem:[%s20476_s5 + $0x3e0] sm:$0xff] }
 0x8e7   :  { %18764 = vmatprep.subr.mxu1 %v15872_v59  ;;  %18730 = vmatpush3.msra.mxu0 %v15824_v24  ;;  %v15892_v4 = vld [vmem:[%s20476_s5 + $0x260] sm:$0xff]  ;;  %v15907_v24 = vld [vmem:[%s20476_s5 + $0x2d8] sm:$0xff] }
 0x8e8   :  { %18765 = vmatpush3.msra.mxu1 %v15856_v51  ;;  %18731 = vmatprep.subr.mxu0 %v15839_v62  ;;  %v15924_v59 = vld [vmem:[%s20476_s5 + $0x360] sm:$0xff]  ;;  %v15939_v51 = vld [vmem:[%s20476_s5 + $0x3d8] sm:$0xff] }
 0x8e9   :  { %18766 = vmatprep.subr.mxu1 %v15871_v45  ;;  %18732 = vmatpush3.msra.mxu0 %v15823_v31  ;;  %v15891_v62 = vld [vmem:[%s20476_s5 + $0x258] sm:$0xff]  ;;  %v15906_v31 = vld [vmem:[%s20476_s5 + $0x2d0] sm:$0xff] }
 0x8ea   :  { %18767 = vmatpush3.msra.mxu1 %v15855_v14  ;;  %18733 = vmatprep.subr.mxu0 %v15838_v26  ;;  %v15923_v45 = vld [vmem:[%s20476_s5 + $0x358] sm:$0xff]  ;;  %v15938_v14 = vld [vmem:[%s20476_s5 + $0x3d0] sm:$0xff] }
 0x8eb   :  { %18768 = vmatprep.subr.mxu1 %v15870_v60  ;;  %18734 = vmatpush3.msra.mxu0 %v15822_v63  ;;  %v15890_v26 = vld [vmem:[%s20476_s5 + $0x250] sm:$0xff]  ;;  %v15905_v63 = vld [vmem:[%s20476_s5 + $0x2c8] sm:$0xff] }
 0x8ec   :  { %18769 = vmatpush3.msra.mxu1 %v15854_v49  ;;  %18735 = vmatprep.subr.mxu0 %v15837_v29  ;;  %v15922_v60 = vld [vmem:[%s20476_s5 + $0x350] sm:$0xff]  ;;  %v15937_v49 = vld [vmem:[%s20476_s5 + $0x3c8] sm:$0xff] }
 0x8ed   :  { %18770 = vmatprep.subr.mxu1 %v15869_v55  ;;  %18736 = vmatpush3.msra.mxu0 %v15821_v30  ;;  %v15889_v29 = vld [vmem:[%s20476_s5 + $0x248] sm:$0xff]  ;;  %v15904_v30 = vld [vmem:[%s20476_s5 + $0x2c0] sm:$0xff] }
 0x8ee   :  { %18771 = vmatpush3.msra.mxu1 %v15853_v47  ;;  %18737 = vmatprep.subr.mxu0 %v15836_v3  ;;  %v15921_v55 = vld [vmem:[%s20476_s5 + $0x348] sm:$0xff]  ;;  %v15936_v47 = vld [vmem:[%s20476_s5 + $0x3c0] sm:$0xff] }
 0x8ef   :  { %18772 = vmatprep.subr.mxu1 %v15868_v48  ;;  %18738 = vmatpush3.msra.mxu0 %v15820_v18  ;;  %v15888_v3 = vld [vmem:[%s20476_s5 + $0x240] sm:$0xff]  ;;  %v15903_v18 = vld [vmem:[%s20476_s5 + $0x2b8] sm:$0xff] }
 0x8f0   :  { %18773 = vmatpush3.msra.mxu1 %v15852_v57  ;;  %18739 = vmatprep.subr.mxu0 %v15835_v38  ;;  %v15920_v48 = vld [vmem:[%s20476_s5 + $0x340] sm:$0xff]  ;;  %v15935_v57 = vld [vmem:[%s20476_s5 + $0x3b8] sm:$0xff] }
 0x8f1   :  { %18774 = vmatprep.subr.mxu1 %v15867_v33  ;;  %18740 = vmatpush3.msra.mxu0 %v15819_v52  ;;  %v15887_v38 = vld [vmem:[%s20476_s5 + $0x238] sm:$0xff]  ;;  %v15902_v52 = vld [vmem:[%s20476_s5 + $0x2b0] sm:$0xff] }
 0x8f2   :  { %18775 = vmatpush3.msra.mxu1 %v15851_v61  ;;  %18741 = vmatprep.subr.mxu0 %v15834_v56  ;;  %v15919_v33 = vld [vmem:[%s20476_s5 + $0x338] sm:$0xff]  ;;  %v15934_v61 = vld [vmem:[%s20476_s5 + $0x3b0] sm:$0xff] }
 0x8f3   :  { %18776 = vmatprep.subr.mxu1 %v15866_v6  ;;  %18742 = vmatpush3.msra.mxu0 %v15818_v22  ;;  %v15886_v56 = vld [vmem:[%s20476_s5 + $0x230] sm:$0xff]  ;;  %v15901_v22 = vld [vmem:[%s20476_s5 + $0x2a8] sm:$0xff] }
 0x8f4   :  { %18777 = vmatpush3.msra.mxu1 %v15850_v58  ;;  %18743 = vmatprep.subr.mxu0 %v15833_v46  ;;  %v15918_v6 = vld [vmem:[%s20476_s5 + $0x330] sm:$0xff]  ;;  %v15933_v58 = vld [vmem:[%s20476_s5 + $0x3a8] sm:$0xff] }
 0x8f5   :  { %18778 = vmatprep.subr.mxu1 %v15865_v53  ;;  %18744 = vmatpush3.msra.mxu0 %v15817_v1  ;;  %v15885_v46 = vld [vmem:[%s20476_s5 + $0x228] sm:$0xff]  ;;  %v15900_v1 = vld [vmem:[%s20476_s5 + $0x2a0] sm:$0xff] }
 0x8f6   :  { %18779 = vmatpush3.msra.mxu1 %v15849_v39  ;;  %18745 = vmatprep.subr.mxu0 %v15832_v12  ;;  %v15917_v53 = vld [vmem:[%s20476_s5 + $0x328] sm:$0xff]  ;;  %v15932_v39 = vld [vmem:[%s20476_s5 + $0x3a0] sm:$0xff] }
 0x8f7   :  { %18780 = vmatprep.subr.mxu1 %v15864_v8  ;;  %18746 = vmatpush3.msra.mxu0 %v15816_v0  ;;  %v15884_v12 = vld [vmem:[%s20476_s5 + $0x220] sm:$0xff]  ;;  %v15899_v0 = vld [vmem:[%s20476_s5 + $0x298] sm:$0xff] }
 0x8f8   :  { %18781 = vmatpush3.msra.mxu1 %v15848_v20  ;;  %16144 = vmatmul.mubr.f32.vlgmr.msra.gmra.mxu0 %v15800_v34  ;;  %v15916_v8 = vld [vmem:[%s20476_s5 + $0x320] sm:$0xff]  ;;  %v15931_v20 = vld [vmem:[%s20476_s5 + $0x398] sm:$0xff] }
 0x8f9   :  { %16214 = vmatmul.mubr.f32.vlgmr.msra.gmra.mxu1 %v15802_v11  ;;  %18785 = vmatprep.subr.mxu0 %v15911_v13  ;;  %v15883_v34 = vld [vmem:[%s20476_s5 + $0x218] sm:$0xff]  ;;  %v15898_v11 = vld [vmem:[%s20476_s5 + $0x290] sm:$0xff] }
 0x8fa   :  { %18820 = vmatprep.subr.mxu1 %v15943_v35  ;;  %18786 = vmatpush3.msra.mxu0 %v15895_v28  ;;  %v15915_v13 = vld [vmem:[%s20476_s5 + $0x318] sm:$0xff]  ;;  %v15930_v35 = vld [vmem:[%s20476_s5 + $0x390] sm:$0xff] }
 0x8fb   :  { %16283 = vmatprep.mubr.f32.mxu0 %v15805_v25  ;;  %18821 = vmatpush3.msra.mxu1 %v15927_v17  ;;  %v15882_v28 = vld [vmem:[%s20476_s5 + $0x210] sm:$0xff]  ;;  %v15897_v25 = vld [vmem:[%s20476_s5 + $0x288] sm:$0xff] }
 0x8fc   :  { %16353 = vmatprep.mubr.f32.mxu1 %v15807_v10  ;;  %18787 = vmatprep.subr.mxu0 %v15910_v50  ;;  %v15914_v17 = vld [vmem:[%s20476_s5 + $0x310] sm:$0xff]  ;;  %v15929_v50 = vld [vmem:[%s20476_s5 + $0x388] sm:$0xff] }
 0x8fd   :  { %18822 = vmatprep.subr.mxu1 %v15942_v54  ;;  %18788 = vmatpush3.msra.mxu0 %v15894_v2  ;;  %v15881_v10 = vld [vmem:[%s20476_s5 + $0x208] sm:$0xff]  ;;  %v15896_v2 = vld [vmem:[%s20476_s5 + $0x280] sm:$0xff] }
 0x8fe   :  { %18823 = vmatpush3.msra.mxu1 %v15926_v15  ;;  %18789 = vmatprep.subr.mxu0 %v15909_v43  ;;  %v15913_v54 = vld [vmem:[%s20476_s5 + $0x308] sm:$0xff]  ;;  %v15928_v15 = vld [vmem:[%s20476_s5 + $0x380] sm:$0xff] }
 0x8ff   :  { %18824 = vmatprep.subr.mxu1 %v15941_v37  ;;  %18790 = vmatpush3.msra.mxu0 %v15893_v7  ;;  %v15880_v43 = vld [vmem:[%s20476_s5 + $0x200] sm:$0xff] }
 0x900   :  { %18825 = vmatpush3.msra.mxu1 %v15925_v42  ;;  %18791 = vmatprep.subr.mxu0 %v15908_v21  ;;  %v15912_v37 = vld [vmem:[%s20476_s5 + $0x300] sm:$0xff]  ;;  %v15804_v42 = vmax.f32 %v19503_v5, 0.0  ;;  %v15959_v5 = vld [vmem:[%s20476_s5 + $0x478] sm:$0xff] }
 0x901   :  { %18826 = vmatprep.subr.mxu1 %v15940_v19  ;;  %18792 = vmatpush3.msra.mxu0 %v15892_v4  ;;  %v15975_v4 = vld [vmem:[%s20476_s5 + $0x4f8] sm:$0xff] }
 0x902   :  { %18827 = vmatpush3.msra.mxu1 %v15924_v59  ;;  %18793 = vmatprep.subr.mxu0 %v15907_v24  ;;  %v15806_v59 = vmax.f32 %v19543_v16, 0.0  ;;  %v16007_v24 = vld [vmem:[%s20476_s5 + $0x5f8] sm:$0xff] }
 0x903   :  { %18828 = vmatprep.subr.mxu1 %v15939_v51  ;;  %18794 = vmatpush3.msra.mxu0 %v15891_v62  ;;  %v15991_v62 = vld [vmem:[%s20476_s5 + $0x578] sm:$0xff] }
 0x904   :  { %18829 = vmatpush3.msra.mxu1 %v15923_v45  ;;  %18795 = vmatprep.subr.mxu0 %v15906_v31  ;;  %v15809_v31 = vmax.f32 %v19587_v40, 0.0  ;;  %v15958_v40 = vld [vmem:[%s20476_s5 + $0x470] sm:$0xff] }
 0x905   :  { %18830 = vmatprep.subr.mxu1 %v15938_v14  ;;  %18796 = vmatpush3.msra.mxu0 %v15890_v26  ;;  %v15974_v14 = vld [vmem:[%s20476_s5 + $0x4f0] sm:$0xff] }
 0x906   :  { %18831 = vmatpush3.msra.mxu1 %v15922_v60  ;;  %18797 = vmatprep.subr.mxu0 %v15905_v63  ;;  %v15811_v60 = vmax.f32 %v19627_v9, 0.0  ;;  %v15973_v9 = vld [vmem:[%s20476_s5 + $0x4e8] sm:$0xff] }
 0x907   :  { %18832 = vmatprep.subr.mxu1 %v15937_v49  ;;  %18798 = vmatpush3.msra.mxu0 %v15889_v29  ;;  %v15990_v29 = vld [vmem:[%s20476_s5 + $0x570] sm:$0xff] }
 0x908   :  { %18833 = vmatpush3.msra.mxu1 %v15921_v55  ;;  %18799 = vmatprep.subr.mxu0 %v15904_v30  ;;  %v16005_v30 = vld [vmem:[%s20476_s5 + $0x5e8] sm:$0xff] }
 0x909   :  { %18834 = vmatprep.subr.mxu1 %v15936_v47  ;;  %18800 = vmatpush3.msra.mxu0 %v15888_v3  ;;  %v15957_v47 = vld [vmem:[%s20476_s5 + $0x468] sm:$0xff] }
 0x90a   :  { %18835 = vmatpush3.msra.mxu1 %v15920_v48  ;;  %18801 = vmatprep.subr.mxu0 %v15903_v18  ;;  %v15989_v48 = vld [vmem:[%s20476_s5 + $0x568] sm:$0xff]  ;;  %v15972_v18 = vld [vmem:[%s20476_s5 + $0x4e0] sm:$0xff] }
 0x90b   :  { %18836 = vmatprep.subr.mxu1 %v15935_v57  ;;  %18802 = vmatpush3.msra.mxu0 %v15887_v38  ;;  %v16004_v57 = vld [vmem:[%s20476_s5 + $0x5e0] sm:$0xff] }
 0x90c   :  { %18837 = vmatpush3.msra.mxu1 %v15919_v33  ;;  %18803 = vmatprep.subr.mxu0 %v15902_v52  ;;  %v15956_v38 = vld [vmem:[%s20476_s5 + $0x460] sm:$0xff]  ;;  %v15971_v52 = vld [vmem:[%s20476_s5 + $0x4d8] sm:$0xff] }
 0x90d   :  { %18838 = vmatprep.subr.mxu1 %v15934_v61  ;;  %18804 = vmatpush3.msra.mxu0 %v15886_v56  ;;  %v15988_v33 = vld [vmem:[%s20476_s5 + $0x560] sm:$0xff]  ;;  %v16003_v61 = vld [vmem:[%s20476_s5 + $0x5d8] sm:$0xff] }
 0x90e   :  { %18839 = vmatpush3.msra.mxu1 %v15918_v6  ;;  %18805 = vmatprep.subr.mxu0 %v15901_v22  ;;  %v15955_v56 = vld [vmem:[%s20476_s5 + $0x458] sm:$0xff]  ;;  %v15970_v22 = vld [vmem:[%s20476_s5 + $0x4d0] sm:$0xff] }
 0x90f   :  { %18840 = vmatprep.subr.mxu1 %v15933_v58  ;;  %18806 = vmatpush3.msra.mxu0 %v15885_v46  ;;  %v15987_v6 = vld [vmem:[%s20476_s5 + $0x558] sm:$0xff]  ;;  %v16002_v58 = vld [vmem:[%s20476_s5 + $0x5d0] sm:$0xff] }
 0x910   :  { %18841 = vmatpush3.msra.mxu1 %v15917_v53  ;;  %18807 = vmatprep.subr.mxu0 %v15900_v1  ;;  %v15954_v46 = vld [vmem:[%s20476_s5 + $0x450] sm:$0xff]  ;;  %v15969_v1 = vld [vmem:[%s20476_s5 + $0x4c8] sm:$0xff] }
 0x911   :  { %18842 = vmatprep.subr.mxu1 %v15932_v39  ;;  %18808 = vmatpush3.msra.mxu0 %v15884_v12  ;;  %v15986_v53 = vld [vmem:[%s20476_s5 + $0x550] sm:$0xff]  ;;  %v16001_v39 = vld [vmem:[%s20476_s5 + $0x5c8] sm:$0xff] }
 0x912   :  { %18843 = vmatpush3.msra.mxu1 %v15916_v8  ;;  %18809 = vmatprep.subr.mxu0 %v15899_v0  ;;  %v15953_v12 = vld [vmem:[%s20476_s5 + $0x448] sm:$0xff]  ;;  %v15968_v0 = vld [vmem:[%s20476_s5 + $0x4c0] sm:$0xff] }
 0x913   :  { %18844 = vmatprep.subr.mxu1 %v15931_v20  ;;  %18810 = vmatpush3.msra.mxu0 %v15883_v34  ;;  %v15985_v8 = vld [vmem:[%s20476_s5 + $0x548] sm:$0xff]  ;;  %v16000_v20 = vld [vmem:[%s20476_s5 + $0x5c0] sm:$0xff] }
 0x914   :  { %18845 = vmatpush3.msra.mxu1 %v15915_v13  ;;  %18811 = vmatprep.subr.mxu0 %v15898_v11  ;;  %v15952_v34 = vld [vmem:[%s20476_s5 + $0x440] sm:$0xff]  ;;  %v15967_v11 = vld [vmem:[%s20476_s5 + $0x4b8] sm:$0xff] }
 0x915   :  { %18846 = vmatprep.subr.mxu1 %v15930_v35  ;;  %18812 = vmatpush3.msra.mxu0 %v15882_v28  ;;  %v15984_v13 = vld [vmem:[%s20476_s5 + $0x540] sm:$0xff]  ;;  %v15999_v35 = vld [vmem:[%s20476_s5 + $0x5b8] sm:$0xff] }
 0x916   :  { %18847 = vmatpush3.msra.mxu1 %v15914_v17  ;;  %18813 = vmatprep.subr.mxu0 %v15897_v25  ;;  %v15951_v28 = vld [vmem:[%s20476_s5 + $0x438] sm:$0xff]  ;;  %v15966_v25 = vld [vmem:[%s20476_s5 + $0x4b0] sm:$0xff] }
 0x917   :  { %18848 = vmatprep.subr.mxu1 %v15929_v50  ;;  %18814 = vmatpush3.msra.mxu0 %v15881_v10  ;;  %v15588_v7 = vpop.f32.mrf.mxu0  ;;  %v15983_v17 = vld [vmem:[%s20476_s5 + $0x538] sm:$0xff]  ;;  %v15998_v50 = vld [vmem:[%s20476_s5 + $0x5b0] sm:$0xff] }
 0x918   :  { %18849 = vmatpush3.msra.mxu1 %v15913_v54  ;;  %18815 = vmatprep.subr.mxu0 %v15896_v2  ;;  %v15589_v21 = vadd.f32 %v15588_v7, %v19702_v32  ;;  %v15629_v19 = vpop.f32.mrf.mxu1  ;;  %v15950_v10 = vld [vmem:[%s20476_s5 + $0x430] sm:$0xff]  ;;  %v15965_v2 = vld [vmem:[%s20476_s5 + $0x4a8] sm:$0xff]  ;;  %v15964_v7 = vld [vmem:[%s20476_s5 + $0x4a0] sm:$0xff] }
 0x919   :  { %18850 = vmatprep.subr.mxu1 %v15928_v15  ;;  %18816 = vmatpush3.msra.mxu0 %v15880_v43  ;;  %v15590_v51 = vpop.f32.mrf.mxu0  ;;  %v15982_v54 = vld [vmem:[%s20476_s5 + $0x530] sm:$0xff]  ;;  %v15997_v15 = vld [vmem:[%s20476_s5 + $0x5a8] sm:$0xff] }
 0x91a   :  { %18851 = vmatpush3.msra.mxu1 %v15912_v37  ;;  %v20079_v32 = vadd.f32 %v15629_v19, %v15589_v21  ;;  %16284 = vmatmul.mubr.f32.vlgmr.msra.gmra.mxu0 %v15804_v42  ;;  %v15591_v16 = vadd.f32 %v15590_v51, %v19716_v44  ;;  %v15631_v45 = vpop.f32.mrf.mxu1  ;;  %v16006_v44 = vld [vmem:[%s20476_s5 + $0x5f0] sm:$0xff]  ;;  %v15949_v43 = vld [vmem:[%s20476_s5 + $0x428] sm:$0xff]  ;;  %v15996_v42 = vld [vmem:[%s20476_s5 + $0x5a0] sm:$0xff] }
 0x91b   :  { %16354 = vmatmul.mubr.f32.vlgmr.msra.gmra.mxu1 %v15806_v59  ;;  %18855 = vmatprep.subr.mxu0 %v15975_v4  ;;  %v15592_v26 = vpop.f32.mrf.mxu0  ;;  %v15981_v37 = vld [vmem:[%s20476_s5 + $0x528] sm:$0xff]  ;;  %v15948_v21 = vld [vmem:[%s20476_s5 + $0x420] sm:$0xff]  ;;  %v15963_v4 = vld [vmem:[%s20476_s5 + $0x498] sm:$0xff] }
 0x91c   :  { %18890 = vmatprep.subr.mxu1 %v16007_v24  ;;  %18856 = vmatpush3.msra.mxu0 %v15959_v5  ;;  %v20090_v63 = vadd.f32 %v15631_v45, %v15591_v16  ;;  %v15633_v49 = vpop.f32.mrf.mxu1  ;;  %v15980_v19 = vld [vmem:[%s20476_s5 + $0x520] sm:$0xff]  ;;  %v15995_v59 = vld [vmem:[%s20476_s5 + $0x598] sm:$0xff]  ;;  %v15962_v51 = vld [vmem:[%s20476_s5 + $0x490] sm:$0xff] }
 0x91d   :  { %16423 = vmatprep.mubr.f32.mxu0 %v15809_v31  ;;  %18891 = vmatpush3.msra.mxu1 %v15991_v62  ;;  %v15593_v55 = vpop.f32.mrf.mxu0  ;;  %v15947_v24 = vld [vmem:[%s20476_s5 + $0x418] sm:$0xff]  ;;  %v15994_v62 = vld [vmem:[%s20476_s5 + $0x590] sm:$0xff]  ;;  %v15961_v31 = vld [vmem:[%s20476_s5 + $0x488] sm:$0xff] }
 0x91e   :  { %16493 = vmatprep.mubr.f32.mxu1 %v15811_v60  ;;  %18857 = vmatprep.subr.mxu0 %v15974_v14  ;;  %v15634_v3 = vpop.f32.mrf.mxu1  ;;  %v15979_v5 = vld [vmem:[%s20476_s5 + $0x518] sm:$0xff]  ;;  %v15946_v16 = vld [vmem:[%s20476_s5 + $0x410] sm:$0xff]  ;;  %v15993_v14 = vld [vmem:[%s20476_s5 + $0x588] sm:$0xff] }
 0x91f   :  { %18892 = vmatprep.subr.mxu1 %v16006_v44  ;;  %18858 = vmatpush3.msra.mxu0 %v15958_v40  ;;  %v15978_v45 = vld [vmem:[%s20476_s5 + $0x510] sm:$0xff]  ;;  %v15945_v26 = vld [vmem:[%s20476_s5 + $0x408] sm:$0xff]  ;;  %v15960_v44 = vld [vmem:[%s20476_s5 + $0x480] sm:$0xff]  ;;  %v15813_v3 = vmax.f32 %v19667_v41, 0.0 }
 0x920   :  { %18893 = vmatpush3.msra.mxu1 %v15990_v29  ;;  %18859 = vmatprep.subr.mxu0 %v15973_v9  ;;  %v15977_v60 = vld [vmem:[%s20476_s5 + $0x508] sm:$0xff]  ;;  %v15992_v40 = vld [vmem:[%s20476_s5 + $0x580] sm:$0xff]  ;;  %v15808_v9 = vmax.f32 %v19583_v27, 0.0  ;;  %v16039_v55 = vld [vmem:[%s20476_s5 + $0x6f8] sm:$0xff] }
 0x921   :  { %18894 = vmatprep.subr.mxu1 %v16005_v30  ;;  %18860 = vmatpush3.msra.mxu0 %v15957_v47  ;;  %v15944_v49 = vld [vmem:[%s20476_s5 + $0x400] sm:$0xff]  ;;  %v15810_v30 = vmax.f32 %v19623_v23, 0.0  ;;  %v16023_v47 = vld [vmem:[%s20476_s5 + $0x678] sm:$0xff]  ;;  %v16038_v27 = vld [vmem:[%s20476_s5 + $0x6f0] sm:$0xff] }
 0x922   :  { %18895 = vmatpush3.msra.mxu1 %v15989_v48  ;;  %18861 = vmatprep.subr.mxu0 %v15972_v18  ;;  %v15976_v29 = vld [vmem:[%s20476_s5 + $0x500] sm:$0xff]  ;;  %v16071_v48 = vld [vmem:[%s20476_s5 + $0x7f8] sm:$0xff]  ;;  %v16022_v23 = vld [vmem:[%s20476_s5 + $0x670] sm:$0xff] }
 0x923   :  { %18896 = vmatprep.subr.mxu1 %v16004_v57  ;;  %18862 = vmatpush3.msra.mxu0 %v15956_v38  ;;  %v16055_v41 = vld [vmem:[%s20476_s5 + $0x778] sm:$0xff]  ;;  %v16037_v18 = vld [vmem:[%s20476_s5 + $0x6e8] sm:$0xff]  ;;  %v16070_v57 = vld [vmem:[%s20476_s5 + $0x7f0] sm:$0xff] }
 0x924   :  { %18897 = vmatpush3.msra.mxu1 %v15988_v33  ;;  %18863 = vmatprep.subr.mxu0 %v15971_v52  ;;  %v16021_v38 = vld [vmem:[%s20476_s5 + $0x668] sm:$0xff]  ;;  %v16054_v33 = vld [vmem:[%s20476_s5 + $0x770] sm:$0xff]  ;;  %v16036_v52 = vld [vmem:[%s20476_s5 + $0x6e0] sm:$0xff] }
 0x925   :  { %18898 = vmatprep.subr.mxu1 %v16003_v61  ;;  %18864 = vmatpush3.msra.mxu0 %v15955_v56  ;;  %v16069_v61 = vld [vmem:[%s20476_s5 + $0x7e8] sm:$0xff]  ;;  %v16020_v56 = vld [vmem:[%s20476_s5 + $0x660] sm:$0xff] }
 0x926   :  { %18899 = vmatpush3.msra.mxu1 %v15987_v6  ;;  %18865 = vmatprep.subr.mxu0 %v15970_v22  ;;  %v16053_v6 = vld [vmem:[%s20476_s5 + $0x768] sm:$0xff]  ;;  %v16035_v22 = vld [vmem:[%s20476_s5 + $0x6d8] sm:$0xff] }
 0x927   :  { %18900 = vmatprep.subr.mxu1 %v16002_v58  ;;  %18866 = vmatpush3.msra.mxu0 %v15954_v46  ;;  %v16068_v58 = vld [vmem:[%s20476_s5 + $0x7e0] sm:$0xff]  ;;  %v16019_v46 = vld [vmem:[%s20476_s5 + $0x658] sm:$0xff] }
 0x928   :  { %18901 = vmatpush3.msra.mxu1 %v15986_v53  ;;  %18867 = vmatprep.subr.mxu0 %v15969_v1  ;;  %v16052_v53 = vld [vmem:[%s20476_s5 + $0x760] sm:$0xff]  ;;  %v16034_v1 = vld [vmem:[%s20476_s5 + $0x6d0] sm:$0xff] }
 0x929   :  { %18902 = vmatprep.subr.mxu1 %v16001_v39  ;;  %18868 = vmatpush3.msra.mxu0 %v15953_v12  ;;  %v16067_v39 = vld [vmem:[%s20476_s5 + $0x7d8] sm:$0xff]  ;;  %v16018_v12 = vld [vmem:[%s20476_s5 + $0x650] sm:$0xff] }
 0x92a   :  { %18903 = vmatpush3.msra.mxu1 %v15985_v8  ;;  %18869 = vmatprep.subr.mxu0 %v15968_v0  ;;  %v16051_v8 = vld [vmem:[%s20476_s5 + $0x758] sm:$0xff]  ;;  %v16033_v0 = vld [vmem:[%s20476_s5 + $0x6c8] sm:$0xff] }
 0x92b   :  { %18904 = vmatprep.subr.mxu1 %v16000_v20  ;;  %18870 = vmatpush3.msra.mxu0 %v15952_v34  ;;  %v16066_v20 = vld [vmem:[%s20476_s5 + $0x7d0] sm:$0xff]  ;;  %v16017_v34 = vld [vmem:[%s20476_s5 + $0x648] sm:$0xff] }
 0x92c   :  { %18905 = vmatpush3.msra.mxu1 %v15984_v13  ;;  %18871 = vmatprep.subr.mxu0 %v15967_v11  ;;  %v16050_v13 = vld [vmem:[%s20476_s5 + $0x750] sm:$0xff]  ;;  %v16032_v11 = vld [vmem:[%s20476_s5 + $0x6c0] sm:$0xff] }
 0x92d   :  { %18906 = vmatprep.subr.mxu1 %v15999_v35  ;;  %18872 = vmatpush3.msra.mxu0 %v15951_v28  ;;  %v16065_v35 = vld [vmem:[%s20476_s5 + $0x7c8] sm:$0xff]  ;;  %v16016_v28 = vld [vmem:[%s20476_s5 + $0x640] sm:$0xff] }
 0x92e   :  { %18907 = vmatpush3.msra.mxu1 %v15983_v17  ;;  %18873 = vmatprep.subr.mxu0 %v15966_v25  ;;  %v16049_v17 = vld [vmem:[%s20476_s5 + $0x748] sm:$0xff]  ;;  %v16031_v25 = vld [vmem:[%s20476_s5 + $0x6b8] sm:$0xff] }
 0x92f   :  { %18908 = vmatprep.subr.mxu1 %v15998_v50  ;;  %18874 = vmatpush3.msra.mxu0 %v15950_v10  ;;  %v16064_v50 = vld [vmem:[%s20476_s5 + $0x7c0] sm:$0xff]  ;;  %v16015_v10 = vld [vmem:[%s20476_s5 + $0x638] sm:$0xff] }
 0x930   :  { %18909 = vmatpush3.msra.mxu1 %v15982_v54  ;;  %18875 = vmatprep.subr.mxu0 %v15965_v2  ;;  %v16048_v54 = vld [vmem:[%s20476_s5 + $0x740] sm:$0xff]  ;;  %v16030_v2 = vld [vmem:[%s20476_s5 + $0x6b0] sm:$0xff] }
 0x931   :  { %18910 = vmatprep.subr.mxu1 %v15997_v15  ;;  %18876 = vmatpush3.msra.mxu0 %v15949_v43  ;;  %v16063_v15 = vld [vmem:[%s20476_s5 + $0x7b8] sm:$0xff]  ;;  %v16014_v43 = vld [vmem:[%s20476_s5 + $0x630] sm:$0xff] }
 0x932   :  { %18911 = vmatpush3.msra.mxu1 %v15981_v37  ;;  %18877 = vmatprep.subr.mxu0 %v15964_v7  ;;  %v16047_v37 = vld [vmem:[%s20476_s5 + $0x738] sm:$0xff]  ;;  %v16029_v7 = vld [vmem:[%s20476_s5 + $0x6a8] sm:$0xff] }
 0x933   :  { %18912 = vmatprep.subr.mxu1 %v15996_v42  ;;  %18878 = vmatpush3.msra.mxu0 %v15948_v21  ;;  %v16062_v42 = vld [vmem:[%s20476_s5 + $0x7b0] sm:$0xff]  ;;  %v16013_v21 = vld [vmem:[%s20476_s5 + $0x628] sm:$0xff] }
 0x934   :  { %18913 = vmatpush3.msra.mxu1 %v15980_v19  ;;  %18879 = vmatprep.subr.mxu0 %v15963_v4  ;;  %v16046_v19 = vld [vmem:[%s20476_s5 + $0x730] sm:$0xff]  ;;  %v16028_v4 = vld [vmem:[%s20476_s5 + $0x6a0] sm:$0xff] }
 0x935   :  { %18914 = vmatprep.subr.mxu1 %v15995_v59  ;;  %18880 = vmatpush3.msra.mxu0 %v15947_v24  ;;  %v16061_v59 = vld [vmem:[%s20476_s5 + $0x7a8] sm:$0xff]  ;;  %v16012_v24 = vld [vmem:[%s20476_s5 + $0x620] sm:$0xff] }
 0x936   :  { %18915 = vmatpush3.msra.mxu1 %v15979_v5  ;;  %18881 = vmatprep.subr.mxu0 %v15962_v51  ;;  %v16045_v5 = vld [vmem:[%s20476_s5 + $0x728] sm:$0xff]  ;;  %v16027_v51 = vld [vmem:[%s20476_s5 + $0x698] sm:$0xff] }
 0x937   :  { %18916 = vmatprep.subr.mxu1 %v15994_v62  ;;  %18882 = vmatpush3.msra.mxu0 %v15946_v16  ;;  %v16060_v62 = vld [vmem:[%s20476_s5 + $0x7a0] sm:$0xff]  ;;  %v16011_v16 = vld [vmem:[%s20476_s5 + $0x618] sm:$0xff] }
 0x938   :  { %18917 = vmatpush3.msra.mxu1 %v15978_v45  ;;  %18883 = vmatprep.subr.mxu0 %v15961_v31  ;;  %v16044_v45 = vld [vmem:[%s20476_s5 + $0x720] sm:$0xff]  ;;  %v16026_v31 = vld [vmem:[%s20476_s5 + $0x690] sm:$0xff] }
 0x939   :  { %18918 = vmatprep.subr.mxu1 %v15993_v14  ;;  %18884 = vmatpush3.msra.mxu0 %v15945_v26  ;;  %v16059_v14 = vld [vmem:[%s20476_s5 + $0x798] sm:$0xff]  ;;  %v16010_v26 = vld [vmem:[%s20476_s5 + $0x610] sm:$0xff] }
 0x93a   :  { %18919 = vmatpush3.msra.mxu1 %v15977_v60  ;;  %18885 = vmatprep.subr.mxu0 %v15960_v44  ;;  %v16043_v60 = vld [vmem:[%s20476_s5 + $0x718] sm:$0xff]  ;;  %v16025_v44 = vld [vmem:[%s20476_s5 + $0x688] sm:$0xff] }
 0x93b   :  { %18920 = vmatprep.subr.mxu1 %v15992_v40  ;;  %18886 = vmatpush3.msra.mxu0 %v15944_v49  ;;  %v16058_v40 = vld [vmem:[%s20476_s5 + $0x790] sm:$0xff]  ;;  %v16009_v49 = vld [vmem:[%s20476_s5 + $0x608] sm:$0xff] }
 0x93c   :  { %18921 = vmatpush3.msra.mxu1 %v15976_v29  ;;  %16424 = vmatmul.mubr.f32.vlgmr.msra.gmra.mxu0 %v15808_v9  ;;  %v16042_v9 = vld [vmem:[%s20476_s5 + $0x710] sm:$0xff] }
 0x93d   :  { %16494 = vmatmul.mubr.f32.vlgmr.msra.gmra.mxu1 %v15810_v30  ;;  %18925 = vmatprep.subr.mxu0 %v16039_v55  ;;  %v16024_v55 = vld [vmem:[%s20476_s5 + $0x680] sm:$0xff] }
 0x93e   :  { %18926 = vmatpush3.msra.mxu0 %v16023_v47  ;;  %16563 = vmatprep.mubr.f32.mxu0 %v15813_v3  ;;  %v16057_v3 = vld [vmem:[%s20476_s5 + $0x788] sm:$0xff] }
 0x93f   :  { %18927 = vmatprep.subr.mxu0 %v16038_v27  ;;  %18960 = vmatprep.subr.mxu1 %v16071_v48  ;;  %v16008_v27 = vld [vmem:[%s20476_s5 + $0x600] sm:$0xff] }
 0x940   :  { %18928 = vmatpush3.msra.mxu0 %v16022_v23  ;;  %18961 = vmatpush3.msra.mxu1 %v16055_v41  ;;  %v16041_v23 = vld [vmem:[%s20476_s5 + $0x708] sm:$0xff] }
 0x941   :  { %18929 = vmatprep.subr.mxu0 %v16037_v18  ;;  %18962 = vmatprep.subr.mxu1 %v16070_v57  ;;  %v16056_v18 = vld [vmem:[%s20476_s5 + $0x780] sm:$0xff]  ;;  %v15812_v57 = vmax.f32 %v19663_v36, 0.0 }
 0x942   :  { %18930 = vmatpush3.msra.mxu0 %v16021_v38  ;;  %18963 = vmatpush3.msra.mxu1 %v16054_v33  ;;  %v16040_v33 = vld [vmem:[%s20476_s5 + $0x700] sm:$0xff]  ;;  %s19170_s5 = smov [#allocation13]  }
 0x943   :  { %18931 = vmatprep.subr.mxu0 %v16036_v52  ;;  %18964 = vmatprep.subr.mxu1 %v16069_v61  ;;  %s16646_s22 = sshll.u32 %s19170_s5, 4  ;;  %s16647_s22 = int_to_ptr.vmem [resolvable:$true] %s16646_s22 }
 0x944   :  { %18932 = vmatpush3.msra.mxu0 %v16020_v56  ;;  %18965 = vmatpush3.msra.mxu1 %v16053_v6  ;;  %s19131_s23 = scalar_lea.vmem %s16647_s22, 128  ;;  %p19136_p3 = scmp.lt.s32.totalorder %s16647_s22, %s16647_s22 }
 0x945   :  { %18933 = vmatprep.subr.mxu0 %v16035_v22  ;;  %18966 = vmatprep.subr.mxu1 %v16068_v58  ;;  %p19132_p2 = scmp.ne.s32.totalorder %s16647_s22, %s19131_s23  ;;  %p19137_p4 = scmp.lt.s32.totalorder %s19131_s23, %s19131_s23 }
 0x946   :  { %18934 = vmatpush3.msra.mxu0 %v16019_v46  ;;  %18967 = vmatpush3.msra.mxu1 %v16052_v53 }
 0x947   :  { %18935 = vmatprep.subr.mxu0 %v16034_v1  ;;  %18968 = vmatprep.subr.mxu1 %v16067_v39  ;;  %p19138_p5 = por %p19137_p4, %p19136_p3 }
 0x948   :  { %18936 = vmatpush3.msra.mxu0 %v16018_v12  ;;  %18969 = vmatpush3.msra.mxu1 %v16051_v8 }
 0x949   :  { %18937 = vmatprep.subr.mxu0 %v16033_v0  ;;  %18970 = vmatprep.subr.mxu1 %v16066_v20  ;;  %p19139_p6 = pnand %p19138_p5, %p19132_p2 }
 0x94a   :  { %18938 = vmatpush3.msra.mxu0 %v16017_v34  ;;  %18971 = vmatpush3.msra.mxu1 %v16050_v13 }
 0x94b   :  { %18939 = vmatprep.subr.mxu0 %v16032_v11  ;;  %18972 = vmatprep.subr.mxu1 %v16065_v35 }
 0x94c   :  { %18940 = vmatpush3.msra.mxu0 %v16016_v28  ;;  %18973 = vmatpush3.msra.mxu1 %v16049_v17 }
 0x94d   :  { %18941 = vmatprep.subr.mxu0 %v16031_v25  ;;  %18974 = vmatprep.subr.mxu1 %v16064_v50 }
 0x94e   :  { %18942 = vmatpush3.msra.mxu0 %v16015_v10  ;;  %18975 = vmatpush3.msra.mxu1 %v16048_v54  ;;  %v18714_v10 = vld [vmem:[#allocation11] ss:$0 sm:$0xff] }
 0x94f   :  { %18943 = vmatprep.subr.mxu0 %v16030_v2  ;;  %18976 = vmatprep.subr.mxu1 %v16063_v15 }
 0x950   :  { %18944 = vmatpush3.msra.mxu0 %v16014_v43  ;;  %18977 = vmatpush3.msra.mxu1 %v16047_v37 }
 0x951   :  { %18945 = vmatprep.subr.mxu0 %v16029_v7  ;;  %18978 = vmatprep.subr.mxu1 %v16062_v42 }
 0x952   :  { %18946 = vmatpush3.msra.mxu0 %v16013_v21  ;;  %18979 = vmatpush3.msra.mxu1 %v16046_v19 }
 0x953   :  { %18947 = vmatprep.subr.mxu0 %v16028_v4  ;;  %18980 = vmatprep.subr.mxu1 %v16061_v59 }
 0x954   :  { %18948 = vmatpush3.msra.mxu0 %v16012_v24  ;;  %18981 = vmatpush3.msra.mxu1 %v16045_v5 }
 0x955   :  { %18949 = vmatprep.subr.mxu0 %v16027_v51  ;;  %18982 = vmatprep.subr.mxu1 %v16060_v62 }
 0x956   :  { %18950 = vmatpush3.msra.mxu0 %v16011_v16  ;;  %18983 = vmatpush3.msra.mxu1 %v16044_v45 }
 0x957   :  { %18951 = vmatprep.subr.mxu0 %v16026_v31  ;;  %v15670_v29 = vpop.f32.mrf.mxu0  ;;  %18984 = vmatprep.subr.mxu1 %v16059_v14 }
 0x958   :  { %18952 = vmatpush3.msra.mxu0 %v16010_v26  ;;  %v15671_v30 = vadd.f32 %v15670_v29, %v20079_v32  ;;  %v15711_v47 = vpop.f32.mrf.mxu1  ;;  %18985 = vmatpush3.msra.mxu1 %v16043_v60 }
 0x959   :  { %18953 = vmatprep.subr.mxu0 %v16025_v44  ;;  %v15672_v48 = vpop.f32.mrf.mxu0  ;;  %18986 = vmatprep.subr.mxu1 %v16058_v40 }
 0x95a   :  { %18954 = vmatpush3.msra.mxu0 %v16009_v49  ;;  %v15712_v41 = vadd.f32 %v15711_v47, %v15671_v30  ;;  %v15713_v32 = vpop.f32.mrf.mxu1  ;;  %18987 = vmatpush3.msra.mxu1 %v16042_v9  ;;  %v15673_v6 = vadd.f32 %v15672_v48, %v20090_v63 }
 0x95b   :  { %18955 = vmatprep.subr.mxu0 %v16024_v55  ;;  %v15674_v38 = vpop.f32.mrf.mxu0  ;;  %18988 = vmatprep.subr.mxu1 %v16057_v3 }
 0x95c   :  { %18956 = vmatpush3.msra.mxu0 %v16008_v27  ;;  %v15715_v52 = vpop.f32.mrf.mxu1  ;;  %18989 = vmatpush3.msra.mxu1 %v16041_v23  ;;  %v15714_v58 = vadd.f32 %v15713_v32, %v15673_v6 }
 0x95d   :  { %16564 = vmatmul.mubr.f32.vlgmr.msra.gmra.mxu0 %v15812_v57  ;;  %v15675_v61 = vpop.f32.mrf.mxu0  ;;  %18990 = vmatprep.subr.mxu1 %v16056_v18 }
 0x95e   :  { %v15716_v56 = vpop.f32.mrf.mxu1  ;;  %18991 = vmatpush3.msra.mxu1 %v16040_v33 }
 0x997   :  { %v15752_v22 = vpop.f32.mrf.mxu0 }
 0x998   :  { %v15753_v36 = vadd.f32 %v15752_v22, %v15712_v41  ;;  %v15793_v46 = vpop.f32.mrf.mxu1 }
 0x999   :  { %v15754_v53 = vpop.f32.mrf.mxu0 }
 0x99a   :  { %v15755_v1 = vadd.f32 %v15754_v53, %v15714_v58  ;;  %v15795_v39 = vpop.f32.mrf.mxu1  ;;  %v15794_v12 = vadd.f32 %v15793_v46, %v15753_v36 }
 0x99b   :  { %v15756_v8 = vpop.f32.mrf.mxu0 }
 0x99c   :  { %v15796_v0 = vadd.f32 %v15795_v39, %v15755_v1  ;;  %v15797_v20 = vpop.f32.mrf.mxu1  ;;  %v15814_v35 = vmax.f32 %v15794_v12, 0.0 }
 0x99d   :  { %v15757_v34 = vpop.f32.mrf.mxu0 }
 0x99e   :  { %v15815_v13 = vmax.f32 %v15796_v0, 0.0  ;;  %v15798_v11 = vpop.f32.mrf.mxu1 }
 0x9a0   :  { %16633 = vmatprep.mubr.f32.mxu1 %v15815_v13 }
 0x9a1   :  { %16634 = vmatmul.mubr.f32.vlgmr.msra.gmra.mxu1 %v15814_v35 }
 0x9b8   :  { %v18747_v28 = vpop.f32.mrf.mxu0 }
 0x9b9   :  { %v18782_v63 = vpop.f32.mrf.mxu1 }
 0x9ba   :  { %v18748_v17 = vpop.f32.mrf.mxu0 }
 0x9bb   :  { %v18749_v50 = vadd.f32 %v18748_v17, %v18747_v28  ;;  %v18783_v54 = vpop.f32.mrf.mxu1 }
 0x9bc   :  { %v18784_v7 = vadd.f32 %v18783_v54, %v18782_v63 }
 0x9bd   :  { %v16146_v15 = vadd.f32 %v18749_v50, %v18714_v10 }
 0x9bf   :  { %v16216_v21 = vadd.f32 %v18784_v7, %v16146_v15 }
 0x9da   :  { %v18817_v25 = vpop.f32.mrf.mxu0 }
 0x9db   :  { %v18852_v43 = vpop.f32.mrf.mxu1 }
 0x9dc   :  { %v18818_v2 = vpop.f32.mrf.mxu0 }
 0x9dd   :  { %v18819_v42 = vadd.f32 %v18818_v2, %v18817_v25  ;;  %v18853_v19 = vpop.f32.mrf.mxu1 }
 0x9de   :  { %v18854_v51 = vadd.f32 %v18853_v19, %v18852_v43 }
 0x9df   :  { %v16286_v59 = vadd.f32 %v18819_v42, %v16216_v21 }
 0x9e1   :  { %v16356_v16 = vadd.f32 %v18854_v51, %v16286_v59 }
 0x9fc   :  { %v18887_v37 = vpop.f32.mrf.mxu0 }
 0x9fd   :  { %v18922_v24 = vpop.f32.mrf.mxu1 }
 0x9fe   :  { %v18888_v4 = vpop.f32.mrf.mxu0 }
 0x9ff   :  { %v18889_v62 = vadd.f32 %v18888_v4, %v18887_v37  ;;  %v18923_v45 = vpop.f32.mrf.mxu1 }
 0xa00   :  { %v18924_v26 = vadd.f32 %v18923_v45, %v18922_v24 }
 0xa01   :  { %v16426_v14 = vadd.f32 %v18889_v62, %v16356_v16 }
 0xa03   :  { %v16496_v40 = vadd.f32 %v18924_v26, %v16426_v14 }
 0xa1d   :  { %v18957_v5 = vpop.f32.mrf.mxu0 }
 0xa1f   :  { %v18958_v31 = vpop.f32.mrf.mxu0 }
 0xa20   :  { %v18959_v60 = vadd.f32 %v18958_v31, %v18957_v5 }
 0xa22   :  { %v16566_v29 = vadd.f32 %v18959_v60, %v16496_v40 }
 0xa61   :  { %v18992_v44 = vpop.f32.mrf.mxu1 }
 0xa63   :  { %v18993_v49 = vpop.f32.mrf.mxu1 }
 0xa64   :  { %v18994_v9 = vadd.f32 %v18993_v49, %v18992_v44 }
 0xa66   :  { %v16636_v55 = vadd.f32 %v18994_v9, %v16566_v29 }
 0xa68   :  { %16639 = vst.msk [vmem:[#allocation13] sm:$0xff] %vm200_vm0, %v16636_v55 }
 0xa69   :  { %19142 = shalt.err (!%p19139_p6)
}
 0xa6a   :  { %16649 = dma.vmem_to_hbm [thread:$0]  %s16647_s22, 128, %s20478_s7, [#allocation4]  }
 0xa6b   :  { %19159 = dma.done.wait [#allocation4], 128  }
 0xa6c   :  { %19160 = vsyncadd [#allocation4], 4294967168 }
 0xa6d   :  { %16653 = vsyncpa [#allocation3], 1 }
 0xa6e   :  { %16654 = vsyncpa [#allocation6], 1 }
 0xa6f   :  { %16655 = vsyncpa [#allocation9], 1 }
 0xa70   :  { %16656 = vsyncpa [#allocation12], 1 }
 0xa71   :  { %16657 = vsyncpa [#allocation4], 1 }

</bundles_post_ra>
